<compile_context>
chip_gen: v7x
topology: tpu7x:2x2x1
jax: 0.10.0
libtpu: 0.0.40
codegen_flags: <defaults>
</compile_context>

<pallas_src>
import functools
import math

import jax
import jax.numpy as jnp
from jax.experimental import pallas as pl
from jax.experimental.pallas import tpu as pltpu


# ----------------------------------------------------------------------------
# cfg / stage bookkeeping
# ----------------------------------------------------------------------------
CFG_SMALL = [16, 'M', 32, 'M', 64, 'M', 512]   # last conv must be 512 for the FC head


def build_stages(cfg, in_channels, height, width):
    """Turn a VGG cfg list into a list of conv-stage descriptors."""
    stages = []
    c, h, w = in_channels, height, width
    i = 0
    while i < len(cfg):
        v = cfg[i]
        assert v != 'M', "cfg must start each block with a conv"
        pool = (i + 1 < len(cfg) and cfg[i + 1] == 'M')
        stages.append(dict(H=h, W=w, Cin=c, Cout=int(v), pool=pool))
        c = int(v)
        if pool:
            h //= 2
            w //= 2
            i += 2
        else:
            i += 1
    return stages


# ----------------------------------------------------------------------------
# fused feature trunk: conv3x3+ReLU (+maxpool2x2) stages + global average pool
# ----------------------------------------------------------------------------
def trunk_kernel(stages, *refs):
    nconv = len(stages)
    x_ref = refs[0]
    conv_refs = refs[1:1 + 2 * nconv]             # w0, b0, w1, b1, ...
    o_ref = refs[1 + 2 * nconv]                   # (1, 1, C_final)
    scratch = refs[2 + 2 * nconv:]
    bufs = scratch[:nconv]                        # padded-flat activation buffers (f32)
    accs = scratch[nconv:2 * nconv]               # f32 matmul accumulators

    # ---- load the input image into the zeroed, padded flat buffer ----------
    st0 = stages[0]
    H0, W0 = st0["H"], st0["W"]
    Wp0 = W0 + 2
    buf0 = bufs[0]
    buf0[...] = jnp.zeros_like(buf0)
    for h in range(H0):
        buf0[pl.ds((h + 1) * Wp0 + 1, W0), :] = x_ref[0, h]

    # ---- conv / relu / (pool) stages ----------------------------------------
    for si, st in enumerate(stages):
        H, W, Cin, Cout, pool = st["H"], st["W"], st["Cin"], st["Cout"], st["pool"]
        Wp = W + 2
        src = bufs[si]
        acc = accs[si]
        w_ref = conv_refs[2 * si]                 # (3, 3, Cin, Cout) bf16
        b_ref = conv_refs[2 * si + 1]             # (1, Cout) f32

        # 9 accumulating taps; tap slab = one contiguous slice -> M = H*(W+2)
        acc[...] = jnp.zeros_like(acc)
        for dy in range(3):
            for dx in range(3):
                slab = src[pl.ds(dy * Wp + dx, H * Wp), :].astype(w_ref.dtype)
                acc[...] += jnp.dot(slab, w_ref[dy, dx],
                                    preferred_element_type=jnp.float32)
        bias = b_ref[...]                         # (1, Cout) f32

        last = (si == nconv - 1)
        if not last:
            dst = bufs[si + 1]
            dst[...] = jnp.zeros_like(dst)

        if pool:
            # fused bias + ReLU + 2x2 maxpool (max/relu/bias commute)
            H2, W2 = H // 2, W // 2
            Wp2 = W2 + 2
            if last:
                total = jnp.zeros((1, Cout), jnp.float32)
            for h2 in range(H2):
                r0 = (2 * h2) * Wp
                r1 = (2 * h2 + 1) * Wp
                a = acc[pl.ds(r0, W2, stride=2), :]
                b = acc[pl.ds(r0 + 1, W2, stride=2), :]
                c = acc[pl.ds(r1, W2, stride=2), :]
                d = acc[pl.ds(r1 + 1, W2, stride=2), :]
                row = jnp.maximum(jnp.maximum(a, b), jnp.maximum(c, d))
                row = jnp.maximum(row + bias, 0.0)          # (W2, Cout) f32
                if last:
                    total = total + jnp.sum(row, axis=0, keepdims=True)
                else:
                    dst[pl.ds((h2 + 1) * Wp2 + 1, W2), :] = row.astype(dst.dtype)
            if last:
                o_ref[0] = (total * (1.0 / float(H2 * W2))).astype(o_ref.dtype)
        else:
            if last:
                total = jnp.zeros((1, Cout), jnp.float32)
            for h in range(H):
                row = jnp.maximum(acc[pl.ds(h * Wp, W), :] + bias, 0.0)  # (W, Cout)
                if last:
                    total = total + jnp.sum(row, axis=0, keepdims=True)
                else:
                    dst[pl.ds((h + 1) * Wp + 1, W), :] = row.astype(dst.dtype)
            if last:
                # adaptive_avg_pool2d(1) + flatten
                o_ref[0] = (total * (1.0 / float(H * W))).astype(o_ref.dtype)


def vgg_features(x_nhwc, conv_params, stages):
    N, H0, W0, C0 = x_nhwc.shape
    c_final = stages[-1]["Cout"]

    in_specs = [pl.BlockSpec((1, H0, W0, C0), lambda n: (n, 0, 0, 0))]
    inputs = [x_nhwc]
    for (w, b) in conv_params:
        in_specs.append(pl.BlockSpec(w.shape, lambda n: (0, 0, 0, 0)))
        in_specs.append(pl.BlockSpec(b.shape, lambda n: (0, 0)))
        inputs.extend([w, b])

    scratch_shapes = []
    for st in stages:                                  # padded-flat activation buffers
        Wp = st["W"] + 2
        rows = (st["H"] + 2) * Wp + Wp                 # + one extra zero row-chunk of slack
        scratch_shapes.append(pltpu.VMEM((rows, st["Cin"]), jnp.float32))
    for st in stages:                                  # f32 accumulators
        Wp = st["W"] + 2
        scratch_shapes.append(pltpu.VMEM((st["H"] * Wp, st["Cout"]), jnp.float32))

    out = pl.pallas_call(
        functools.partial(trunk_kernel, stages),
        out_shape=jax.ShapeDtypeStruct((N, 1, c_final), jnp.float32),
        grid=(N,),
        in_specs=in_specs,
        out_specs=pl.BlockSpec((1, 1, c_final), lambda n: (n, 0, 0)),
        scratch_shapes=scratch_shapes,
        compiler_params=pltpu.CompilerParams(dimension_semantics=("parallel",)),
    )(*inputs)
    return out.reshape(N, c_final)


# ----------------------------------------------------------------------------
# fully-connected layers (bf16 weight streaming, f32 accumulation)
# ----------------------------------------------------------------------------
def linear_kernel(x_ref, w_ref, b_ref, o_ref, *, relu):
    y = jnp.dot(x_ref[...].astype(w_ref.dtype), w_ref[...],
                preferred_element_type=jnp.float32)
    y = y + b_ref[...]
    if relu:
        y = jnp.maximum(y, 0.0)
    o_ref[...] = y.astype(o_ref.dtype)


def linear(x, w, b, *, relu, tile_n=1024):
    NB, K = x.shape
    Nout = w.shape[1]
    tn = min(tile_n, Nout)
    return pl.pallas_call(
        functools.partial(linear_kernel, relu=relu),
        out_shape=jax.ShapeDtypeStruct((NB, Nout), jnp.float32),
        grid=(pl.cdiv(Nout, tn),),
        in_specs=[
            pl.BlockSpec((NB, K), lambda j: (0, 0)),
            pl.BlockSpec((K, tn), lambda j: (0, j)),
            pl.BlockSpec((1, tn), lambda j: (0, j)),
        ],
        out_specs=pl.BlockSpec((NB, tn), lambda j: (0, j)),
        compiler_params=pltpu.CompilerParams(dimension_semantics=("parallel",)),
    )(x, w, b)


def linear_sigmoid_kernel(x_ref, w_ref, b_ref, logit_ref, prob_ref):
    y = jnp.dot(x_ref[...].astype(w_ref.dtype), w_ref[...],
                preferred_element_type=jnp.float32)
    y = y + b_ref[...]
    logit_ref[...] = y.astype(logit_ref.dtype)
    prob_ref[...] = (1.0 / (1.0 + jnp.exp(-y))).astype(prob_ref.dtype)  # exp on the EUP


def linear_sigmoid(x, w, b):
    NB, K = x.shape
    Nout = w.shape[1]
    return pl.pallas_call(
        linear_sigmoid_kernel,
        out_shape=(jax.ShapeDtypeStruct((NB, Nout), jnp.float32),
                   jax.ShapeDtypeStruct((NB, Nout), jnp.float32)),
        grid=(1,),
        in_specs=[
            pl.BlockSpec((NB, K), lambda j: (0, 0)),
            pl.BlockSpec((K, Nout), lambda j: (0, 0)),
            pl.BlockSpec((1, Nout), lambda j: (0, 0)),
        ],
        out_specs=(pl.BlockSpec((NB, Nout), lambda j: (0, 0)),
                   pl.BlockSpec((NB, Nout), lambda j: (0, 0))),
    )(x, w, b)


# ----------------------------------------------------------------------------
# VGG model (batch_norm=False), deterministic init matching the PyTorch scheme
# ----------------------------------------------------------------------------
def init_params(key, stages, num_classes):
    params = {"convs": [], "fc": []}
    for st in stages:
        key, kw = jax.random.split(key)
        std = math.sqrt(2.0 / (3 * 3 * st["Cout"]))            # kaiming (PyTorch init)
        w = (std * jax.random.normal(kw, (3, 3, st["Cin"], st["Cout"]), jnp.float32)
             ).astype(jnp.bfloat16)
        b = jnp.zeros((1, st["Cout"]), jnp.float32)
        params["convs"].append((w, b))
    for din, dout in [(stages[-1]["Cout"], 2048), (2048, 2048), (2048, num_classes)]:
        key, kw = jax.random.split(key)
        w = (0.01 * jax.random.normal(kw, (din, dout), jnp.float32)).astype(jnp.bfloat16)
        b = jnp.zeros((1, dout), jnp.float32)
        params["fc"].append((w, b))
    return params


def vgg_forward(params, x_nchw, stages):
    x = jnp.transpose(x_nchw, (0, 2, 3, 1))       # NCHW (PyTorch) -> NHWC (kernel)
    feat = vgg_features(x, params["convs"], stages)   # fused trunk + global avg pool
    (w1, b1), (w2, b2), (w3, b3) = params["fc"]
    h = linear(feat, w1, b1, relu=True)
    # TODO(synk): nn.Dropout is treated as identity (inference semantics); stochastic
    # training-mode dropout is not implemented.
    h = linear(h, w2, b2, relu=True)
    logit, prob = linear_sigmoid(h, w3, b3)       # prob = sigmoid(logit)
    return logit, prob


if __name__ == "__main__":
    key = jax.random.PRNGKey(0)
    kp, kx = jax.random.split(key)

    in_shape = (3, 16, 16)     # (C, H, W) as in the PyTorch constructor
    num_classes = 10
    batch = 2

    stages = build_stages(CFG_SMALL, in_shape[0], in_shape[1], in_shape[2])
    params = init_params(kp, stages, num_classes)
    x = jax.random.normal(kx, (batch,) + in_shape, jnp.float32)   # NCHW input

    logit, prob = vgg_forward(params, x, stages)
    jax.block_until_ready((logit, prob))

    assert logit.shape == (batch, num_classes)
    assert prob.shape == (batch, num_classes)
    assert bool(jnp.all(jnp.isfinite(logit)))
    assert bool(jnp.all((prob >= 0.0) & (prob <= 1.0)))
    print("KERNEL_OK")
</pallas_src>

<mosaic_0001>
module attributes {stable_mosaic.version = 11 : i64} {
  func.func @trunk_kernel(%arg0: i32, %arg1: memref<1x16x16x3xf32, #tpu.memory_space<vmem>>, %arg2: memref<3x3x3x16xbf16, #tpu.memory_space<vmem>>, %arg3: memref<1x16xf32, #tpu.memory_space<vmem>>, %arg4: memref<3x3x16x32xbf16, #tpu.memory_space<vmem>>, %arg5: memref<1x32xf32, #tpu.memory_space<vmem>>, %arg6: memref<3x3x32x64xbf16, #tpu.memory_space<vmem>>, %arg7: memref<1x64xf32, #tpu.memory_space<vmem>>, %arg8: memref<3x3x64x512xbf16, #tpu.memory_space<vmem>>, %arg9: memref<1x512xf32, #tpu.memory_space<vmem>>, %arg10: memref<1x1x512xf32, #tpu.memory_space<vmem>>, %arg11: memref<342x3xf32, #tpu.memory_space<vmem>>, %arg12: memref<110x16xf32, #tpu.memory_space<vmem>>, %arg13: memref<42x32xf32, #tpu.memory_space<vmem>>, %arg14: memref<20x64xf32, #tpu.memory_space<vmem>>, %arg15: memref<288x16xf32, #tpu.memory_space<vmem>>, %arg16: memref<80x32xf32, #tpu.memory_space<vmem>>, %arg17: memref<24x64xf32, #tpu.memory_space<vmem>>, %arg18: memref<8x512xf32, #tpu.memory_space<vmem>>) attributes {dimension_semantics = [#tpu.dimension_semantics<parallel>], iteration_bounds = array<i64: 2>, scalar_prefetch = 0 : i64, scratch_operands = 8 : i64, tpu.core_type = #tpu.core_type<tc>, window_params = [{transform_indices = @transform_0, window_bounds = array<i64: 1, 16, 16, 3>}, {pipeline_mode = #tpu.pipeline_mode<synchronous>, transform_indices = @transform_1, window_bounds = array<i64: 3, 3, 3, 16>}, {pipeline_mode = #tpu.pipeline_mode<synchronous>, transform_indices = @transform_2, window_bounds = array<i64: 1, 16>}, {pipeline_mode = #tpu.pipeline_mode<synchronous>, transform_indices = @transform_3, window_bounds = array<i64: 3, 3, 16, 32>}, {pipeline_mode = #tpu.pipeline_mode<synchronous>, transform_indices = @transform_4, window_bounds = array<i64: 1, 32>}, {pipeline_mode = #tpu.pipeline_mode<synchronous>, transform_indices = @transform_5, window_bounds = array<i64: 3, 3, 32, 64>}, {pipeline_mode = #tpu.pipeline_mode<synchronous>, transform_indices = @transform_6, window_bounds = array<i64: 1, 64>}, {pipeline_mode = #tpu.pipeline_mode<synchronous>, transform_indices = @transform_7, window_bounds = array<i64: 3, 3, 64, 512>}, {pipeline_mode = #tpu.pipeline_mode<synchronous>, transform_indices = @transform_8, window_bounds = array<i64: 1, 512>}, {transform_indices = @transform_9, window_bounds = array<i64: 1, 1, 512>}]} {
    %cst = arith.constant 0.000000e+00 : f32
    %0 = vector.broadcast %cst : f32 to vector<342x3xf32>
    %c0 = arith.constant 0 : index
    %c0_0 = arith.constant 0 : index
    %1 = vector.load %arg11[%c0, %c0_0] : memref<342x3xf32, #tpu.memory_space<vmem>>, vector<342x3xf32>
    tpu.vector_store %arg11[%c0, %c0_0], %0 {strides = array<i32>} : memref<342x3xf32, #tpu.memory_space<vmem>>, vector<342x3xf32>,
    %c0_1 = arith.constant 0 : index
    %c0_2 = arith.constant 0 : index
    %c0_3 = arith.constant 0 : index
    %c0_4 = arith.constant 0 : index
    %2 = vector.load %arg1[%c0_1, %c0_2, %c0_3, %c0_4] : memref<1x16x16x3xf32, #tpu.memory_space<vmem>>, vector<1x1x16x3xf32>
    %3 = vector.shape_cast %2 : vector<1x1x16x3xf32> to vector<16x3xf32>
    %c19 = arith.constant 19 : index
    %c0_5 = arith.constant 0 : index
    %4 = vector.load %arg11[%c19, %c0_5] : memref<342x3xf32, #tpu.memory_space<vmem>>, vector<16x3xf32>
    tpu.vector_store %arg11[%c19, %c0_5], %3 {strides = array<i32>} : memref<342x3xf32, #tpu.memory_space<vmem>>, vector<16x3xf32>,
    %c0_6 = arith.constant 0 : index
    %c1 = arith.constant 1 : index
    %c0_7 = arith.constant 0 : index
    %c0_8 = arith.constant 0 : index
    %5 = vector.load %arg1[%c0_6, %c1, %c0_7, %c0_8] : memref<1x16x16x3xf32, #tpu.memory_space<vmem>>, vector<1x1x16x3xf32>
    %6 = vector.shape_cast %5 : vector<1x1x16x3xf32> to vector<16x3xf32>
    %c37 = arith.constant 37 : index
    %c0_9 = arith.constant 0 : index
    %7 = vector.load %arg11[%c37, %c0_9] : memref<342x3xf32, #tpu.memory_space<vmem>>, vector<16x3xf32>
    tpu.vector_store %arg11[%c37, %c0_9], %6 {strides = array<i32>} : memref<342x3xf32, #tpu.memory_space<vmem>>, vector<16x3xf32>,
    %c0_10 = arith.constant 0 : index
    %c2 = arith.constant 2 : index
    %c0_11 = arith.constant 0 : index
    %c0_12 = arith.constant 0 : index
    %8 = vector.load %arg1[%c0_10, %c2, %c0_11, %c0_12] : memref<1x16x16x3xf32, #tpu.memory_space<vmem>>, vector<1x1x16x3xf32>
    %9 = vector.shape_cast %8 : vector<1x1x16x3xf32> to vector<16x3xf32>
    %c55 = arith.constant 55 : index
    %c0_13 = arith.constant 0 : index
    %10 = vector.load %arg11[%c55, %c0_13] : memref<342x3xf32, #tpu.memory_space<vmem>>, vector<16x3xf32>
    tpu.vector_store %arg11[%c55, %c0_13], %9 {strides = array<i32>} : memref<342x3xf32, #tpu.memory_space<vmem>>, vector<16x3xf32>,
    %c0_14 = arith.constant 0 : index
    %c3 = arith.constant 3 : index
    %c0_15 = arith.constant 0 : index
    %c0_16 = arith.constant 0 : index
    %11 = vector.load %arg1[%c0_14, %c3, %c0_15, %c0_16] : memref<1x16x16x3xf32, #tpu.memory_space<vmem>>, vector<1x1x16x3xf32>
    %12 = vector.shape_cast %11 : vector<1x1x16x3xf32> to vector<16x3xf32>
    %c73 = arith.constant 73 : index
    %c0_17 = arith.constant 0 : index
    %13 = vector.load %arg11[%c73, %c0_17] : memref<342x3xf32, #tpu.memory_space<vmem>>, vector<16x3xf32>
    tpu.vector_store %arg11[%c73, %c0_17], %12 {strides = array<i32>} : memref<342x3xf32, #tpu.memory_space<vmem>>, vector<16x3xf32>,
    %c0_18 = arith.constant 0 : index
    %c4 = arith.constant 4 : index
    %c0_19 = arith.constant 0 : index
    %c0_20 = arith.constant 0 : index
    %14 = vector.load %arg1[%c0_18, %c4, %c0_19, %c0_20] : memref<1x16x16x3xf32, #tpu.memory_space<vmem>>, vector<1x1x16x3xf32>
    %15 = vector.shape_cast %14 : vector<1x1x16x3xf32> to vector<16x3xf32>
    %c91 = arith.constant 91 : index
    %c0_21 = arith.constant 0 : index
    %16 = vector.load %arg11[%c91, %c0_21] : memref<342x3xf32, #tpu.memory_space<vmem>>, vector<16x3xf32>
    tpu.vector_store %arg11[%c91, %c0_21], %15 {strides = array<i32>} : memref<342x3xf32, #tpu.memory_space<vmem>>, vector<16x3xf32>,
    %c0_22 = arith.constant 0 : index
    %c5 = arith.constant 5 : index
    %c0_23 = arith.constant 0 : index
    %c0_24 = arith.constant 0 : index
    %17 = vector.load %arg1[%c0_22, %c5, %c0_23, %c0_24] : memref<1x16x16x3xf32, #tpu.memory_space<vmem>>, vector<1x1x16x3xf32>
    %18 = vector.shape_cast %17 : vector<1x1x16x3xf32> to vector<16x3xf32>
    %c109 = arith.constant 109 : index
    %c0_25 = arith.constant 0 : index
    %19 = vector.load %arg11[%c109, %c0_25] : memref<342x3xf32, #tpu.memory_space<vmem>>, vector<16x3xf32>
    tpu.vector_store %arg11[%c109, %c0_25], %18 {strides = array<i32>} : memref<342x3xf32, #tpu.memory_space<vmem>>, vector<16x3xf32>,
    %c0_26 = arith.constant 0 : index
    %c6 = arith.constant 6 : index
    %c0_27 = arith.constant 0 : index
    %c0_28 = arith.constant 0 : index
    %20 = vector.load %arg1[%c0_26, %c6, %c0_27, %c0_28] : memref<1x16x16x3xf32, #tpu.memory_space<vmem>>, vector<1x1x16x3xf32>
    %21 = vector.shape_cast %20 : vector<1x1x16x3xf32> to vector<16x3xf32>
    %c127 = arith.constant 127 : index
    %c0_29 = arith.constant 0 : index
    %22 = vector.load %arg11[%c127, %c0_29] : memref<342x3xf32, #tpu.memory_space<vmem>>, vector<16x3xf32>
    tpu.vector_store %arg11[%c127, %c0_29], %21 {strides = array<i32>} : memref<342x3xf32, #tpu.memory_space<vmem>>, vector<16x3xf32>,
    %c0_30 = arith.constant 0 : index
    %c7 = arith.constant 7 : index
    %c0_31 = arith.constant 0 : index
    %c0_32 = arith.constant 0 : index
    %23 = vector.load %arg1[%c0_30, %c7, %c0_31, %c0_32] : memref<1x16x16x3xf32, #tpu.memory_space<vmem>>, vector<1x1x16x3xf32>
    %24 = vector.shape_cast %23 : vector<1x1x16x3xf32> to vector<16x3xf32>
    %c145 = arith.constant 145 : index
    %c0_33 = arith.constant 0 : index
    %25 = vector.load %arg11[%c145, %c0_33] : memref<342x3xf32, #tpu.memory_space<vmem>>, vector<16x3xf32>
    tpu.vector_store %arg11[%c145, %c0_33], %24 {strides = array<i32>} : memref<342x3xf32, #tpu.memory_space<vmem>>, vector<16x3xf32>,
    %c0_34 = arith.constant 0 : index
    %c8 = arith.constant 8 : index
    %c0_35 = arith.constant 0 : index
    %c0_36 = arith.constant 0 : index
    %26 = vector.load %arg1[%c0_34, %c8, %c0_35, %c0_36] : memref<1x16x16x3xf32, #tpu.memory_space<vmem>>, vector<1x1x16x3xf32>
    %27 = vector.shape_cast %26 : vector<1x1x16x3xf32> to vector<16x3xf32>
    %c163 = arith.constant 163 : index
    %c0_37 = arith.constant 0 : index
    %28 = vector.load %arg11[%c163, %c0_37] : memref<342x3xf32, #tpu.memory_space<vmem>>, vector<16x3xf32>
    tpu.vector_store %arg11[%c163, %c0_37], %27 {strides = array<i32>} : memref<342x3xf32, #tpu.memory_space<vmem>>, vector<16x3xf32>,
    %c0_38 = arith.constant 0 : index
    %c9 = arith.constant 9 : index
    %c0_39 = arith.constant 0 : index
    %c0_40 = arith.constant 0 : index
    %29 = vector.load %arg1[%c0_38, %c9, %c0_39, %c0_40] : memref<1x16x16x3xf32, #tpu.memory_space<vmem>>, vector<1x1x16x3xf32>
    %30 = vector.shape_cast %29 : vector<1x1x16x3xf32> to vector<16x3xf32>
    %c181 = arith.constant 181 : index
    %c0_41 = arith.constant 0 : index
    %31 = vector.load %arg11[%c181, %c0_41] : memref<342x3xf32, #tpu.memory_space<vmem>>, vector<16x3xf32>
    tpu.vector_store %arg11[%c181, %c0_41], %30 {strides = array<i32>} : memref<342x3xf32, #tpu.memory_space<vmem>>, vector<16x3xf32>,
    %c0_42 = arith.constant 0 : index
    %c10 = arith.constant 10 : index
    %c0_43 = arith.constant 0 : index
    %c0_44 = arith.constant 0 : index
    %32 = vector.load %arg1[%c0_42, %c10, %c0_43, %c0_44] : memref<1x16x16x3xf32, #tpu.memory_space<vmem>>, vector<1x1x16x3xf32>
    %33 = vector.shape_cast %32 : vector<1x1x16x3xf32> to vector<16x3xf32>
    %c199 = arith.constant 199 : index
    %c0_45 = arith.constant 0 : index
    %34 = vector.load %arg11[%c199, %c0_45] : memref<342x3xf32, #tpu.memory_space<vmem>>, vector<16x3xf32>
    tpu.vector_store %arg11[%c199, %c0_45], %33 {strides = array<i32>} : memref<342x3xf32, #tpu.memory_space<vmem>>, vector<16x3xf32>,
    %c0_46 = arith.constant 0 : index
    %c11 = arith.constant 11 : index
    %c0_47 = arith.constant 0 : index
    %c0_48 = arith.constant 0 : index
    %35 = vector.load %arg1[%c0_46, %c11, %c0_47, %c0_48] : memref<1x16x16x3xf32, #tpu.memory_space<vmem>>, vector<1x1x16x3xf32>
    %36 = vector.shape_cast %35 : vector<1x1x16x3xf32> to vector<16x3xf32>
    %c217 = arith.constant 217 : index
    %c0_49 = arith.constant 0 : index
    %37 = vector.load %arg11[%c217, %c0_49] : memref<342x3xf32, #tpu.memory_space<vmem>>, vector<16x3xf32>
    tpu.vector_store %arg11[%c217, %c0_49], %36 {strides = array<i32>} : memref<342x3xf32, #tpu.memory_space<vmem>>, vector<16x3xf32>,
    %c0_50 = arith.constant 0 : index
    %c12 = arith.constant 12 : index
    %c0_51 = arith.constant 0 : index
    %c0_52 = arith.constant 0 : index
    %38 = vector.load %arg1[%c0_50, %c12, %c0_51, %c0_52] : memref<1x16x16x3xf32, #tpu.memory_space<vmem>>, vector<1x1x16x3xf32>
    %39 = vector.shape_cast %38 : vector<1x1x16x3xf32> to vector<16x3xf32>
    %c235 = arith.constant 235 : index
    %c0_53 = arith.constant 0 : index
    %40 = vector.load %arg11[%c235, %c0_53] : memref<342x3xf32, #tpu.memory_space<vmem>>, vector<16x3xf32>
    tpu.vector_store %arg11[%c235, %c0_53], %39 {strides = array<i32>} : memref<342x3xf32, #tpu.memory_space<vmem>>, vector<16x3xf32>,
    %c0_54 = arith.constant 0 : index
    %c13 = arith.constant 13 : index
    %c0_55 = arith.constant 0 : index
    %c0_56 = arith.constant 0 : index
    %41 = vector.load %arg1[%c0_54, %c13, %c0_55, %c0_56] : memref<1x16x16x3xf32, #tpu.memory_space<vmem>>, vector<1x1x16x3xf32>
    %42 = vector.shape_cast %41 : vector<1x1x16x3xf32> to vector<16x3xf32>
    %c253 = arith.constant 253 : index
    %c0_57 = arith.constant 0 : index
    %43 = vector.load %arg11[%c253, %c0_57] : memref<342x3xf32, #tpu.memory_space<vmem>>, vector<16x3xf32>
    tpu.vector_store %arg11[%c253, %c0_57], %42 {strides = array<i32>} : memref<342x3xf32, #tpu.memory_space<vmem>>, vector<16x3xf32>,
    %c0_58 = arith.constant 0 : index
    %c14 = arith.constant 14 : index
    %c0_59 = arith.constant 0 : index
    %c0_60 = arith.constant 0 : index
    %44 = vector.load %arg1[%c0_58, %c14, %c0_59, %c0_60] : memref<1x16x16x3xf32, #tpu.memory_space<vmem>>, vector<1x1x16x3xf32>
    %45 = vector.shape_cast %44 : vector<1x1x16x3xf32> to vector<16x3xf32>
    %c271 = arith.constant 271 : index
    %c0_61 = arith.constant 0 : index
    %46 = vector.load %arg11[%c271, %c0_61] : memref<342x3xf32, #tpu.memory_space<vmem>>, vector<16x3xf32>
    tpu.vector_store %arg11[%c271, %c0_61], %45 {strides = array<i32>} : memref<342x3xf32, #tpu.memory_space<vmem>>, vector<16x3xf32>,
    %c0_62 = arith.constant 0 : index
    %c15 = arith.constant 15 : index
    %c0_63 = arith.constant 0 : index
    %c0_64 = arith.constant 0 : index
    %47 = vector.load %arg1[%c0_62, %c15, %c0_63, %c0_64] : memref<1x16x16x3xf32, #tpu.memory_space<vmem>>, vector<1x1x16x3xf32>
    %48 = vector.shape_cast %47 : vector<1x1x16x3xf32> to vector<16x3xf32>
    %c289 = arith.constant 289 : index
    %c0_65 = arith.constant 0 : index
    %49 = vector.load %arg11[%c289, %c0_65] : memref<342x3xf32, #tpu.memory_space<vmem>>, vector<16x3xf32>
    tpu.vector_store %arg11[%c289, %c0_65], %48 {strides = array<i32>} : memref<342x3xf32, #tpu.memory_space<vmem>>, vector<16x3xf32>,
    %cst_66 = arith.constant 0.000000e+00 : f32
    %50 = vector.broadcast %cst_66 : f32 to vector<288x16xf32>
    %c0_67 = arith.constant 0 : index
    %c0_68 = arith.constant 0 : index
    %51 = vector.load %arg15[%c0_67, %c0_68] : memref<288x16xf32, #tpu.memory_space<vmem>>, vector<288x16xf32>
    tpu.vector_store %arg15[%c0_67, %c0_68], %50 {strides = array<i32>} : memref<288x16xf32, #tpu.memory_space<vmem>>, vector<288x16xf32>,
    %c0_69 = arith.constant 0 : index
    %c0_70 = arith.constant 0 : index
    %52 = vector.load %arg11[%c0_69, %c0_70] : memref<342x3xf32, #tpu.memory_space<vmem>>, vector<288x3xf32>
    %53 = arith.truncf %52 : vector<288x3xf32> to vector<288x3xbf16>
    %c0_71 = arith.constant 0 : index
    %c0_72 = arith.constant 0 : index
    %54 = vector.load %arg15[%c0_71, %c0_72] : memref<288x16xf32, #tpu.memory_space<vmem>>, vector<288x16xf32>
    %c0_73 = arith.constant 0 : index
    %c0_74 = arith.constant 0 : index
    %c0_75 = arith.constant 0 : index
    %c0_76 = arith.constant 0 : index
    %55 = vector.load %arg2[%c0_73, %c0_74, %c0_75, %c0_76] : memref<3x3x3x16xbf16, #tpu.memory_space<vmem>>, vector<1x1x3x16xbf16>
    %56 = vector.shape_cast %55 : vector<1x1x3x16xbf16> to vector<3x16xbf16>
    %cst_77 = arith.constant dense<0.000000e+00> : vector<288x16xf32>
    %57 = tpu.matmul %53, %56, %cst_77 {dimension_numbers = #tpu.dot_dimension_numbers<[1], [0], [0], [1], [0, 0, 1, 1], [], []>} : vector<288x3xbf16>, vector<3x16xbf16>, vector<288x16xf32> -> vector<288x16xf32>
    %58 = arith.addf %54, %57 : vector<288x16xf32>
    %c0_78 = arith.constant 0 : index
    %c0_79 = arith.constant 0 : index
    %59 = vector.load %arg15[%c0_78, %c0_79] : memref<288x16xf32, #tpu.memory_space<vmem>>, vector<288x16xf32>
    tpu.vector_store %arg15[%c0_78, %c0_79], %58 {strides = array<i32>} : memref<288x16xf32, #tpu.memory_space<vmem>>, vector<288x16xf32>,
    %c1_80 = arith.constant 1 : index
    %c0_81 = arith.constant 0 : index
    %60 = vector.load %arg11[%c1_80, %c0_81] : memref<342x3xf32, #tpu.memory_space<vmem>>, vector<288x3xf32>
    %61 = arith.truncf %60 : vector<288x3xf32> to vector<288x3xbf16>
    %c0_82 = arith.constant 0 : index
    %c0_83 = arith.constant 0 : index
    %62 = vector.load %arg15[%c0_82, %c0_83] : memref<288x16xf32, #tpu.memory_space<vmem>>, vector<288x16xf32>
    %c0_84 = arith.constant 0 : index
    %c1_85 = arith.constant 1 : index
    %c0_86 = arith.constant 0 : index
    %c0_87 = arith.constant 0 : index
    %63 = vector.load %arg2[%c0_84, %c1_85, %c0_86, %c0_87] : memref<3x3x3x16xbf16, #tpu.memory_space<vmem>>, vector<1x1x3x16xbf16>
    %64 = vector.shape_cast %63 : vector<1x1x3x16xbf16> to vector<3x16xbf16>
    %cst_88 = arith.constant dense<0.000000e+00> : vector<288x16xf32>
    %65 = tpu.matmul %61, %64, %cst_88 {dimension_numbers = #tpu.dot_dimension_numbers<[1], [0], [0], [1], [0, 0, 1, 1], [], []>} : vector<288x3xbf16>, vector<3x16xbf16>, vector<288x16xf32> -> vector<288x16xf32>
    %66 = arith.addf %62, %65 : vector<288x16xf32>
    %c0_89 = arith.constant 0 : index
    %c0_90 = arith.constant 0 : index
    %67 = vector.load %arg15[%c0_89, %c0_90] : memref<288x16xf32, #tpu.memory_space<vmem>>, vector<288x16xf32>
    tpu.vector_store %arg15[%c0_89, %c0_90], %66 {strides = array<i32>} : memref<288x16xf32, #tpu.memory_space<vmem>>, vector<288x16xf32>,
    %c2_91 = arith.constant 2 : index
    %c0_92 = arith.constant 0 : index
    %68 = vector.load %arg11[%c2_91, %c0_92] : memref<342x3xf32, #tpu.memory_space<vmem>>, vector<288x3xf32>
    %69 = arith.truncf %68 : vector<288x3xf32> to vector<288x3xbf16>
    %c0_93 = arith.constant 0 : index
    %c0_94 = arith.constant 0 : index
    %70 = vector.load %arg15[%c0_93, %c0_94] : memref<288x16xf32, #tpu.memory_space<vmem>>, vector<288x16xf32>
    %c0_95 = arith.constant 0 : index
    %c2_96 = arith.constant 2 : index
    %c0_97 = arith.constant 0 : index
    %c0_98 = arith.constant 0 : index
    %71 = vector.load %arg2[%c0_95, %c2_96, %c0_97, %c0_98] : memref<3x3x3x16xbf16, #tpu.memory_space<vmem>>, vector<1x1x3x16xbf16>
    %72 = vector.shape_cast %71 : vector<1x1x3x16xbf16> to vector<3x16xbf16>
    %cst_99 = arith.constant dense<0.000000e+00> : vector<288x16xf32>
    %73 = tpu.matmul %69, %72, %cst_99 {dimension_numbers = #tpu.dot_dimension_numbers<[1], [0], [0], [1], [0, 0, 1, 1], [], []>} : vector<288x3xbf16>, vector<3x16xbf16>, vector<288x16xf32> -> vector<288x16xf32>
    %74 = arith.addf %70, %73 : vector<288x16xf32>
    %c0_100 = arith.constant 0 : index
    %c0_101 = arith.constant 0 : index
    %75 = vector.load %arg15[%c0_100, %c0_101] : memref<288x16xf32, #tpu.memory_space<vmem>>, vector<288x16xf32>
    tpu.vector_store %arg15[%c0_100, %c0_101], %74 {strides = array<i32>} : memref<288x16xf32, #tpu.memory_space<vmem>>, vector<288x16xf32>,
    %c18 = arith.constant 18 : index
    %c0_102 = arith.constant 0 : index
    %76 = vector.load %arg11[%c18, %c0_102] : memref<342x3xf32, #tpu.memory_space<vmem>>, vector<288x3xf32>
    %77 = arith.truncf %76 : vector<288x3xf32> to vector<288x3xbf16>
    %c0_103 = arith.constant 0 : index
    %c0_104 = arith.constant 0 : index
    %78 = vector.load %arg15[%c0_103, %c0_104] : memref<288x16xf32, #tpu.memory_space<vmem>>, vector<288x16xf32>
    %c1_105 = arith.constant 1 : index
    %c0_106 = arith.constant 0 : index
    %c0_107 = arith.constant 0 : index
    %c0_108 = arith.constant 0 : index
    %79 = vector.load %arg2[%c1_105, %c0_106, %c0_107, %c0_108] : memref<3x3x3x16xbf16, #tpu.memory_space<vmem>>, vector<1x1x3x16xbf16>
    %80 = vector.shape_cast %79 : vector<1x1x3x16xbf16> to vector<3x16xbf16>
    %cst_109 = arith.constant dense<0.000000e+00> : vector<288x16xf32>
    %81 = tpu.matmul %77, %80, %cst_109 {dimension_numbers = #tpu.dot_dimension_numbers<[1], [0], [0], [1], [0, 0, 1, 1], [], []>} : vector<288x3xbf16>, vector<3x16xbf16>, vector<288x16xf32> -> vector<288x16xf32>
    %82 = arith.addf %78, %81 : vector<288x16xf32>
    %c0_110 = arith.constant 0 : index
    %c0_111 = arith.constant 0 : index
    %83 = vector.load %arg15[%c0_110, %c0_111] : memref<288x16xf32, #tpu.memory_space<vmem>>, vector<288x16xf32>
    tpu.vector_store %arg15[%c0_110, %c0_111], %82 {strides = array<i32>} : memref<288x16xf32, #tpu.memory_space<vmem>>, vector<288x16xf32>,
    %c19_112 = arith.constant 19 : index
    %c0_113 = arith.constant 0 : index
    %84 = vector.load %arg11[%c19_112, %c0_113] : memref<342x3xf32, #tpu.memory_space<vmem>>, vector<288x3xf32>
    %85 = arith.truncf %84 : vector<288x3xf32> to vector<288x3xbf16>
    %c0_114 = arith.constant 0 : index
    %c0_115 = arith.constant 0 : index
    %86 = vector.load %arg15[%c0_114, %c0_115] : memref<288x16xf32, #tpu.memory_space<vmem>>, vector<288x16xf32>
    %c1_116 = arith.constant 1 : index
    %c1_117 = arith.constant 1 : index
    %c0_118 = arith.constant 0 : index
    %c0_119 = arith.constant 0 : index
    %87 = vector.load %arg2[%c1_116, %c1_117, %c0_118, %c0_119] : memref<3x3x3x16xbf16, #tpu.memory_space<vmem>>, vector<1x1x3x16xbf16>
    %88 = vector.shape_cast %87 : vector<1x1x3x16xbf16> to vector<3x16xbf16>
    %cst_120 = arith.constant dense<0.000000e+00> : vector<288x16xf32>
    %89 = tpu.matmul %85, %88, %cst_120 {dimension_numbers = #tpu.dot_dimension_numbers<[1], [0], [0], [1], [0, 0, 1, 1], [], []>} : vector<288x3xbf16>, vector<3x16xbf16>, vector<288x16xf32> -> vector<288x16xf32>
    %90 = arith.addf %86, %89 : vector<288x16xf32>
    %c0_121 = arith.constant 0 : index
    %c0_122 = arith.constant 0 : index
    %91 = vector.load %arg15[%c0_121, %c0_122] : memref<288x16xf32, #tpu.memory_space<vmem>>, vector<288x16xf32>
    tpu.vector_store %arg15[%c0_121, %c0_122], %90 {strides = array<i32>} : memref<288x16xf32, #tpu.memory_space<vmem>>, vector<288x16xf32>,
    %c20 = arith.constant 20 : index
    %c0_123 = arith.constant 0 : index
    %92 = vector.load %arg11[%c20, %c0_123] : memref<342x3xf32, #tpu.memory_space<vmem>>, vector<288x3xf32>
    %93 = arith.truncf %92 : vector<288x3xf32> to vector<288x3xbf16>
    %c0_124 = arith.constant 0 : index
    %c0_125 = arith.constant 0 : index
    %94 = vector.load %arg15[%c0_124, %c0_125] : memref<288x16xf32, #tpu.memory_space<vmem>>, vector<288x16xf32>
    %c1_126 = arith.constant 1 : index
    %c2_127 = arith.constant 2 : index
    %c0_128 = arith.constant 0 : index
    %c0_129 = arith.constant 0 : index
    %95 = vector.load %arg2[%c1_126, %c2_127, %c0_128, %c0_129] : memref<3x3x3x16xbf16, #tpu.memory_space<vmem>>, vector<1x1x3x16xbf16>
    %96 = vector.shape_cast %95 : vector<1x1x3x16xbf16> to vector<3x16xbf16>
    %cst_130 = arith.constant dense<0.000000e+00> : vector<288x16xf32>
    %97 = tpu.matmul %93, %96, %cst_130 {dimension_numbers = #tpu.dot_dimension_numbers<[1], [0], [0], [1], [0, 0, 1, 1], [], []>} : vector<288x3xbf16>, vector<3x16xbf16>, vector<288x16xf32> -> vector<288x16xf32>
    %98 = arith.addf %94, %97 : vector<288x16xf32>
    %c0_131 = arith.constant 0 : index
    %c0_132 = arith.constant 0 : index
    %99 = vector.load %arg15[%c0_131, %c0_132] : memref<288x16xf32, #tpu.memory_space<vmem>>, vector<288x16xf32>
    tpu.vector_store %arg15[%c0_131, %c0_132], %98 {strides = array<i32>} : memref<288x16xf32, #tpu.memory_space<vmem>>, vector<288x16xf32>,
    %c36 = arith.constant 36 : index
    %c0_133 = arith.constant 0 : index
    %100 = vector.load %arg11[%c36, %c0_133] : memref<342x3xf32, #tpu.memory_space<vmem>>, vector<288x3xf32>
    %101 = arith.truncf %100 : vector<288x3xf32> to vector<288x3xbf16>
    %c0_134 = arith.constant 0 : index
    %c0_135 = arith.constant 0 : index
    %102 = vector.load %arg15[%c0_134, %c0_135] : memref<288x16xf32, #tpu.memory_space<vmem>>, vector<288x16xf32>
    %c2_136 = arith.constant 2 : index
    %c0_137 = arith.constant 0 : index
    %c0_138 = arith.constant 0 : index
    %c0_139 = arith.constant 0 : index
    %103 = vector.load %arg2[%c2_136, %c0_137, %c0_138, %c0_139] : memref<3x3x3x16xbf16, #tpu.memory_space<vmem>>, vector<1x1x3x16xbf16>
    %104 = vector.shape_cast %103 : vector<1x1x3x16xbf16> to vector<3x16xbf16>
    %cst_140 = arith.constant dense<0.000000e+00> : vector<288x16xf32>
    %105 = tpu.matmul %101, %104, %cst_140 {dimension_numbers = #tpu.dot_dimension_numbers<[1], [0], [0], [1], [0, 0, 1, 1], [], []>} : vector<288x3xbf16>, vector<3x16xbf16>, vector<288x16xf32> -> vector<288x16xf32>
    %106 = arith.addf %102, %105 : vector<288x16xf32>
    %c0_141 = arith.constant 0 : index
    %c0_142 = arith.constant 0 : index
    %107 = vector.load %arg15[%c0_141, %c0_142] : memref<288x16xf32, #tpu.memory_space<vmem>>, vector<288x16xf32>
    tpu.vector_store %arg15[%c0_141, %c0_142], %106 {strides = array<i32>} : memref<288x16xf32, #tpu.memory_space<vmem>>, vector<288x16xf32>,
    %c37_143 = arith.constant 37 : index
    %c0_144 = arith.constant 0 : index
    %108 = vector.load %arg11[%c37_143, %c0_144] : memref<342x3xf32, #tpu.memory_space<vmem>>, vector<288x3xf32>
    %109 = arith.truncf %108 : vector<288x3xf32> to vector<288x3xbf16>
    %c0_145 = arith.constant 0 : index
    %c0_146 = arith.constant 0 : index
    %110 = vector.load %arg15[%c0_145, %c0_146] : memref<288x16xf32, #tpu.memory_space<vmem>>, vector<288x16xf32>
    %c2_147 = arith.constant 2 : index
    %c1_148 = arith.constant 1 : index
    %c0_149 = arith.constant 0 : index
    %c0_150 = arith.constant 0 : index
    %111 = vector.load %arg2[%c2_147, %c1_148, %c0_149, %c0_150] : memref<3x3x3x16xbf16, #tpu.memory_space<vmem>>, vector<1x1x3x16xbf16>
    %112 = vector.shape_cast %111 : vector<1x1x3x16xbf16> to vector<3x16xbf16>
    %cst_151 = arith.constant dense<0.000000e+00> : vector<288x16xf32>
    %113 = tpu.matmul %109, %112, %cst_151 {dimension_numbers = #tpu.dot_dimension_numbers<[1], [0], [0], [1], [0, 0, 1, 1], [], []>} : vector<288x3xbf16>, vector<3x16xbf16>, vector<288x16xf32> -> vector<288x16xf32>
    %114 = arith.addf %110, %113 : vector<288x16xf32>
    %c0_152 = arith.constant 0 : index
    %c0_153 = arith.constant 0 : index
    %115 = vector.load %arg15[%c0_152, %c0_153] : memref<288x16xf32, #tpu.memory_space<vmem>>, vector<288x16xf32>
    tpu.vector_store %arg15[%c0_152, %c0_153], %114 {strides = array<i32>} : memref<288x16xf32, #tpu.memory_space<vmem>>, vector<288x16xf32>,
    %c38 = arith.constant 38 : index
    %c0_154 = arith.constant 0 : index
    %116 = vector.load %arg11[%c38, %c0_154] : memref<342x3xf32, #tpu.memory_space<vmem>>, vector<288x3xf32>
    %117 = arith.truncf %116 : vector<288x3xf32> to vector<288x3xbf16>
    %c0_155 = arith.constant 0 : index
    %c0_156 = arith.constant 0 : index
    %118 = vector.load %arg15[%c0_155, %c0_156] : memref<288x16xf32, #tpu.memory_space<vmem>>, vector<288x16xf32>
    %c2_157 = arith.constant 2 : index
    %c2_158 = arith.constant 2 : index
    %c0_159 = arith.constant 0 : index
    %c0_160 = arith.constant 0 : index
    %119 = vector.load %arg2[%c2_157, %c2_158, %c0_159, %c0_160] : memref<3x3x3x16xbf16, #tpu.memory_space<vmem>>, vector<1x1x3x16xbf16>
    %120 = vector.shape_cast %119 : vector<1x1x3x16xbf16> to vector<3x16xbf16>
    %cst_161 = arith.constant dense<0.000000e+00> : vector<288x16xf32>
    %121 = tpu.matmul %117, %120, %cst_161 {dimension_numbers = #tpu.dot_dimension_numbers<[1], [0], [0], [1], [0, 0, 1, 1], [], []>} : vector<288x3xbf16>, vector<3x16xbf16>, vector<288x16xf32> -> vector<288x16xf32>
    %122 = arith.addf %118, %121 : vector<288x16xf32>
    %c0_162 = arith.constant 0 : index
    %c0_163 = arith.constant 0 : index
    %123 = vector.load %arg15[%c0_162, %c0_163] : memref<288x16xf32, #tpu.memory_space<vmem>>, vector<288x16xf32>
    tpu.vector_store %arg15[%c0_162, %c0_163], %122 {strides = array<i32>} : memref<288x16xf32, #tpu.memory_space<vmem>>, vector<288x16xf32>,
    %c0_164 = arith.constant 0 : index
    %c0_165 = arith.constant 0 : index
    %124 = vector.load %arg3[%c0_164, %c0_165] : memref<1x16xf32, #tpu.memory_space<vmem>>, vector<1x16xf32>
    %cst_166 = arith.constant 0.000000e+00 : f32
    %125 = vector.broadcast %cst_166 : f32 to vector<110x16xf32>
    %c0_167 = arith.constant 0 : index
    %c0_168 = arith.constant 0 : index
    %126 = vector.load %arg12[%c0_167, %c0_168] : memref<110x16xf32, #tpu.memory_space<vmem>>, vector<110x16xf32>
    tpu.vector_store %arg12[%c0_167, %c0_168], %125 {strides = array<i32>} : memref<110x16xf32, #tpu.memory_space<vmem>>, vector<110x16xf32>,
    %c0_169 = arith.constant 0 : index
    %c0_170 = arith.constant 0 : index
    %127 = tpu.strided_load %arg15[%c0_169, %c0_170] {strides = array<i32: 2, 1>} : memref<288x16xf32, #tpu.memory_space<vmem>>, vector<8x16xf32>
    %c1_171 = arith.constant 1 : index
    %c0_172 = arith.constant 0 : index
    %128 = tpu.strided_load %arg15[%c1_171, %c0_172] {strides = array<i32: 2, 1>} : memref<288x16xf32, #tpu.memory_space<vmem>>, vector<8x16xf32>
    %c18_173 = arith.constant 18 : index
    %c0_174 = arith.constant 0 : index
    %129 = tpu.strided_load %arg15[%c18_173, %c0_174] {strides = array<i32: 2, 1>} : memref<288x16xf32, #tpu.memory_space<vmem>>, vector<8x16xf32>
    %c19_175 = arith.constant 19 : index
    %c0_176 = arith.constant 0 : index
    %130 = tpu.strided_load %arg15[%c19_175, %c0_176] {strides = array<i32: 2, 1>} : memref<288x16xf32, #tpu.memory_space<vmem>>, vector<8x16xf32>
    %131 = arith.maximumf %127, %128 : vector<8x16xf32>
    %132 = arith.maximumf %129, %130 : vector<8x16xf32>
    %133 = arith.maximumf %131, %132 : vector<8x16xf32>
    %134 = vector.broadcast %124 : vector<1x16xf32> to vector<8x16xf32>
    %135 = arith.addf %133, %134 : vector<8x16xf32>
    %cst_177 = arith.constant 0.000000e+00 : f32
    %136 = vector.broadcast %cst_177 : f32 to vector<8x16xf32>
    %137 = arith.maximumf %135, %136 : vector<8x16xf32>
    %c11_178 = arith.constant 11 : index
    %c0_179 = arith.constant 0 : index
    %138 = vector.load %arg12[%c11_178, %c0_179] : memref<110x16xf32, #tpu.memory_space<vmem>>, vector<8x16xf32>
    tpu.vector_store %arg12[%c11_178, %c0_179], %137 {strides = array<i32>} : memref<110x16xf32, #tpu.memory_space<vmem>>, vector<8x16xf32>,
    %c36_180 = arith.constant 36 : index
    %c0_181 = arith.constant 0 : index
    %139 = tpu.strided_load %arg15[%c36_180, %c0_181] {strides = array<i32: 2, 1>} : memref<288x16xf32, #tpu.memory_space<vmem>>, vector<8x16xf32>
    %c37_182 = arith.constant 37 : index
    %c0_183 = arith.constant 0 : index
    %140 = tpu.strided_load %arg15[%c37_182, %c0_183] {strides = array<i32: 2, 1>} : memref<288x16xf32, #tpu.memory_space<vmem>>, vector<8x16xf32>
    %c54 = arith.constant 54 : index
    %c0_184 = arith.constant 0 : index
    %141 = tpu.strided_load %arg15[%c54, %c0_184] {strides = array<i32: 2, 1>} : memref<288x16xf32, #tpu.memory_space<vmem>>, vector<8x16xf32>
    %c55_185 = arith.constant 55 : index
    %c0_186 = arith.constant 0 : index
    %142 = tpu.strided_load %arg15[%c55_185, %c0_186] {strides = array<i32: 2, 1>} : memref<288x16xf32, #tpu.memory_space<vmem>>, vector<8x16xf32>
    %143 = arith.maximumf %139, %140 : vector<8x16xf32>
    %144 = arith.maximumf %141, %142 : vector<8x16xf32>
    %145 = arith.maximumf %143, %144 : vector<8x16xf32>
    %146 = vector.broadcast %124 : vector<1x16xf32> to vector<8x16xf32>
    %147 = arith.addf %145, %146 : vector<8x16xf32>
    %cst_187 = arith.constant 0.000000e+00 : f32
    %148 = vector.broadcast %cst_187 : f32 to vector<8x16xf32>
    %149 = arith.maximumf %147, %148 : vector<8x16xf32>
    %c21 = arith.constant 21 : index
    %c0_188 = arith.constant 0 : index
    %150 = vector.load %arg12[%c21, %c0_188] : memref<110x16xf32, #tpu.memory_space<vmem>>, vector<8x16xf32>
    tpu.vector_store %arg12[%c21, %c0_188], %149 {strides = array<i32>} : memref<110x16xf32, #tpu.memory_space<vmem>>, vector<8x16xf32>,
    %c72 = arith.constant 72 : index
    %c0_189 = arith.constant 0 : index
    %151 = tpu.strided_load %arg15[%c72, %c0_189] {strides = array<i32: 2, 1>} : memref<288x16xf32, #tpu.memory_space<vmem>>, vector<8x16xf32>
    %c73_190 = arith.constant 73 : index
    %c0_191 = arith.constant 0 : index
    %152 = tpu.strided_load %arg15[%c73_190, %c0_191] {strides = array<i32: 2, 1>} : memref<288x16xf32, #tpu.memory_space<vmem>>, vector<8x16xf32>
    %c90 = arith.constant 90 : index
    %c0_192 = arith.constant 0 : index
    %153 = tpu.strided_load %arg15[%c90, %c0_192] {strides = array<i32: 2, 1>} : memref<288x16xf32, #tpu.memory_space<vmem>>, vector<8x16xf32>
    %c91_193 = arith.constant 91 : index
    %c0_194 = arith.constant 0 : index
    %154 = tpu.strided_load %arg15[%c91_193, %c0_194] {strides = array<i32: 2, 1>} : memref<288x16xf32, #tpu.memory_space<vmem>>, vector<8x16xf32>
    %155 = arith.maximumf %151, %152 : vector<8x16xf32>
    %156 = arith.maximumf %153, %154 : vector<8x16xf32>
    %157 = arith.maximumf %155, %156 : vector<8x16xf32>
    %158 = vector.broadcast %124 : vector<1x16xf32> to vector<8x16xf32>
    %159 = arith.addf %157, %158 : vector<8x16xf32>
    %cst_195 = arith.constant 0.000000e+00 : f32
    %160 = vector.broadcast %cst_195 : f32 to vector<8x16xf32>
    %161 = arith.maximumf %159, %160 : vector<8x16xf32>
    %c31 = arith.constant 31 : index
    %c0_196 = arith.constant 0 : index
    %162 = vector.load %arg12[%c31, %c0_196] : memref<110x16xf32, #tpu.memory_space<vmem>>, vector<8x16xf32>
    tpu.vector_store %arg12[%c31, %c0_196], %161 {strides = array<i32>} : memref<110x16xf32, #tpu.memory_space<vmem>>, vector<8x16xf32>,
    %c108 = arith.constant 108 : index
    %c0_197 = arith.constant 0 : index
    %163 = tpu.strided_load %arg15[%c108, %c0_197] {strides = array<i32: 2, 1>} : memref<288x16xf32, #tpu.memory_space<vmem>>, vector<8x16xf32>
    %c109_198 = arith.constant 109 : index
    %c0_199 = arith.constant 0 : index
    %164 = tpu.strided_load %arg15[%c109_198, %c0_199] {strides = array<i32: 2, 1>} : memref<288x16xf32, #tpu.memory_space<vmem>>, vector<8x16xf32>
    %c126 = arith.constant 126 : index
    %c0_200 = arith.constant 0 : index
    %165 = tpu.strided_load %arg15[%c126, %c0_200] {strides = array<i32: 2, 1>} : memref<288x16xf32, #tpu.memory_space<vmem>>, vector<8x16xf32>
    %c127_201 = arith.constant 127 : index
    %c0_202 = arith.constant 0 : index
    %166 = tpu.strided_load %arg15[%c127_201, %c0_202] {strides = array<i32: 2, 1>} : memref<288x16xf32, #tpu.memory_space<vmem>>, vector<8x16xf32>
    %167 = arith.maximumf %163, %164 : vector<8x16xf32>
    %168 = arith.maximumf %165, %166 : vector<8x16xf32>
    %169 = arith.maximumf %167, %168 : vector<8x16xf32>
    %170 = vector.broadcast %124 : vector<1x16xf32> to vector<8x16xf32>
    %171 = arith.addf %169, %170 : vector<8x16xf32>
    %cst_203 = arith.constant 0.000000e+00 : f32
    %172 = vector.broadcast %cst_203 : f32 to vector<8x16xf32>
    %173 = arith.maximumf %171, %172 : vector<8x16xf32>
    %c41 = arith.constant 41 : index
    %c0_204 = arith.constant 0 : index
    %174 = vector.load %arg12[%c41, %c0_204] : memref<110x16xf32, #tpu.memory_space<vmem>>, vector<8x16xf32>
    tpu.vector_store %arg12[%c41, %c0_204], %173 {strides = array<i32>} : memref<110x16xf32, #tpu.memory_space<vmem>>, vector<8x16xf32>,
    %c144 = arith.constant 144 : index
    %c0_205 = arith.constant 0 : index
    %175 = tpu.strided_load %arg15[%c144, %c0_205] {strides = array<i32: 2, 1>} : memref<288x16xf32, #tpu.memory_space<vmem>>, vector<8x16xf32>
    %c145_206 = arith.constant 145 : index
    %c0_207 = arith.constant 0 : index
    %176 = tpu.strided_load %arg15[%c145_206, %c0_207] {strides = array<i32: 2, 1>} : memref<288x16xf32, #tpu.memory_space<vmem>>, vector<8x16xf32>
    %c162 = arith.constant 162 : index
    %c0_208 = arith.constant 0 : index
    %177 = tpu.strided_load %arg15[%c162, %c0_208] {strides = array<i32: 2, 1>} : memref<288x16xf32, #tpu.memory_space<vmem>>, vector<8x16xf32>
    %c163_209 = arith.constant 163 : index
    %c0_210 = arith.constant 0 : index
    %178 = tpu.strided_load %arg15[%c163_209, %c0_210] {strides = array<i32: 2, 1>} : memref<288x16xf32, #tpu.memory_space<vmem>>, vector<8x16xf32>
    %179 = arith.maximumf %175, %176 : vector<8x16xf32>
    %180 = arith.maximumf %177, %178 : vector<8x16xf32>
    %181 = arith.maximumf %179, %180 : vector<8x16xf32>
    %182 = vector.broadcast %124 : vector<1x16xf32> to vector<8x16xf32>
    %183 = arith.addf %181, %182 : vector<8x16xf32>
    %cst_211 = arith.constant 0.000000e+00 : f32
    %184 = vector.broadcast %cst_211 : f32 to vector<8x16xf32>
    %185 = arith.maximumf %183, %184 : vector<8x16xf32>
    %c51 = arith.constant 51 : index
    %c0_212 = arith.constant 0 : index
    %186 = vector.load %arg12[%c51, %c0_212] : memref<110x16xf32, #tpu.memory_space<vmem>>, vector<8x16xf32>
    tpu.vector_store %arg12[%c51, %c0_212], %185 {strides = array<i32>} : memref<110x16xf32, #tpu.memory_space<vmem>>, vector<8x16xf32>,
    %c180 = arith.constant 180 : index
    %c0_213 = arith.constant 0 : index
    %187 = tpu.strided_load %arg15[%c180, %c0_213] {strides = array<i32: 2, 1>} : memref<288x16xf32, #tpu.memory_space<vmem>>, vector<8x16xf32>
    %c181_214 = arith.constant 181 : index
    %c0_215 = arith.constant 0 : index
    %188 = tpu.strided_load %arg15[%c181_214, %c0_215] {strides = array<i32: 2, 1>} : memref<288x16xf32, #tpu.memory_space<vmem>>, vector<8x16xf32>
    %c198 = arith.constant 198 : index
    %c0_216 = arith.constant 0 : index
    %189 = tpu.strided_load %arg15[%c198, %c0_216] {strides = array<i32: 2, 1>} : memref<288x16xf32, #tpu.memory_space<vmem>>, vector<8x16xf32>
    %c199_217 = arith.constant 199 : index
    %c0_218 = arith.constant 0 : index
    %190 = tpu.strided_load %arg15[%c199_217, %c0_218] {strides = array<i32: 2, 1>} : memref<288x16xf32, #tpu.memory_space<vmem>>, vector<8x16xf32>
    %191 = arith.maximumf %187, %188 : vector<8x16xf32>
    %192 = arith.maximumf %189, %190 : vector<8x16xf32>
    %193 = arith.maximumf %191, %192 : vector<8x16xf32>
    %194 = vector.broadcast %124 : vector<1x16xf32> to vector<8x16xf32>
    %195 = arith.addf %193, %194 : vector<8x16xf32>
    %cst_219 = arith.constant 0.000000e+00 : f32
    %196 = vector.broadcast %cst_219 : f32 to vector<8x16xf32>
    %197 = arith.maximumf %195, %196 : vector<8x16xf32>
    %c61 = arith.constant 61 : index
    %c0_220 = arith.constant 0 : index
    %198 = vector.load %arg12[%c61, %c0_220] : memref<110x16xf32, #tpu.memory_space<vmem>>, vector<8x16xf32>
    tpu.vector_store %arg12[%c61, %c0_220], %197 {strides = array<i32>} : memref<110x16xf32, #tpu.memory_space<vmem>>, vector<8x16xf32>,
    %c216 = arith.constant 216 : index
    %c0_221 = arith.constant 0 : index
    %199 = tpu.strided_load %arg15[%c216, %c0_221] {strides = array<i32: 2, 1>} : memref<288x16xf32, #tpu.memory_space<vmem>>, vector<8x16xf32>
    %c217_222 = arith.constant 217 : index
    %c0_223 = arith.constant 0 : index
    %200 = tpu.strided_load %arg15[%c217_222, %c0_223] {strides = array<i32: 2, 1>} : memref<288x16xf32, #tpu.memory_space<vmem>>, vector<8x16xf32>
    %c234 = arith.constant 234 : index
    %c0_224 = arith.constant 0 : index
    %201 = tpu.strided_load %arg15[%c234, %c0_224] {strides = array<i32: 2, 1>} : memref<288x16xf32, #tpu.memory_space<vmem>>, vector<8x16xf32>
    %c235_225 = arith.constant 235 : index
    %c0_226 = arith.constant 0 : index
    %202 = tpu.strided_load %arg15[%c235_225, %c0_226] {strides = array<i32: 2, 1>} : memref<288x16xf32, #tpu.memory_space<vmem>>, vector<8x16xf32>
    %203 = arith.maximumf %199, %200 : vector<8x16xf32>
    %204 = arith.maximumf %201, %202 : vector<8x16xf32>
    %205 = arith.maximumf %203, %204 : vector<8x16xf32>
    %206 = vector.broadcast %124 : vector<1x16xf32> to vector<8x16xf32>
    %207 = arith.addf %205, %206 : vector<8x16xf32>
    %cst_227 = arith.constant 0.000000e+00 : f32
    %208 = vector.broadcast %cst_227 : f32 to vector<8x16xf32>
    %209 = arith.maximumf %207, %208 : vector<8x16xf32>
    %c71 = arith.constant 71 : index
    %c0_228 = arith.constant 0 : index
    %210 = vector.load %arg12[%c71, %c0_228] : memref<110x16xf32, #tpu.memory_space<vmem>>, vector<8x16xf32>
    tpu.vector_store %arg12[%c71, %c0_228], %209 {strides = array<i32>} : memref<110x16xf32, #tpu.memory_space<vmem>>, vector<8x16xf32>,
    %c252 = arith.constant 252 : index
    %c0_229 = arith.constant 0 : index
    %211 = tpu.strided_load %arg15[%c252, %c0_229] {strides = array<i32: 2, 1>} : memref<288x16xf32, #tpu.memory_space<vmem>>, vector<8x16xf32>
    %c253_230 = arith.constant 253 : index
    %c0_231 = arith.constant 0 : index
    %212 = tpu.strided_load %arg15[%c253_230, %c0_231] {strides = array<i32: 2, 1>} : memref<288x16xf32, #tpu.memory_space<vmem>>, vector<8x16xf32>
    %c270 = arith.constant 270 : index
    %c0_232 = arith.constant 0 : index
    %213 = tpu.strided_load %arg15[%c270, %c0_232] {strides = array<i32: 2, 1>} : memref<288x16xf32, #tpu.memory_space<vmem>>, vector<8x16xf32>
    %c271_233 = arith.constant 271 : index
    %c0_234 = arith.constant 0 : index
    %214 = tpu.strided_load %arg15[%c271_233, %c0_234] {strides = array<i32: 2, 1>} : memref<288x16xf32, #tpu.memory_space<vmem>>, vector<8x16xf32>
    %215 = arith.maximumf %211, %212 : vector<8x16xf32>
    %216 = arith.maximumf %213, %214 : vector<8x16xf32>
    %217 = arith.maximumf %215, %216 : vector<8x16xf32>
    %218 = vector.broadcast %124 : vector<1x16xf32> to vector<8x16xf32>
    %219 = arith.addf %217, %218 : vector<8x16xf32>
    %cst_235 = arith.constant 0.000000e+00 : f32
    %220 = vector.broadcast %cst_235 : f32 to vector<8x16xf32>
    %221 = arith.maximumf %219, %220 : vector<8x16xf32>
    %c81 = arith.constant 81 : index
    %c0_236 = arith.constant 0 : index
    %222 = vector.load %arg12[%c81, %c0_236] : memref<110x16xf32, #tpu.memory_space<vmem>>, vector<8x16xf32>
    tpu.vector_store %arg12[%c81, %c0_236], %221 {strides = array<i32>} : memref<110x16xf32, #tpu.memory_space<vmem>>, vector<8x16xf32>,
    %cst_237 = arith.constant 0.000000e+00 : f32
    %223 = vector.broadcast %cst_237 : f32 to vector<80x32xf32>
    %c0_238 = arith.constant 0 : index
    %c0_239 = arith.constant 0 : index
    %224 = vector.load %arg16[%c0_238, %c0_239] : memref<80x32xf32, #tpu.memory_space<vmem>>, vector<80x32xf32>
    tpu.vector_store %arg16[%c0_238, %c0_239], %223 {strides = array<i32>} : memref<80x32xf32, #tpu.memory_space<vmem>>, vector<80x32xf32>,
    %c0_240 = arith.constant 0 : index
    %c0_241 = arith.constant 0 : index
    %225 = vector.load %arg12[%c0_240, %c0_241] : memref<110x16xf32, #tpu.memory_space<vmem>>, vector<80x16xf32>
    %226 = arith.truncf %225 : vector<80x16xf32> to vector<80x16xbf16>
    %c0_242 = arith.constant 0 : index
    %c0_243 = arith.constant 0 : index
    %227 = vector.load %arg16[%c0_242, %c0_243] : memref<80x32xf32, #tpu.memory_space<vmem>>, vector<80x32xf32>
    %c0_244 = arith.constant 0 : index
    %c0_245 = arith.constant 0 : index
    %c0_246 = arith.constant 0 : index
    %c0_247 = arith.constant 0 : index
    %228 = vector.load %arg4[%c0_244, %c0_245, %c0_246, %c0_247] : memref<3x3x16x32xbf16, #tpu.memory_space<vmem>>, vector<1x1x16x32xbf16>
    %229 = vector.shape_cast %228 : vector<1x1x16x32xbf16> to vector<16x32xbf16>
    %cst_248 = arith.constant dense<0.000000e+00> : vector<80x32xf32>
    %230 = tpu.matmul %226, %229, %cst_248 {dimension_numbers = #tpu.dot_dimension_numbers<[1], [0], [0], [1], [0, 0, 1, 1], [], []>} : vector<80x16xbf16>, vector<16x32xbf16>, vector<80x32xf32> -> vector<80x32xf32>
    %231 = arith.addf %227, %230 : vector<80x32xf32>
    %c0_249 = arith.constant 0 : index
    %c0_250 = arith.constant 0 : index
    %232 = vector.load %arg16[%c0_249, %c0_250] : memref<80x32xf32, #tpu.memory_space<vmem>>, vector<80x32xf32>
    tpu.vector_store %arg16[%c0_249, %c0_250], %231 {strides = array<i32>} : memref<80x32xf32, #tpu.memory_space<vmem>>, vector<80x32xf32>,
    %c1_251 = arith.constant 1 : index
    %c0_252 = arith.constant 0 : index
    %233 = vector.load %arg12[%c1_251, %c0_252] : memref<110x16xf32, #tpu.memory_space<vmem>>, vector<80x16xf32>
    %234 = arith.truncf %233 : vector<80x16xf32> to vector<80x16xbf16>
    %c0_253 = arith.constant 0 : index
    %c0_254 = arith.constant 0 : index
    %235 = vector.load %arg16[%c0_253, %c0_254] : memref<80x32xf32, #tpu.memory_space<vmem>>, vector<80x32xf32>
    %c0_255 = arith.constant 0 : index
    %c1_256 = arith.constant 1 : index
    %c0_257 = arith.constant 0 : index
    %c0_258 = arith.constant 0 : index
    %236 = vector.load %arg4[%c0_255, %c1_256, %c0_257, %c0_258] : memref<3x3x16x32xbf16, #tpu.memory_space<vmem>>, vector<1x1x16x32xbf16>
    %237 = vector.shape_cast %236 : vector<1x1x16x32xbf16> to vector<16x32xbf16>
    %cst_259 = arith.constant dense<0.000000e+00> : vector<80x32xf32>
    %238 = tpu.matmul %234, %237, %cst_259 {dimension_numbers = #tpu.dot_dimension_numbers<[1], [0], [0], [1], [0, 0, 1, 1], [], []>} : vector<80x16xbf16>, vector<16x32xbf16>, vector<80x32xf32> -> vector<80x32xf32>
    %239 = arith.addf %235, %238 : vector<80x32xf32>
    %c0_260 = arith.constant 0 : index
    %c0_261 = arith.constant 0 : index
    %240 = vector.load %arg16[%c0_260, %c0_261] : memref<80x32xf32, #tpu.memory_space<vmem>>, vector<80x32xf32>
    tpu.vector_store %arg16[%c0_260, %c0_261], %239 {strides = array<i32>} : memref<80x32xf32, #tpu.memory_space<vmem>>, vector<80x32xf32>,
    %c2_262 = arith.constant 2 : index
    %c0_263 = arith.constant 0 : index
    %241 = vector.load %arg12[%c2_262, %c0_263] : memref<110x16xf32, #tpu.memory_space<vmem>>, vector<80x16xf32>
    %242 = arith.truncf %241 : vector<80x16xf32> to vector<80x16xbf16>
    %c0_264 = arith.constant 0 : index
    %c0_265 = arith.constant 0 : index
    %243 = vector.load %arg16[%c0_264, %c0_265] : memref<80x32xf32, #tpu.memory_space<vmem>>, vector<80x32xf32>
    %c0_266 = arith.constant 0 : index
    %c2_267 = arith.constant 2 : index
    %c0_268 = arith.constant 0 : index
    %c0_269 = arith.constant 0 : index
    %244 = vector.load %arg4[%c0_266, %c2_267, %c0_268, %c0_269] : memref<3x3x16x32xbf16, #tpu.memory_space<vmem>>, vector<1x1x16x32xbf16>
    %245 = vector.shape_cast %244 : vector<1x1x16x32xbf16> to vector<16x32xbf16>
    %cst_270 = arith.constant dense<0.000000e+00> : vector<80x32xf32>
    %246 = tpu.matmul %242, %245, %cst_270 {dimension_numbers = #tpu.dot_dimension_numbers<[1], [0], [0], [1], [0, 0, 1, 1], [], []>} : vector<80x16xbf16>, vector<16x32xbf16>, vector<80x32xf32> -> vector<80x32xf32>
    %247 = arith.addf %243, %246 : vector<80x32xf32>
    %c0_271 = arith.constant 0 : index
    %c0_272 = arith.constant 0 : index
    %248 = vector.load %arg16[%c0_271, %c0_272] : memref<80x32xf32, #tpu.memory_space<vmem>>, vector<80x32xf32>
    tpu.vector_store %arg16[%c0_271, %c0_272], %247 {strides = array<i32>} : memref<80x32xf32, #tpu.memory_space<vmem>>, vector<80x32xf32>,
    %c10_273 = arith.constant 10 : index
    %c0_274 = arith.constant 0 : index
    %249 = vector.load %arg12[%c10_273, %c0_274] : memref<110x16xf32, #tpu.memory_space<vmem>>, vector<80x16xf32>
    %250 = arith.truncf %249 : vector<80x16xf32> to vector<80x16xbf16>
    %c0_275 = arith.constant 0 : index
    %c0_276 = arith.constant 0 : index
    %251 = vector.load %arg16[%c0_275, %c0_276] : memref<80x32xf32, #tpu.memory_space<vmem>>, vector<80x32xf32>
    %c1_277 = arith.constant 1 : index
    %c0_278 = arith.constant 0 : index
    %c0_279 = arith.constant 0 : index
    %c0_280 = arith.constant 0 : index
    %252 = vector.load %arg4[%c1_277, %c0_278, %c0_279, %c0_280] : memref<3x3x16x32xbf16, #tpu.memory_space<vmem>>, vector<1x1x16x32xbf16>
    %253 = vector.shape_cast %252 : vector<1x1x16x32xbf16> to vector<16x32xbf16>
    %cst_281 = arith.constant dense<0.000000e+00> : vector<80x32xf32>
    %254 = tpu.matmul %250, %253, %cst_281 {dimension_numbers = #tpu.dot_dimension_numbers<[1], [0], [0], [1], [0, 0, 1, 1], [], []>} : vector<80x16xbf16>, vector<16x32xbf16>, vector<80x32xf32> -> vector<80x32xf32>
    %255 = arith.addf %251, %254 : vector<80x32xf32>
    %c0_282 = arith.constant 0 : index
    %c0_283 = arith.constant 0 : index
    %256 = vector.load %arg16[%c0_282, %c0_283] : memref<80x32xf32, #tpu.memory_space<vmem>>, vector<80x32xf32>
    tpu.vector_store %arg16[%c0_282, %c0_283], %255 {strides = array<i32>} : memref<80x32xf32, #tpu.memory_space<vmem>>, vector<80x32xf32>,
    %c11_284 = arith.constant 11 : index
    %c0_285 = arith.constant 0 : index
    %257 = vector.load %arg12[%c11_284, %c0_285] : memref<110x16xf32, #tpu.memory_space<vmem>>, vector<80x16xf32>
    %258 = arith.truncf %257 : vector<80x16xf32> to vector<80x16xbf16>
    %c0_286 = arith.constant 0 : index
    %c0_287 = arith.constant 0 : index
    %259 = vector.load %arg16[%c0_286, %c0_287] : memref<80x32xf32, #tpu.memory_space<vmem>>, vector<80x32xf32>
    %c1_288 = arith.constant 1 : index
    %c1_289 = arith.constant 1 : index
    %c0_290 = arith.constant 0 : index
    %c0_291 = arith.constant 0 : index
    %260 = vector.load %arg4[%c1_288, %c1_289, %c0_290, %c0_291] : memref<3x3x16x32xbf16, #tpu.memory_space<vmem>>, vector<1x1x16x32xbf16>
    %261 = vector.shape_cast %260 : vector<1x1x16x32xbf16> to vector<16x32xbf16>
    %cst_292 = arith.constant dense<0.000000e+00> : vector<80x32xf32>
    %262 = tpu.matmul %258, %261, %cst_292 {dimension_numbers = #tpu.dot_dimension_numbers<[1], [0], [0], [1], [0, 0, 1, 1], [], []>} : vector<80x16xbf16>, vector<16x32xbf16>, vector<80x32xf32> -> vector<80x32xf32>
    %263 = arith.addf %259, %262 : vector<80x32xf32>
    %c0_293 = arith.constant 0 : index
    %c0_294 = arith.constant 0 : index
    %264 = vector.load %arg16[%c0_293, %c0_294] : memref<80x32xf32, #tpu.memory_space<vmem>>, vector<80x32xf32>
    tpu.vector_store %arg16[%c0_293, %c0_294], %263 {strides = array<i32>} : memref<80x32xf32, #tpu.memory_space<vmem>>, vector<80x32xf32>,
    %c12_295 = arith.constant 12 : index
    %c0_296 = arith.constant 0 : index
    %265 = vector.load %arg12[%c12_295, %c0_296] : memref<110x16xf32, #tpu.memory_space<vmem>>, vector<80x16xf32>
    %266 = arith.truncf %265 : vector<80x16xf32> to vector<80x16xbf16>
    %c0_297 = arith.constant 0 : index
    %c0_298 = arith.constant 0 : index
    %267 = vector.load %arg16[%c0_297, %c0_298] : memref<80x32xf32, #tpu.memory_space<vmem>>, vector<80x32xf32>
    %c1_299 = arith.constant 1 : index
    %c2_300 = arith.constant 2 : index
    %c0_301 = arith.constant 0 : index
    %c0_302 = arith.constant 0 : index
    %268 = vector.load %arg4[%c1_299, %c2_300, %c0_301, %c0_302] : memref<3x3x16x32xbf16, #tpu.memory_space<vmem>>, vector<1x1x16x32xbf16>
    %269 = vector.shape_cast %268 : vector<1x1x16x32xbf16> to vector<16x32xbf16>
    %cst_303 = arith.constant dense<0.000000e+00> : vector<80x32xf32>
    %270 = tpu.matmul %266, %269, %cst_303 {dimension_numbers = #tpu.dot_dimension_numbers<[1], [0], [0], [1], [0, 0, 1, 1], [], []>} : vector<80x16xbf16>, vector<16x32xbf16>, vector<80x32xf32> -> vector<80x32xf32>
    %271 = arith.addf %267, %270 : vector<80x32xf32>
    %c0_304 = arith.constant 0 : index
    %c0_305 = arith.constant 0 : index
    %272 = vector.load %arg16[%c0_304, %c0_305] : memref<80x32xf32, #tpu.memory_space<vmem>>, vector<80x32xf32>
    tpu.vector_store %arg16[%c0_304, %c0_305], %271 {strides = array<i32>} : memref<80x32xf32, #tpu.memory_space<vmem>>, vector<80x32xf32>,
    %c20_306 = arith.constant 20 : index
    %c0_307 = arith.constant 0 : index
    %273 = vector.load %arg12[%c20_306, %c0_307] : memref<110x16xf32, #tpu.memory_space<vmem>>, vector<80x16xf32>
    %274 = arith.truncf %273 : vector<80x16xf32> to vector<80x16xbf16>
    %c0_308 = arith.constant 0 : index
    %c0_309 = arith.constant 0 : index
    %275 = vector.load %arg16[%c0_308, %c0_309] : memref<80x32xf32, #tpu.memory_space<vmem>>, vector<80x32xf32>
    %c2_310 = arith.constant 2 : index
    %c0_311 = arith.constant 0 : index
    %c0_312 = arith.constant 0 : index
    %c0_313 = arith.constant 0 : index
    %276 = vector.load %arg4[%c2_310, %c0_311, %c0_312, %c0_313] : memref<3x3x16x32xbf16, #tpu.memory_space<vmem>>, vector<1x1x16x32xbf16>
    %277 = vector.shape_cast %276 : vector<1x1x16x32xbf16> to vector<16x32xbf16>
    %cst_314 = arith.constant dense<0.000000e+00> : vector<80x32xf32>
    %278 = tpu.matmul %274, %277, %cst_314 {dimension_numbers = #tpu.dot_dimension_numbers<[1], [0], [0], [1], [0, 0, 1, 1], [], []>} : vector<80x16xbf16>, vector<16x32xbf16>, vector<80x32xf32> -> vector<80x32xf32>
    %279 = arith.addf %275, %278 : vector<80x32xf32>
    %c0_315 = arith.constant 0 : index
    %c0_316 = arith.constant 0 : index
    %280 = vector.load %arg16[%c0_315, %c0_316] : memref<80x32xf32, #tpu.memory_space<vmem>>, vector<80x32xf32>
    tpu.vector_store %arg16[%c0_315, %c0_316], %279 {strides = array<i32>} : memref<80x32xf32, #tpu.memory_space<vmem>>, vector<80x32xf32>,
    %c21_317 = arith.constant 21 : index
    %c0_318 = arith.constant 0 : index
    %281 = vector.load %arg12[%c21_317, %c0_318] : memref<110x16xf32, #tpu.memory_space<vmem>>, vector<80x16xf32>
    %282 = arith.truncf %281 : vector<80x16xf32> to vector<80x16xbf16>
    %c0_319 = arith.constant 0 : index
    %c0_320 = arith.constant 0 : index
    %283 = vector.load %arg16[%c0_319, %c0_320] : memref<80x32xf32, #tpu.memory_space<vmem>>, vector<80x32xf32>
    %c2_321 = arith.constant 2 : index
    %c1_322 = arith.constant 1 : index
    %c0_323 = arith.constant 0 : index
    %c0_324 = arith.constant 0 : index
    %284 = vector.load %arg4[%c2_321, %c1_322, %c0_323, %c0_324] : memref<3x3x16x32xbf16, #tpu.memory_space<vmem>>, vector<1x1x16x32xbf16>
    %285 = vector.shape_cast %284 : vector<1x1x16x32xbf16> to vector<16x32xbf16>
    %cst_325 = arith.constant dense<0.000000e+00> : vector<80x32xf32>
    %286 = tpu.matmul %282, %285, %cst_325 {dimension_numbers = #tpu.dot_dimension_numbers<[1], [0], [0], [1], [0, 0, 1, 1], [], []>} : vector<80x16xbf16>, vector<16x32xbf16>, vector<80x32xf32> -> vector<80x32xf32>
    %287 = arith.addf %283, %286 : vector<80x32xf32>
    %c0_326 = arith.constant 0 : index
    %c0_327 = arith.constant 0 : index
    %288 = vector.load %arg16[%c0_326, %c0_327] : memref<80x32xf32, #tpu.memory_space<vmem>>, vector<80x32xf32>
    tpu.vector_store %arg16[%c0_326, %c0_327], %287 {strides = array<i32>} : memref<80x32xf32, #tpu.memory_space<vmem>>, vector<80x32xf32>,
    %c22 = arith.constant 22 : index
    %c0_328 = arith.constant 0 : index
    %289 = vector.load %arg12[%c22, %c0_328] : memref<110x16xf32, #tpu.memory_space<vmem>>, vector<80x16xf32>
    %290 = arith.truncf %289 : vector<80x16xf32> to vector<80x16xbf16>
    %c0_329 = arith.constant 0 : index
    %c0_330 = arith.constant 0 : index
    %291 = vector.load %arg16[%c0_329, %c0_330] : memref<80x32xf32, #tpu.memory_space<vmem>>, vector<80x32xf32>
    %c2_331 = arith.constant 2 : index
    %c2_332 = arith.constant 2 : index
    %c0_333 = arith.constant 0 : index
    %c0_334 = arith.constant 0 : index
    %292 = vector.load %arg4[%c2_331, %c2_332, %c0_333, %c0_334] : memref<3x3x16x32xbf16, #tpu.memory_space<vmem>>, vector<1x1x16x32xbf16>
    %293 = vector.shape_cast %292 : vector<1x1x16x32xbf16> to vector<16x32xbf16>
    %cst_335 = arith.constant dense<0.000000e+00> : vector<80x32xf32>
    %294 = tpu.matmul %290, %293, %cst_335 {dimension_numbers = #tpu.dot_dimension_numbers<[1], [0], [0], [1], [0, 0, 1, 1], [], []>} : vector<80x16xbf16>, vector<16x32xbf16>, vector<80x32xf32> -> vector<80x32xf32>
    %295 = arith.addf %291, %294 : vector<80x32xf32>
    %c0_336 = arith.constant 0 : index
    %c0_337 = arith.constant 0 : index
    %296 = vector.load %arg16[%c0_336, %c0_337] : memref<80x32xf32, #tpu.memory_space<vmem>>, vector<80x32xf32>
    tpu.vector_store %arg16[%c0_336, %c0_337], %295 {strides = array<i32>} : memref<80x32xf32, #tpu.memory_space<vmem>>, vector<80x32xf32>,
    %c0_338 = arith.constant 0 : index
    %c0_339 = arith.constant 0 : index
    %297 = vector.load %arg5[%c0_338, %c0_339] : memref<1x32xf32, #tpu.memory_space<vmem>>, vector<1x32xf32>
    %cst_340 = arith.constant 0.000000e+00 : f32
    %298 = vector.broadcast %cst_340 : f32 to vector<42x32xf32>
    %c0_341 = arith.constant 0 : index
    %c0_342 = arith.constant 0 : index
    %299 = vector.load %arg13[%c0_341, %c0_342] : memref<42x32xf32, #tpu.memory_space<vmem>>, vector<42x32xf32>
    tpu.vector_store %arg13[%c0_341, %c0_342], %298 {strides = array<i32>} : memref<42x32xf32, #tpu.memory_space<vmem>>, vector<42x32xf32>,
    %c0_343 = arith.constant 0 : index
    %c0_344 = arith.constant 0 : index
    %300 = tpu.strided_load %arg16[%c0_343, %c0_344] {strides = array<i32: 2, 1>} : memref<80x32xf32, #tpu.memory_space<vmem>>, vector<4x32xf32>
    %c1_345 = arith.constant 1 : index
    %c0_346 = arith.constant 0 : index
    %301 = tpu.strided_load %arg16[%c1_345, %c0_346] {strides = array<i32: 2, 1>} : memref<80x32xf32, #tpu.memory_space<vmem>>, vector<4x32xf32>
    %c10_347 = arith.constant 10 : index
    %c0_348 = arith.constant 0 : index
    %302 = tpu.strided_load %arg16[%c10_347, %c0_348] {strides = array<i32: 2, 1>} : memref<80x32xf32, #tpu.memory_space<vmem>>, vector<4x32xf32>
    %c11_349 = arith.constant 11 : index
    %c0_350 = arith.constant 0 : index
    %303 = tpu.strided_load %arg16[%c11_349, %c0_350] {strides = array<i32: 2, 1>} : memref<80x32xf32, #tpu.memory_space<vmem>>, vector<4x32xf32>
    %304 = arith.maximumf %300, %301 : vector<4x32xf32>
    %305 = arith.maximumf %302, %303 : vector<4x32xf32>
    %306 = arith.maximumf %304, %305 : vector<4x32xf32>
    %307 = vector.broadcast %297 : vector<1x32xf32> to vector<4x32xf32>
    %308 = arith.addf %306, %307 : vector<4x32xf32>
    %cst_351 = arith.constant 0.000000e+00 : f32
    %309 = vector.broadcast %cst_351 : f32 to vector<4x32xf32>
    %310 = arith.maximumf %308, %309 : vector<4x32xf32>
    %c7_352 = arith.constant 7 : index
    %c0_353 = arith.constant 0 : index
    %311 = vector.load %arg13[%c7_352, %c0_353] : memref<42x32xf32, #tpu.memory_space<vmem>>, vector<4x32xf32>
    tpu.vector_store %arg13[%c7_352, %c0_353], %310 {strides = array<i32>} : memref<42x32xf32, #tpu.memory_space<vmem>>, vector<4x32xf32>,
    %c20_354 = arith.constant 20 : index
    %c0_355 = arith.constant 0 : index
    %312 = tpu.strided_load %arg16[%c20_354, %c0_355] {strides = array<i32: 2, 1>} : memref<80x32xf32, #tpu.memory_space<vmem>>, vector<4x32xf32>
    %c21_356 = arith.constant 21 : index
    %c0_357 = arith.constant 0 : index
    %313 = tpu.strided_load %arg16[%c21_356, %c0_357] {strides = array<i32: 2, 1>} : memref<80x32xf32, #tpu.memory_space<vmem>>, vector<4x32xf32>
    %c30 = arith.constant 30 : index
    %c0_358 = arith.constant 0 : index
    %314 = tpu.strided_load %arg16[%c30, %c0_358] {strides = array<i32: 2, 1>} : memref<80x32xf32, #tpu.memory_space<vmem>>, vector<4x32xf32>
    %c31_359 = arith.constant 31 : index
    %c0_360 = arith.constant 0 : index
    %315 = tpu.strided_load %arg16[%c31_359, %c0_360] {strides = array<i32: 2, 1>} : memref<80x32xf32, #tpu.memory_space<vmem>>, vector<4x32xf32>
    %316 = arith.maximumf %312, %313 : vector<4x32xf32>
    %317 = arith.maximumf %314, %315 : vector<4x32xf32>
    %318 = arith.maximumf %316, %317 : vector<4x32xf32>
    %319 = vector.broadcast %297 : vector<1x32xf32> to vector<4x32xf32>
    %320 = arith.addf %318, %319 : vector<4x32xf32>
    %cst_361 = arith.constant 0.000000e+00 : f32
    %321 = vector.broadcast %cst_361 : f32 to vector<4x32xf32>
    %322 = arith.maximumf %320, %321 : vector<4x32xf32>
    %c13_362 = arith.constant 13 : index
    %c0_363 = arith.constant 0 : index
    %323 = vector.load %arg13[%c13_362, %c0_363] : memref<42x32xf32, #tpu.memory_space<vmem>>, vector<4x32xf32>
    tpu.vector_store %arg13[%c13_362, %c0_363], %322 {strides = array<i32>} : memref<42x32xf32, #tpu.memory_space<vmem>>, vector<4x32xf32>,
    %c40 = arith.constant 40 : index
    %c0_364 = arith.constant 0 : index
    %324 = tpu.strided_load %arg16[%c40, %c0_364] {strides = array<i32: 2, 1>} : memref<80x32xf32, #tpu.memory_space<vmem>>, vector<4x32xf32>
    %c41_365 = arith.constant 41 : index
    %c0_366 = arith.constant 0 : index
    %325 = tpu.strided_load %arg16[%c41_365, %c0_366] {strides = array<i32: 2, 1>} : memref<80x32xf32, #tpu.memory_space<vmem>>, vector<4x32xf32>
    %c50 = arith.constant 50 : index
    %c0_367 = arith.constant 0 : index
    %326 = tpu.strided_load %arg16[%c50, %c0_367] {strides = array<i32: 2, 1>} : memref<80x32xf32, #tpu.memory_space<vmem>>, vector<4x32xf32>
    %c51_368 = arith.constant 51 : index
    %c0_369 = arith.constant 0 : index
    %327 = tpu.strided_load %arg16[%c51_368, %c0_369] {strides = array<i32: 2, 1>} : memref<80x32xf32, #tpu.memory_space<vmem>>, vector<4x32xf32>
    %328 = arith.maximumf %324, %325 : vector<4x32xf32>
    %329 = arith.maximumf %326, %327 : vector<4x32xf32>
    %330 = arith.maximumf %328, %329 : vector<4x32xf32>
    %331 = vector.broadcast %297 : vector<1x32xf32> to vector<4x32xf32>
    %332 = arith.addf %330, %331 : vector<4x32xf32>
    %cst_370 = arith.constant 0.000000e+00 : f32
    %333 = vector.broadcast %cst_370 : f32 to vector<4x32xf32>
    %334 = arith.maximumf %332, %333 : vector<4x32xf32>
    %c19_371 = arith.constant 19 : index
    %c0_372 = arith.constant 0 : index
    %335 = vector.load %arg13[%c19_371, %c0_372] : memref<42x32xf32, #tpu.memory_space<vmem>>, vector<4x32xf32>
    tpu.vector_store %arg13[%c19_371, %c0_372], %334 {strides = array<i32>} : memref<42x32xf32, #tpu.memory_space<vmem>>, vector<4x32xf32>,
    %c60 = arith.constant 60 : index
    %c0_373 = arith.constant 0 : index
    %336 = tpu.strided_load %arg16[%c60, %c0_373] {strides = array<i32: 2, 1>} : memref<80x32xf32, #tpu.memory_space<vmem>>, vector<4x32xf32>
    %c61_374 = arith.constant 61 : index
    %c0_375 = arith.constant 0 : index
    %337 = tpu.strided_load %arg16[%c61_374, %c0_375] {strides = array<i32: 2, 1>} : memref<80x32xf32, #tpu.memory_space<vmem>>, vector<4x32xf32>
    %c70 = arith.constant 70 : index
    %c0_376 = arith.constant 0 : index
    %338 = tpu.strided_load %arg16[%c70, %c0_376] {strides = array<i32: 2, 1>} : memref<80x32xf32, #tpu.memory_space<vmem>>, vector<4x32xf32>
    %c71_377 = arith.constant 71 : index
    %c0_378 = arith.constant 0 : index
    %339 = tpu.strided_load %arg16[%c71_377, %c0_378] {strides = array<i32: 2, 1>} : memref<80x32xf32, #tpu.memory_space<vmem>>, vector<4x32xf32>
    %340 = arith.maximumf %336, %337 : vector<4x32xf32>
    %341 = arith.maximumf %338, %339 : vector<4x32xf32>
    %342 = arith.maximumf %340, %341 : vector<4x32xf32>
    %343 = vector.broadcast %297 : vector<1x32xf32> to vector<4x32xf32>
    %344 = arith.addf %342, %343 : vector<4x32xf32>
    %cst_379 = arith.constant 0.000000e+00 : f32
    %345 = vector.broadcast %cst_379 : f32 to vector<4x32xf32>
    %346 = arith.maximumf %344, %345 : vector<4x32xf32>
    %c25 = arith.constant 25 : index
    %c0_380 = arith.constant 0 : index
    %347 = vector.load %arg13[%c25, %c0_380] : memref<42x32xf32, #tpu.memory_space<vmem>>, vector<4x32xf32>
    tpu.vector_store %arg13[%c25, %c0_380], %346 {strides = array<i32>} : memref<42x32xf32, #tpu.memory_space<vmem>>, vector<4x32xf32>,
    %cst_381 = arith.constant 0.000000e+00 : f32
    %348 = vector.broadcast %cst_381 : f32 to vector<24x64xf32>
    %c0_382 = arith.constant 0 : index
    %c0_383 = arith.constant 0 : index
    %349 = vector.load %arg17[%c0_382, %c0_383] : memref<24x64xf32, #tpu.memory_space<vmem>>, vector<24x64xf32>
    tpu.vector_store %arg17[%c0_382, %c0_383], %348 {strides = array<i32>} : memref<24x64xf32, #tpu.memory_space<vmem>>, vector<24x64xf32>,
    %c0_384 = arith.constant 0 : index
    %c0_385 = arith.constant 0 : index
    %350 = vector.load %arg13[%c0_384, %c0_385] : memref<42x32xf32, #tpu.memory_space<vmem>>, vector<24x32xf32>
    %351 = arith.truncf %350 : vector<24x32xf32> to vector<24x32xbf16>
    %c0_386 = arith.constant 0 : index
    %c0_387 = arith.constant 0 : index
    %352 = vector.load %arg17[%c0_386, %c0_387] : memref<24x64xf32, #tpu.memory_space<vmem>>, vector<24x64xf32>
    %c0_388 = arith.constant 0 : index
    %c0_389 = arith.constant 0 : index
    %c0_390 = arith.constant 0 : index
    %c0_391 = arith.constant 0 : index
    %353 = vector.load %arg6[%c0_388, %c0_389, %c0_390, %c0_391] : memref<3x3x32x64xbf16, #tpu.memory_space<vmem>>, vector<1x1x32x64xbf16>
    %354 = vector.shape_cast %353 : vector<1x1x32x64xbf16> to vector<32x64xbf16>
    %cst_392 = arith.constant dense<0.000000e+00> : vector<24x64xf32>
    %355 = tpu.matmul %351, %354, %cst_392 {dimension_numbers = #tpu.dot_dimension_numbers<[1], [0], [0], [1], [0, 0, 1, 1], [], []>} : vector<24x32xbf16>, vector<32x64xbf16>, vector<24x64xf32> -> vector<24x64xf32>
    %356 = arith.addf %352, %355 : vector<24x64xf32>
    %c0_393 = arith.constant 0 : index
    %c0_394 = arith.constant 0 : index
    %357 = vector.load %arg17[%c0_393, %c0_394] : memref<24x64xf32, #tpu.memory_space<vmem>>, vector<24x64xf32>
    tpu.vector_store %arg17[%c0_393, %c0_394], %356 {strides = array<i32>} : memref<24x64xf32, #tpu.memory_space<vmem>>, vector<24x64xf32>,
    %c1_395 = arith.constant 1 : index
    %c0_396 = arith.constant 0 : index
    %358 = vector.load %arg13[%c1_395, %c0_396] : memref<42x32xf32, #tpu.memory_space<vmem>>, vector<24x32xf32>
    %359 = arith.truncf %358 : vector<24x32xf32> to vector<24x32xbf16>
    %c0_397 = arith.constant 0 : index
    %c0_398 = arith.constant 0 : index
    %360 = vector.load %arg17[%c0_397, %c0_398] : memref<24x64xf32, #tpu.memory_space<vmem>>, vector<24x64xf32>
    %c0_399 = arith.constant 0 : index
    %c1_400 = arith.constant 1 : index
    %c0_401 = arith.constant 0 : index
    %c0_402 = arith.constant 0 : index
    %361 = vector.load %arg6[%c0_399, %c1_400, %c0_401, %c0_402] : memref<3x3x32x64xbf16, #tpu.memory_space<vmem>>, vector<1x1x32x64xbf16>
    %362 = vector.shape_cast %361 : vector<1x1x32x64xbf16> to vector<32x64xbf16>
    %cst_403 = arith.constant dense<0.000000e+00> : vector<24x64xf32>
    %363 = tpu.matmul %359, %362, %cst_403 {dimension_numbers = #tpu.dot_dimension_numbers<[1], [0], [0], [1], [0, 0, 1, 1], [], []>} : vector<24x32xbf16>, vector<32x64xbf16>, vector<24x64xf32> -> vector<24x64xf32>
    %364 = arith.addf %360, %363 : vector<24x64xf32>
    %c0_404 = arith.constant 0 : index
    %c0_405 = arith.constant 0 : index
    %365 = vector.load %arg17[%c0_404, %c0_405] : memref<24x64xf32, #tpu.memory_space<vmem>>, vector<24x64xf32>
    tpu.vector_store %arg17[%c0_404, %c0_405], %364 {strides = array<i32>} : memref<24x64xf32, #tpu.memory_space<vmem>>, vector<24x64xf32>,
    %c2_406 = arith.constant 2 : index
    %c0_407 = arith.constant 0 : index
    %366 = vector.load %arg13[%c2_406, %c0_407] : memref<42x32xf32, #tpu.memory_space<vmem>>, vector<24x32xf32>
    %367 = arith.truncf %366 : vector<24x32xf32> to vector<24x32xbf16>
    %c0_408 = arith.constant 0 : index
    %c0_409 = arith.constant 0 : index
    %368 = vector.load %arg17[%c0_408, %c0_409] : memref<24x64xf32, #tpu.memory_space<vmem>>, vector<24x64xf32>
    %c0_410 = arith.constant 0 : index
    %c2_411 = arith.constant 2 : index
    %c0_412 = arith.constant 0 : index
    %c0_413 = arith.constant 0 : index
    %369 = vector.load %arg6[%c0_410, %c2_411, %c0_412, %c0_413] : memref<3x3x32x64xbf16, #tpu.memory_space<vmem>>, vector<1x1x32x64xbf16>
    %370 = vector.shape_cast %369 : vector<1x1x32x64xbf16> to vector<32x64xbf16>
    %cst_414 = arith.constant dense<0.000000e+00> : vector<24x64xf32>
    %371 = tpu.matmul %367, %370, %cst_414 {dimension_numbers = #tpu.dot_dimension_numbers<[1], [0], [0], [1], [0, 0, 1, 1], [], []>} : vector<24x32xbf16>, vector<32x64xbf16>, vector<24x64xf32> -> vector<24x64xf32>
    %372 = arith.addf %368, %371 : vector<24x64xf32>
    %c0_415 = arith.constant 0 : index
    %c0_416 = arith.constant 0 : index
    %373 = vector.load %arg17[%c0_415, %c0_416] : memref<24x64xf32, #tpu.memory_space<vmem>>, vector<24x64xf32>
    tpu.vector_store %arg17[%c0_415, %c0_416], %372 {strides = array<i32>} : memref<24x64xf32, #tpu.memory_space<vmem>>, vector<24x64xf32>,
    %c6_417 = arith.constant 6 : index
    %c0_418 = arith.constant 0 : index
    %374 = vector.load %arg13[%c6_417, %c0_418] : memref<42x32xf32, #tpu.memory_space<vmem>>, vector<24x32xf32>
    %375 = arith.truncf %374 : vector<24x32xf32> to vector<24x32xbf16>
    %c0_419 = arith.constant 0 : index
    %c0_420 = arith.constant 0 : index
    %376 = vector.load %arg17[%c0_419, %c0_420] : memref<24x64xf32, #tpu.memory_space<vmem>>, vector<24x64xf32>
    %c1_421 = arith.constant 1 : index
    %c0_422 = arith.constant 0 : index
    %c0_423 = arith.constant 0 : index
    %c0_424 = arith.constant 0 : index
    %377 = vector.load %arg6[%c1_421, %c0_422, %c0_423, %c0_424] : memref<3x3x32x64xbf16, #tpu.memory_space<vmem>>, vector<1x1x32x64xbf16>
    %378 = vector.shape_cast %377 : vector<1x1x32x64xbf16> to vector<32x64xbf16>
    %cst_425 = arith.constant dense<0.000000e+00> : vector<24x64xf32>
    %379 = tpu.matmul %375, %378, %cst_425 {dimension_numbers = #tpu.dot_dimension_numbers<[1], [0], [0], [1], [0, 0, 1, 1], [], []>} : vector<24x32xbf16>, vector<32x64xbf16>, vector<24x64xf32> -> vector<24x64xf32>
    %380 = arith.addf %376, %379 : vector<24x64xf32>
    %c0_426 = arith.constant 0 : index
    %c0_427 = arith.constant 0 : index
    %381 = vector.load %arg17[%c0_426, %c0_427] : memref<24x64xf32, #tpu.memory_space<vmem>>, vector<24x64xf32>
    tpu.vector_store %arg17[%c0_426, %c0_427], %380 {strides = array<i32>} : memref<24x64xf32, #tpu.memory_space<vmem>>, vector<24x64xf32>,
    %c7_428 = arith.constant 7 : index
    %c0_429 = arith.constant 0 : index
    %382 = vector.load %arg13[%c7_428, %c0_429] : memref<42x32xf32, #tpu.memory_space<vmem>>, vector<24x32xf32>
    %383 = arith.truncf %382 : vector<24x32xf32> to vector<24x32xbf16>
    %c0_430 = arith.constant 0 : index
    %c0_431 = arith.constant 0 : index
    %384 = vector.load %arg17[%c0_430, %c0_431] : memref<24x64xf32, #tpu.memory_space<vmem>>, vector<24x64xf32>
    %c1_432 = arith.constant 1 : index
    %c1_433 = arith.constant 1 : index
    %c0_434 = arith.constant 0 : index
    %c0_435 = arith.constant 0 : index
    %385 = vector.load %arg6[%c1_432, %c1_433, %c0_434, %c0_435] : memref<3x3x32x64xbf16, #tpu.memory_space<vmem>>, vector<1x1x32x64xbf16>
    %386 = vector.shape_cast %385 : vector<1x1x32x64xbf16> to vector<32x64xbf16>
    %cst_436 = arith.constant dense<0.000000e+00> : vector<24x64xf32>
    %387 = tpu.matmul %383, %386, %cst_436 {dimension_numbers = #tpu.dot_dimension_numbers<[1], [0], [0], [1], [0, 0, 1, 1], [], []>} : vector<24x32xbf16>, vector<32x64xbf16>, vector<24x64xf32> -> vector<24x64xf32>
    %388 = arith.addf %384, %387 : vector<24x64xf32>
    %c0_437 = arith.constant 0 : index
    %c0_438 = arith.constant 0 : index
    %389 = vector.load %arg17[%c0_437, %c0_438] : memref<24x64xf32, #tpu.memory_space<vmem>>, vector<24x64xf32>
    tpu.vector_store %arg17[%c0_437, %c0_438], %388 {strides = array<i32>} : memref<24x64xf32, #tpu.memory_space<vmem>>, vector<24x64xf32>,
    %c8_439 = arith.constant 8 : index
    %c0_440 = arith.constant 0 : index
    %390 = vector.load %arg13[%c8_439, %c0_440] : memref<42x32xf32, #tpu.memory_space<vmem>>, vector<24x32xf32>
    %391 = arith.truncf %390 : vector<24x32xf32> to vector<24x32xbf16>
    %c0_441 = arith.constant 0 : index
    %c0_442 = arith.constant 0 : index
    %392 = vector.load %arg17[%c0_441, %c0_442] : memref<24x64xf32, #tpu.memory_space<vmem>>, vector<24x64xf32>
    %c1_443 = arith.constant 1 : index
    %c2_444 = arith.constant 2 : index
    %c0_445 = arith.constant 0 : index
    %c0_446 = arith.constant 0 : index
    %393 = vector.load %arg6[%c1_443, %c2_444, %c0_445, %c0_446] : memref<3x3x32x64xbf16, #tpu.memory_space<vmem>>, vector<1x1x32x64xbf16>
    %394 = vector.shape_cast %393 : vector<1x1x32x64xbf16> to vector<32x64xbf16>
    %cst_447 = arith.constant dense<0.000000e+00> : vector<24x64xf32>
    %395 = tpu.matmul %391, %394, %cst_447 {dimension_numbers = #tpu.dot_dimension_numbers<[1], [0], [0], [1], [0, 0, 1, 1], [], []>} : vector<24x32xbf16>, vector<32x64xbf16>, vector<24x64xf32> -> vector<24x64xf32>
    %396 = arith.addf %392, %395 : vector<24x64xf32>
    %c0_448 = arith.constant 0 : index
    %c0_449 = arith.constant 0 : index
    %397 = vector.load %arg17[%c0_448, %c0_449] : memref<24x64xf32, #tpu.memory_space<vmem>>, vector<24x64xf32>
    tpu.vector_store %arg17[%c0_448, %c0_449], %396 {strides = array<i32>} : memref<24x64xf32, #tpu.memory_space<vmem>>, vector<24x64xf32>,
    %c12_450 = arith.constant 12 : index
    %c0_451 = arith.constant 0 : index
    %398 = vector.load %arg13[%c12_450, %c0_451] : memref<42x32xf32, #tpu.memory_space<vmem>>, vector<24x32xf32>
    %399 = arith.truncf %398 : vector<24x32xf32> to vector<24x32xbf16>
    %c0_452 = arith.constant 0 : index
    %c0_453 = arith.constant 0 : index
    %400 = vector.load %arg17[%c0_452, %c0_453] : memref<24x64xf32, #tpu.memory_space<vmem>>, vector<24x64xf32>
    %c2_454 = arith.constant 2 : index
    %c0_455 = arith.constant 0 : index
    %c0_456 = arith.constant 0 : index
    %c0_457 = arith.constant 0 : index
    %401 = vector.load %arg6[%c2_454, %c0_455, %c0_456, %c0_457] : memref<3x3x32x64xbf16, #tpu.memory_space<vmem>>, vector<1x1x32x64xbf16>
    %402 = vector.shape_cast %401 : vector<1x1x32x64xbf16> to vector<32x64xbf16>
    %cst_458 = arith.constant dense<0.000000e+00> : vector<24x64xf32>
    %403 = tpu.matmul %399, %402, %cst_458 {dimension_numbers = #tpu.dot_dimension_numbers<[1], [0], [0], [1], [0, 0, 1, 1], [], []>} : vector<24x32xbf16>, vector<32x64xbf16>, vector<24x64xf32> -> vector<24x64xf32>
    %404 = arith.addf %400, %403 : vector<24x64xf32>
    %c0_459 = arith.constant 0 : index
    %c0_460 = arith.constant 0 : index
    %405 = vector.load %arg17[%c0_459, %c0_460] : memref<24x64xf32, #tpu.memory_space<vmem>>, vector<24x64xf32>
    tpu.vector_store %arg17[%c0_459, %c0_460], %404 {strides = array<i32>} : memref<24x64xf32, #tpu.memory_space<vmem>>, vector<24x64xf32>,
    %c13_461 = arith.constant 13 : index
    %c0_462 = arith.constant 0 : index
    %406 = vector.load %arg13[%c13_461, %c0_462] : memref<42x32xf32, #tpu.memory_space<vmem>>, vector<24x32xf32>
    %407 = arith.truncf %406 : vector<24x32xf32> to vector<24x32xbf16>
    %c0_463 = arith.constant 0 : index
    %c0_464 = arith.constant 0 : index
    %408 = vector.load %arg17[%c0_463, %c0_464] : memref<24x64xf32, #tpu.memory_space<vmem>>, vector<24x64xf32>
    %c2_465 = arith.constant 2 : index
    %c1_466 = arith.constant 1 : index
    %c0_467 = arith.constant 0 : index
    %c0_468 = arith.constant 0 : index
    %409 = vector.load %arg6[%c2_465, %c1_466, %c0_467, %c0_468] : memref<3x3x32x64xbf16, #tpu.memory_space<vmem>>, vector<1x1x32x64xbf16>
    %410 = vector.shape_cast %409 : vector<1x1x32x64xbf16> to vector<32x64xbf16>
    %cst_469 = arith.constant dense<0.000000e+00> : vector<24x64xf32>
    %411 = tpu.matmul %407, %410, %cst_469 {dimension_numbers = #tpu.dot_dimension_numbers<[1], [0], [0], [1], [0, 0, 1, 1], [], []>} : vector<24x32xbf16>, vector<32x64xbf16>, vector<24x64xf32> -> vector<24x64xf32>
    %412 = arith.addf %408, %411 : vector<24x64xf32>
    %c0_470 = arith.constant 0 : index
    %c0_471 = arith.constant 0 : index
    %413 = vector.load %arg17[%c0_470, %c0_471] : memref<24x64xf32, #tpu.memory_space<vmem>>, vector<24x64xf32>
    tpu.vector_store %arg17[%c0_470, %c0_471], %412 {strides = array<i32>} : memref<24x64xf32, #tpu.memory_space<vmem>>, vector<24x64xf32>,
    %c14_472 = arith.constant 14 : index
    %c0_473 = arith.constant 0 : index
    %414 = vector.load %arg13[%c14_472, %c0_473] : memref<42x32xf32, #tpu.memory_space<vmem>>, vector<24x32xf32>
    %415 = arith.truncf %414 : vector<24x32xf32> to vector<24x32xbf16>
    %c0_474 = arith.constant 0 : index
    %c0_475 = arith.constant 0 : index
    %416 = vector.load %arg17[%c0_474, %c0_475] : memref<24x64xf32, #tpu.memory_space<vmem>>, vector<24x64xf32>
    %c2_476 = arith.constant 2 : index
    %c2_477 = arith.constant 2 : index
    %c0_478 = arith.constant 0 : index
    %c0_479 = arith.constant 0 : index
    %417 = vector.load %arg6[%c2_476, %c2_477, %c0_478, %c0_479] : memref<3x3x32x64xbf16, #tpu.memory_space<vmem>>, vector<1x1x32x64xbf16>
    %418 = vector.shape_cast %417 : vector<1x1x32x64xbf16> to vector<32x64xbf16>
    %cst_480 = arith.constant dense<0.000000e+00> : vector<24x64xf32>
    %419 = tpu.matmul %415, %418, %cst_480 {dimension_numbers = #tpu.dot_dimension_numbers<[1], [0], [0], [1], [0, 0, 1, 1], [], []>} : vector<24x32xbf16>, vector<32x64xbf16>, vector<24x64xf32> -> vector<24x64xf32>
    %420 = arith.addf %416, %419 : vector<24x64xf32>
    %c0_481 = arith.constant 0 : index
    %c0_482 = arith.constant 0 : index
    %421 = vector.load %arg17[%c0_481, %c0_482] : memref<24x64xf32, #tpu.memory_space<vmem>>, vector<24x64xf32>
    tpu.vector_store %arg17[%c0_481, %c0_482], %420 {strides = array<i32>} : memref<24x64xf32, #tpu.memory_space<vmem>>, vector<24x64xf32>,
    %c0_483 = arith.constant 0 : index
    %c0_484 = arith.constant 0 : index
    %422 = vector.load %arg7[%c0_483, %c0_484] : memref<1x64xf32, #tpu.memory_space<vmem>>, vector<1x64xf32>
    %cst_485 = arith.constant 0.000000e+00 : f32
    %423 = vector.broadcast %cst_485 : f32 to vector<20x64xf32>
    %c0_486 = arith.constant 0 : index
    %c0_487 = arith.constant 0 : index
    %424 = vector.load %arg14[%c0_486, %c0_487] : memref<20x64xf32, #tpu.memory_space<vmem>>, vector<20x64xf32>
    tpu.vector_store %arg14[%c0_486, %c0_487], %423 {strides = array<i32>} : memref<20x64xf32, #tpu.memory_space<vmem>>, vector<20x64xf32>,
    %c0_488 = arith.constant 0 : index
    %c0_489 = arith.constant 0 : index
    %425 = tpu.strided_load %arg17[%c0_488, %c0_489] {strides = array<i32: 2, 1>} : memref<24x64xf32, #tpu.memory_space<vmem>>, vector<2x64xf32>
    %c1_490 = arith.constant 1 : index
    %c0_491 = arith.constant 0 : index
    %426 = tpu.strided_load %arg17[%c1_490, %c0_491] {strides = array<i32: 2, 1>} : memref<24x64xf32, #tpu.memory_space<vmem>>, vector<2x64xf32>
    %c6_492 = arith.constant 6 : index
    %c0_493 = arith.constant 0 : index
    %427 = tpu.strided_load %arg17[%c6_492, %c0_493] {strides = array<i32: 2, 1>} : memref<24x64xf32, #tpu.memory_space<vmem>>, vector<2x64xf32>
    %c7_494 = arith.constant 7 : index
    %c0_495 = arith.constant 0 : index
    %428 = tpu.strided_load %arg17[%c7_494, %c0_495] {strides = array<i32: 2, 1>} : memref<24x64xf32, #tpu.memory_space<vmem>>, vector<2x64xf32>
    %429 = arith.maximumf %425, %426 : vector<2x64xf32>
    %430 = arith.maximumf %427, %428 : vector<2x64xf32>
    %431 = arith.maximumf %429, %430 : vector<2x64xf32>
    %432 = vector.broadcast %422 : vector<1x64xf32> to vector<2x64xf32>
    %433 = arith.addf %431, %432 : vector<2x64xf32>
    %cst_496 = arith.constant 0.000000e+00 : f32
    %434 = vector.broadcast %cst_496 : f32 to vector<2x64xf32>
    %435 = arith.maximumf %433, %434 : vector<2x64xf32>
    %c5_497 = arith.constant 5 : index
    %c0_498 = arith.constant 0 : index
    %436 = vector.load %arg14[%c5_497, %c0_498] : memref<20x64xf32, #tpu.memory_space<vmem>>, vector<2x64xf32>
    tpu.vector_store %arg14[%c5_497, %c0_498], %435 {strides = array<i32>} : memref<20x64xf32, #tpu.memory_space<vmem>>, vector<2x64xf32>,
    %c12_499 = arith.constant 12 : index
    %c0_500 = arith.constant 0 : index
    %437 = tpu.strided_load %arg17[%c12_499, %c0_500] {strides = array<i32: 2, 1>} : memref<24x64xf32, #tpu.memory_space<vmem>>, vector<2x64xf32>
    %c13_501 = arith.constant 13 : index
    %c0_502 = arith.constant 0 : index
    %438 = tpu.strided_load %arg17[%c13_501, %c0_502] {strides = array<i32: 2, 1>} : memref<24x64xf32, #tpu.memory_space<vmem>>, vector<2x64xf32>
    %c18_503 = arith.constant 18 : index
    %c0_504 = arith.constant 0 : index
    %439 = tpu.strided_load %arg17[%c18_503, %c0_504] {strides = array<i32: 2, 1>} : memref<24x64xf32, #tpu.memory_space<vmem>>, vector<2x64xf32>
    %c19_505 = arith.constant 19 : index
    %c0_506 = arith.constant 0 : index
    %440 = tpu.strided_load %arg17[%c19_505, %c0_506] {strides = array<i32: 2, 1>} : memref<24x64xf32, #tpu.memory_space<vmem>>, vector<2x64xf32>
    %441 = arith.maximumf %437, %438 : vector<2x64xf32>
    %442 = arith.maximumf %439, %440 : vector<2x64xf32>
    %443 = arith.maximumf %441, %442 : vector<2x64xf32>
    %444 = vector.broadcast %422 : vector<1x64xf32> to vector<2x64xf32>
    %445 = arith.addf %443, %444 : vector<2x64xf32>
    %cst_507 = arith.constant 0.000000e+00 : f32
    %446 = vector.broadcast %cst_507 : f32 to vector<2x64xf32>
    %447 = arith.maximumf %445, %446 : vector<2x64xf32>
    %c9_508 = arith.constant 9 : index
    %c0_509 = arith.constant 0 : index
    %448 = vector.load %arg14[%c9_508, %c0_509] : memref<20x64xf32, #tpu.memory_space<vmem>>, vector<2x64xf32>
    tpu.vector_store %arg14[%c9_508, %c0_509], %447 {strides = array<i32>} : memref<20x64xf32, #tpu.memory_space<vmem>>, vector<2x64xf32>,
    %cst_510 = arith.constant 0.000000e+00 : f32
    %449 = vector.broadcast %cst_510 : f32 to vector<8x512xf32>
    %c0_511 = arith.constant 0 : index
    %c0_512 = arith.constant 0 : index
    %450 = vector.load %arg18[%c0_511, %c0_512] : memref<8x512xf32, #tpu.memory_space<vmem>>, vector<8x512xf32>
    tpu.vector_store %arg18[%c0_511, %c0_512], %449 {strides = array<i32>} : memref<8x512xf32, #tpu.memory_space<vmem>>, vector<8x512xf32>,
    %c0_513 = arith.constant 0 : index
    %c0_514 = arith.constant 0 : index
    %451 = vector.load %arg14[%c0_513, %c0_514] : memref<20x64xf32, #tpu.memory_space<vmem>>, vector<8x64xf32>
    %452 = arith.truncf %451 : vector<8x64xf32> to vector<8x64xbf16>
    %c0_515 = arith.constant 0 : index
    %c0_516 = arith.constant 0 : index
    %453 = vector.load %arg18[%c0_515, %c0_516] : memref<8x512xf32, #tpu.memory_space<vmem>>, vector<8x512xf32>
    %c0_517 = arith.constant 0 : index
    %c0_518 = arith.constant 0 : index
    %c0_519 = arith.constant 0 : index
    %c0_520 = arith.constant 0 : index
    %454 = vector.load %arg8[%c0_517, %c0_518, %c0_519, %c0_520] : memref<3x3x64x512xbf16, #tpu.memory_space<vmem>>, vector<1x1x64x512xbf16>
    %455 = vector.shape_cast %454 : vector<1x1x64x512xbf16> to vector<64x512xbf16>
    %cst_521 = arith.constant dense<0.000000e+00> : vector<8x512xf32>
    %456 = tpu.matmul %452, %455, %cst_521 {dimension_numbers = #tpu.dot_dimension_numbers<[1], [0], [0], [1], [0, 0, 1, 1], [], []>} : vector<8x64xbf16>, vector<64x512xbf16>, vector<8x512xf32> -> vector<8x512xf32>
    %457 = arith.addf %453, %456 : vector<8x512xf32>
    %c0_522 = arith.constant 0 : index
    %c0_523 = arith.constant 0 : index
    %458 = vector.load %arg18[%c0_522, %c0_523] : memref<8x512xf32, #tpu.memory_space<vmem>>, vector<8x512xf32>
    tpu.vector_store %arg18[%c0_522, %c0_523], %457 {strides = array<i32>} : memref<8x512xf32, #tpu.memory_space<vmem>>, vector<8x512xf32>,
    %c1_524 = arith.constant 1 : index
    %c0_525 = arith.constant 0 : index
    %459 = vector.load %arg14[%c1_524, %c0_525] : memref<20x64xf32, #tpu.memory_space<vmem>>, vector<8x64xf32>
    %460 = arith.truncf %459 : vector<8x64xf32> to vector<8x64xbf16>
    %c0_526 = arith.constant 0 : index
    %c0_527 = arith.constant 0 : index
    %461 = vector.load %arg18[%c0_526, %c0_527] : memref<8x512xf32, #tpu.memory_space<vmem>>, vector<8x512xf32>
    %c0_528 = arith.constant 0 : index
    %c1_529 = arith.constant 1 : index
    %c0_530 = arith.constant 0 : index
    %c0_531 = arith.constant 0 : index
    %462 = vector.load %arg8[%c0_528, %c1_529, %c0_530, %c0_531] : memref<3x3x64x512xbf16, #tpu.memory_space<vmem>>, vector<1x1x64x512xbf16>
    %463 = vector.shape_cast %462 : vector<1x1x64x512xbf16> to vector<64x512xbf16>
    %cst_532 = arith.constant dense<0.000000e+00> : vector<8x512xf32>
    %464 = tpu.matmul %460, %463, %cst_532 {dimension_numbers = #tpu.dot_dimension_numbers<[1], [0], [0], [1], [0, 0, 1, 1], [], []>} : vector<8x64xbf16>, vector<64x512xbf16>, vector<8x512xf32> -> vector<8x512xf32>
    %465 = arith.addf %461, %464 : vector<8x512xf32>
    %c0_533 = arith.constant 0 : index
    %c0_534 = arith.constant 0 : index
    %466 = vector.load %arg18[%c0_533, %c0_534] : memref<8x512xf32, #tpu.memory_space<vmem>>, vector<8x512xf32>
    tpu.vector_store %arg18[%c0_533, %c0_534], %465 {strides = array<i32>} : memref<8x512xf32, #tpu.memory_space<vmem>>, vector<8x512xf32>,
    %c2_535 = arith.constant 2 : index
    %c0_536 = arith.constant 0 : index
    %467 = vector.load %arg14[%c2_535, %c0_536] : memref<20x64xf32, #tpu.memory_space<vmem>>, vector<8x64xf32>
    %468 = arith.truncf %467 : vector<8x64xf32> to vector<8x64xbf16>
    %c0_537 = arith.constant 0 : index
    %c0_538 = arith.constant 0 : index
    %469 = vector.load %arg18[%c0_537, %c0_538] : memref<8x512xf32, #tpu.memory_space<vmem>>, vector<8x512xf32>
    %c0_539 = arith.constant 0 : index
    %c2_540 = arith.constant 2 : index
    %c0_541 = arith.constant 0 : index
    %c0_542 = arith.constant 0 : index
    %470 = vector.load %arg8[%c0_539, %c2_540, %c0_541, %c0_542] : memref<3x3x64x512xbf16, #tpu.memory_space<vmem>>, vector<1x1x64x512xbf16>
    %471 = vector.shape_cast %470 : vector<1x1x64x512xbf16> to vector<64x512xbf16>
    %cst_543 = arith.constant dense<0.000000e+00> : vector<8x512xf32>
    %472 = tpu.matmul %468, %471, %cst_543 {dimension_numbers = #tpu.dot_dimension_numbers<[1], [0], [0], [1], [0, 0, 1, 1], [], []>} : vector<8x64xbf16>, vector<64x512xbf16>, vector<8x512xf32> -> vector<8x512xf32>
    %473 = arith.addf %469, %472 : vector<8x512xf32>
    %c0_544 = arith.constant 0 : index
    %c0_545 = arith.constant 0 : index
    %474 = vector.load %arg18[%c0_544, %c0_545] : memref<8x512xf32, #tpu.memory_space<vmem>>, vector<8x512xf32>
    tpu.vector_store %arg18[%c0_544, %c0_545], %473 {strides = array<i32>} : memref<8x512xf32, #tpu.memory_space<vmem>>, vector<8x512xf32>,
    %c4_546 = arith.constant 4 : index
    %c0_547 = arith.constant 0 : index
    %475 = vector.load %arg14[%c4_546, %c0_547] : memref<20x64xf32, #tpu.memory_space<vmem>>, vector<8x64xf32>
    %476 = arith.truncf %475 : vector<8x64xf32> to vector<8x64xbf16>
    %c0_548 = arith.constant 0 : index
    %c0_549 = arith.constant 0 : index
    %477 = vector.load %arg18[%c0_548, %c0_549] : memref<8x512xf32, #tpu.memory_space<vmem>>, vector<8x512xf32>
    %c1_550 = arith.constant 1 : index
    %c0_551 = arith.constant 0 : index
    %c0_552 = arith.constant 0 : index
    %c0_553 = arith.constant 0 : index
    %478 = vector.load %arg8[%c1_550, %c0_551, %c0_552, %c0_553] : memref<3x3x64x512xbf16, #tpu.memory_space<vmem>>, vector<1x1x64x512xbf16>
    %479 = vector.shape_cast %478 : vector<1x1x64x512xbf16> to vector<64x512xbf16>
    %cst_554 = arith.constant dense<0.000000e+00> : vector<8x512xf32>
    %480 = tpu.matmul %476, %479, %cst_554 {dimension_numbers = #tpu.dot_dimension_numbers<[1], [0], [0], [1], [0, 0, 1, 1], [], []>} : vector<8x64xbf16>, vector<64x512xbf16>, vector<8x512xf32> -> vector<8x512xf32>
    %481 = arith.addf %477, %480 : vector<8x512xf32>
    %c0_555 = arith.constant 0 : index
    %c0_556 = arith.constant 0 : index
    %482 = vector.load %arg18[%c0_555, %c0_556] : memref<8x512xf32, #tpu.memory_space<vmem>>, vector<8x512xf32>
    tpu.vector_store %arg18[%c0_555, %c0_556], %481 {strides = array<i32>} : memref<8x512xf32, #tpu.memory_space<vmem>>, vector<8x512xf32>,
    %c5_557 = arith.constant 5 : index
    %c0_558 = arith.constant 0 : index
    %483 = vector.load %arg14[%c5_557, %c0_558] : memref<20x64xf32, #tpu.memory_space<vmem>>, vector<8x64xf32>
    %484 = arith.truncf %483 : vector<8x64xf32> to vector<8x64xbf16>
    %c0_559 = arith.constant 0 : index
    %c0_560 = arith.constant 0 : index
    %485 = vector.load %arg18[%c0_559, %c0_560] : memref<8x512xf32, #tpu.memory_space<vmem>>, vector<8x512xf32>
    %c1_561 = arith.constant 1 : index
    %c1_562 = arith.constant 1 : index
    %c0_563 = arith.constant 0 : index
    %c0_564 = arith.constant 0 : index
    %486 = vector.load %arg8[%c1_561, %c1_562, %c0_563, %c0_564] : memref<3x3x64x512xbf16, #tpu.memory_space<vmem>>, vector<1x1x64x512xbf16>
    %487 = vector.shape_cast %486 : vector<1x1x64x512xbf16> to vector<64x512xbf16>
    %cst_565 = arith.constant dense<0.000000e+00> : vector<8x512xf32>
    %488 = tpu.matmul %484, %487, %cst_565 {dimension_numbers = #tpu.dot_dimension_numbers<[1], [0], [0], [1], [0, 0, 1, 1], [], []>} : vector<8x64xbf16>, vector<64x512xbf16>, vector<8x512xf32> -> vector<8x512xf32>
    %489 = arith.addf %485, %488 : vector<8x512xf32>
    %c0_566 = arith.constant 0 : index
    %c0_567 = arith.constant 0 : index
    %490 = vector.load %arg18[%c0_566, %c0_567] : memref<8x512xf32, #tpu.memory_space<vmem>>, vector<8x512xf32>
    tpu.vector_store %arg18[%c0_566, %c0_567], %489 {strides = array<i32>} : memref<8x512xf32, #tpu.memory_space<vmem>>, vector<8x512xf32>,
    %c6_568 = arith.constant 6 : index
    %c0_569 = arith.constant 0 : index
    %491 = vector.load %arg14[%c6_568, %c0_569] : memref<20x64xf32, #tpu.memory_space<vmem>>, vector<8x64xf32>
    %492 = arith.truncf %491 : vector<8x64xf32> to vector<8x64xbf16>
    %c0_570 = arith.constant 0 : index
    %c0_571 = arith.constant 0 : index
    %493 = vector.load %arg18[%c0_570, %c0_571] : memref<8x512xf32, #tpu.memory_space<vmem>>, vector<8x512xf32>
    %c1_572 = arith.constant 1 : index
    %c2_573 = arith.constant 2 : index
    %c0_574 = arith.constant 0 : index
    %c0_575 = arith.constant 0 : index
    %494 = vector.load %arg8[%c1_572, %c2_573, %c0_574, %c0_575] : memref<3x3x64x512xbf16, #tpu.memory_space<vmem>>, vector<1x1x64x512xbf16>
    %495 = vector.shape_cast %494 : vector<1x1x64x512xbf16> to vector<64x512xbf16>
    %cst_576 = arith.constant dense<0.000000e+00> : vector<8x512xf32>
    %496 = tpu.matmul %492, %495, %cst_576 {dimension_numbers = #tpu.dot_dimension_numbers<[1], [0], [0], [1], [0, 0, 1, 1], [], []>} : vector<8x64xbf16>, vector<64x512xbf16>, vector<8x512xf32> -> vector<8x512xf32>
    %497 = arith.addf %493, %496 : vector<8x512xf32>
    %c0_577 = arith.constant 0 : index
    %c0_578 = arith.constant 0 : index
    %498 = vector.load %arg18[%c0_577, %c0_578] : memref<8x512xf32, #tpu.memory_space<vmem>>, vector<8x512xf32>
    tpu.vector_store %arg18[%c0_577, %c0_578], %497 {strides = array<i32>} : memref<8x512xf32, #tpu.memory_space<vmem>>, vector<8x512xf32>,
    %c8_579 = arith.constant 8 : index
    %c0_580 = arith.constant 0 : index
    %499 = vector.load %arg14[%c8_579, %c0_580] : memref<20x64xf32, #tpu.memory_space<vmem>>, vector<8x64xf32>
    %500 = arith.truncf %499 : vector<8x64xf32> to vector<8x64xbf16>
    %c0_581 = arith.constant 0 : index
    %c0_582 = arith.constant 0 : index
    %501 = vector.load %arg18[%c0_581, %c0_582] : memref<8x512xf32, #tpu.memory_space<vmem>>, vector<8x512xf32>
    %c2_583 = arith.constant 2 : index
    %c0_584 = arith.constant 0 : index
    %c0_585 = arith.constant 0 : index
    %c0_586 = arith.constant 0 : index
    %502 = vector.load %arg8[%c2_583, %c0_584, %c0_585, %c0_586] : memref<3x3x64x512xbf16, #tpu.memory_space<vmem>>, vector<1x1x64x512xbf16>
    %503 = vector.shape_cast %502 : vector<1x1x64x512xbf16> to vector<64x512xbf16>
    %cst_587 = arith.constant dense<0.000000e+00> : vector<8x512xf32>
    %504 = tpu.matmul %500, %503, %cst_587 {dimension_numbers = #tpu.dot_dimension_numbers<[1], [0], [0], [1], [0, 0, 1, 1], [], []>} : vector<8x64xbf16>, vector<64x512xbf16>, vector<8x512xf32> -> vector<8x512xf32>
    %505 = arith.addf %501, %504 : vector<8x512xf32>
    %c0_588 = arith.constant 0 : index
    %c0_589 = arith.constant 0 : index
    %506 = vector.load %arg18[%c0_588, %c0_589] : memref<8x512xf32, #tpu.memory_space<vmem>>, vector<8x512xf32>
    tpu.vector_store %arg18[%c0_588, %c0_589], %505 {strides = array<i32>} : memref<8x512xf32, #tpu.memory_space<vmem>>, vector<8x512xf32>,
    %c9_590 = arith.constant 9 : index
    %c0_591 = arith.constant 0 : index
    %507 = vector.load %arg14[%c9_590, %c0_591] : memref<20x64xf32, #tpu.memory_space<vmem>>, vector<8x64xf32>
    %508 = arith.truncf %507 : vector<8x64xf32> to vector<8x64xbf16>
    %c0_592 = arith.constant 0 : index
    %c0_593 = arith.constant 0 : index
    %509 = vector.load %arg18[%c0_592, %c0_593] : memref<8x512xf32, #tpu.memory_space<vmem>>, vector<8x512xf32>
    %c2_594 = arith.constant 2 : index
    %c1_595 = arith.constant 1 : index
    %c0_596 = arith.constant 0 : index
    %c0_597 = arith.constant 0 : index
    %510 = vector.load %arg8[%c2_594, %c1_595, %c0_596, %c0_597] : memref<3x3x64x512xbf16, #tpu.memory_space<vmem>>, vector<1x1x64x512xbf16>
    %511 = vector.shape_cast %510 : vector<1x1x64x512xbf16> to vector<64x512xbf16>
    %cst_598 = arith.constant dense<0.000000e+00> : vector<8x512xf32>
    %512 = tpu.matmul %508, %511, %cst_598 {dimension_numbers = #tpu.dot_dimension_numbers<[1], [0], [0], [1], [0, 0, 1, 1], [], []>} : vector<8x64xbf16>, vector<64x512xbf16>, vector<8x512xf32> -> vector<8x512xf32>
    %513 = arith.addf %509, %512 : vector<8x512xf32>
    %c0_599 = arith.constant 0 : index
    %c0_600 = arith.constant 0 : index
    %514 = vector.load %arg18[%c0_599, %c0_600] : memref<8x512xf32, #tpu.memory_space<vmem>>, vector<8x512xf32>
    tpu.vector_store %arg18[%c0_599, %c0_600], %513 {strides = array<i32>} : memref<8x512xf32, #tpu.memory_space<vmem>>, vector<8x512xf32>,
    %c10_601 = arith.constant 10 : index
    %c0_602 = arith.constant 0 : index
    %515 = vector.load %arg14[%c10_601, %c0_602] : memref<20x64xf32, #tpu.memory_space<vmem>>, vector<8x64xf32>
    %516 = arith.truncf %515 : vector<8x64xf32> to vector<8x64xbf16>
    %c0_603 = arith.constant 0 : index
    %c0_604 = arith.constant 0 : index
    %517 = vector.load %arg18[%c0_603, %c0_604] : memref<8x512xf32, #tpu.memory_space<vmem>>, vector<8x512xf32>
    %c2_605 = arith.constant 2 : index
    %c2_606 = arith.constant 2 : index
    %c0_607 = arith.constant 0 : index
    %c0_608 = arith.constant 0 : index
    %518 = vector.load %arg8[%c2_605, %c2_606, %c0_607, %c0_608] : memref<3x3x64x512xbf16, #tpu.memory_space<vmem>>, vector<1x1x64x512xbf16>
    %519 = vector.shape_cast %518 : vector<1x1x64x512xbf16> to vector<64x512xbf16>
    %cst_609 = arith.constant dense<0.000000e+00> : vector<8x512xf32>
    %520 = tpu.matmul %516, %519, %cst_609 {dimension_numbers = #tpu.dot_dimension_numbers<[1], [0], [0], [1], [0, 0, 1, 1], [], []>} : vector<8x64xbf16>, vector<64x512xbf16>, vector<8x512xf32> -> vector<8x512xf32>
    %521 = arith.addf %517, %520 : vector<8x512xf32>
    %c0_610 = arith.constant 0 : index
    %c0_611 = arith.constant 0 : index
    %522 = vector.load %arg18[%c0_610, %c0_611] : memref<8x512xf32, #tpu.memory_space<vmem>>, vector<8x512xf32>
    tpu.vector_store %arg18[%c0_610, %c0_611], %521 {strides = array<i32>} : memref<8x512xf32, #tpu.memory_space<vmem>>, vector<8x512xf32>,
    %c0_612 = arith.constant 0 : index
    %c0_613 = arith.constant 0 : index
    %523 = vector.load %arg9[%c0_612, %c0_613] : memref<1x512xf32, #tpu.memory_space<vmem>>, vector<1x512xf32>
    %cst_614 = arith.constant 0.000000e+00 : f32
    %524 = vector.broadcast %cst_614 : f32 to vector<1x512xf32>
    %c0_615 = arith.constant 0 : index
    %c0_616 = arith.constant 0 : index
    %525 = vector.load %arg18[%c0_615, %c0_616] : memref<8x512xf32, #tpu.memory_space<vmem>>, vector<2x512xf32>
    %526 = vector.broadcast %523 : vector<1x512xf32> to vector<2x512xf32>
    %527 = arith.addf %525, %526 : vector<2x512xf32>
    %cst_617 = arith.constant 0.000000e+00 : f32
    %528 = vector.broadcast %cst_617 : f32 to vector<2x512xf32>
    %529 = arith.maximumf %527, %528 : vector<2x512xf32>
    %cst_618 = arith.constant dense<0.000000e+00> : vector<512xf32>
    %530 = vector.multi_reduction <add>, %529, %cst_618 [0] : vector<2x512xf32> to vector<512xf32>
    %531 = vector.shape_cast %530 : vector<512xf32> to vector<1x512xf32>
    %532 = arith.addf %524, %531 : vector<1x512xf32>
    %c4_619 = arith.constant 4 : index
    %c0_620 = arith.constant 0 : index
    %533 = vector.load %arg18[%c4_619, %c0_620] : memref<8x512xf32, #tpu.memory_space<vmem>>, vector<2x512xf32>
    %534 = vector.broadcast %523 : vector<1x512xf32> to vector<2x512xf32>
    %535 = arith.addf %533, %534 : vector<2x512xf32>
    %cst_621 = arith.constant 0.000000e+00 : f32
    %536 = vector.broadcast %cst_621 : f32 to vector<2x512xf32>
    %537 = arith.maximumf %535, %536 : vector<2x512xf32>
    %cst_622 = arith.constant dense<0.000000e+00> : vector<512xf32>
    %538 = vector.multi_reduction <add>, %537, %cst_622 [0] : vector<2x512xf32> to vector<512xf32>
    %539 = vector.shape_cast %538 : vector<512xf32> to vector<1x512xf32>
    %540 = arith.addf %532, %539 : vector<1x512xf32>
    %cst_623 = arith.constant 2.500000e-01 : f32
    %541 = vector.broadcast %cst_623 : f32 to vector<1x512xf32>
    %542 = arith.mulf %540, %541 : vector<1x512xf32>
    %c0_624 = arith.constant 0 : index
    %c0_625 = arith.constant 0 : index
    %c0_626 = arith.constant 0 : index
    %543 = vector.load %arg10[%c0_624, %c0_625, %c0_626] : memref<1x1x512xf32, #tpu.memory_space<vmem>>, vector<1x1x512xf32>
    %544 = vector.shape_cast %543 : vector<1x1x512xf32> to vector<1x512xf32>
    %545 = vector.shape_cast %542 : vector<1x512xf32> to vector<1x1x512xf32>
    tpu.vector_store %arg10[%c0_624, %c0_625, %c0_626], %545 {strides = array<i32>} : memref<1x1x512xf32, #tpu.memory_space<vmem>>, vector<1x1x512xf32>,
    return
  }
  func.func @transform_0(%arg0: i32) -> (i32, i32, i32, i32) {
    %c0_i32 = arith.constant 0 : i32
    %c0_i32_0 = arith.constant 0 : i32
    %c0_i32_1 = arith.constant 0 : i32
    %c0_i32_2 = arith.constant 0 : i32
    return %arg0, %c0_i32, %c0_i32_0, %c0_i32_1 : i32, i32, i32, i32
  }
  func.func @transform_1(%arg0: i32) -> (i32, i32, i32, i32) {
    %c0_i32 = arith.constant 0 : i32
    %c0_i32_0 = arith.constant 0 : i32
    %c0_i32_1 = arith.constant 0 : i32
    %c0_i32_2 = arith.constant 0 : i32
    %c0_i32_3 = arith.constant 0 : i32
    return %c0_i32, %c0_i32_0, %c0_i32_1, %c0_i32_2 : i32, i32, i32, i32
  }
  func.func @transform_2(%arg0: i32) -> (i32, i32) {
    %c0_i32 = arith.constant 0 : i32
    %c0_i32_0 = arith.constant 0 : i32
    %c0_i32_1 = arith.constant 0 : i32
    return %c0_i32, %c0_i32_0 : i32, i32
  }
  func.func @transform_3(%arg0: i32) -> (i32, i32, i32, i32) {
    %c0_i32 = arith.constant 0 : i32
    %c0_i32_0 = arith.constant 0 : i32
    %c0_i32_1 = arith.constant 0 : i32
    %c0_i32_2 = arith.constant 0 : i32
    %c0_i32_3 = arith.constant 0 : i32
    return %c0_i32, %c0_i32_0, %c0_i32_1, %c0_i32_2 : i32, i32, i32, i32
  }
  func.func @transform_4(%arg0: i32) -> (i32, i32) {
    %c0_i32 = arith.constant 0 : i32
    %c0_i32_0 = arith.constant 0 : i32
    %c0_i32_1 = arith.constant 0 : i32
    return %c0_i32, %c0_i32_0 : i32, i32
  }
  func.func @transform_5(%arg0: i32) -> (i32, i32, i32, i32) {
    %c0_i32 = arith.constant 0 : i32
    %c0_i32_0 = arith.constant 0 : i32
    %c0_i32_1 = arith.constant 0 : i32
    %c0_i32_2 = arith.constant 0 : i32
    %c0_i32_3 = arith.constant 0 : i32
    return %c0_i32, %c0_i32_0, %c0_i32_1, %c0_i32_2 : i32, i32, i32, i32
  }
  func.func @transform_6(%arg0: i32) -> (i32, i32) {
    %c0_i32 = arith.constant 0 : i32
    %c0_i32_0 = arith.constant 0 : i32
    %c0_i32_1 = arith.constant 0 : i32
    return %c0_i32, %c0_i32_0 : i32, i32
  }
  func.func @transform_7(%arg0: i32) -> (i32, i32, i32, i32) {
    %c0_i32 = arith.constant 0 : i32
    %c0_i32_0 = arith.constant 0 : i32
    %c0_i32_1 = arith.constant 0 : i32
    %c0_i32_2 = arith.constant 0 : i32
    %c0_i32_3 = arith.constant 0 : i32
    return %c0_i32, %c0_i32_0, %c0_i32_1, %c0_i32_2 : i32, i32, i32, i32
  }
  func.func @transform_8(%arg0: i32) -> (i32, i32) {
    %c0_i32 = arith.constant 0 : i32
    %c0_i32_0 = arith.constant 0 : i32
    %c0_i32_1 = arith.constant 0 : i32
    return %c0_i32, %c0_i32_0 : i32, i32
  }
  func.func @transform_9(%arg0: i32) -> (i32, i32, i32) {
    %c0_i32 = arith.constant 0 : i32
    %c0_i32_0 = arith.constant 0 : i32
    %c0_i32_1 = arith.constant 0 : i32
    return %arg0, %c0_i32, %c0_i32_0 : i32, i32, i32
  }
}

</mosaic_0001>

<bundles_post_ra>
// kernel: tpu_custom_call.1
= control target key start
LH: loop header
LB: loop body
LE: loop exit
PB: predicated region body
PF: predicated region fallthrough
CT: control target
= control target key end

     0   :  { %14 = vsyncpa [#allocation11], 0  ;;  %s12002_s0 = inlined_call_operand.vmem [shape: f32[2,16,16,3], index: 0, kind: input, shape index: {}]   ;;  %s12003_s1 = inlined_call_operand.vmem [shape: bf16[3,3,3,16], index: 1, kind: input, shape index: {}]   ;;  %s12004_s2 = inlined_call_operand.vmem [shape: f32[1,16], index: 2, kind: input, shape index: {}]   ;;  %s12005_s3 = inlined_call_operand.vmem [shape: bf16[3,3,16,32], index: 3, kind: input, shape index: {}]   ;;  %s12006_s4 = inlined_call_operand.vmem [shape: f32[1,32], index: 4, kind: input, shape index: {}]   ;;  %s12007_s5 = inlined_call_operand.vmem [shape: bf16[3,3,32,64], index: 5, kind: input, shape index: {}]   ;;  %s12008_s6 = inlined_call_operand.vmem [shape: f32[1,64], index: 6, kind: input, shape index: {}]   ;;  %s12009_s7 = inlined_call_operand.hbm [shape: bf16[3,3,64,512], index: 7, kind: input, shape index: {}]   ;;  %s12010_s8 = inlined_call_operand.vmem [shape: f32[1,512], index: 8, kind: input, shape index: {}]   ;;  %s12011_s9 = inlined_call_operand.hbm [shape: f32[2,1,512], index: 9, kind: output, shape index: {}]  }
   0x1   :  { %15 = vsyncpa [#allocation12], 0 }
   0x2   :  { %17 = vsyncpa [#allocation12 + $0x1], 0  ;;  %s10327_s30 = smov 0   ;;  %s10329_s10 = smov 0  }
   0x3   :  { %s10331_s11 = smov 0   ;;  %s10333_s12 = smov 0  }
   0x4 LB: > { %s10348_s13 = sadd.s32 4294967295, %s10266_s12   ;;  %s8404_s14 = sadd.s32 4294967294, %s10266_s12   ;;  %s10266_s12 = sphi %s10333_s12, %s12027_s12   ;;  %s10262_s11 = sphi %s10331_s11, %s12026_s11   ;;  %s10258_s10 = sphi %s10329_s10, %s12025_s10   ;;  %s10254_s30 = sphi %s10327_s30, %s12024_s30  }
   0x5   : > { %s10352_s15 = sadd.s32 1, %s10266_s12   ;;  %s224_s16 = sadd.s32 1, %s10262_s11 }
   0x6   : > { %s221_s17 = ssub.s32 %s10266_s12, %s10352_s15  ;;  %p234_p0 = scmp.ne.s32.totalorder %s10262_s11, %s10258_s10 }
   0x7   : > { %p222_p1 = scmp.eq.s32.totalorder %s221_s17, 0  ;;  %p235_p2 = scmp.eq.s32.totalorder %s10348_s13, 1 }
   0x8   : > { %p240_p3 = scmp.ne.s32.totalorder %s10258_s10, %s10254_s30  ;;  %p241_p4 = scmp.eq.s32.totalorder %s8404_s14, 1 }
   0x9   : > { %s10363_s18 = scalar_select %p222_p1, %s10262_s11, %s224_s16  }
   0xa   : > { %p10365_p5 = por %p235_p2, %p234_p0  ;;  %p10369_p6 = por %p241_p4, %p240_p3 }
   0xb   : > { %p8405_p7 = scmp.ge.s32.totalorder %s10266_s12, 1  ;;  %p248_p8 = scmp.lt.s32.totalorder %s10266_s12, 3 }
   0xc   : > { %s12015_s19 = scalar_select %p10365_p5, 1, 0 }
   0xd   : > { %s12016_s20 = scalar_select %p10369_p6, 1, 0 }
   0xe   : > { %p12012_p9 = scmp.eq.s32.totalorder %s10348_s13, 0  ;;  %p10376_p10 = pnand %p8405_p7, %p248_p8 }
   0xf   : > { %s10268_s22 = smov [#allocation10]   ;;  %s10172_s27 = scalar_lea.hbm %s12009_s7, 18432 }
  0x10   : > { %s12017_s21 = scalar_select %p10376_p10, 1, 0 }
  0x11   : > { %s278_s23 = sshll.u32 %s10268_s22, 4  ;;  %p9878_p11 = pneg %p10376_p10  ;;  %s279_s23 = int_to_ptr.vmem [resolvable:$true] %s278_s23 }
  0x12   : > { %p10173_p13 = scmp.ne.s32.totalorder %s12009_s7, %s10172_s27  ;;  %p10179_p3 = scmp.lt.u32.totalorder %s10172_s27, %s12009_s7 }
  0x13   : > { %p10384_p12 = pnand %p12012_p9, %p9878_p11 }
  0x15   : > { %p10174_p0 = pneg %p10384_p12 }
  0x17   : > { %p10175_p1 = pnand %p10174_p0, %p10173_p13 }
  0x19   : > { %p10176_p2 = pneg %p10175_p1 }
  0x1b   : > { %p10181_p4 = pnand %p10179_p3, %p10176_p2 }
  0x1d   : > { %10184 = shalt.err (!%p10181_p4)
}
  0x1e   : > { %s10185_s17 = scalar_lea.vmem %s279_s23, 18432  ;;  %p10193_p9 = scmp.lt.s32.totalorder %s279_s23, %s279_s23 }
  0x1f   : > { %p10186_p7 = scmp.ne.s32.totalorder %s279_s23, %s10185_s17  ;;  %p10194_p6 = scmp.lt.s32.totalorder %s10185_s17, %s10185_s17 }
  0x21   : > { %p10188_p8 = pnand %p10186_p7, %p10174_p0  ;;  %p10195_p5 = por %p10194_p6, %p10193_p9 }
  0x23   : > { %p10189_p11 = pneg %p10188_p8 }
  0x25   : > { %p10196_p10 = pnand %p10195_p5, %p10189_p11 }
  0x27   : > { %10199 = shalt.err (!%p10196_p10)
}
  0x28   : > { %s10269_s22 = smov 256   ;;  %s10270_s25 = smov 16  }
  0x29   : > { %9881 = dma.hbm_to_vmem [thread:$0]  (!%p10384_p12), %s12009_s7, 18432, %s279_s23, [#allocation11], %s10269_s22, %s10269_s22, %s10270_s25  }
  0x2a   : > { %p12019_p13 = scmp.ne.s32.totalorder %s12017_s21, 0 }
  0x2b   : > { %p12020_p1 = scmp.eq.s32.totalorder (!%p12019_p13), %s10348_s13, 0 }
  0x2c   : > { %305 = sbr.rel (%p12019_p13) target bundleno = 1798 (0x706), region = 56 }
  0x33   : > { %10245 = dma.done.wait (%p12020_p1), [#allocation11], 18432   ;;  %p12021_p0 = pmov %p12020_p1 }
  0x34   : > { %vm347_vm0 = vcmask 23552   ;;  %v10271_v0 = vmov 0.0   ;;  %vm653_vm1 = vcmask 1040384   ;;  %p341_p5 = scmp.lt.s32.totalorder %s10348_s13, 1  ;;  %vm654_vm2 = vcmask 1041408   ;;  %s8922_s27 = sshll.u32 %s10348_s13, 6 }
  0x35   : > { %10247 = vsyncadd (%p12021_p0), [#allocation11], 4294948864  ;;  %348 = vst.msk [vmem:[#allocation2] sm:$0xff] %vm347_vm0, %v10271_v0  ;;  %v10272_v1 = vmov 65535   ;;  %v598_v4 = vld [vmem:[%s12003_s1] sm:$0x3]  ;;  %s11960_s22 = scalar_lea.hbm %s12011_s9, %s8922_s27 }
  0x36   : > { %349 = vst.msk [vmem:[#allocation2 + $0x8] sm:$0xff] %vm347_vm0, %v10271_v0  ;;  %350 = vst.msk [vmem:[#allocation2 + $0x10] sm:$0xff] %vm347_vm0, %v10271_v0  ;;  %v655_v2 = vsel %vm653_vm1, 4294967295, %v10272_v1  ;;  %s342_s21 = scalar_select %p341_p5, %s10348_s13, 1  ;;  %v8480_v5 = vld [vmem:[%s12003_s1 + $0x4] sm:$0x3] }
  0x37   : > { %351 = vst.msk [vmem:[#allocation2 + $0x18] sm:$0xff] %vm347_vm0, %v10271_v0  ;;  %352 = vst.msk [vmem:[#allocation2 + $0x20] sm:$0xff] %vm347_vm0, %v10271_v0  ;;  %v10495_v3 = vsel %vm654_vm2, %v655_v2, 0  ;;  %v8461_v13 = vld [vmem:[%s12003_s1 + $0x2] sm:$0x3]  ;;  %vm471_vm3 = vcmask 130048  }
  0x38   : > { %353 = vst.msk [vmem:[#allocation2 + $0x28] sm:$0xff] %vm347_vm0, %v10271_v0  ;;  %354 = vst.msk [vmem:[#allocation2 + $0x30] sm:$0xff] %vm347_vm0, %v10271_v0  ;;  %s8921_s23 = sshll.u32 %s342_s21, 8  ;;  %v658_v7 = vand.u32 %v10495_v3, %v598_v4  ;;  %v10511_v10 = vand.u32 %v8480_v5, %v10495_v3  ;;  %v1056_v16 = vand.u32 %v8461_v13, %v10495_v3  ;;  %vm10273_vm4 = vmmov 0   ;;  %p12022_p9 = scmp.ne.s32.totalorder %s12015_s19, 0 }
  0x39   : > { %355 = vst.msk [vmem:[#allocation2 + $0x38] sm:$0xff] %vm347_vm0, %v10271_v0  ;;  %356 = vst.msk [vmem:[#allocation2 + $0x40] sm:$0xff] %vm347_vm0, %v10271_v0  ;;  %s10500_s29 = scalar_lea.vmem %s12002_s0, %s8921_s23  ;;  %vm4226_vm5 = vcmask 261120   ;;  %vm5584_vm6 = vcmask 523264   ;;  %vm5540_vm7 = vcmask 257024   ;;  %vm6355_vm8 = vcmask 519168  }
  0x3a   : > { %357 = vst.msk [vmem:[#allocation2 + $0x48] sm:$0xff] %vm347_vm0, %v10271_v0  ;;  %358 = vst.msk [vmem:[#allocation2 + $0x50] sm:$0xff] %vm347_vm0, %v10271_v0  ;;  %v392_v6 = vld [vmem:[%s10500_s29] sm:$0xff]  ;;  %v393_v11 = vld [vmem:[%s10500_s29 + $0x8] sm:$0xff]  ;;  %9184 = vmatprep.subr.bf16.mxu0 %v658_v7  ;;  %9222 = vmatprep.subr.bf16.mxu1 %v1056_v16  ;;  %vm6375_vm9 = vcmask 517120   ;;  %s338_s23 = sand.u32 1, %s10258_s10  }
  0x3b   : > { %359 = vst.msk [vmem:[#allocation2 + $0x58] sm:$0xff] %vm347_vm0, %v10271_v0  ;;  %360 = vst.msk [vmem:[#allocation2 + $0x60] sm:$0xff] %vm347_vm0, %v10271_v0  ;;  %v8413_v14 = vld [vmem:[%s10500_s29 + $0x10] sm:$0xff]  ;;  %v8414_v15 = vld [vmem:[%s10500_s29 + $0x18] sm:$0xff]  ;;  %9185 = vmatpush3.bf16.msra.mxu0 %v658_v7  ;;  %9223 = vmatpush3.bf16.msra.mxu1 %v1056_v16  ;;  %s8410_s24 = sshll.u32 %s338_s23, 2  ;;  %s8319_s25 = scalar_lea.sflag [#allocation12], %s338_s23 }
  0x3c   : > { %361 = vst.msk [vmem:[#allocation2 + $0x68] sm:$0xff] %vm347_vm0, %v10271_v0  ;;  %362 = vst.msk [vmem:[#allocation2 + $0x70] sm:$0xff] %vm347_vm0, %v10271_v0  ;;  %v508_v8 = vld [vmem:[#allocation2] sm:$0xff]  ;;  %v8415_v17 = vld [vmem:[%s10500_s29 + $0x20] sm:$0xff]  ;;  %9260 = vmatprep.subr.bf16.mxu0 %v10511_v10  ;;  %s340_s14 = scalar_lea.vmem [#allocation13], %s8410_s24  ;;  %s10276_s13 = smov [#allocation13]  }
  0x3d   : > { %363 = vst.msk [vmem:[#allocation2 + $0x78] sm:$0xff] %vm347_vm0, %v10271_v0  ;;  %364 = vst.msk [vmem:[#allocation2 + $0x80] sm:$0xff] %vm347_vm0, %v10271_v0  ;;  %v509_v9 = vld [vmem:[#allocation2 + $0x8] sm:$0xff]  ;;  %v8416_v18 = vld [vmem:[%s10500_s29 + $0x28] sm:$0xff]  ;;  %s10204_s28 = sshll.u32 %s10276_s13, 4  ;;  %s10205_s28 = int_to_ptr.vmem [resolvable:$false] %s10204_s28 }
  0x3e   : > { %365 = vst.msk [vmem:[#allocation2 + $0x88] sm:$0xff] %vm347_vm0, %v10271_v0  ;;  %366 = vst.msk [vmem:[#allocation2 + $0x90] sm:$0xff] %vm347_vm0, %v10271_v0  ;;  %v544_v12 = vpack.c.bf16 %v509_v9, %v508_v8  ;;  %v909_v19 = vld [vmem:[#allocation2 + $0x1] sm:$0xff]  ;;  %v910_v20 = vld [vmem:[#allocation2 + $0x9] sm:$0xff]  ;;  %s10206_s21 = scalar_lea.vmem %s10205_s28, 128 }
  0x3f   : > { %367 = vst.msk [vmem:[#allocation2 + $0x98] sm:$0xff] %vm347_vm0, %v10271_v0  ;;  %368 = vst.msk [vmem:[#allocation2 + $0xa0] sm:$0xff] %vm347_vm0, %v10271_v0  ;;  %v8417_v21 = vld [vmem:[%s10500_s29 + $0x30] sm:$0xff]  ;;  %v8418_v22 = vld [vmem:[%s10500_s29 + $0x38] sm:$0xff]  ;;  %v945_v23 = vpack.c.bf16 %v910_v20, %v909_v19 }
  0x40   : > { %369 = vst.msk [vmem:[#allocation2 + $0xa8] sm:$0xff] %vm347_vm0, %v10271_v0  ;;  %370 = vst.msk [vmem:[#allocation2 + $0xb0] sm:$0xff] %vm347_vm0, %v10271_v0  ;;  %9186 = vmatprep.mubr.msk.bf16.mxu0 %vm347_vm0, %v544_v12  ;;  %v8419_v24 = vld [vmem:[%s10500_s29 + $0x40] sm:$0xff]  ;;  %v8420_v25 = vld [vmem:[%s10500_s29 + $0x48] sm:$0xff] }
  0x41   : > { %371 = vst.msk [vmem:[#allocation2 + $0xb8] sm:$0xff] %vm347_vm0, %v10271_v0  ;;  %372 = vst.msk [vmem:[#allocation2 + $0xc0] sm:$0xff] %vm347_vm0, %v10271_v0  ;;  %v8421_v26 = vld [vmem:[%s10500_s29 + $0x50] sm:$0xff]  ;;  %v8422_v27 = vld [vmem:[%s10500_s29 + $0x58] sm:$0xff]  ;;  %9224 = vmatprep.mubr.msk.bf16.mxu1 %vm347_vm0, %v945_v23 }
  0x42   : > { %373 = vst.msk [vmem:[#allocation2 + $0xc8] sm:$0xff] %vm347_vm0, %v10271_v0  ;;  %374 = vst.msk [vmem:[#allocation2 + $0xd0] sm:$0xff] %vm347_vm0, %v10271_v0  ;;  %v8423_v28 = vld [vmem:[%s10500_s29 + $0x60] sm:$0xff]  ;;  %v8424_v29 = vld [vmem:[%s10500_s29 + $0x68] sm:$0xff] }
  0x43   : > { %375 = vst.msk [vmem:[#allocation2 + $0xd8] sm:$0xff] %vm347_vm0, %v10271_v0  ;;  %376 = vst.msk [vmem:[#allocation2 + $0xe0] sm:$0xff] %vm347_vm0, %v10271_v0  ;;  %v8425_v30 = vld [vmem:[%s10500_s29 + $0x70] sm:$0xff]  ;;  %v8426_v31 = vld [vmem:[%s10500_s29 + $0x78] sm:$0xff] }
  0x44   : > { %377 = vst.msk [vmem:[#allocation2 + $0xe8] sm:$0xff] %vm347_vm0, %v10271_v0  ;;  %378 = vst.msk [vmem:[#allocation2 + $0xf0] sm:$0xff] %vm347_vm0, %v10271_v0  ;;  %v8427_v32 = vld [vmem:[%s10500_s29 + $0x80] sm:$0xff]  ;;  %v8428_v35 = vld [vmem:[%s10500_s29 + $0x88] sm:$0xff] }
  0x45   : > { %379 = vst.msk [vmem:[#allocation2 + $0xf8] sm:$0xff] %vm347_vm0, %v10271_v0  ;;  %380 = vst.msk [vmem:[#allocation2 + $0x100] sm:$0xff] %vm347_vm0, %v10271_v0  ;;  %v8429_v38 = vld [vmem:[%s10500_s29 + $0x90] sm:$0xff]  ;;  %v8430_v1 = vld [vmem:[%s10500_s29 + $0x98] sm:$0xff] }
  0x46   : > { %381 = vst.msk [vmem:[#allocation2 + $0x108] sm:$0xff] %vm347_vm0, %v10271_v0  ;;  %382 = vst.msk [vmem:[#allocation2 + $0x110] sm:$0xff] %vm347_vm0, %v10271_v0  ;;  %v8432_v7 = vld [vmem:[%s10500_s29 + $0xa8] sm:$0xff]  ;;  %v8433_v8 = vld [vmem:[%s10500_s29 + $0xb0] sm:$0xff] }
  0x47   : > { %383 = vst.msk [vmem:[#allocation2 + $0x118] sm:$0xff] %vm347_vm0, %v10271_v0  ;;  %384 = vst.msk [vmem:[#allocation2 + $0x120] sm:$0xff] %vm347_vm0, %v10271_v0  ;;  %v8435_v12 = vld [vmem:[%s10500_s29 + $0xc0] sm:$0xff]  ;;  %v8436_v13 = vld [vmem:[%s10500_s29 + $0xc8] sm:$0xff] }
  0x48   : > { %385 = vst.msk [vmem:[#allocation2 + $0x128] sm:$0xff] %vm347_vm0, %v10271_v0  ;;  %386 = vst.msk [vmem:[#allocation2 + $0x130] sm:$0xff] %vm347_vm0, %v10271_v0  ;;  %v8437_v16 = vld [vmem:[%s10500_s29 + $0xd0] sm:$0xff]  ;;  %v8439_v20 = vld [vmem:[%s10500_s29 + $0xe0] sm:$0xff] }
  0x49   : > { %387 = vst.msk [vmem:[#allocation2 + $0x138] sm:$0xff] %vm347_vm0, %v10271_v0  ;;  %388 = vst.msk [vmem:[#allocation2 + $0x140] sm:$0xff] %vm347_vm0, %v10271_v0 }
  0x4a   : > { %394 = vst.msk [vmem:[#allocation2 + $0x13] sm:$0xff] %vm347_vm0, %v392_v6  ;;  %395 = vst.msk [vmem:[#allocation2 + $0x1b] sm:$0xff] %vm347_vm0, %v393_v11  ;;  %v8431_v6 = vld [vmem:[%s10500_s29 + $0xa0] sm:$0xff]  ;;  %v8434_v11 = vld [vmem:[%s10500_s29 + $0xb8] sm:$0xff] }
  0x4b   : > { %399 = vst.msk [vmem:[#allocation2 + $0x25] sm:$0xff] %vm347_vm0, %v8413_v14  ;;  %400 = vst.msk [vmem:[#allocation2 + $0x2d] sm:$0xff] %vm347_vm0, %v8414_v15 }
  0x4c   : > { %404 = vst.msk [vmem:[#allocation2 + $0x37] sm:$0xff] %vm347_vm0, %v8415_v17  ;;  %405 = vst.msk [vmem:[#allocation2 + $0x3f] sm:$0xff] %vm347_vm0, %v8416_v18  ;;  %v8499_v17 = vld [vmem:[%s12003_s1 + $0x6] sm:$0x3]  ;;  %v8438_v18 = vld [vmem:[%s10500_s29 + $0xd8] sm:$0xff] }
  0x4d   : > { %409 = vst.msk [vmem:[#allocation2 + $0x49] sm:$0xff] %vm347_vm0, %v8417_v21  ;;  %410 = vst.msk [vmem:[#allocation2 + $0x51] sm:$0xff] %vm347_vm0, %v8418_v22  ;;  %v1852_v19 = vand.u32 %v8499_v17, %v10495_v3  ;;  %v8440_v21 = vld [vmem:[%s10500_s29 + $0xe8] sm:$0xff] }
  0x4e   : > { %414 = vst.msk [vmem:[#allocation2 + $0x5b] sm:$0xff] %vm347_vm0, %v8419_v24  ;;  %415 = vst.msk [vmem:[#allocation2 + $0x63] sm:$0xff] %vm347_vm0, %v8420_v25  ;;  %v8518_v22 = vld [vmem:[%s12003_s1 + $0x8] sm:$0x3] }
  0x4f   : > { %419 = vst.msk [vmem:[#allocation2 + $0x6d] sm:$0xff] %vm347_vm0, %v8421_v26  ;;  %420 = vst.msk [vmem:[#allocation2 + $0x75] sm:$0xff] %vm347_vm0, %v8422_v27  ;;  %v10598_v25 = vand.u32 %v8518_v22, %v10495_v3  ;;  %9298 = vmatprep.subr.bf16.mxu1 %v1852_v19 }
  0x50   : > { %424 = vst.msk [vmem:[#allocation2 + $0x7f] sm:$0xff] %vm347_vm0, %v8423_v28  ;;  %425 = vst.msk [vmem:[#allocation2 + $0x87] sm:$0xff] %vm347_vm0, %v8424_v29 }
  0x51   : > { %v510_v33 = vld [vmem:[#allocation2 + $0x10] sm:$0xff]  ;;  %429 = vst.msk [vmem:[#allocation2 + $0x91] sm:$0xff] %vm347_vm0, %v8425_v30  ;;  %430 = vst.msk [vmem:[#allocation2 + $0x99] sm:$0xff] %vm347_vm0, %v8426_v31  ;;  %v511_v36 = vld [vmem:[#allocation2 + $0x18] sm:$0xff] }
  0x52   : > { %v911_v34 = vld [vmem:[#allocation2 + $0x11] sm:$0xff]  ;;  %434 = vst.msk [vmem:[#allocation2 + $0xa3] sm:$0xff] %vm347_vm0, %v8427_v32  ;;  %v912_v37 = vld [vmem:[#allocation2 + $0x19] sm:$0xff]  ;;  %435 = vst.msk [vmem:[#allocation2 + $0xab] sm:$0xff] %vm347_vm0, %v8428_v35  ;;  %v545_v39 = vpack.c.bf16 %v511_v36, %v510_v33 }
  0x53   : > { %v512_v40 = vld [vmem:[#allocation2 + $0x20] sm:$0xff]  ;;  %v513_v41 = vld [vmem:[#allocation2 + $0x28] sm:$0xff]  ;;  %v946_v42 = vpack.c.bf16 %v912_v37, %v911_v34  ;;  %439 = vst.msk [vmem:[#allocation2 + $0xb5] sm:$0xff] %vm347_vm0, %v8429_v38  ;;  %v514_v45 = vld [vmem:[#allocation2 + $0x30] sm:$0xff] }
  0x54   : > { %v913_v43 = vld [vmem:[#allocation2 + $0x21] sm:$0xff]  ;;  %v546_v44 = vpack.c.bf16 %v513_v41, %v512_v40  ;;  %9187 = vmatmul.mubr.msk.bf16.vlgmr.msra.gmra.mrb[0].mxu0 %vm347_vm0, %v545_v39  ;;  %v914_v46 = vld [vmem:[#allocation2 + $0x29] sm:$0xff]  ;;  %v515_v47 = vld [vmem:[#allocation2 + $0x38] sm:$0xff]  ;;  %440 = vst.msk [vmem:[#allocation2 + $0xbd] sm:$0xff] %vm347_vm0, %v8430_v1 }
  0x55   : > { %9225 = vmatmul.mubr.msk.bf16.vlgmr.msra.gmra.mrb[0].mxu1 %vm347_vm0, %v946_v42  ;;  %9261 = vmatpush3.bf16.msra.mxu0 %v10511_v10  ;;  %v947_v48 = vpack.c.bf16 %v914_v46, %v913_v43  ;;  %v915_v49 = vld [vmem:[#allocation2 + $0x31] sm:$0xff]  ;;  %v916_v50 = vld [vmem:[#allocation2 + $0x39] sm:$0xff]  ;;  %v517_v52 = vld [vmem:[#allocation2 + $0x48] sm:$0xff]  ;;  %v547_v55 = vpack.c.bf16 %v515_v47, %v514_v45  ;;  %444 = vst.msk [vmem:[#allocation2 + $0xc7] sm:$0xff] %vm347_vm0, %v8431_v6 }
  0x56   : > { %9190 = vmatprep.mubr.msk.bf16.mxu0 %vm347_vm0, %v546_v44  ;;  %v516_v51 = vld [vmem:[#allocation2 + $0x40] sm:$0xff]  ;;  %v918_v54 = vld [vmem:[#allocation2 + $0x49] sm:$0xff]  ;;  %v948_v56 = vpack.c.bf16 %v916_v50, %v915_v49  ;;  %v519_v60 = vld [vmem:[#allocation2 + $0x58] sm:$0xff]  ;;  %445 = vst.msk [vmem:[#allocation2 + $0xcf] sm:$0xff] %vm347_vm0, %v8432_v7  ;;  %9336 = vmatprep.subr.bf16.mxu0 %v10598_v25 }
  0x57   : > { %9228 = vmatprep.mubr.msk.bf16.mxu1 %vm347_vm0, %v947_v48  ;;  %v917_v53 = vld [vmem:[#allocation2 + $0x41] sm:$0xff]  ;;  %v548_v57 = vpack.c.bf16 %v517_v52, %v516_v51  ;;  %v518_v59 = vld [vmem:[#allocation2 + $0x50] sm:$0xff]  ;;  %v920_v2 = vld [vmem:[#allocation2 + $0x59] sm:$0xff]  ;;  %449 = vst.msk [vmem:[#allocation2 + $0xd9] sm:$0xff] %vm347_vm0, %v8433_v8  ;;  %9299 = vmatpush3.bf16.msra.mxu1 %v1852_v19 }
  0x58   : > { %v949_v58 = vpack.c.bf16 %v918_v54, %v917_v53  ;;  %v520_v61 = vld [vmem:[#allocation2 + $0x60] sm:$0xff]  ;;  %v521_v62 = vld [vmem:[#allocation2 + $0x68] sm:$0xff]  ;;  %v919_v63 = vld [vmem:[#allocation2 + $0x51] sm:$0xff]  ;;  %v549_v9 = vpack.c.bf16 %v519_v60, %v518_v59  ;;  %450 = vst.msk [vmem:[#allocation2 + $0xe1] sm:$0xff] %vm347_vm0, %v8434_v11 }
  0x59   : > { %v921_v4 = vld [vmem:[#allocation2 + $0x61] sm:$0xff]  ;;  %v922_v5 = vld [vmem:[#allocation2 + $0x69] sm:$0xff]  ;;  %v950_v10 = vpack.c.bf16 %v920_v2, %v919_v63  ;;  %v550_v14 = vpack.c.bf16 %v521_v62, %v520_v61  ;;  %454 = vst.msk [vmem:[#allocation2 + $0xeb] sm:$0xff] %vm347_vm0, %v8435_v12  ;;  %455 = vst.msk [vmem:[#allocation2 + $0xf3] sm:$0xff] %vm347_vm0, %v8436_v13 }
  0x5a   : > { %v951_v15 = vpack.c.bf16 %v922_v5, %v921_v4  ;;  %459 = vst.msk [vmem:[#allocation2 + $0xfd] sm:$0xff] %vm347_vm0, %v8437_v16  ;;  %460 = vst.msk [vmem:[#allocation2 + $0x105] sm:$0xff] %vm347_vm0, %v8438_v18  ;;  %v522_v23 = vld [vmem:[#allocation2 + $0x70] sm:$0xff]  ;;  %v523_v24 = vld [vmem:[#allocation2 + $0x78] sm:$0xff] }
  0x5b   : > { %464 = vst.msk [vmem:[#allocation2 + $0x10f] sm:$0xff] %vm347_vm0, %v8439_v20  ;;  %465 = vst.msk [vmem:[#allocation2 + $0x117] sm:$0xff] %vm347_vm0, %v8440_v21  ;;  %v524_v26 = vld [vmem:[#allocation2 + $0x80] sm:$0xff]  ;;  %v923_v27 = vld [vmem:[#allocation2 + $0x71] sm:$0xff]  ;;  %v551_v32 = vpack.c.bf16 %v523_v24, %v522_v23 }
  0x5c   : > { %9191 = vmatmul.mubr.msk.bf16.gmra.mrb[4].mxu0 %vm347_vm0, %v547_v55  ;;  %v924_v28 = vld [vmem:[#allocation2 + $0x79] sm:$0xff]  ;;  %v525_v29 = vld [vmem:[#allocation2 + $0x88] sm:$0xff]  ;;  %v526_v36 = vld [vmem:[#allocation2 + $0x90] sm:$0xff]  ;;  %474 = vst.msk [vmem:[#allocation6 + $0x10] sm:$0xff] %vm471_vm3, %v10271_v0 }
  0x5d   : > { %9229 = vmatmul.mubr.msk.bf16.gmra.mrb[4].mxu1 %vm347_vm0, %v948_v56  ;;  %9194 = vmatprep.mubr.msk.bf16.mxu0 %vm347_vm0, %v548_v57  ;;  %v925_v30 = vld [vmem:[#allocation2 + $0x81] sm:$0xff]  ;;  %v926_v31 = vld [vmem:[#allocation2 + $0x89] sm:$0xff]  ;;  %v952_v33 = vpack.c.bf16 %v924_v28, %v923_v27  ;;  %v552_v34 = vpack.c.bf16 %v525_v29, %v524_v26  ;;  %v527_v37 = vld [vmem:[#allocation2 + $0x98] sm:$0xff]  ;;  %472 = vst.msk [vmem:[#allocation6] sm:$0xff] %vm471_vm3, %v10271_v0 }
  0x5e   : > { %9232 = vmatprep.mubr.msk.bf16.mxu1 %vm347_vm0, %v949_v58  ;;  %v953_v35 = vpack.c.bf16 %v926_v31, %v925_v30  ;;  %v528_v38 = vld [vmem:[#allocation2 + $0xa0] sm:$0xff]  ;;  %v927_v39 = vld [vmem:[#allocation2 + $0x91] sm:$0xff]  ;;  %v529_v41 = vld [vmem:[#allocation2 + $0xa8] sm:$0xff]  ;;  %v553_v44 = vpack.c.bf16 %v527_v37, %v526_v36  ;;  %473 = vst.msk [vmem:[#allocation6 + $0x8] sm:$0xff] %vm471_vm3, %v10271_v0 }
  0x5f   : > { %v928_v40 = vld [vmem:[#allocation2 + $0x99] sm:$0xff]  ;;  %v929_v42 = vld [vmem:[#allocation2 + $0xa1] sm:$0xff]  ;;  %v930_v43 = vld [vmem:[#allocation2 + $0xa9] sm:$0xff]  ;;  %v554_v46 = vpack.c.bf16 %v529_v41, %v528_v38  ;;  %475 = vst.msk [vmem:[#allocation6 + $0x18] sm:$0xff] %vm471_vm3, %v10271_v0 }
  0x60   : > { %v954_v45 = vpack.c.bf16 %v928_v40, %v927_v39  ;;  %v955_v47 = vpack.c.bf16 %v930_v43, %v929_v42  ;;  %v530_v48 = vld [vmem:[#allocation2 + $0xb0] sm:$0xff]  ;;  %v531_v49 = vld [vmem:[#allocation2 + $0xb8] sm:$0xff]  ;;  %v532_v51 = vld [vmem:[#allocation2 + $0xc0] sm:$0xff]  ;;  %476 = vst.msk [vmem:[#allocation6 + $0x20] sm:$0xff] %vm471_vm3, %v10271_v0 }
  0x61   : > { %v931_v50 = vld [vmem:[#allocation2 + $0xb1] sm:$0xff]  ;;  %v533_v52 = vld [vmem:[#allocation2 + $0xc8] sm:$0xff]  ;;  %v932_v53 = vld [vmem:[#allocation2 + $0xb9] sm:$0xff]  ;;  %v555_v59 = vpack.c.bf16 %v531_v49, %v530_v48  ;;  %477 = vst.msk [vmem:[#allocation6 + $0x28] sm:$0xff] %vm471_vm3, %v10271_v0 }
  0x62   : > { %v933_v54 = vld [vmem:[#allocation2 + $0xc1] sm:$0xff]  ;;  %v934_v55 = vld [vmem:[#allocation2 + $0xc9] sm:$0xff]  ;;  %v8537_v56 = vld [vmem:[%s12003_s1 + $0xa] sm:$0x3]  ;;  %v956_v60 = vpack.c.bf16 %v932_v53, %v931_v50  ;;  %v556_v61 = vpack.c.bf16 %v533_v52, %v532_v51  ;;  %478 = vst.msk [vmem:[#allocation6 + $0x30] sm:$0xff] %vm471_vm3, %v10271_v0 }
  0x63   : > { %v10615_v57 = vand.u32 %v8537_v56, %v10495_v3  ;;  %v8441_v58 = vld [vmem:[%s10500_s29 + $0xf0] sm:$0xff]  ;;  %v957_v62 = vpack.c.bf16 %v934_v55, %v933_v54  ;;  %v8442_v63 = vld [vmem:[%s10500_s29 + $0xf8] sm:$0xff]  ;;  %v534_v1 = vld [vmem:[#allocation2 + $0xd0] sm:$0xff]  ;;  %479 = vst.msk [vmem:[#allocation6 + $0x38] sm:$0xff] %vm471_vm3, %v10271_v0  ;;  %s8333_s29 = sshll.u32 %s340_s14, 4  ;;  %s11962_s29 = int_to_ptr.vmem [resolvable:$true] %s8333_s29 }
  0x64   : > { %9195 = vmatmul.mubr.msk.bf16.gmra.mrb[8].mxu0 %vm347_vm0, %v549_v9  ;;  %469 = vst.msk [vmem:[#allocation2 + $0x121] sm:$0xff] %vm347_vm0, %v8441_v58  ;;  %470 = vst.msk [vmem:[#allocation2 + $0x129] sm:$0xff] %vm347_vm0, %v8442_v63  ;;  %v535_v2 = vld [vmem:[#allocation2 + $0xd8] sm:$0xff]  ;;  %v536_v4 = vld [vmem:[#allocation2 + $0xe0] sm:$0xff]  ;;  %s10200_s26 = scalar_lea.vmem %s11962_s29, 64  ;;  %p10207_p2 = scmp.lt.s32.totalorder %s11962_s29, %s10205_s28 }
  0x65   : > { %9233 = vmatmul.mubr.msk.bf16.gmra.mrb[8].mxu1 %vm347_vm0, %v950_v10  ;;  %9198 = vmatprep.mubr.msk.bf16.mxu0 %vm347_vm0, %v550_v14  ;;  %v935_v5 = vld [vmem:[#allocation2 + $0xd1] sm:$0xff]  ;;  %v936_v6 = vld [vmem:[#allocation2 + $0xd9] sm:$0xff]  ;;  %v537_v7 = vld [vmem:[#allocation2 + $0xe8] sm:$0xff]  ;;  %v557_v10 = vpack.c.bf16 %v535_v2, %v534_v1  ;;  %480 = vst.msk [vmem:[#allocation6 + $0x40] sm:$0xff] %vm471_vm3, %v10271_v0  ;;  %p10201_p6 = scmp.ne.s32.totalorder %s11962_s29, %s10200_s26  ;;  %p10208_p3 = scmp.lt.s32.totalorder %s10206_s21, %s10200_s26 }
  0x66   : > { %9236 = vmatprep.mubr.msk.bf16.mxu1 %vm347_vm0, %v951_v15  ;;  %9374 = vmatprep.subr.bf16.mxu1 %v10615_v57  ;;  %v937_v8 = vld [vmem:[#allocation2 + $0xe1] sm:$0xff]  ;;  %v938_v9 = vld [vmem:[#allocation2 + $0xe9] sm:$0xff]  ;;  %v958_v11 = vpack.c.bf16 %v936_v6, %v935_v5  ;;  %v558_v12 = vpack.c.bf16 %v537_v7, %v536_v4  ;;  %v539_v15 = vld [vmem:[#allocation2 + $0xf8] sm:$0xff]  ;;  %481 = vst.msk [vmem:[#allocation6 + $0x48] sm:$0xff] %vm471_vm3, %v10271_v0 }
  0x67   : > { %v959_v13 = vpack.c.bf16 %v938_v9, %v937_v8  ;;  %v538_v14 = vld [vmem:[#allocation2 + $0xf0] sm:$0xff]  ;;  %v540_v16 = vld [vmem:[#allocation2 + $0x100] sm:$0xff]  ;;  %v541_v19 = vld [vmem:[#allocation2 + $0x108] sm:$0xff]  ;;  %482 = vst.msk [vmem:[#allocation6 + $0x50] sm:$0xff] %vm471_vm3, %v10271_v0  ;;  %p10202_p10 = pnand %p10201_p6, %p12022_p9  ;;  %p10209_p4 = por %p10208_p3, %p10207_p2 }
  0x68   : > { %v939_v17 = vld [vmem:[#allocation2 + $0xf1] sm:$0xff]  ;;  %v940_v18 = vld [vmem:[#allocation2 + $0xf9] sm:$0xff]  ;;  %v941_v20 = vld [vmem:[#allocation2 + $0x101] sm:$0xff]  ;;  %v559_v22 = vpack.c.bf16 %v539_v15, %v538_v14  ;;  %v560_v24 = vpack.c.bf16 %v541_v19, %v540_v16  ;;  %483 = vst.msk [vmem:[#allocation6 + $0x58] sm:$0xff] %vm471_vm3, %v10271_v0 }
  0x69   : > { %v942_v21 = vld [vmem:[#allocation2 + $0x109] sm:$0xff]  ;;  %v960_v23 = vpack.c.bf16 %v940_v18, %v939_v17  ;;  %v543_v28 = vld [vmem:[#allocation2 + $0x118] sm:$0xff]  ;;  %484 = vst.msk [vmem:[#allocation6 + $0x60] sm:$0xff] %vm471_vm3, %v10271_v0  ;;  %485 = vst.msk [vmem:[#allocation6 + $0x68] sm:$0xff] %vm471_vm3, %v10271_v0  ;;  %p10203_p12 = pneg %p10202_p10 }
  0x6a   : > { %v961_v26 = vpack.c.bf16 %v942_v21, %v941_v20  ;;  %v542_v27 = vld [vmem:[#allocation2 + $0x110] sm:$0xff]  ;;  %v1307_v29 = vld [vmem:[#allocation2 + $0x2] sm:$0xff]  ;;  %v8556_v41 = vld [vmem:[%s12003_s1 + $0xc] sm:$0x3]  ;;  %486 = vst.msk [vmem:[#allocation6 + $0x70] sm:$0xff] %vm471_vm3, %v10271_v0 }
  0x6b   : > { %v1308_v30 = vld [vmem:[#allocation2 + $0xa] sm:$0xff]  ;;  %v1311_v39 = vld [vmem:[#allocation2 + $0x22] sm:$0xff]  ;;  %v1313_v42 = vld [vmem:[#allocation2 + $0x32] sm:$0xff]  ;;  %487 = vst.msk [vmem:[#allocation6 + $0x78] sm:$0xff] %vm471_vm3, %v10271_v0  ;;  %p10210_p7 = pnand %p10209_p4, %p10203_p12 }
  0x6c   : > { %9199 = vmatmul.mubr.msk.bf16.gmra.mrb[12].mxu0 %vm347_vm0, %v551_v32  ;;  %v943_v31 = vld [vmem:[#allocation2 + $0x111] sm:$0xff]  ;;  %v944_v32 = vld [vmem:[#allocation2 + $0x119] sm:$0xff]  ;;  %v1343_v37 = vpack.c.bf16 %v1308_v30, %v1307_v29  ;;  %v1315_v48 = vld [vmem:[#allocation2 + $0x42] sm:$0xff]  ;;  %488 = vst.msk [vmem:[#allocation6 + $0x80] sm:$0xff] %vm471_vm3, %v10271_v0 }
  0x6d   : > { %9237 = vmatmul.mubr.msk.bf16.gmra.mrb[12].mxu1 %vm347_vm0, %v952_v33  ;;  %9202 = vmatprep.mubr.msk.bf16.mxu0 %vm347_vm0, %v552_v34  ;;  %v1309_v33 = vld [vmem:[#allocation2 + $0x12] sm:$0xff]  ;;  %v1310_v34 = vld [vmem:[#allocation2 + $0x1a] sm:$0xff]  ;;  %v962_v36 = vpack.c.bf16 %v944_v32, %v943_v31  ;;  %v1312_v40 = vld [vmem:[#allocation2 + $0x2a] sm:$0xff]  ;;  %489 = vst.msk [vmem:[#allocation6 + $0x88] sm:$0xff] %vm471_vm3, %v10271_v0 }
  0x6e   : > { %9240 = vmatprep.mubr.msk.bf16.mxu1 %vm347_vm0, %v953_v35  ;;  %v561_v35 = vpack.c.bf16 %v543_v28, %v542_v27  ;;  %v1344_v38 = vpack.c.bf16 %v1310_v34, %v1309_v33  ;;  %v1314_v43 = vld [vmem:[#allocation2 + $0x3a] sm:$0xff]  ;;  %v1316_v49 = vld [vmem:[#allocation2 + $0x4a] sm:$0xff]  ;;  %v1317_v51 = vld [vmem:[#allocation2 + $0x52] sm:$0xff]  ;;  %490 = vst.msk [vmem:[#allocation6 + $0x90] sm:$0xff] %vm471_vm3, %v10271_v0 }
  0x6f   : > { %v1318_v52 = vld [vmem:[#allocation2 + $0x5a] sm:$0xff]  ;;  %491 = vst.msk [vmem:[#allocation6 + $0x98] sm:$0xff] %vm471_vm3, %v10271_v0  ;;  %492 = vst.msk [vmem:[#allocation6 + $0xa0] sm:$0xff] %vm471_vm3, %v10271_v0  ;;  %v1319_v54 = vld [vmem:[#allocation2 + $0x62] sm:$0xff] }
  0x70   : > { %493 = vst.msk [vmem:[#allocation6 + $0xa8] sm:$0xff] %vm471_vm3, %v10271_v0  ;;  %494 = vst.msk [vmem:[#allocation6 + $0xb0] sm:$0xff] %vm471_vm3, %v10271_v0  ;;  %v1348_v53 = vpack.c.bf16 %v1318_v52, %v1317_v51  ;;  %v1320_v55 = vld [vmem:[#allocation2 + $0x6a] sm:$0xff]  ;;  %v1321_v56 = vld [vmem:[#allocation2 + $0x72] sm:$0xff] }
  0x71   : > { %495 = vst.msk [vmem:[#allocation6 + $0xb8] sm:$0xff] %vm471_vm3, %v10271_v0  ;;  %496 = vst.msk [vmem:[#allocation6 + $0xc0] sm:$0xff] %vm471_vm3, %v10271_v0  ;;  %v1349_v58 = vpack.c.bf16 %v1320_v55, %v1319_v54  ;;  %v1326_v63 = vld [vmem:[#allocation2 + $0x9a] sm:$0xff]  ;;  %v1327_v4 = vld [vmem:[#allocation2 + $0xa2] sm:$0xff] }
  0x72   : > { %497 = vst.msk [vmem:[#allocation6 + $0xc8] sm:$0xff] %vm471_vm3, %v10271_v0  ;;  %498 = vst.msk [vmem:[#allocation6 + $0xd0] sm:$0xff] %vm471_vm3, %v10271_v0  ;;  %v1328_v5 = vld [vmem:[#allocation2 + $0xaa] sm:$0xff]  ;;  %v1329_v6 = vld [vmem:[#allocation2 + $0xb2] sm:$0xff] }
  0x73   : > { %499 = vst.msk [vmem:[#allocation6 + $0xd8] sm:$0xff] %vm471_vm3, %v10271_v0  ;;  %500 = vst.msk [vmem:[#allocation6 + $0xe0] sm:$0xff] %vm471_vm3, %v10271_v0  ;;  %v1330_v7 = vld [vmem:[#allocation2 + $0xba] sm:$0xff]  ;;  %v1353_v8 = vpack.c.bf16 %v1328_v5, %v1327_v4  ;;  %v1335_v16 = vld [vmem:[#allocation2 + $0xe2] sm:$0xff] }
  0x74   : > { %9203 = vmatmul.mubr.msk.bf16.gmra.mrb[16].mxu0 %vm347_vm0, %v553_v44  ;;  %v1345_v44 = vpack.c.bf16 %v1312_v40, %v1311_v39  ;;  %501 = vst.msk [vmem:[#allocation6 + $0xe8] sm:$0xff] %vm471_vm3, %v10271_v0  ;;  %502 = vst.msk [vmem:[#allocation6 + $0xf0] sm:$0xff] %vm471_vm3, %v10271_v0  ;;  %v1354_v9 = vpack.c.bf16 %v1330_v7, %v1329_v6  ;;  %v1336_v17 = vld [vmem:[#allocation2 + $0xea] sm:$0xff]  ;;  %v1337_v18 = vld [vmem:[#allocation2 + $0xf2] sm:$0xff] }
  0x75   : > { %9241 = vmatmul.mubr.msk.bf16.gmra.mrb[16].mxu1 %vm347_vm0, %v954_v45  ;;  %9206 = vmatprep.mubr.msk.bf16.mxu0 %vm347_vm0, %v554_v46  ;;  %v10642_v45 = vand.u32 %v8556_v41, %v10495_v3  ;;  %v10645_v46 = vpack.c.bf16 %v1314_v43, %v1313_v42  ;;  %503 = vst.msk [vmem:[#allocation6 + $0xf8] sm:$0xff] %vm471_vm3, %v10271_v0  ;;  %504 = vst.msk [vmem:[#allocation6 + $0x100] sm:$0xff] %vm471_vm3, %v10271_v0  ;;  %v1338_v19 = vld [vmem:[#allocation2 + $0xfa] sm:$0xff]  ;;  %v1739_v29 = vld [vmem:[#allocation2 + $0x122] sm:$0xff] }
  0x76   : > { %9244 = vmatprep.mubr.msk.bf16.mxu1 %vm347_vm0, %v955_v47  ;;  %v8575_v47 = vld [vmem:[%s12003_s1 + $0xe] sm:$0x3]  ;;  %505 = vst.msk [vmem:[#allocation6 + $0x108] sm:$0xff] %vm471_vm3, %v10271_v0  ;;  %506 = vst.msk [vmem:[#allocation6 + $0x110] sm:$0xff] %vm471_vm3, %v10271_v0  ;;  %v1357_v20 = vpack.c.bf16 %v1336_v17, %v1335_v16  ;;  %v1358_v21 = vpack.c.bf16 %v1338_v19, %v1337_v18  ;;  %v1740_v30 = vld [vmem:[#allocation2 + $0x12a] sm:$0xff] }
  0x77   : > { %v10654_v50 = vand.u32 %v8575_v47, %v10495_v3  ;;  %507 = vst.msk [vmem:[#allocation6 + $0x118] sm:$0xff] %vm471_vm3, %v10271_v0  ;;  %4094 = vst.msk [vmem:[#allocation3] sm:$0xff] %vm471_vm3, %v10271_v0  ;;  %v2103_v31 = vld [vmem:[#allocation2 + $0x13] sm:$0xff]  ;;  %v2104_v32 = vld [vmem:[#allocation2 + $0x1b] sm:$0xff] }
  0x78   : > { %4095 = vst.msk [vmem:[#allocation3 + $0x8] sm:$0xff] %vm471_vm3, %v10271_v0  ;;  %4096 = vst.msk [vmem:[#allocation3 + $0x10] sm:$0xff] %vm471_vm3, %v10271_v0  ;;  %v2501_v33 = vld [vmem:[#allocation2 + $0x14] sm:$0xff]  ;;  %v2502_v34 = vld [vmem:[#allocation2 + $0x1c] sm:$0xff] }
  0x79   : > { %4097 = vst.msk [vmem:[#allocation3 + $0x18] sm:$0xff] %vm471_vm3, %v10271_v0  ;;  %4098 = vst.msk [vmem:[#allocation3 + $0x20] sm:$0xff] %vm471_vm3, %v10271_v0  ;;  %v2106_v39 = vld [vmem:[#allocation2 + $0x2b] sm:$0xff]  ;;  %v2107_v42 = vld [vmem:[#allocation2 + $0x33] sm:$0xff] }
  0x7a   : > { %4099 = vst.msk [vmem:[#allocation3 + $0x28] sm:$0xff] %vm471_vm3, %v10271_v0  ;;  %4100 = vst.msk [vmem:[#allocation3 + $0x30] sm:$0xff] %vm471_vm3, %v10271_v0  ;;  %v2503_v40 = vld [vmem:[#allocation2 + $0x24] sm:$0xff]  ;;  %v2504_v41 = vld [vmem:[#allocation2 + $0x2c] sm:$0xff] }
  0x7b   : > { %4101 = vst.msk [vmem:[#allocation3 + $0x38] sm:$0xff] %vm471_vm3, %v10271_v0  ;;  %4102 = vst.msk [vmem:[#allocation3 + $0x40] sm:$0xff] %vm471_vm3, %v10271_v0  ;;  %v2108_v43 = vld [vmem:[#allocation2 + $0x3b] sm:$0xff]  ;;  %v2507_v54 = vld [vmem:[#allocation2 + $0x44] sm:$0xff] }
  0x7c   : > { %9207 = vmatmul.mubr.msk.bf16.gmra.mrb[20].mxu0 %vm347_vm0, %v555_v59  ;;  %4103 = vst.msk [vmem:[#allocation3 + $0x48] sm:$0xff] %vm471_vm3, %v10271_v0  ;;  %4104 = vst.msk [vmem:[#allocation3 + $0x50] sm:$0xff] %vm471_vm3, %v10271_v0  ;;  %v2141_v51 = vpack.c.bf16 %v2108_v43, %v2107_v42  ;;  %v2508_v55 = vld [vmem:[#allocation2 + $0x4c] sm:$0xff]  ;;  %v2116_v5 = vld [vmem:[#allocation2 + $0x7b] sm:$0xff] }
  0x7d   : > { %9245 = vmatmul.mubr.msk.bf16.gmra.mrb[20].mxu1 %vm347_vm0, %v956_v60  ;;  %9210 = vmatprep.mubr.msk.bf16.mxu0 %vm347_vm0, %v556_v61  ;;  %4105 = vst.msk [vmem:[#allocation3 + $0x58] sm:$0xff] %vm471_vm3, %v10271_v0  ;;  %4106 = vst.msk [vmem:[#allocation3 + $0x60] sm:$0xff] %vm471_vm3, %v10271_v0  ;;  %v1323_v60 = vld [vmem:[#allocation2 + $0x82] sm:$0xff]  ;;  %v1324_v61 = vld [vmem:[#allocation2 + $0x8a] sm:$0xff] }
  0x7e   : > { %9248 = vmatprep.mubr.msk.bf16.mxu1 %vm347_vm0, %v957_v62  ;;  %v1325_v62 = vld [vmem:[#allocation2 + $0x92] sm:$0xff]  ;;  %v1351_v1 = vpack.c.bf16 %v1324_v61, %v1323_v60  ;;  %v2510_v60 = vld [vmem:[#allocation2 + $0x5c] sm:$0xff]  ;;  %v10812_v61 = vpack.c.bf16 %v2508_v55, %v2507_v54  ;;  %v2527_v55 = vld [vmem:[#allocation2 + $0xe4] sm:$0xff]  ;;  %4227 = vst.msk [vmem:[#allocation7] sm:$0xff] %vm4226_vm5, %v10271_v0 }
  0x7f   : > { %v1352_v2 = vpack.c.bf16 %v1326_v63, %v1325_v62  ;;  %v2512_v4 = vld [vmem:[#allocation2 + $0x6c] sm:$0xff]  ;;  %v2513_v6 = vld [vmem:[#allocation2 + $0x74] sm:$0xff]  ;;  %v2514_v7 = vld [vmem:[#allocation2 + $0x7c] sm:$0xff]  ;;  %4228 = vst.msk [vmem:[#allocation7 + $0x8] sm:$0xff] %vm4226_vm5, %v10271_v0 }
  0x80   : > { %v2516_v16 = vld [vmem:[#allocation2 + $0x8c] sm:$0xff]  ;;  %v2120_v17 = vld [vmem:[#allocation2 + $0x9b] sm:$0xff]  ;;  %4229 = vst.msk [vmem:[#allocation7 + $0x10] sm:$0xff] %vm4226_vm5, %v10271_v0  ;;  %4230 = vst.msk [vmem:[#allocation7 + $0x18] sm:$0xff] %vm4226_vm5, %v10271_v0 }
  0x81   : > { %v2517_v18 = vld [vmem:[#allocation2 + $0x94] sm:$0xff]  ;;  %v2518_v19 = vld [vmem:[#allocation2 + $0x9c] sm:$0xff]  ;;  %4231 = vst.msk [vmem:[#allocation7 + $0x20] sm:$0xff] %vm4226_vm5, %v10271_v0  ;;  %4232 = vst.msk [vmem:[#allocation7 + $0x28] sm:$0xff] %vm4226_vm5, %v10271_v0 }
  0x82   : > { %v2128_v42 = vld [vmem:[#allocation2 + $0xdb] sm:$0xff]  ;;  %v2131_v54 = vld [vmem:[#allocation2 + $0xf3] sm:$0xff]  ;;  %4233 = vst.msk [vmem:[#allocation7 + $0x30] sm:$0xff] %vm4226_vm5, %v10271_v0  ;;  %4234 = vst.msk [vmem:[#allocation7 + $0x38] sm:$0xff] %vm4226_vm5, %v10271_v0 }
  0x83   : > { %v2525_v43 = vld [vmem:[#allocation2 + $0xd4] sm:$0xff]  ;;  %4235 = vst.msk [vmem:[#allocation7 + $0x40] sm:$0xff] %vm4226_vm5, %v10271_v0  ;;  %4236 = vst.msk [vmem:[#allocation7 + $0x48] sm:$0xff] %vm4226_vm5, %v10271_v0 }
  0x84   : > { %9211 = vmatmul.mubr.msk.bf16.gmra.mrb[24].mxu0 %vm347_vm0, %v557_v10  ;;  %v1331_v10 = vld [vmem:[#allocation2 + $0xc2] sm:$0xff]  ;;  %5515 = vst.msk [vmem:[#allocation4] sm:$0xff] %vm4226_vm5, %v10271_v0  ;;  %5516 = vst.msk [vmem:[#allocation4 + $0x8] sm:$0xff] %vm4226_vm5, %v10271_v0 }
  0x85   : > { %9249 = vmatmul.mubr.msk.bf16.gmra.mrb[24].mxu1 %vm347_vm0, %v958_v11  ;;  %9214 = vmatprep.mubr.msk.bf16.mxu0 %vm347_vm0, %v558_v12  ;;  %v1332_v11 = vld [vmem:[#allocation2 + $0xca] sm:$0xff]  ;;  %v1333_v12 = vld [vmem:[#allocation2 + $0xd2] sm:$0xff]  ;;  %5517 = vst.msk [vmem:[#allocation4 + $0x10] sm:$0xff] %vm4226_vm5, %v10271_v0  ;;  %5518 = vst.msk [vmem:[#allocation4 + $0x18] sm:$0xff] %vm4226_vm5, %v10271_v0 }
  0x86   : > { %9252 = vmatprep.mubr.msk.bf16.mxu1 %vm347_vm0, %v959_v13  ;;  %v1334_v13 = vld [vmem:[#allocation2 + $0xda] sm:$0xff]  ;;  %v1355_v14 = vpack.c.bf16 %v1332_v11, %v1331_v10  ;;  %v10824_v11 = vpack.c.bf16 %v2514_v7, %v2513_v6  ;;  %v2532_v6 = vld [vmem:[#allocation2 + $0x10c] sm:$0xff]  ;;  %5519 = vst.msk [vmem:[#allocation4 + $0x20] sm:$0xff] %vm4226_vm5, %v10271_v0 }
  0x87   : > { %v1356_v15 = vpack.c.bf16 %v1334_v13, %v1333_v12  ;;  %v2117_v12 = vld [vmem:[#allocation2 + $0x83] sm:$0xff]  ;;  %v2118_v13 = vld [vmem:[#allocation2 + $0x8b] sm:$0xff]  ;;  %v2136_v7 = vld [vmem:[#allocation2 + $0x11b] sm:$0xff]  ;;  %5587 = vst.msk [vmem:[#allocation8 + $0x10] sm:$0xff] %vm5584_vm6, %v10271_v0 }
  0x88   : > { %5585 = vst.msk [vmem:[#allocation8] sm:$0xff] %vm5584_vm6, %v10271_v0  ;;  %5586 = vst.msk [vmem:[#allocation8 + $0x8] sm:$0xff] %vm5584_vm6, %v10271_v0 }
  0x89   : > { %6353 = vst.msk [vmem:[#allocation5] sm:$0xff] %vm5584_vm6, %v10271_v0  ;;  %6354 = vst.msk [vmem:[#allocation5 + $0x8] sm:$0xff] %vm5584_vm6, %v10271_v0 }
  0x8a   : > { %6356 = vst.msk [vmem:[#allocation5 + $0x10] sm:$0xf] %vm6355_vm8, %v10271_v0 }
  0x8c   : > { %9215 = vmatmul.mubr.msk.bf16.gmra.mrb[28].mxu0 %vm347_vm0, %v559_v22  ;;  %v1339_v22 = vld [vmem:[#allocation2 + $0x102] sm:$0xff] }
  0x8d   : > { %9253 = vmatmul.mubr.msk.bf16.gmra.mrb[28].mxu1 %vm347_vm0, %v960_v23  ;;  %9218 = vmatprep.mubr.msk.bf16.mxu0 %vm347_vm0, %v560_v24  ;;  %v1340_v23 = vld [vmem:[#allocation2 + $0x10a] sm:$0xff]  ;;  %v1341_v24 = vld [vmem:[#allocation2 + $0x112] sm:$0xff] }
  0x8e   : > { %9256 = vmatprep.mubr.msk.bf16.mxu1 %vm347_vm0, %v961_v26  ;;  %v1342_v26 = vld [vmem:[#allocation2 + $0x11a] sm:$0xff]  ;;  %v1359_v27 = vpack.c.bf16 %v1340_v23, %v1339_v22  ;;  %v10834_v23 = vpack.c.bf16 %v2518_v19, %v2517_v18  ;;  %v2535_v18 = vld [vmem:[#allocation2 + $0x124] sm:$0xff]  ;;  %v2536_v19 = vld [vmem:[#allocation2 + $0x12c] sm:$0xff] }
  0x8f   : > { %v1360_v28 = vpack.c.bf16 %v1342_v26, %v1341_v24  ;;  %v2121_v24 = vld [vmem:[#allocation2 + $0xa3] sm:$0xff]  ;;  %v2122_v26 = vld [vmem:[#allocation2 + $0xab] sm:$0xff] }
  0x94   : > { %9219 = vmatmul.mubr.msk.bf16.gmra.mrb[32].mxu0 %vm347_vm0, %v561_v35  ;;  %v1758_v35 = vpack.c.bf16 %v1740_v30, %v1739_v29  ;;  %v2520_v29 = vld [vmem:[#allocation2 + $0xac] sm:$0xff]  ;;  %v2124_v30 = vld [vmem:[#allocation2 + $0xbb] sm:$0xff] }
  0x95   : > { %9257 = vmatmul.mubr.msk.bf16.gmra.mrb[32].mxu1 %vm347_vm0, %v962_v36  ;;  %9262 = vmatprep.mubr.msk.bf16.mxu0 %vm347_vm0, %v1343_v37  ;;  %v2139_v36 = vpack.c.bf16 %v2104_v32, %v2103_v31  ;;  %v2537_v37 = vpack.c.bf16 %v2502_v34, %v2501_v33  ;;  %v2521_v31 = vld [vmem:[#allocation2 + $0xb4] sm:$0xff]  ;;  %v2522_v32 = vld [vmem:[#allocation2 + $0xbc] sm:$0xff]  ;;  %v2148_v33 = vpack.c.bf16 %v2122_v26, %v2121_v24 }
  0x96   : > { %9300 = vmatprep.mubr.msk.bf16.mxu1 %vm347_vm0, %v1344_v38  ;;  %v10882_v26 = vpack.c.bf16 %v2536_v19, %v2535_v18 }
  0x9c   : > { %9263 = vmatmul.mubr.msk.bf16.vlgmr.msra.gmra.mrb[36].mxu0 %vm347_vm0, %v1344_v38  ;;  %v2105_v38 = vld [vmem:[#allocation2 + $0x23] sm:$0xff] }
  0x9d   : > { %9301 = vmatmul.mubr.msk.bf16.vlgmr.msra.gmra.mrb[36].mxu1 %vm347_vm0, %v1345_v44  ;;  %9337 = vmatpush3.bf16.msra.mxu0 %v10598_v25  ;;  %v1347_v25 = vpack.c.bf16 %v1316_v49, %v1315_v48  ;;  %v2140_v47 = vpack.c.bf16 %v2106_v39, %v2105_v38  ;;  %v10792_v48 = vpack.c.bf16 %v2504_v41, %v2503_v40  ;;  %v8594_v49 = vld [vmem:[%s12003_s1 + $0x10] sm:$0x3]  ;;  %v2126_v38 = vld [vmem:[#allocation2 + $0xcb] sm:$0xff]  ;;  %v2127_v39 = vld [vmem:[#allocation2 + $0xd3] sm:$0xff] }
  0x9e   : > { %9266 = vmatprep.mubr.msk.bf16.mxu0 %vm347_vm0, %v1345_v44  ;;  %9304 = vmatprep.mubr.msk.bf16.mxu1 %vm347_vm0, %v10645_v46  ;;  %v2505_v44 = vld [vmem:[#allocation2 + $0x34] sm:$0xff]  ;;  %v2523_v40 = vld [vmem:[#allocation2 + $0xc4] sm:$0xff]  ;;  %v2524_v41 = vld [vmem:[#allocation2 + $0xcc] sm:$0xff] }
  0x9f   : > { %9375 = vmatpush3.bf16.msra.mxu1 %v10615_v57  ;;  %9412 = vmatprep.subr.bf16.mxu0 %v10642_v45  ;;  %v1322_v57 = vld [vmem:[#allocation2 + $0x7a] sm:$0xff] }
  0xa0   : > { %9450 = vmatprep.subr.bf16.mxu1 %v10654_v50  ;;  %v1350_v59 = vpack.c.bf16 %v1322_v57, %v1321_v56  ;;  %v10800_v56 = vand.u32 %v8594_v49, %v10495_v3  ;;  %v2111_v57 = vld [vmem:[#allocation2 + $0x53] sm:$0xff]  ;;  %v2151_v49 = vpack.c.bf16 %v2128_v42, %v2127_v39 }
  0xa4   : > { %9267 = vmatmul.mubr.msk.bf16.gmra.mrb[40].mxu0 %vm347_vm0, %v10645_v46  ;;  %v2506_v46 = vld [vmem:[#allocation2 + $0x3c] sm:$0xff] }
  0xa5   : > { %9305 = vmatmul.mubr.msk.bf16.gmra.mrb[40].mxu1 %vm347_vm0, %v1347_v25  ;;  %9270 = vmatprep.mubr.msk.bf16.mxu0 %vm347_vm0, %v1347_v25  ;;  %v10797_v52 = vpack.c.bf16 %v2506_v46, %v2505_v44  ;;  %v2109_v25 = vld [vmem:[#allocation2 + $0x43] sm:$0xff] }
  0xa6   : > { %9308 = vmatprep.mubr.msk.bf16.mxu1 %vm347_vm0, %v1348_v53  ;;  %v2526_v44 = vld [vmem:[#allocation2 + $0xdc] sm:$0xff] }
  0xac   : > { %9271 = vmatmul.mubr.msk.bf16.gmra.mrb[44].mxu0 %vm347_vm0, %v1348_v53  ;;  %v2110_v53 = vld [vmem:[#allocation2 + $0x4b] sm:$0xff] }
  0xad   : > { %9309 = vmatmul.mubr.msk.bf16.gmra.mrb[44].mxu1 %vm347_vm0, %v1349_v58  ;;  %9274 = vmatprep.mubr.msk.bf16.mxu0 %vm347_vm0, %v1349_v58  ;;  %v2112_v58 = vld [vmem:[#allocation2 + $0x5b] sm:$0xff]  ;;  %v2142_v3 = vpack.c.bf16 %v2110_v53, %v2109_v25  ;;  %v2129_v25 = vld [vmem:[#allocation2 + $0xe3] sm:$0xff]  ;;  %v2130_v53 = vld [vmem:[#allocation2 + $0xeb] sm:$0xff] }
  0xae   : > { %9312 = vmatprep.mubr.msk.bf16.mxu1 %vm347_vm0, %v1350_v59  ;;  %v2143_v62 = vpack.c.bf16 %v2112_v58, %v2111_v57  ;;  %v2528_v57 = vld [vmem:[#allocation2 + $0xec] sm:$0xff]  ;;  %v2132_v58 = vld [vmem:[#allocation2 + $0xfb] sm:$0xff] }
  0xb4   : > { %9275 = vmatmul.mubr.msk.bf16.gmra.mrb[48].mxu0 %vm347_vm0, %v1350_v59  ;;  %v2509_v59 = vld [vmem:[#allocation2 + $0x54] sm:$0xff] }
  0xb5   : > { %9313 = vmatmul.mubr.msk.bf16.gmra.mrb[48].mxu1 %vm347_vm0, %v1351_v1  ;;  %9278 = vmatprep.mubr.msk.bf16.mxu0 %vm347_vm0, %v1351_v1  ;;  %v10814_v63 = vpack.c.bf16 %v2510_v60, %v2509_v59  ;;  %v2114_v1 = vld [vmem:[#allocation2 + $0x6b] sm:$0xff]  ;;  %v2529_v59 = vld [vmem:[#allocation2 + $0xf4] sm:$0xff]  ;;  %v2530_v60 = vld [vmem:[#allocation2 + $0xfc] sm:$0xff] }
  0xb6   : > { %9316 = vmatprep.mubr.msk.bf16.mxu1 %vm347_vm0, %v1352_v2 }
  0xbc   : > { %9279 = vmatmul.mubr.msk.bf16.gmra.mrb[52].mxu0 %vm347_vm0, %v1352_v2  ;;  %v2511_v2 = vld [vmem:[#allocation2 + $0x64] sm:$0xff] }
  0xbd   : > { %9317 = vmatmul.mubr.msk.bf16.gmra.mrb[52].mxu1 %vm347_vm0, %v1353_v8  ;;  %9282 = vmatprep.mubr.msk.bf16.mxu0 %vm347_vm0, %v1353_v8 }
  0xbe   : > { %9320 = vmatprep.mubr.msk.bf16.mxu1 %vm347_vm0, %v1354_v9 }
  0xc4   : > { %9283 = vmatmul.mubr.msk.bf16.gmra.mrb[56].mxu0 %vm347_vm0, %v1354_v9  ;;  %v10822_v9 = vpack.c.bf16 %v2512_v4, %v2511_v2  ;;  %v2134_v2 = vld [vmem:[#allocation2 + $0x10b] sm:$0xff]  ;;  %v2135_v4 = vld [vmem:[#allocation2 + $0x113] sm:$0xff] }
  0xc5   : > { %9321 = vmatmul.mubr.msk.bf16.gmra.mrb[56].mxu1 %vm347_vm0, %v1355_v14  ;;  %9286 = vmatprep.mubr.msk.bf16.mxu0 %vm347_vm0, %v1355_v14  ;;  %v2119_v14 = vld [vmem:[#allocation2 + $0x93] sm:$0xff] }
  0xc6   : > { %9324 = vmatprep.mubr.msk.bf16.mxu1 %vm347_vm0, %v1356_v15  ;;  %v2147_v22 = vpack.c.bf16 %v2120_v17, %v2119_v14  ;;  %v2155_v14 = vpack.c.bf16 %v2136_v7, %v2135_v4  ;;  %v2138_v17 = vld [vmem:[#allocation2 + $0x12b] sm:$0xff] }
  0xcc   : > { %9287 = vmatmul.mubr.msk.bf16.gmra.mrb[60].mxu0 %vm347_vm0, %v1356_v15  ;;  %v2515_v15 = vld [vmem:[#allocation2 + $0x84] sm:$0xff] }
  0xcd   : > { %9325 = vmatmul.mubr.msk.bf16.gmra.mrb[60].mxu1 %vm347_vm0, %v1357_v20  ;;  %9290 = vmatprep.mubr.msk.bf16.mxu0 %vm347_vm0, %v1357_v20  ;;  %v2146_v20 = vpack.c.bf16 %v2118_v13, %v2117_v12 }
  0xce   : > { %9328 = vmatprep.mubr.msk.bf16.mxu1 %vm347_vm0, %v1358_v21 }
  0xd4   : > { %9291 = vmatmul.mubr.msk.bf16.gmra.mrb[64].mxu0 %vm347_vm0, %v1358_v21  ;;  %v10832_v21 = vpack.c.bf16 %v2516_v16, %v2515_v15  ;;  %v2137_v16 = vld [vmem:[#allocation2 + $0x123] sm:$0xff] }
  0xd5   : > { %9329 = vmatmul.mubr.msk.bf16.gmra.mrb[64].mxu1 %vm347_vm0, %v1359_v27  ;;  %9294 = vmatprep.mubr.msk.bf16.mxu0 %vm347_vm0, %v1359_v27  ;;  %v2123_v27 = vld [vmem:[#allocation2 + $0xb3] sm:$0xff]  ;;  %v2156_v24 = vpack.c.bf16 %v2138_v17, %v2137_v16 }
  0xd6   : > { %9332 = vmatprep.mubr.msk.bf16.mxu1 %vm347_vm0, %v1360_v28 }
  0xdc   : > { %9295 = vmatmul.mubr.msk.bf16.gmra.mrb[68].mxu0 %vm347_vm0, %v1360_v28  ;;  %v2519_v28 = vld [vmem:[#allocation2 + $0xa4] sm:$0xff] }
  0xdd   : > { %9333 = vmatmul.mubr.msk.bf16.gmra.mrb[68].mxu1 %vm347_vm0, %v1758_v35  ;;  %9338 = vmatprep.mubr.msk.bf16.mxu0 %vm347_vm0, %v2139_v36  ;;  %v10842_v34 = vpack.c.bf16 %v2520_v29, %v2519_v28  ;;  %v2149_v35 = vpack.c.bf16 %v2124_v30, %v2123_v27  ;;  %v10844_v36 = vpack.c.bf16 %v2522_v32, %v2521_v31  ;;  %v564_v28 = vld [vmem:[#allocation6 + $0x10] sm:$0xff]  ;;  %v3299_v29 = vld [vmem:[#allocation2 + $0x35] sm:$0xff] }
  0xde   : > { %9376 = vmatprep.mubr.msk.bf16.mxu1 %vm347_vm0, %v2537_v37  ;;  %v2125_v37 = vld [vmem:[#allocation2 + $0xc3] sm:$0xff]  ;;  %v562_v31 = vld [vmem:[#allocation6] sm:$0xff] }
  0xdf   : > { %v2150_v46 = vpack.c.bf16 %v2126_v38, %v2125_v37  ;;  %v3300_v30 = vld [vmem:[#allocation2 + $0x3d] sm:$0xff]  ;;  %v3301_v37 = vld [vmem:[#allocation2 + $0x45] sm:$0xff]  ;;  %v3302_v38 = vld [vmem:[#allocation2 + $0x4d] sm:$0xff] }
  0xe4   : > { %9339 = vmatmul.mubr.msk.bf16.vlgmr.msra.gmra.mrb[72].mxu0 %vm347_vm0, %v2140_v47  ;;  %v10852_v47 = vpack.c.bf16 %v2524_v41, %v2523_v40  ;;  %v563_v41 = vld [vmem:[#allocation6 + $0x8] sm:$0xff] }
  0xe5   : > { %9377 = vmatmul.mubr.msk.bf16.vlgmr.msra.gmra.mrb[72].mxu1 %vm347_vm0, %v10792_v48  ;;  %9413 = vmatpush3.bf16.msra.mxu0 %v10642_v45  ;;  %v2113_v45 = vld [vmem:[#allocation2 + $0x63] sm:$0xff] }
  0xe6   : > { %9342 = vmatprep.mubr.msk.bf16.mxu0 %vm347_vm0, %v2141_v51  ;;  %9380 = vmatprep.mubr.msk.bf16.mxu1 %vm347_vm0, %v10797_v52  ;;  %v2144_v8 = vpack.c.bf16 %v2114_v1, %v2113_v45  ;;  %v10854_v51 = vpack.c.bf16 %v2526_v44, %v2525_v43  ;;  %v2153_v45 = vpack.c.bf16 %v2132_v58, %v2131_v54  ;;  %v3303_v58 = vld [vmem:[#allocation2 + $0x55] sm:$0xff] }
  0xe7   : > { %9451 = vmatpush3.bf16.msra.mxu1 %v10654_v50  ;;  %9488 = vmatprep.subr.bf16.mxu0 %v10800_v56  ;;  %v2115_v50 = vld [vmem:[#allocation2 + $0x73] sm:$0xff]  ;;  %v10864_v1 = vpack.c.bf16 %v2530_v60, %v2529_v59  ;;  %v3334_v43 = vpack.c.bf16 %v3300_v30, %v3299_v29  ;;  %v3335_v54 = vpack.c.bf16 %v3302_v38, %v3301_v37  ;;  %v3304_v59 = vld [vmem:[#allocation2 + $0x5d] sm:$0xff]  ;;  %v3309_v37 = vld [vmem:[#allocation2 + $0x85] sm:$0xff] }
  0xe8   : > { %9526 = vmatprep.subr.bf16.mxu1 %v10271_v0  ;;  %v2145_v10 = vpack.c.bf16 %v2116_v5, %v2115_v50  ;;  %v2133_v50 = vld [vmem:[#allocation2 + $0x103] sm:$0xff]  ;;  %v566_v60 = vld [vmem:[#allocation6 + $0x20] sm:$0xff]  ;;  %v3336_v7 = vpack.c.bf16 %v3304_v59, %v3303_v58 }
  0xe9   : > { %v2531_v5 = vld [vmem:[#allocation2 + $0x104] sm:$0xff]  ;;  %v2154_v12 = vpack.c.bf16 %v2134_v2, %v2133_v50 }
  0xea   : > { %v10872_v13 = vpack.c.bf16 %v2532_v6, %v2531_v5  ;;  %v569_v50 = vld [vmem:[#allocation6 + $0x38] sm:$0xff]  ;;  %v567_v6 = vld [vmem:[#allocation6 + $0x28] sm:$0xff] }
  0xec   : > { %9343 = vmatmul.mubr.msk.bf16.gmra.mrb[76].mxu0 %vm347_vm0, %v2142_v3  ;;  %v2152_v3 = vpack.c.bf16 %v2130_v53, %v2129_v25 }
  0xed   : > { %9381 = vmatmul.mubr.msk.bf16.gmra.mrb[76].mxu1 %vm347_vm0, %v10812_v61  ;;  %9346 = vmatprep.mubr.msk.bf16.mxu0 %vm347_vm0, %v2143_v62  ;;  %v10862_v62 = vpack.c.bf16 %v2528_v57, %v2527_v55  ;;  %v568_v57 = vld [vmem:[#allocation6 + $0x30] sm:$0xff] }
  0xee   : > { %9384 = vmatprep.mubr.msk.bf16.mxu1 %vm347_vm0, %v10814_v63 }
  0xf4   : > { %9347 = vmatmul.mubr.msk.bf16.gmra.mrb[80].mxu0 %vm347_vm0, %v2144_v8  ;;  %v2533_v8 = vld [vmem:[#allocation2 + $0x114] sm:$0xff] }
  0xf5   : > { %9385 = vmatmul.mubr.msk.bf16.gmra.mrb[80].mxu1 %vm347_vm0, %v10822_v9  ;;  %9350 = vmatprep.mubr.msk.bf16.mxu0 %vm347_vm0, %v2145_v10  ;;  %v2534_v10 = vld [vmem:[#allocation2 + $0x11c] sm:$0xff] }
  0xf6   : > { %9388 = vmatprep.mubr.msk.bf16.mxu1 %vm347_vm0, %v10824_v11  ;;  %v10874_v15 = vpack.c.bf16 %v2534_v10, %v2533_v8 }
  0xfc   : > { %9351 = vmatmul.mubr.msk.bf16.gmra.mrb[84].mxu0 %vm347_vm0, %v2146_v20  ;;  %v3297_v20 = vld [vmem:[#allocation2 + $0x25] sm:$0xff] }
  0xfd   : > { %9389 = vmatmul.mubr.msk.bf16.gmra.mrb[84].mxu1 %vm347_vm0, %v10832_v21  ;;  %9354 = vmatprep.mubr.msk.bf16.mxu0 %vm347_vm0, %v2147_v22  ;;  %v3298_v22 = vld [vmem:[#allocation2 + $0x2d] sm:$0xff] }
  0xfe   : > { %9392 = vmatprep.mubr.msk.bf16.mxu1 %vm347_vm0, %v10834_v23  ;;  %v3333_v27 = vpack.c.bf16 %v3298_v22, %v3297_v20 }
 0x104   : > { %9355 = vmatmul.mubr.msk.bf16.gmra.mrb[88].mxu0 %vm347_vm0, %v2148_v33  ;;  %v565_v33 = vld [vmem:[#allocation6 + $0x18] sm:$0xff] }
 0x105   : > { %9393 = vmatmul.mubr.msk.bf16.gmra.mrb[88].mxu1 %vm347_vm0, %v10842_v34  ;;  %9358 = vmatprep.mubr.msk.bf16.mxu0 %vm347_vm0, %v2149_v35 }
 0x106   : > { %9396 = vmatprep.mubr.msk.bf16.mxu1 %vm347_vm0, %v10844_v36 }
 0x10c   : > { %9359 = vmatmul.mubr.msk.bf16.gmra.mrb[92].mxu0 %vm347_vm0, %v2150_v46 }
 0x10d   : > { %9397 = vmatmul.mubr.msk.bf16.gmra.mrb[92].mxu1 %vm347_vm0, %v10852_v47  ;;  %9362 = vmatprep.mubr.msk.bf16.mxu0 %vm347_vm0, %v2151_v49 }
 0x10e   : > { %9400 = vmatprep.mubr.msk.bf16.mxu1 %vm347_vm0, %v10854_v51 }
 0x114   : > { %9363 = vmatmul.mubr.msk.bf16.gmra.mrb[96].mxu0 %vm347_vm0, %v2152_v3  ;;  %v3305_v3 = vld [vmem:[#allocation2 + $0x65] sm:$0xff] }
 0x115   : > { %9401 = vmatmul.mubr.msk.bf16.gmra.mrb[96].mxu1 %vm347_vm0, %v10862_v62  ;;  %9366 = vmatprep.mubr.msk.bf16.mxu0 %vm347_vm0, %v2153_v45  ;;  %v3306_v45 = vld [vmem:[#allocation2 + $0x6d] sm:$0xff] }
 0x116   : > { %9404 = vmatprep.mubr.msk.bf16.mxu1 %vm347_vm0, %v10864_v1 }
 0x11c   : > { %9367 = vmatmul.mubr.msk.bf16.gmra.mrb[100].mxu0 %vm347_vm0, %v2154_v12 }
 0x11d   : > { %9405 = vmatmul.mubr.msk.bf16.gmra.mrb[100].mxu1 %vm347_vm0, %v10872_v13  ;;  %9370 = vmatprep.mubr.msk.bf16.mxu0 %vm347_vm0, %v2155_v14  ;;  %v3337_v14 = vpack.c.bf16 %v3306_v45, %v3305_v3 }
 0x11e   : > { %9408 = vmatprep.mubr.msk.bf16.mxu1 %vm347_vm0, %v10874_v15 }
 0x124   : > { %9371 = vmatmul.mubr.msk.bf16.gmra.mrb[104].mxu0 %vm347_vm0, %v2156_v24 }
 0x125   : > { %9409 = vmatmul.mubr.msk.bf16.gmra.mrb[104].mxu1 %vm347_vm0, %v10882_v26  ;;  %9414 = vmatprep.mubr.msk.bf16.mxu0 %vm347_vm0, %v10792_v48 }
 0x126   : > { %9452 = vmatprep.mubr.msk.bf16.mxu1 %vm347_vm0, %v3333_v27 }
 0x127   : > { %v9188_v32 = vpop.f32.mrb[0].mxu0 }
 0x128   : > { %v9226_v35 = vpop.f32.mrb[0].mxu1  ;;  %v839_v39 = vadd.f32 %v9188_v32, %v564_v28  ;;  %v694_v40 = vpop.f32.mrb[1].mxu0  ;;  %v3307_v32 = vld [vmem:[#allocation2 + $0x75] sm:$0xff] }
 0x129   : > { %v1092_v42 = vpop.f32.mrb[1].mxu1  ;;  %v837_v44 = vadd.f32 %v694_v40, %v562_v31  ;;  %v9189_v46 = vpop.f32.mrb[2].mxu0  ;;  %v572_v31 = vld [vmem:[#allocation6 + $0x50] sm:$0xff] }
 0x12a   : > { %v9227_v49 = vpop.f32.mrb[2].mxu1  ;;  %875 = vst.msk [vmem:[#allocation6 + $0x10] sm:$0xff] %vm471_vm3, %v839_v39  ;;  %v840_v48 = vadd.f32 %v9189_v46, %v565_v33  ;;  %v697_v25 = vpop.f32.mrb[3].mxu0  ;;  %v3308_v33 = vld [vmem:[#allocation2 + $0x7d] sm:$0xff]  ;;  %v573_v39 = vld [vmem:[#allocation6 + $0x58] sm:$0xff] }
 0x12b   : > { %v1095_v53 = vpop.f32.mrb[3].mxu1  ;;  %873 = vst.msk [vmem:[#allocation6] sm:$0xff] %vm471_vm3, %v837_v44  ;;  %v838_v55 = vadd.f32 %v697_v25, %v563_v41  ;;  %v3338_v46 = vpack.c.bf16 %v3308_v33, %v3307_v32 }
 0x12c   : > { %876 = vst.msk [vmem:[#allocation6 + $0x18] sm:$0xff] %vm471_vm3, %v840_v48  ;;  %9415 = vmatmul.mubr.msk.bf16.vlgmr.msra.gmra.mrb[108].mxu0 %vm347_vm0, %v10797_v52 }
 0x12d   : > { %9453 = vmatmul.mubr.msk.bf16.vlgmr.msra.gmra.mrb[108].mxu1 %vm347_vm0, %v3334_v43  ;;  %874 = vst.msk [vmem:[#allocation6 + $0x8] sm:$0xff] %vm471_vm3, %v838_v55  ;;  %9489 = vmatpush3.bf16.msra.mxu0 %v10800_v56  ;;  %v571_v43 = vld [vmem:[#allocation6 + $0x48] sm:$0xff] }
 0x12e   : > { %9418 = vmatprep.mubr.msk.bf16.mxu0 %vm347_vm0, %v10812_v61  ;;  %9456 = vmatprep.mubr.msk.bf16.mxu1 %vm347_vm0, %v3335_v54 }
 0x12f   : > { %9570 = vmatprep.subr.bf16.mxu0 %v10271_v0  ;;  %v9192_v52 = vpop.f32.mrb[4].mxu0 }
 0x130   : > { %v9230_v2 = vpop.f32.mrb[4].mxu1  ;;  %v843_v4 = vadd.f32 %v9192_v52, %v568_v57  ;;  %v710_v5 = vpop.f32.mrb[5].mxu0 }
 0x131   : > { %v1108_v56 = vpop.f32.mrb[5].mxu1  ;;  %v841_v8 = vadd.f32 %v710_v5, %v566_v60  ;;  %v9193_v10 = vpop.f32.mrb[6].mxu0  ;;  %v965_v61 = vld [vmem:[#allocation6 + $0x10] sm:$0xff]  ;;  %v3311_v5 = vld [vmem:[#allocation2 + $0x95] sm:$0xff] }
 0x132   : > { %v9231_v12 = vpop.f32.mrb[6].mxu1  ;;  %879 = vst.msk [vmem:[#allocation6 + $0x30] sm:$0xff] %vm471_vm3, %v843_v4  ;;  %v844_v16 = vadd.f32 %v9193_v10, %v569_v50  ;;  %v1237_v17 = vadd.f32 %v9226_v35, %v965_v61  ;;  %v713_v18 = vpop.f32.mrb[7].mxu0  ;;  %v963_v19 = vld [vmem:[#allocation6] sm:$0xff]  ;;  %v576_v4 = vld [vmem:[#allocation6 + $0x70] sm:$0xff]  ;;  %v577_v10 = vld [vmem:[#allocation6 + $0x78] sm:$0xff] }
 0x133   : > { %v1111_v20 = vpop.f32.mrb[7].mxu1  ;;  %877 = vst.msk [vmem:[#allocation6 + $0x20] sm:$0xff] %vm471_vm3, %v841_v8  ;;  %v842_v22 = vadd.f32 %v713_v18, %v567_v6  ;;  %v1235_v24 = vadd.f32 %v1092_v42, %v963_v19  ;;  %v966_v27 = vld [vmem:[#allocation6 + $0x18] sm:$0xff]  ;;  %v570_v35 = vld [vmem:[#allocation6 + $0x40] sm:$0xff]  ;;  %v3312_v6 = vld [vmem:[#allocation2 + $0x9d] sm:$0xff] }
 0x134   : > { %880 = vst.msk [vmem:[#allocation6 + $0x38] sm:$0xff] %vm471_vm3, %v844_v16  ;;  %1273 = vst.msk [vmem:[#allocation6 + $0x10] sm:$0xff] %vm471_vm3, %v1237_v17  ;;  %v1238_v28 = vadd.f32 %v9227_v49, %v966_v27  ;;  %v964_v29 = vld [vmem:[#allocation6 + $0x8] sm:$0xff]  ;;  %9419 = vmatmul.mubr.msk.bf16.gmra.mrb[112].mxu0 %vm347_vm0, %v10814_v63  ;;  %v3310_v63 = vld [vmem:[#allocation2 + $0x8d] sm:$0xff]  ;;  %v3340_v18 = vpack.c.bf16 %v3312_v6, %v3311_v5 }
 0x135   : > { %9457 = vmatmul.mubr.msk.bf16.gmra.mrb[112].mxu1 %vm347_vm0, %v3336_v7  ;;  %878 = vst.msk [vmem:[#allocation6 + $0x28] sm:$0xff] %vm471_vm3, %v842_v22  ;;  %1271 = vst.msk [vmem:[#allocation6] sm:$0xff] %vm471_vm3, %v1235_v24  ;;  %v1236_v30 = vadd.f32 %v1095_v53, %v964_v29  ;;  %9422 = vmatprep.mubr.msk.bf16.mxu0 %vm347_vm0, %v10822_v9  ;;  %v3339_v53 = vpack.c.bf16 %v3310_v63, %v3309_v37  ;;  %v3313_v7 = vld [vmem:[#allocation2 + $0xa5] sm:$0xff]  ;;  %v575_v16 = vld [vmem:[#allocation6 + $0x68] sm:$0xff] }
 0x136   : > { %9460 = vmatprep.mubr.msk.bf16.mxu1 %vm347_vm0, %v3337_v14  ;;  %1274 = vst.msk [vmem:[#allocation6 + $0x18] sm:$0xff] %vm471_vm3, %v1238_v28 }
 0x137   : > { %1272 = vst.msk [vmem:[#allocation6 + $0x8] sm:$0xff] %vm471_vm3, %v1236_v30  ;;  %v9196_v38 = vpop.f32.mrb[8].mxu0 }
 0x138   : > { %v9234_v40 = vpop.f32.mrb[8].mxu1  ;;  %v847_v41 = vadd.f32 %v9196_v38, %v572_v31  ;;  %v726_v42 = vpop.f32.mrb[9].mxu0 }
 0x139   : > { %v1124_v44 = vpop.f32.mrb[9].mxu1  ;;  %v845_v9 = vadd.f32 %v726_v42, %v570_v35  ;;  %v9197_v49 = vpop.f32.mrb[10].mxu0  ;;  %v969_v48 = vld [vmem:[#allocation6 + $0x30] sm:$0xff]  ;;  %v578_v42 = vld [vmem:[#allocation6 + $0x80] sm:$0xff] }
 0x13a   : > { %v9235_v25 = vpop.f32.mrb[10].mxu1  ;;  %883 = vst.msk [vmem:[#allocation6 + $0x50] sm:$0xff] %vm471_vm3, %v847_v41  ;;  %v848_v54 = vadd.f32 %v9197_v49, %v573_v39  ;;  %v1241_v55 = vadd.f32 %v9230_v2, %v969_v48  ;;  %v729_v57 = vpop.f32.mrb[11].mxu0  ;;  %v967_v58 = vld [vmem:[#allocation6 + $0x20] sm:$0xff]  ;;  %v580_v39 = vld [vmem:[#allocation6 + $0x90] sm:$0xff] }
 0x13b   : > { %v1127_v59 = vpop.f32.mrb[11].mxu1  ;;  %881 = vst.msk [vmem:[#allocation6 + $0x40] sm:$0xff] %vm471_vm3, %v845_v9  ;;  %v846_v60 = vadd.f32 %v729_v57, %v571_v43  ;;  %v1239_v3 = vadd.f32 %v1108_v56, %v967_v58  ;;  %v970_v45 = vld [vmem:[#allocation6 + $0x38] sm:$0xff]  ;;  %v574_v56 = vld [vmem:[#allocation6 + $0x60] sm:$0xff]  ;;  %v3316_v41 = vld [vmem:[#allocation2 + $0xbd] sm:$0xff] }
 0x13c   : > { %884 = vst.msk [vmem:[#allocation6 + $0x58] sm:$0xff] %vm471_vm3, %v848_v54  ;;  %1277 = vst.msk [vmem:[#allocation6 + $0x30] sm:$0xff] %vm471_vm3, %v1241_v55  ;;  %v1242_v52 = vadd.f32 %v9231_v12, %v970_v45  ;;  %v968_v50 = vld [vmem:[#allocation6 + $0x28] sm:$0xff]  ;;  %9423 = vmatmul.mubr.msk.bf16.gmra.mrb[116].mxu0 %vm347_vm0, %v10824_v11  ;;  %v3314_v11 = vld [vmem:[#allocation2 + $0xad] sm:$0xff] }
 0x13d   : > { %9461 = vmatmul.mubr.msk.bf16.gmra.mrb[116].mxu1 %vm347_vm0, %v3338_v46  ;;  %882 = vst.msk [vmem:[#allocation6 + $0x48] sm:$0xff] %vm471_vm3, %v846_v60  ;;  %1275 = vst.msk [vmem:[#allocation6 + $0x20] sm:$0xff] %vm471_vm3, %v1239_v3  ;;  %v1240_v2 = vadd.f32 %v1111_v20, %v968_v50  ;;  %9426 = vmatprep.mubr.msk.bf16.mxu0 %vm347_vm0, %v10832_v21  ;;  %v3341_v24 = vpack.c.bf16 %v3314_v11, %v3313_v7  ;;  %v3317_v43 = vld [vmem:[#allocation2 + $0xc5] sm:$0xff]  ;;  %v3319_v11 = vld [vmem:[#allocation2 + $0xd5] sm:$0xff] }
 0x13e   : > { %9464 = vmatprep.mubr.msk.bf16.mxu1 %vm347_vm0, %v3339_v53  ;;  %1278 = vst.msk [vmem:[#allocation6 + $0x38] sm:$0xff] %vm471_vm3, %v1242_v52  ;;  %v581_v9 = vld [vmem:[#allocation6 + $0x98] sm:$0xff]  ;;  %v579_v53 = vld [vmem:[#allocation6 + $0x88] sm:$0xff]  ;;  %v584_v7 = vld [vmem:[#allocation6 + $0xb0] sm:$0xff] }
 0x13f   : > { %1276 = vst.msk [vmem:[#allocation6 + $0x28] sm:$0xff] %vm471_vm3, %v1240_v2  ;;  %v9200_v8 = vpop.f32.mrb[12].mxu0 }
 0x140   : > { %v9238_v61 = vpop.f32.mrb[12].mxu1  ;;  %v851_v12 = vadd.f32 %v9200_v8, %v576_v4  ;;  %v742_v14 = vpop.f32.mrb[13].mxu0  ;;  %v3320_v8 = vld [vmem:[#allocation2 + $0xdd] sm:$0xff] }
 0x141   : > { %v1140_v17 = vpop.f32.mrb[13].mxu1  ;;  %v849_v21 = vadd.f32 %v742_v14, %v574_v56  ;;  %v9201_v19 = vpop.f32.mrb[14].mxu0  ;;  %v973_v20 = vld [vmem:[#allocation6 + $0x50] sm:$0xff] }
 0x142   : > { %v9239_v22 = vpop.f32.mrb[14].mxu1  ;;  %887 = vst.msk [vmem:[#allocation6 + $0x70] sm:$0xff] %vm471_vm3, %v851_v12  ;;  %v852_v27 = vadd.f32 %v9201_v19, %v577_v10  ;;  %v1245_v28 = vadd.f32 %v9234_v40, %v973_v20  ;;  %v745_v29 = vpop.f32.mrb[15].mxu0  ;;  %v971_v30 = vld [vmem:[#allocation6 + $0x40] sm:$0xff]  ;;  %v3344_v20 = vpack.c.bf16 %v3320_v8, %v3319_v11  ;;  %v592_v8 = vld [vmem:[#allocation6 + $0xf0] sm:$0xff] }
 0x143   : > { %v1143_v31 = vpop.f32.mrb[15].mxu1  ;;  %885 = vst.msk [vmem:[#allocation6 + $0x60] sm:$0xff] %vm471_vm3, %v849_v21  ;;  %v850_v32 = vadd.f32 %v745_v29, %v575_v16  ;;  %v1243_v33 = vadd.f32 %v1124_v44, %v971_v30  ;;  %v974_v35 = vld [vmem:[#allocation6 + $0x58] sm:$0xff]  ;;  %v3315_v40 = vld [vmem:[#allocation2 + $0xb5] sm:$0xff] }
 0x144   : > { %888 = vst.msk [vmem:[#allocation6 + $0x78] sm:$0xff] %vm471_vm3, %v852_v27  ;;  %1281 = vst.msk [vmem:[#allocation6 + $0x50] sm:$0xff] %vm471_vm3, %v1245_v28  ;;  %v1246_v37 = vadd.f32 %v9235_v25, %v974_v35  ;;  %v972_v63 = vld [vmem:[#allocation6 + $0x48] sm:$0xff]  ;;  %9427 = vmatmul.mubr.msk.bf16.gmra.mrb[120].mxu0 %vm347_vm0, %v10834_v23  ;;  %v3318_v23 = vld [vmem:[#allocation2 + $0xcd] sm:$0xff] }
 0x145   : > { %9465 = vmatmul.mubr.msk.bf16.gmra.mrb[120].mxu1 %vm347_vm0, %v3340_v18  ;;  %886 = vst.msk [vmem:[#allocation6 + $0x68] sm:$0xff] %vm471_vm3, %v850_v32  ;;  %1279 = vst.msk [vmem:[#allocation6 + $0x40] sm:$0xff] %vm471_vm3, %v1243_v33  ;;  %v1244_v38 = vadd.f32 %v1127_v59, %v972_v63  ;;  %9430 = vmatprep.mubr.msk.bf16.mxu0 %vm347_vm0, %v10842_v34  ;;  %v3342_v34 = vpack.c.bf16 %v3316_v41, %v3315_v40  ;;  %v582_v10 = vld [vmem:[#allocation6 + $0xa0] sm:$0xff]  ;;  %v585_v16 = vld [vmem:[#allocation6 + $0xb8] sm:$0xff] }
 0x146   : > { %9468 = vmatprep.mubr.msk.bf16.mxu1 %vm347_vm0, %v3341_v24  ;;  %1282 = vst.msk [vmem:[#allocation6 + $0x58] sm:$0xff] %vm471_vm3, %v1246_v37  ;;  %v3343_v58 = vpack.c.bf16 %v3318_v23, %v3317_v43  ;;  %v3322_v12 = vld [vmem:[#allocation2 + $0xed] sm:$0xff]  ;;  %v583_v21 = vld [vmem:[#allocation6 + $0xa8] sm:$0xff] }
 0x147   : > { %1280 = vst.msk [vmem:[#allocation6 + $0x48] sm:$0xff] %vm471_vm3, %v1244_v38  ;;  %v9204_v44 = vpop.f32.mrb[16].mxu0  ;;  %v3323_v43 = vld [vmem:[#allocation2 + $0xf5] sm:$0xff]  ;;  %v3324_v23 = vld [vmem:[#allocation2 + $0xfd] sm:$0xff] }
 0x148   : > { %v9242_v46 = vpop.f32.mrb[16].mxu1  ;;  %v758_v49 = vpop.f32.mrb[17].mxu0  ;;  %v855_v48 = vadd.f32 %v9204_v44, %v580_v39  ;;  %v586_v44 = vld [vmem:[#allocation6 + $0xc0] sm:$0xff] }
 0x149   : > { %v1156_v25 = vpop.f32.mrb[17].mxu1  ;;  %v9205_v54 = vpop.f32.mrb[18].mxu0  ;;  %v853_v55 = vadd.f32 %v758_v49, %v578_v42  ;;  %v977_v59 = vld [vmem:[#allocation6 + $0x70] sm:$0xff]  ;;  %v589_v49 = vld [vmem:[#allocation6 + $0xd8] sm:$0xff] }
 0x14a   : > { %v9243_v57 = vpop.f32.mrb[18].mxu1  ;;  %v761_v60 = vpop.f32.mrb[19].mxu0  ;;  %891 = vst.msk [vmem:[#allocation6 + $0x90] sm:$0xff] %vm471_vm3, %v855_v48  ;;  %v856_v3 = vadd.f32 %v9205_v54, %v581_v9  ;;  %v1249_v52 = vadd.f32 %v9238_v61, %v977_v59  ;;  %v975_v50 = vld [vmem:[#allocation6 + $0x60] sm:$0xff]  ;;  %v3321_v61 = vld [vmem:[#allocation2 + $0xe5] sm:$0xff] }
 0x14b   : > { %v1159_v45 = vpop.f32.mrb[19].mxu1  ;;  %889 = vst.msk [vmem:[#allocation6 + $0x80] sm:$0xff] %vm471_vm3, %v853_v55  ;;  %v854_v2 = vadd.f32 %v761_v60, %v579_v53  ;;  %v1247_v4 = vadd.f32 %v1140_v17, %v975_v50  ;;  %v978_v5 = vld [vmem:[#allocation6 + $0x78] sm:$0xff]  ;;  %v3345_v29 = vpack.c.bf16 %v3322_v12, %v3321_v61  ;;  %v588_v42 = vld [vmem:[#allocation6 + $0xd0] sm:$0xff]  ;;  %v3346_v55 = vpack.c.bf16 %v3324_v23, %v3323_v43  ;;  %v590_v61 = vld [vmem:[#allocation6 + $0xe0] sm:$0xff] }
 0x14c   : > { %9431 = vmatmul.mubr.msk.bf16.gmra.mrb[124].mxu0 %vm347_vm0, %v10844_v36  ;;  %892 = vst.msk [vmem:[#allocation6 + $0x98] sm:$0xff] %vm471_vm3, %v856_v3  ;;  %1285 = vst.msk [vmem:[#allocation6 + $0x70] sm:$0xff] %vm471_vm3, %v1249_v52  ;;  %v1250_v6 = vadd.f32 %v9239_v22, %v978_v5  ;;  %v976_v56 = vld [vmem:[#allocation6 + $0x68] sm:$0xff]  ;;  %v3329_v12 = vld [vmem:[#allocation2 + $0x125] sm:$0xff] }
 0x14d   : > { %9469 = vmatmul.mubr.msk.bf16.gmra.mrb[124].mxu1 %vm347_vm0, %v3342_v34  ;;  %9434 = vmatprep.mubr.msk.bf16.mxu0 %vm347_vm0, %v10852_v47  ;;  %890 = vst.msk [vmem:[#allocation6 + $0x88] sm:$0xff] %vm471_vm3, %v854_v2  ;;  %1283 = vst.msk [vmem:[#allocation6 + $0x60] sm:$0xff] %vm471_vm3, %v1247_v4  ;;  %v1248_v36 = vadd.f32 %v1143_v31, %v976_v56  ;;  %v587_v34 = vld [vmem:[#allocation6 + $0xc8] sm:$0xff] }
 0x14e   : > { %9472 = vmatprep.mubr.msk.bf16.mxu1 %vm347_vm0, %v3343_v58  ;;  %1286 = vst.msk [vmem:[#allocation6 + $0x78] sm:$0xff] %vm471_vm3, %v1250_v6  ;;  %v2934_v43 = vld [vmem:[#allocation2 + $0x13c] sm:$0xff] }
 0x14f   : > { %v9208_v14 = vpop.f32.mrb[20].mxu0  ;;  %1284 = vst.msk [vmem:[#allocation6 + $0x68] sm:$0xff] %vm471_vm3, %v1248_v36  ;;  %v3327_v36 = vld [vmem:[#allocation2 + $0x115] sm:$0xff] }
 0x150   : > { %v9246_v17 = vpop.f32.mrb[20].mxu1  ;;  %v859_v47 = vadd.f32 %v9208_v14, %v584_v7  ;;  %v774_v18 = vpop.f32.mrb[21].mxu0  ;;  %v3331_v23 = vld [vmem:[#allocation2 + $0x135] sm:$0xff] }
 0x151   : > { %v1172_v19 = vpop.f32.mrb[21].mxu1  ;;  %v857_v22 = vadd.f32 %v774_v18, %v582_v10  ;;  %v9209_v24 = vpop.f32.mrb[22].mxu0  ;;  %v981_v27 = vld [vmem:[#allocation6 + $0x90] sm:$0xff] }
 0x152   : > { %v9247_v28 = vpop.f32.mrb[22].mxu1  ;;  %895 = vst.msk [vmem:[#allocation6 + $0xb0] sm:$0xff] %vm471_vm3, %v859_v47  ;;  %v860_v30 = vadd.f32 %v9209_v24, %v585_v16  ;;  %v1253_v31 = vadd.f32 %v9242_v46, %v981_v27  ;;  %v777_v32 = vpop.f32.mrb[23].mxu0  ;;  %v979_v33 = vld [vmem:[#allocation6 + $0x80] sm:$0xff]  ;;  %v3325_v46 = vld [vmem:[#allocation2 + $0x105] sm:$0xff]  ;;  %v3328_v10 = vld [vmem:[#allocation2 + $0x11d] sm:$0xff] }
 0x153   : > { %v1175_v35 = vpop.f32.mrb[23].mxu1  ;;  %893 = vst.msk [vmem:[#allocation6 + $0xa0] sm:$0xff] %vm471_vm3, %v857_v22  ;;  %v858_v37 = vadd.f32 %v777_v32, %v583_v21  ;;  %v1251_v63 = vadd.f32 %v1156_v25, %v979_v33  ;;  %v982_v38 = vld [vmem:[#allocation6 + $0x98] sm:$0xff]  ;;  %v591_v21 = vld [vmem:[#allocation6 + $0xe8] sm:$0xff] }
 0x154   : > { %896 = vst.msk [vmem:[#allocation6 + $0xb8] sm:$0xff] %vm471_vm3, %v860_v30  ;;  %1289 = vst.msk [vmem:[#allocation6 + $0x90] sm:$0xff] %vm471_vm3, %v1253_v31  ;;  %v1254_v39 = vadd.f32 %v9243_v57, %v982_v38  ;;  %v980_v40 = vld [vmem:[#allocation6 + $0x88] sm:$0xff]  ;;  %9435 = vmatmul.mubr.msk.bf16.gmra.mrb[128].mxu0 %vm347_vm0, %v10854_v51  ;;  %v3326_v51 = vld [vmem:[#allocation2 + $0x10d] sm:$0xff] }
 0x155   : > { %9473 = vmatmul.mubr.msk.bf16.gmra.mrb[128].mxu1 %vm347_vm0, %v3344_v20  ;;  %894 = vst.msk [vmem:[#allocation6 + $0xa8] sm:$0xff] %vm471_vm3, %v858_v37  ;;  %1287 = vst.msk [vmem:[#allocation6 + $0x80] sm:$0xff] %vm471_vm3, %v1251_v63  ;;  %v1252_v41 = vadd.f32 %v1159_v45, %v980_v40  ;;  %9438 = vmatprep.mubr.msk.bf16.mxu0 %vm347_vm0, %v10862_v62  ;;  %v3347_v60 = vpack.c.bf16 %v3326_v51, %v3325_v46  ;;  %v593_v16 = vld [vmem:[#allocation6 + $0xf8] sm:$0xff]  ;;  %v596_v40 = vld [vmem:[#allocation6 + $0x110] sm:$0xff] }
 0x156   : > { %9476 = vmatprep.mubr.msk.bf16.mxu1 %vm347_vm0, %v3345_v29  ;;  %1290 = vst.msk [vmem:[#allocation6 + $0x98] sm:$0xff] %vm471_vm3, %v1254_v39  ;;  %v3348_v20 = vpack.c.bf16 %v3328_v10, %v3327_v36  ;;  %v3695_v46 = vld [vmem:[#allocation2 + $0x26] sm:$0xff]  ;;  %v3696_v51 = vld [vmem:[#allocation2 + $0x2e] sm:$0xff]  ;;  %v3698_v36 = vld [vmem:[#allocation2 + $0x3e] sm:$0xff] }
 0x157   : > { %1288 = vst.msk [vmem:[#allocation6 + $0x88] sm:$0xff] %vm471_vm3, %v1252_v41  ;;  %v9212_v9 = vpop.f32.mrb[24].mxu0  ;;  %v2933_v41 = vld [vmem:[#allocation2 + $0x134] sm:$0xff]  ;;  %v3699_v10 = vld [vmem:[#allocation2 + $0x46] sm:$0xff] }
 0x158   : > { %v9250_v48 = vpop.f32.mrb[24].mxu1  ;;  %v863_v25 = vadd.f32 %v9212_v9, %v588_v42  ;;  %v790_v53 = vpop.f32.mrb[25].mxu0 }
 0x159   : > { %v1188_v54 = vpop.f32.mrb[25].mxu1  ;;  %v861_v62 = vadd.f32 %v790_v53, %v586_v44  ;;  %v9213_v57 = vpop.f32.mrb[26].mxu0  ;;  %v985_v58 = vld [vmem:[#allocation6 + $0xb0] sm:$0xff] }
 0x15a   : > { %v9251_v59 = vpop.f32.mrb[26].mxu1  ;;  %899 = vst.msk [vmem:[#allocation6 + $0xd0] sm:$0xff] %vm471_vm3, %v863_v25  ;;  %v864_v3 = vadd.f32 %v9213_v57, %v589_v49  ;;  %v1257_v45 = vadd.f32 %v9246_v17, %v985_v58  ;;  %v793_v52 = vpop.f32.mrb[27].mxu0  ;;  %v983_v50 = vld [vmem:[#allocation6 + $0xa0] sm:$0xff]  ;;  %v3332_v44 = vld [vmem:[#allocation2 + $0x13d] sm:$0xff]  ;;  %v597_v49 = vld [vmem:[#allocation6 + $0x118] sm:$0xff] }
 0x15b   : > { %v1191_v2 = vpop.f32.mrb[27].mxu1  ;;  %897 = vst.msk [vmem:[#allocation6 + $0xc0] sm:$0xff] %vm471_vm3, %v861_v62  ;;  %v862_v4 = vadd.f32 %v793_v52, %v587_v34  ;;  %v1255_v5 = vadd.f32 %v1172_v19, %v983_v50  ;;  %v986_v6 = vld [vmem:[#allocation6 + $0xb8] sm:$0xff]  ;;  %v595_v34 = vld [vmem:[#allocation6 + $0x108] sm:$0xff] }
 0x15c   : > { %900 = vst.msk [vmem:[#allocation6 + $0xd8] sm:$0xff] %vm471_vm3, %v864_v3  ;;  %1293 = vst.msk [vmem:[#allocation6 + $0xb0] sm:$0xff] %vm471_vm3, %v1257_v45  ;;  %v1258_v56 = vadd.f32 %v9247_v28, %v986_v6  ;;  %v984_v7 = vld [vmem:[#allocation6 + $0xa8] sm:$0xff]  ;;  %9439 = vmatmul.mubr.msk.bf16.gmra.mrb[132].mxu0 %vm347_vm0, %v10864_v1  ;;  %v3330_v1 = vld [vmem:[#allocation2 + $0x12d] sm:$0xff] }
 0x15d   : > { %9477 = vmatmul.mubr.msk.bf16.gmra.mrb[132].mxu1 %vm347_vm0, %v3346_v55  ;;  %898 = vst.msk [vmem:[#allocation6 + $0xc8] sm:$0xff] %vm471_vm3, %v862_v4  ;;  %1291 = vst.msk [vmem:[#allocation6 + $0xa0] sm:$0xff] %vm471_vm3, %v1255_v5  ;;  %v1256_v11 = vadd.f32 %v1175_v35, %v984_v7  ;;  %9442 = vmatprep.mubr.msk.bf16.mxu0 %vm347_vm0, %v10872_v13  ;;  %v3349_v28 = vpack.c.bf16 %v3330_v1, %v3329_v12  ;;  %v1363_v12 = vld [vmem:[#allocation6 + $0x10] sm:$0xff] }
 0x15e   : > { %9480 = vmatprep.mubr.msk.bf16.mxu1 %vm347_vm0, %v3347_v60  ;;  %1294 = vst.msk [vmem:[#allocation6 + $0xb8] sm:$0xff] %vm471_vm3, %v1258_v56  ;;  %v3350_v55 = vpack.c.bf16 %v3332_v44, %v3331_v23  ;;  %v3731_v60 = vpack.c.bf16 %v3696_v51, %v3695_v46  ;;  %v3704_v23 = vld [vmem:[#allocation2 + $0x6e] sm:$0xff]  ;;  %v1367_v44 = vld [vmem:[#allocation6 + $0x30] sm:$0xff] }
 0x15f   : > { %1292 = vst.msk [vmem:[#allocation6 + $0xa8] sm:$0xff] %vm471_vm3, %v1256_v11  ;;  %v9216_v14 = vpop.f32.mrb[28].mxu0 }
 0x160   : > { %v9254_v17 = vpop.f32.mrb[28].mxu1  ;;  %v867_v47 = vadd.f32 %v9216_v14, %v592_v8  ;;  %v806_v18 = vpop.f32.mrb[29].mxu0  ;;  %v3697_v8 = vld [vmem:[#allocation2 + $0x36] sm:$0xff] }
 0x161   : > { %v1204_v19 = vpop.f32.mrb[29].mxu1  ;;  %v865_v13 = vadd.f32 %v806_v18, %v590_v61  ;;  %v9217_v22 = vpop.f32.mrb[30].mxu0  ;;  %v989_v24 = vld [vmem:[#allocation6 + $0xd0] sm:$0xff]  ;;  %v3700_v61 = vld [vmem:[#allocation2 + $0x4e] sm:$0xff]  ;;  %v3732_v18 = vpack.c.bf16 %v3698_v36, %v3697_v8 }
 0x162   : > { %v9255_v27 = vpop.f32.mrb[30].mxu1  ;;  %903 = vst.msk [vmem:[#allocation6 + $0xf0] sm:$0xff] %vm471_vm3, %v867_v47  ;;  %v868_v29 = vadd.f32 %v9217_v22, %v593_v16  ;;  %v1261_v30 = vadd.f32 %v9250_v48, %v989_v24  ;;  %v809_v31 = vpop.f32.mrb[31].mxu0  ;;  %v987_v32 = vld [vmem:[#allocation6 + $0xc0] sm:$0xff]  ;;  %v1371_v36 = vld [vmem:[#allocation6 + $0x50] sm:$0xff] }
 0x163   : > { %v1207_v33 = vpop.f32.mrb[31].mxu1  ;;  %901 = vst.msk [vmem:[#allocation6 + $0xe0] sm:$0xff] %vm471_vm3, %v865_v13  ;;  %v866_v35 = vadd.f32 %v809_v31, %v591_v21  ;;  %v1259_v37 = vadd.f32 %v1188_v54, %v987_v32  ;;  %v990_v63 = vld [vmem:[#allocation6 + $0xd8] sm:$0xff]  ;;  %v2952_v54 = vpack.c.bf16 %v2934_v43, %v2933_v41  ;;  %v1362_v31 = vld [vmem:[#allocation6 + $0x8] sm:$0xff] }
 0x164   : > { %904 = vst.msk [vmem:[#allocation6 + $0xf8] sm:$0xff] %vm471_vm3, %v868_v29  ;;  %1297 = vst.msk [vmem:[#allocation6 + $0xd0] sm:$0xff] %vm471_vm3, %v1261_v30  ;;  %v1262_v38 = vadd.f32 %v9251_v59, %v990_v63  ;;  %v988_v39 = vld [vmem:[#allocation6 + $0xc8] sm:$0xff]  ;;  %9443 = vmatmul.mubr.msk.bf16.gmra.mrb[136].mxu0 %vm347_vm0, %v10874_v15  ;;  %v594_v15 = vld [vmem:[#allocation6 + $0x100] sm:$0xff] }
 0x165   : > { %9481 = vmatmul.mubr.msk.bf16.gmra.mrb[136].mxu1 %vm347_vm0, %v3348_v20  ;;  %902 = vst.msk [vmem:[#allocation6 + $0xe8] sm:$0xff] %vm471_vm3, %v866_v35  ;;  %1295 = vst.msk [vmem:[#allocation6 + $0xc0] sm:$0xff] %vm471_vm3, %v1259_v37  ;;  %v1260_v42 = vadd.f32 %v1191_v2, %v988_v39  ;;  %9446 = vmatprep.mubr.msk.bf16.mxu0 %vm347_vm0, %v10882_v26  ;;  %v1364_v13 = vld [vmem:[#allocation6 + $0x18] sm:$0xff]  ;;  %v3701_v41 = vld [vmem:[#allocation2 + $0x56] sm:$0xff] }
 0x166   : > { %9484 = vmatprep.mubr.msk.bf16.mxu1 %vm347_vm0, %v3349_v28  ;;  %1298 = vst.msk [vmem:[#allocation6 + $0xd8] sm:$0xff] %vm471_vm3, %v1262_v38  ;;  %v3703_v43 = vld [vmem:[#allocation2 + $0x66] sm:$0xff]  ;;  %v3708_v8 = vld [vmem:[#allocation2 + $0x8e] sm:$0xff] }
 0x167   : > { %1296 = vst.msk [vmem:[#allocation6 + $0xc8] sm:$0xff] %vm471_vm3, %v1260_v42  ;;  %v9220_v9 = vpop.f32.mrb[32].mxu0  ;;  %v3702_v42 = vld [vmem:[#allocation2 + $0x5e] sm:$0xff] }
 0x168   : > { %v9258_v48 = vpop.f32.mrb[32].mxu1  ;;  %v871_v25 = vadd.f32 %v9220_v9, %v596_v40  ;;  %v822_v53 = vpop.f32.mrb[33].mxu0  ;;  %v1365_v9 = vld [vmem:[#allocation6 + $0x20] sm:$0xff] }
 0x169   : > { %v1220_v26 = vpop.f32.mrb[33].mxu1  ;;  %v869_v62 = vadd.f32 %v822_v53, %v594_v15  ;;  %v9221_v57 = vpop.f32.mrb[34].mxu0  ;;  %v993_v58 = vld [vmem:[#allocation6 + $0xf0] sm:$0xff] }
 0x16a   : > { %v9259_v59 = vpop.f32.mrb[34].mxu1  ;;  %907 = vst.msk [vmem:[#allocation6 + $0x110] sm:$0xff] %vm471_vm3, %v871_v25  ;;  %v872_v3 = vadd.f32 %v9221_v57, %v597_v49  ;;  %v1265_v45 = vadd.f32 %v9254_v17, %v993_v58  ;;  %v825_v52 = vpop.f32.mrb[35].mxu0  ;;  %v991_v50 = vld [vmem:[#allocation6 + $0xe0] sm:$0xff] }
 0x16b   : > { %v1223_v2 = vpop.f32.mrb[35].mxu1  ;;  %905 = vst.msk [vmem:[#allocation6 + $0x100] sm:$0xff] %vm471_vm3, %v869_v62  ;;  %v870_v4 = vadd.f32 %v825_v52, %v595_v34  ;;  %v1263_v5 = vadd.f32 %v1204_v19, %v991_v50  ;;  %v994_v6 = vld [vmem:[#allocation6 + $0xf8] sm:$0xff]  ;;  %v1361_v17 = vld [vmem:[#allocation6] sm:$0xff]  ;;  %v3735_v62 = vpack.c.bf16 %v3704_v23, %v3703_v43 }
 0x16c   : > { %908 = vst.msk [vmem:[#allocation6 + $0x118] sm:$0xff] %vm471_vm3, %v872_v3  ;;  %1301 = vst.msk [vmem:[#allocation6 + $0xf0] sm:$0xff] %vm471_vm3, %v1265_v45  ;;  %v1266_v56 = vadd.f32 %v9255_v27, %v994_v6  ;;  %v992_v7 = vld [vmem:[#allocation6 + $0xe8] sm:$0xff]  ;;  %9447 = vmatmul.mubr.msk.bf16.gmra.mrb[140].mxu0 %vm347_vm0, %v2952_v54  ;;  %v3733_v27 = vpack.c.bf16 %v3700_v61, %v3699_v10  ;;  %v1368_v34 = vld [vmem:[#allocation6 + $0x38] sm:$0xff] }
 0x16d   : > { %9485 = vmatmul.mubr.msk.bf16.gmra.mrb[140].mxu1 %vm347_vm0, %v3350_v55  ;;  %906 = vst.msk [vmem:[#allocation6 + $0x108] sm:$0xff] %vm471_vm3, %v870_v4  ;;  %1299 = vst.msk [vmem:[#allocation6 + $0xe0] sm:$0xff] %vm471_vm3, %v1263_v5  ;;  %v1264_v11 = vadd.f32 %v1207_v33, %v992_v7  ;;  %9490 = vmatprep.mubr.msk.bf16.mxu0 %vm347_vm0, %v3731_v60  ;;  %v3706_v7 = vld [vmem:[#allocation2 + $0x7e] sm:$0xff] }
 0x16e   : > { %1302 = vst.msk [vmem:[#allocation6 + $0xf8] sm:$0xff] %vm471_vm3, %v1266_v56  ;;  %v3705_v56 = vld [vmem:[#allocation2 + $0x76] sm:$0xff]  ;;  %9528 = vmatprep.mubr.msk.bf16.mxu1 %vm10273_vm4, %v10271_v0 }
 0x16f   : > { %1300 = vst.msk [vmem:[#allocation6 + $0xe8] sm:$0xff] %vm471_vm3, %v1264_v11  ;;  %v9264_v1 = vpop.f32.mrb[36].mxu0  ;;  %v3707_v11 = vld [vmem:[#allocation2 + $0x86] sm:$0xff] }
 0x170   : > { %v9302_v14 = vpop.f32.mrb[36].mxu1  ;;  %v1635_v16 = vadd.f32 %v9264_v1, %v1363_v12  ;;  %v1490_v47 = vpop.f32.mrb[37].mxu0  ;;  %v1369_v1 = vld [vmem:[#allocation6 + $0x40] sm:$0xff] }
 0x171   : > { %v1888_v21 = vpop.f32.mrb[37].mxu1  ;;  %v1633_v19 = vadd.f32 %v1490_v47, %v1361_v17  ;;  %v997_v20 = vld [vmem:[#allocation6 + $0x110] sm:$0xff]  ;;  %v9265_v22 = vpop.f32.mrb[38].mxu0 }
 0x172   : > { %v9303_v24 = vpop.f32.mrb[38].mxu1  ;;  %1671 = vst.msk [vmem:[#allocation6 + $0x10] sm:$0xff] %vm471_vm3, %v1635_v16  ;;  %v1269_v28 = vadd.f32 %v9258_v48, %v997_v20  ;;  %v1636_v29 = vadd.f32 %v9265_v22, %v1364_v13  ;;  %v995_v30 = vld [vmem:[#allocation6 + $0x100] sm:$0xff]  ;;  %v1493_v32 = vpop.f32.mrb[39].mxu0  ;;  %v3734_v48 = vpack.c.bf16 %v3702_v42, %v3701_v41  ;;  %v3736_v16 = vpack.c.bf16 %v3706_v7, %v3705_v56  ;;  %v1375_v42 = vld [vmem:[#allocation6 + $0x70] sm:$0xff] }
 0x173   : > { %v1891_v33 = vpop.f32.mrb[39].mxu1  ;;  %1669 = vst.msk [vmem:[#allocation6] sm:$0xff] %vm471_vm3, %v1633_v19  ;;  %v1267_v35 = vadd.f32 %v1220_v26, %v995_v30  ;;  %v1634_v37 = vadd.f32 %v1493_v32, %v1362_v31  ;;  %v998_v63 = vld [vmem:[#allocation6 + $0x118] sm:$0xff]  ;;  %v3737_v13 = vpack.c.bf16 %v3708_v8, %v3707_v11  ;;  %v1379_v7 = vld [vmem:[#allocation6 + $0x90] sm:$0xff] }
 0x174   : > { %1305 = vst.msk [vmem:[#allocation6 + $0x110] sm:$0xff] %vm471_vm3, %v1269_v28  ;;  %1672 = vst.msk [vmem:[#allocation6 + $0x18] sm:$0xff] %vm471_vm3, %v1636_v29  ;;  %v1270_v38 = vadd.f32 %v9259_v59, %v998_v63  ;;  %v996_v39 = vld [vmem:[#allocation6 + $0x108] sm:$0xff]  ;;  %9491 = vmatmul.mubr.msk.bf16.vlgmr.msra.gmra.mrb[144].mxu0 %vm347_vm0, %v3732_v18  ;;  %v1372_v18 = vld [vmem:[#allocation6 + $0x58] sm:$0xff] }
 0x175   : > { %1303 = vst.msk [vmem:[#allocation6 + $0x100] sm:$0xff] %vm471_vm3, %v1267_v35  ;;  %1670 = vst.msk [vmem:[#allocation6 + $0x8] sm:$0xff] %vm471_vm3, %v1634_v37  ;;  %v1268_v40 = vadd.f32 %v1223_v2, %v996_v39  ;;  %9494 = vmatprep.mubr.msk.bf16.mxu0 %vm347_vm0, %v3733_v27  ;;  %v1366_v59 = vld [vmem:[#allocation6 + $0x28] sm:$0xff]  ;;  %v3712_v41 = vld [vmem:[#allocation2 + $0xae] sm:$0xff] }
 0x176   : > { %1306 = vst.msk [vmem:[#allocation6 + $0x118] sm:$0xff] %vm471_vm3, %v1270_v38  ;;  %v1370_v27 = vld [vmem:[#allocation6 + $0x48] sm:$0xff]  ;;  %v3716_v56 = vld [vmem:[#allocation2 + $0xce] sm:$0xff] }
 0x177   : > { %1304 = vst.msk [vmem:[#allocation6 + $0x108] sm:$0xff] %vm471_vm3, %v1268_v40  ;;  %v9268_v15 = vpop.f32.mrb[40].mxu0  ;;  %v3709_v38 = vld [vmem:[#allocation2 + $0x96] sm:$0xff]  ;;  %v3710_v39 = vld [vmem:[#allocation2 + $0x9e] sm:$0xff]  ;;  %v3711_v40 = vld [vmem:[#allocation2 + $0xa6] sm:$0xff] }
 0x178   : > { %v9306_v46 = vpop.f32.mrb[40].mxu1  ;;  %v1639_v51 = vadd.f32 %v9268_v15, %v1367_v44  ;;  %v1506_v49 = vpop.f32.mrb[41].mxu0  ;;  %v1373_v15 = vld [vmem:[#allocation6 + $0x60] sm:$0xff] }
 0x179   : > { %v1904_v25 = vpop.f32.mrb[41].mxu1  ;;  %v1637_v53 = vadd.f32 %v1506_v49, %v1365_v9  ;;  %v9269_v54 = vpop.f32.mrb[42].mxu0  ;;  %v1761_v26 = vld [vmem:[#allocation6 + $0x10] sm:$0xff] }
 0x17a   : > { %v9307_v55 = vpop.f32.mrb[42].mxu1  ;;  %1675 = vst.msk [vmem:[#allocation6 + $0x30] sm:$0xff] %vm471_vm3, %v1639_v51  ;;  %v1640_v57 = vadd.f32 %v9269_v54, %v1368_v34  ;;  %v2033_v58 = vadd.f32 %v9302_v14, %v1761_v26  ;;  %v1509_v60 = vpop.f32.mrb[43].mxu0  ;;  %v1759_v3 = vld [vmem:[#allocation6] sm:$0xff]  ;;  %v3738_v51 = vpack.c.bf16 %v3710_v39, %v3709_v38  ;;  %v3739_v54 = vpack.c.bf16 %v3712_v41, %v3711_v40  ;;  %v1383_v39 = vld [vmem:[#allocation6 + $0xb0] sm:$0xff] }
 0x17b   : > { %v1907_v45 = vpop.f32.mrb[43].mxu1  ;;  %1673 = vst.msk [vmem:[#allocation6 + $0x20] sm:$0xff] %vm471_vm3, %v1637_v53  ;;  %v1638_v52 = vadd.f32 %v1509_v60, %v1366_v59  ;;  %v2031_v50 = vadd.f32 %v1888_v21, %v1759_v3  ;;  %v1762_v2 = vld [vmem:[#allocation6 + $0x18] sm:$0xff] }
 0x17c   : > { %1676 = vst.msk [vmem:[#allocation6 + $0x38] sm:$0xff] %vm471_vm3, %v1640_v57  ;;  %2069 = vst.msk [vmem:[#allocation6 + $0x10] sm:$0xff] %vm471_vm3, %v2033_v58  ;;  %v2034_v4 = vadd.f32 %v9303_v24, %v1762_v2  ;;  %v1760_v5 = vld [vmem:[#allocation6 + $0x8] sm:$0xff]  ;;  %9495 = vmatmul.mubr.msk.bf16.gmra.mrb[148].mxu0 %vm347_vm0, %v3734_v48  ;;  %v1376_v48 = vld [vmem:[#allocation6 + $0x78] sm:$0xff] }
 0x17d   : > { %1674 = vst.msk [vmem:[#allocation6 + $0x28] sm:$0xff] %vm471_vm3, %v1638_v52  ;;  %2067 = vst.msk [vmem:[#allocation6] sm:$0xff] %vm471_vm3, %v2031_v50  ;;  %v2032_v6 = vadd.f32 %v1891_v33, %v1760_v5  ;;  %9498 = vmatprep.mubr.msk.bf16.mxu0 %vm347_vm0, %v3735_v62  ;;  %v1374_v62 = vld [vmem:[#allocation6 + $0x68] sm:$0xff]  ;;  %v3720_v38 = vld [vmem:[#allocation2 + $0xee] sm:$0xff] }
 0x17e   : > { %2070 = vst.msk [vmem:[#allocation6 + $0x18] sm:$0xff] %vm471_vm3, %v2034_v4  ;;  %v3713_v4 = vld [vmem:[#allocation2 + $0xb6] sm:$0xff]  ;;  %v3714_v5 = vld [vmem:[#allocation2 + $0xbe] sm:$0xff] }
 0x17f   : > { %2068 = vst.msk [vmem:[#allocation6 + $0x8] sm:$0xff] %vm471_vm3, %v2032_v6  ;;  %v9272_v10 = vpop.f32.mrb[44].mxu0  ;;  %v3715_v6 = vld [vmem:[#allocation2 + $0xc6] sm:$0xff] }
 0x180   : > { %v9310_v61 = vpop.f32.mrb[44].mxu1  ;;  %v1643_v12 = vadd.f32 %v9272_v10, %v1371_v36  ;;  %v1522_v14 = vpop.f32.mrb[45].mxu0  ;;  %v1377_v10 = vld [vmem:[#allocation6 + $0x80] sm:$0xff] }
 0x181   : > { %v1920_v17 = vpop.f32.mrb[45].mxu1  ;;  %v1641_v47 = vadd.f32 %v1522_v14, %v1369_v1  ;;  %v9273_v21 = vpop.f32.mrb[46].mxu0  ;;  %v1765_v19 = vld [vmem:[#allocation6 + $0x30] sm:$0xff] }
 0x182   : > { %v9311_v20 = vpop.f32.mrb[46].mxu1  ;;  %1679 = vst.msk [vmem:[#allocation6 + $0x50] sm:$0xff] %vm471_vm3, %v1643_v12  ;;  %v1644_v22 = vadd.f32 %v9273_v21, %v1372_v18  ;;  %v2037_v24 = vadd.f32 %v9306_v46, %v1765_v19  ;;  %v1525_v28 = vpop.f32.mrb[47].mxu0  ;;  %v1763_v29 = vld [vmem:[#allocation6 + $0x20] sm:$0xff]  ;;  %v3740_v12 = vpack.c.bf16 %v3714_v5, %v3713_v4  ;;  %v3741_v21 = vpack.c.bf16 %v3716_v56, %v3715_v6  ;;  %v1387_v5 = vld [vmem:[#allocation6 + $0xd0] sm:$0xff] }
 0x183   : > { %v1923_v30 = vpop.f32.mrb[47].mxu1  ;;  %1677 = vst.msk [vmem:[#allocation6 + $0x40] sm:$0xff] %vm471_vm3, %v1641_v47  ;;  %v1642_v31 = vadd.f32 %v1525_v28, %v1370_v27  ;;  %v2035_v32 = vadd.f32 %v1904_v25, %v1763_v29  ;;  %v1766_v33 = vld [vmem:[#allocation6 + $0x38] sm:$0xff] }
 0x184   : > { %1680 = vst.msk [vmem:[#allocation6 + $0x58] sm:$0xff] %vm471_vm3, %v1644_v22  ;;  %2073 = vst.msk [vmem:[#allocation6 + $0x30] sm:$0xff] %vm471_vm3, %v2037_v24  ;;  %v2038_v35 = vadd.f32 %v9307_v55, %v1766_v33  ;;  %v1764_v37 = vld [vmem:[#allocation6 + $0x28] sm:$0xff]  ;;  %9499 = vmatmul.mubr.msk.bf16.gmra.mrb[152].mxu0 %vm347_vm0, %v3736_v16  ;;  %v1380_v16 = vld [vmem:[#allocation6 + $0x98] sm:$0xff] }
 0x185   : > { %1678 = vst.msk [vmem:[#allocation6 + $0x48] sm:$0xff] %vm471_vm3, %v1642_v31  ;;  %2071 = vst.msk [vmem:[#allocation6 + $0x20] sm:$0xff] %vm471_vm3, %v2035_v32  ;;  %v2036_v63 = vadd.f32 %v1907_v45, %v1764_v37  ;;  %9502 = vmatprep.mubr.msk.bf16.mxu0 %vm347_vm0, %v3737_v13  ;;  %v1378_v13 = vld [vmem:[#allocation6 + $0x88] sm:$0xff]  ;;  %v3724_v4 = vld [vmem:[#allocation2 + $0x10e] sm:$0xff] }
 0x186   : > { %2074 = vst.msk [vmem:[#allocation6 + $0x38] sm:$0xff] %vm471_vm3, %v2038_v35  ;;  %v3717_v35 = vld [vmem:[#allocation2 + $0xd6] sm:$0xff]  ;;  %v3718_v37 = vld [vmem:[#allocation2 + $0xde] sm:$0xff] }
 0x187   : > { %2072 = vst.msk [vmem:[#allocation6 + $0x28] sm:$0xff] %vm471_vm3, %v2036_v63  ;;  %v9276_v43 = vpop.f32.mrb[48].mxu0  ;;  %v3719_v63 = vld [vmem:[#allocation2 + $0xe6] sm:$0xff] }
 0x188   : > { %v9314_v23 = vpop.f32.mrb[48].mxu1  ;;  %v1647_v44 = vadd.f32 %v9276_v43, %v1375_v42  ;;  %v1538_v46 = vpop.f32.mrb[49].mxu0  ;;  %v1381_v43 = vld [vmem:[#allocation6 + $0xa0] sm:$0xff] }
 0x189   : > { %v1936_v9 = vpop.f32.mrb[49].mxu1  ;;  %v1645_v49 = vadd.f32 %v1538_v46, %v1373_v15  ;;  %v9277_v25 = vpop.f32.mrb[50].mxu0  ;;  %v1769_v53 = vld [vmem:[#allocation6 + $0x50] sm:$0xff] }
 0x18a   : > { %v9315_v34 = vpop.f32.mrb[50].mxu1  ;;  %1683 = vst.msk [vmem:[#allocation6 + $0x70] sm:$0xff] %vm471_vm3, %v1647_v44  ;;  %v1648_v26 = vadd.f32 %v9277_v25, %v1376_v48  ;;  %v2041_v55 = vadd.f32 %v9310_v61, %v1769_v53  ;;  %v1541_v57 = vpop.f32.mrb[51].mxu0  ;;  %v1767_v58 = vld [vmem:[#allocation6 + $0x40] sm:$0xff]  ;;  %v3742_v44 = vpack.c.bf16 %v3718_v37, %v3717_v35  ;;  %v3743_v25 = vpack.c.bf16 %v3720_v38, %v3719_v63  ;;  %v1391_v37 = vld [vmem:[#allocation6 + $0xf0] sm:$0xff] }
 0x18b   : > { %v1939_v59 = vpop.f32.mrb[51].mxu1  ;;  %1681 = vst.msk [vmem:[#allocation6 + $0x60] sm:$0xff] %vm471_vm3, %v1645_v49  ;;  %v1646_v60 = vadd.f32 %v1541_v57, %v1374_v62  ;;  %v2039_v3 = vadd.f32 %v1920_v17, %v1767_v58  ;;  %v1770_v45 = vld [vmem:[#allocation6 + $0x58] sm:$0xff] }
 0x18c   : > { %1684 = vst.msk [vmem:[#allocation6 + $0x78] sm:$0xff] %vm471_vm3, %v1648_v26  ;;  %2077 = vst.msk [vmem:[#allocation6 + $0x50] sm:$0xff] %vm471_vm3, %v2041_v55  ;;  %v2042_v52 = vadd.f32 %v9311_v20, %v1770_v45  ;;  %v1768_v50 = vld [vmem:[#allocation6 + $0x48] sm:$0xff]  ;;  %9503 = vmatmul.mubr.msk.bf16.gmra.mrb[156].mxu0 %vm347_vm0, %v3738_v51  ;;  %v1384_v51 = vld [vmem:[#allocation6 + $0xb8] sm:$0xff] }
 0x18d   : > { %1682 = vst.msk [vmem:[#allocation6 + $0x68] sm:$0xff] %vm471_vm3, %v1646_v60  ;;  %2075 = vst.msk [vmem:[#allocation6 + $0x40] sm:$0xff] %vm471_vm3, %v2039_v3  ;;  %v2040_v2 = vadd.f32 %v1923_v30, %v1768_v50  ;;  %9506 = vmatprep.mubr.msk.bf16.mxu0 %vm347_vm0, %v3739_v54  ;;  %v1382_v54 = vld [vmem:[#allocation6 + $0xa8] sm:$0xff]  ;;  %v3728_v35 = vld [vmem:[#allocation2 + $0x12e] sm:$0xff] }
 0x18e   : > { %2078 = vst.msk [vmem:[#allocation6 + $0x58] sm:$0xff] %vm471_vm3, %v2042_v52  ;;  %v3721_v52 = vld [vmem:[#allocation2 + $0xf6] sm:$0xff]  ;;  %v3722_v50 = vld [vmem:[#allocation2 + $0xfe] sm:$0xff] }
 0x18f   : > { %2076 = vst.msk [vmem:[#allocation6 + $0x48] sm:$0xff] %vm471_vm3, %v2040_v2  ;;  %v9280_v11 = vpop.f32.mrb[52].mxu0  ;;  %v3723_v2 = vld [vmem:[#allocation2 + $0x106] sm:$0xff] }
 0x190   : > { %v9318_v8 = vpop.f32.mrb[52].mxu1  ;;  %v1651_v36 = vadd.f32 %v9280_v11, %v1379_v7  ;;  %v1554_v61 = vpop.f32.mrb[53].mxu0  ;;  %v1385_v11 = vld [vmem:[#allocation6 + $0xc0] sm:$0xff] }
 0x191   : > { %v1952_v1 = vpop.f32.mrb[53].mxu1  ;;  %v1649_v14 = vadd.f32 %v1554_v61, %v1377_v10  ;;  %v9281_v17 = vpop.f32.mrb[54].mxu0  ;;  %v1773_v47 = vld [vmem:[#allocation6 + $0x70] sm:$0xff] }
 0x192   : > { %v9319_v18 = vpop.f32.mrb[54].mxu1  ;;  %1687 = vst.msk [vmem:[#allocation6 + $0x90] sm:$0xff] %vm471_vm3, %v1651_v36  ;;  %v1652_v19 = vadd.f32 %v9281_v17, %v1380_v16  ;;  %v2045_v20 = vadd.f32 %v9314_v23, %v1773_v47  ;;  %v1557_v22 = vpop.f32.mrb[55].mxu0  ;;  %v1771_v24 = vld [vmem:[#allocation6 + $0x60] sm:$0xff]  ;;  %v3744_v36 = vpack.c.bf16 %v3722_v50, %v3721_v52  ;;  %v3745_v17 = vpack.c.bf16 %v3724_v4, %v3723_v2 }
 0x193   : > { %v1955_v27 = vpop.f32.mrb[55].mxu1  ;;  %1685 = vst.msk [vmem:[#allocation6 + $0x80] sm:$0xff] %vm471_vm3, %v1649_v14  ;;  %v1650_v28 = vadd.f32 %v1557_v22, %v1378_v13  ;;  %v2043_v29 = vadd.f32 %v1936_v9, %v1771_v24  ;;  %v1774_v30 = vld [vmem:[#allocation6 + $0x78] sm:$0xff]  ;;  %v1393_v4 = vld [vmem:[#allocation6 + $0x100] sm:$0xff] }
 0x194   : > { %1688 = vst.msk [vmem:[#allocation6 + $0x98] sm:$0xff] %vm471_vm3, %v1652_v19  ;;  %2081 = vst.msk [vmem:[#allocation6 + $0x70] sm:$0xff] %vm471_vm3, %v2045_v20  ;;  %v2046_v31 = vadd.f32 %v9315_v34, %v1774_v30  ;;  %v1772_v32 = vld [vmem:[#allocation6 + $0x68] sm:$0xff]  ;;  %9507 = vmatmul.mubr.msk.bf16.gmra.mrb[160].mxu0 %vm347_vm0, %v3740_v12  ;;  %v1388_v12 = vld [vmem:[#allocation6 + $0xd8] sm:$0xff] }
 0x195   : > { %1686 = vst.msk [vmem:[#allocation6 + $0x88] sm:$0xff] %vm471_vm3, %v1650_v28  ;;  %2079 = vst.msk [vmem:[#allocation6 + $0x60] sm:$0xff] %vm471_vm3, %v2043_v29  ;;  %v2044_v33 = vadd.f32 %v1939_v59, %v1772_v32  ;;  %9510 = vmatprep.mubr.msk.bf16.mxu0 %vm347_vm0, %v3741_v21  ;;  %v1386_v21 = vld [vmem:[#allocation6 + $0xc8] sm:$0xff] }
 0x196   : > { %2082 = vst.msk [vmem:[#allocation6 + $0x78] sm:$0xff] %vm471_vm3, %v2046_v31  ;;  %v3725_v31 = vld [vmem:[#allocation2 + $0x116] sm:$0xff]  ;;  %v3726_v32 = vld [vmem:[#allocation2 + $0x11e] sm:$0xff] }
 0x197   : > { %2080 = vst.msk [vmem:[#allocation6 + $0x68] sm:$0xff] %vm471_vm3, %v2044_v33  ;;  %v9284_v40 = vpop.f32.mrb[56].mxu0  ;;  %v3727_v33 = vld [vmem:[#allocation2 + $0x126] sm:$0xff] }
 0x198   : > { %v9322_v41 = vpop.f32.mrb[56].mxu1  ;;  %v1655_v42 = vadd.f32 %v9284_v40, %v1383_v39  ;;  %v1570_v23 = vpop.f32.mrb[57].mxu0  ;;  %v1389_v40 = vld [vmem:[#allocation6 + $0xe0] sm:$0xff] }
 0x199   : > { %v1968_v15 = vpop.f32.mrb[57].mxu1  ;;  %v1653_v46 = vadd.f32 %v1570_v23, %v1381_v43  ;;  %v9285_v9 = vpop.f32.mrb[58].mxu0  ;;  %v1777_v49 = vld [vmem:[#allocation6 + $0x90] sm:$0xff] }
 0x19a   : > { %v9323_v48 = vpop.f32.mrb[58].mxu1  ;;  %1691 = vst.msk [vmem:[#allocation6 + $0xb0] sm:$0xff] %vm471_vm3, %v1655_v42  ;;  %v1656_v53 = vadd.f32 %v9285_v9, %v1384_v51  ;;  %v2049_v34 = vadd.f32 %v9318_v8, %v1777_v49  ;;  %v1573_v26 = vpop.f32.mrb[59].mxu0  ;;  %v1775_v55 = vld [vmem:[#allocation6 + $0x80] sm:$0xff]  ;;  %v3746_v42 = vpack.c.bf16 %v3726_v32, %v3725_v31  ;;  %v3747_v9 = vpack.c.bf16 %v3728_v35, %v3727_v33  ;;  %v2160_v35 = vld [vmem:[#allocation6 + $0x18] sm:$0xff] }
 0x19b   : > { %v1971_v62 = vpop.f32.mrb[59].mxu1  ;;  %1689 = vst.msk [vmem:[#allocation6 + $0xa0] sm:$0xff] %vm471_vm3, %v1653_v46  ;;  %v1654_v57 = vadd.f32 %v1573_v26, %v1382_v54  ;;  %v2047_v58 = vadd.f32 %v1952_v1, %v1775_v55  ;;  %v1778_v59 = vld [vmem:[#allocation6 + $0x98] sm:$0xff] }
 0x19c   : > { %1692 = vst.msk [vmem:[#allocation6 + $0xb8] sm:$0xff] %vm471_vm3, %v1656_v53  ;;  %2085 = vst.msk [vmem:[#allocation6 + $0x90] sm:$0xff] %vm471_vm3, %v2049_v34  ;;  %v2050_v60 = vadd.f32 %v9319_v18, %v1778_v59  ;;  %v1776_v3 = vld [vmem:[#allocation6 + $0x88] sm:$0xff]  ;;  %9511 = vmatmul.mubr.msk.bf16.gmra.mrb[164].mxu0 %vm347_vm0, %v3742_v44  ;;  %v1392_v44 = vld [vmem:[#allocation6 + $0xf8] sm:$0xff] }
 0x19d   : > { %1690 = vst.msk [vmem:[#allocation6 + $0xa8] sm:$0xff] %vm471_vm3, %v1654_v57  ;;  %2083 = vst.msk [vmem:[#allocation6 + $0x80] sm:$0xff] %vm471_vm3, %v2047_v58  ;;  %v2048_v45 = vadd.f32 %v1955_v27, %v1776_v3  ;;  %9514 = vmatprep.mubr.msk.bf16.mxu0 %vm347_vm0, %v3743_v25  ;;  %v1390_v25 = vld [vmem:[#allocation6 + $0xe8] sm:$0xff] }
 0x19e   : > { %2086 = vst.msk [vmem:[#allocation6 + $0x98] sm:$0xff] %vm471_vm3, %v2050_v60  ;;  %v3729_v60 = vld [vmem:[#allocation2 + $0x136] sm:$0xff]  ;;  %v3730_v3 = vld [vmem:[#allocation2 + $0x13e] sm:$0xff] }
 0x19f   : > { %2084 = vst.msk [vmem:[#allocation6 + $0x88] sm:$0xff] %vm471_vm3, %v2048_v45  ;;  %v9288_v6 = vpop.f32.mrb[60].mxu0  ;;  %v1395_v45 = vld [vmem:[#allocation6 + $0x110] sm:$0xff] }
 0x1a0   : > { %v9326_v56 = vpop.f32.mrb[60].mxu1  ;;  %v1659_v7 = vadd.f32 %v9288_v6, %v1387_v5  ;;  %v1586_v8 = vpop.f32.mrb[61].mxu0  ;;  %v3748_v6 = vpack.c.bf16 %v3730_v3, %v3729_v60 }
 0x1a1   : > { %v1984_v10 = vpop.f32.mrb[61].mxu1  ;;  %v1657_v61 = vadd.f32 %v1586_v8, %v1385_v11  ;;  %v9289_v1 = vpop.f32.mrb[62].mxu0  ;;  %v1781_v14 = vld [vmem:[#allocation6 + $0xb0] sm:$0xff]  ;;  %v1396_v11 = vld [vmem:[#allocation6 + $0x118] sm:$0xff] }
 0x1a2   : > { %v9327_v16 = vpop.f32.mrb[62].mxu1  ;;  %1695 = vst.msk [vmem:[#allocation6 + $0xd0] sm:$0xff] %vm471_vm3, %v1659_v7  ;;  %v1660_v47 = vadd.f32 %v9289_v1, %v1388_v12  ;;  %v2053_v18 = vadd.f32 %v9322_v41, %v1781_v14  ;;  %v1589_v19 = vpop.f32.mrb[63].mxu0  ;;  %v1779_v20 = vld [vmem:[#allocation6 + $0xa0] sm:$0xff]  ;;  %v1394_v1 = vld [vmem:[#allocation6 + $0x108] sm:$0xff] }
 0x1a3   : > { %v1987_v13 = vpop.f32.mrb[63].mxu1  ;;  %1693 = vst.msk [vmem:[#allocation6 + $0xc0] sm:$0xff] %vm471_vm3, %v1657_v61  ;;  %v1658_v22 = vadd.f32 %v1589_v19, %v1386_v21  ;;  %v2051_v24 = vadd.f32 %v1968_v15, %v1779_v20  ;;  %v1782_v27 = vld [vmem:[#allocation6 + $0xb8] sm:$0xff] }
 0x1a4   : > { %1696 = vst.msk [vmem:[#allocation6 + $0xd8] sm:$0xff] %vm471_vm3, %v1660_v47  ;;  %2089 = vst.msk [vmem:[#allocation6 + $0xb0] sm:$0xff] %vm471_vm3, %v2053_v18  ;;  %v2054_v28 = vadd.f32 %v9323_v48, %v1782_v27  ;;  %v1780_v29 = vld [vmem:[#allocation6 + $0xa8] sm:$0xff]  ;;  %9515 = vmatmul.mubr.msk.bf16.gmra.mrb[168].mxu0 %vm347_vm0, %v3744_v36 }
 0x1a5   : > { %1694 = vst.msk [vmem:[#allocation6 + $0xc8] sm:$0xff] %vm471_vm3, %v1658_v22  ;;  %2087 = vst.msk [vmem:[#allocation6 + $0xa0] sm:$0xff] %vm471_vm3, %v2051_v24  ;;  %v2052_v30 = vadd.f32 %v1971_v62, %v1780_v29  ;;  %9518 = vmatprep.mubr.msk.bf16.mxu0 %vm347_vm0, %v3745_v17  ;;  %v2159_v22 = vld [vmem:[#allocation6 + $0x10] sm:$0xff]  ;;  %v2157_v29 = vld [vmem:[#allocation6] sm:$0xff] }
 0x1a6   : > { %2090 = vst.msk [vmem:[#allocation6 + $0xb8] sm:$0xff] %vm471_vm3, %v2054_v28 }
 0x1a7   : > { %2088 = vst.msk [vmem:[#allocation6 + $0xa8] sm:$0xff] %vm471_vm3, %v2052_v30  ;;  %v9292_v63 = vpop.f32.mrb[64].mxu0 }
 0x1a8   : > { %v9330_v38 = vpop.f32.mrb[64].mxu1  ;;  %v1663_v39 = vadd.f32 %v9292_v63, %v1391_v37  ;;  %v1602_v41 = vpop.f32.mrb[65].mxu0 }
 0x1a9   : > { %v2000_v43 = vpop.f32.mrb[65].mxu1  ;;  %v1661_v23 = vadd.f32 %v1602_v41, %v1389_v40  ;;  %v9293_v15 = vpop.f32.mrb[66].mxu0  ;;  %v1785_v46 = vld [vmem:[#allocation6 + $0xd0] sm:$0xff]  ;;  %v2158_v41 = vld [vmem:[#allocation6 + $0x8] sm:$0xff] }
 0x1aa   : > { %v9331_v51 = vpop.f32.mrb[66].mxu1  ;;  %1699 = vst.msk [vmem:[#allocation6 + $0xf0] sm:$0xff] %vm471_vm3, %v1663_v39  ;;  %v1664_v49 = vadd.f32 %v9293_v15, %v1392_v44  ;;  %v2057_v48 = vadd.f32 %v9326_v56, %v1785_v46  ;;  %v1605_v53 = vpop.f32.mrb[67].mxu0  ;;  %v1783_v34 = vld [vmem:[#allocation6 + $0xc0] sm:$0xff] }
 0x1ab   : > { %v2003_v54 = vpop.f32.mrb[67].mxu1  ;;  %1697 = vst.msk [vmem:[#allocation6 + $0xe0] sm:$0xff] %vm471_vm3, %v1661_v23  ;;  %v1662_v26 = vadd.f32 %v1605_v53, %v1390_v25  ;;  %v2055_v55 = vadd.f32 %v1984_v10, %v1783_v34  ;;  %v1786_v62 = vld [vmem:[#allocation6 + $0xd8] sm:$0xff]  ;;  %v9929_v23 = vld [vmem:[%s12005_s3] sm:$0xff]  }
 0x1ac   : > { %1700 = vst.msk [vmem:[#allocation6 + $0xf8] sm:$0xff] %vm471_vm3, %v1664_v49  ;;  %2093 = vst.msk [vmem:[#allocation6 + $0xd0] sm:$0xff] %vm471_vm3, %v2057_v48  ;;  %v2058_v57 = vadd.f32 %v9327_v16, %v1786_v62  ;;  %v1784_v58 = vld [vmem:[#allocation6 + $0xc8] sm:$0xff]  ;;  %9519 = vmatmul.mubr.msk.bf16.gmra.mrb[172].mxu0 %vm347_vm0, %v3746_v42  ;;  %9527 = vmatpush3.bf16.msra.mxu1 %v9929_v23  ;;  %v2163_v48 = vld [vmem:[#allocation6 + $0x30] sm:$0xff] }
 0x1ad   : > { %1698 = vst.msk [vmem:[#allocation6 + $0xe8] sm:$0xff] %vm471_vm3, %v1662_v26  ;;  %2091 = vst.msk [vmem:[#allocation6 + $0xc0] sm:$0xff] %vm471_vm3, %v2055_v55  ;;  %v2056_v59 = vadd.f32 %v1987_v13, %v1784_v58  ;;  %9522 = vmatprep.mubr.msk.bf16.mxu0 %vm347_vm0, %v3747_v9  ;;  %9548 = vmatprep.subr.bf16.mxu1 %v10271_v0  ;;  %v2172_v23 = vld [vmem:[#allocation6 + $0x78] sm:$0xff] }
 0x1ae   : > { %2094 = vst.msk [vmem:[#allocation6 + $0xd8] sm:$0xff] %vm471_vm3, %v2058_v57  ;;  %v2164_v57 = vld [vmem:[#allocation6 + $0x38] sm:$0xff] }
 0x1af   : > { %2092 = vst.msk [vmem:[#allocation6 + $0xc8] sm:$0xff] %vm471_vm3, %v2056_v59  ;;  %v9296_v52 = vpop.f32.mrb[68].mxu0 }
 0x1b0   : > { %v9334_v50 = vpop.f32.mrb[68].mxu1  ;;  %v1667_v2 = vadd.f32 %v9296_v52, %v1395_v45  ;;  %v1618_v5 = vpop.f32.mrb[69].mxu0  ;;  %v2162_v52 = vld [vmem:[#allocation6 + $0x28] sm:$0xff] }
 0x1b1   : > { %v2016_v56 = vpop.f32.mrb[69].mxu1  ;;  %v1665_v7 = vadd.f32 %v1618_v5, %v1393_v4  ;;  %v9297_v8 = vpop.f32.mrb[70].mxu0  ;;  %v1789_v36 = vld [vmem:[#allocation6 + $0xf0] sm:$0xff] }
 0x1b2   : > { %v9335_v10 = vpop.f32.mrb[70].mxu1  ;;  %1703 = vst.msk [vmem:[#allocation6 + $0x110] sm:$0xff] %vm471_vm3, %v1667_v2  ;;  %v1668_v61 = vadd.f32 %v9297_v8, %v1396_v11  ;;  %v2061_v12 = vadd.f32 %v9330_v38, %v1789_v36  ;;  %v1621_v14 = vpop.f32.mrb[71].mxu0  ;;  %v1787_v16 = vld [vmem:[#allocation6 + $0xe0] sm:$0xff]  ;;  %v2167_v36 = vld [vmem:[#allocation6 + $0x50] sm:$0xff] }
 0x1b3   : > { %v2019_v17 = vpop.f32.mrb[71].mxu1  ;;  %1701 = vst.msk [vmem:[#allocation6 + $0x100] sm:$0xff] %vm471_vm3, %v1665_v7  ;;  %v1666_v47 = vadd.f32 %v1621_v14, %v1394_v1  ;;  %v2059_v18 = vadd.f32 %v2000_v43, %v1787_v16  ;;  %v1790_v21 = vld [vmem:[#allocation6 + $0xf8] sm:$0xff]  ;;  %v2165_v1 = vld [vmem:[#allocation6 + $0x40] sm:$0xff] }
 0x1b4   : > { %1704 = vst.msk [vmem:[#allocation6 + $0x118] sm:$0xff] %vm471_vm3, %v1668_v61  ;;  %2097 = vst.msk [vmem:[#allocation6 + $0xf0] sm:$0xff] %vm471_vm3, %v2061_v12  ;;  %v2062_v19 = vadd.f32 %v9331_v51, %v1790_v21  ;;  %v1788_v20 = vld [vmem:[#allocation6 + $0xe8] sm:$0xff]  ;;  %9523 = vmatmul.mubr.msk.bf16.gmra.mrb[176].mxu0 %vm347_vm0, %v3748_v6 }
 0x1b5   : > { %1702 = vst.msk [vmem:[#allocation6 + $0x108] sm:$0xff] %vm471_vm3, %v1666_v47  ;;  %2095 = vst.msk [vmem:[#allocation6 + $0xe0] sm:$0xff] %vm471_vm3, %v2059_v18  ;;  %v2060_v13 = vadd.f32 %v2003_v54, %v1788_v20  ;;  %v2161_v54 = vld [vmem:[#allocation6 + $0x20] sm:$0xff]  ;;  %v2168_v47 = vld [vmem:[#allocation6 + $0x58] sm:$0xff]  ;;  %9572 = vmatprep.mubr.msk.bf16.mxu0 %vm10273_vm4, %v10271_v0 }
 0x1b6   : > { %2098 = vst.msk [vmem:[#allocation6 + $0xf8] sm:$0xff] %vm471_vm3, %v2062_v19 }
 0x1b7   : > { %2096 = vst.msk [vmem:[#allocation6 + $0xe8] sm:$0xff] %vm471_vm3, %v2060_v13  ;;  %v9340_v24 = vpop.f32.mrb[72].mxu0 }
 0x1b8   : > { %v9378_v27 = vpop.f32.mrb[72].mxu1  ;;  %v2431_v28 = vadd.f32 %v9340_v24, %v2159_v22  ;;  %v2286_v30 = vpop.f32.mrb[73].mxu0  ;;  %v2166_v22 = vld [vmem:[#allocation6 + $0x48] sm:$0xff] }
 0x1b9   : > { %v2684_v31 = vpop.f32.mrb[73].mxu1  ;;  %v2429_v32 = vadd.f32 %v2286_v30, %v2157_v29  ;;  %v1793_v33 = vld [vmem:[#allocation6 + $0x110] sm:$0xff]  ;;  %v9341_v37 = vpop.f32.mrb[74].mxu0 }
 0x1ba   : > { %v9379_v63 = vpop.f32.mrb[74].mxu1  ;;  %2467 = vst.msk [vmem:[#allocation6 + $0x10] sm:$0xff] %vm471_vm3, %v2431_v28  ;;  %v2065_v38 = vadd.f32 %v9334_v50, %v1793_v33  ;;  %v2432_v39 = vadd.f32 %v9341_v37, %v2160_v35  ;;  %v1791_v40 = vld [vmem:[#allocation6 + $0x100] sm:$0xff]  ;;  %v2289_v42 = vpop.f32.mrb[75].mxu0  ;;  %v2171_v37 = vld [vmem:[#allocation6 + $0x70] sm:$0xff] }
 0x1bb   : > { %v2687_v43 = vpop.f32.mrb[75].mxu1  ;;  %2465 = vst.msk [vmem:[#allocation6] sm:$0xff] %vm471_vm3, %v2429_v32  ;;  %v2063_v44 = vadd.f32 %v2016_v56, %v1791_v40  ;;  %v2430_v15 = vadd.f32 %v2289_v42, %v2158_v41  ;;  %v1794_v46 = vld [vmem:[#allocation6 + $0x118] sm:$0xff]  ;;  %v2169_v40 = vld [vmem:[#allocation6 + $0x60] sm:$0xff] }
 0x1bc   : > { %2101 = vst.msk [vmem:[#allocation6 + $0x110] sm:$0xff] %vm471_vm3, %v2065_v38  ;;  %2468 = vst.msk [vmem:[#allocation6 + $0x18] sm:$0xff] %vm471_vm3, %v2432_v39  ;;  %v2066_v51 = vadd.f32 %v9335_v10, %v1794_v46  ;;  %v1792_v9 = vld [vmem:[#allocation6 + $0x108] sm:$0xff] }
 0x1bd   : > { %2099 = vst.msk [vmem:[#allocation6 + $0x100] sm:$0xff] %vm471_vm3, %v2063_v44  ;;  %2466 = vst.msk [vmem:[#allocation6 + $0x8] sm:$0xff] %vm471_vm3, %v2430_v15  ;;  %v2064_v49 = vadd.f32 %v2019_v17, %v1792_v9 }
 0x1be   : > { %2102 = vst.msk [vmem:[#allocation6 + $0x118] sm:$0xff] %vm471_vm3, %v2066_v51 }
 0x1bf   : > { %2100 = vst.msk [vmem:[#allocation6 + $0x108] sm:$0xff] %vm471_vm3, %v2064_v49  ;;  %v9344_v25 = vpop.f32.mrb[76].mxu0  ;;  %v2170_v49 = vld [vmem:[#allocation6 + $0x68] sm:$0xff] }
 0x1c0   : > { %v9382_v53 = vpop.f32.mrb[76].mxu1  ;;  %v2435_v34 = vadd.f32 %v9344_v25, %v2163_v48  ;;  %v2302_v26 = vpop.f32.mrb[77].mxu0 }
 0x1c1   : > { %v2700_v55 = vpop.f32.mrb[77].mxu1  ;;  %v2433_v62 = vadd.f32 %v2302_v26, %v2161_v54  ;;  %v9345_v58 = vpop.f32.mrb[78].mxu0  ;;  %v2557_v59 = vld [vmem:[#allocation6 + $0x10] sm:$0xff] }
 0x1c2   : > { %v9383_v60 = vpop.f32.mrb[78].mxu1  ;;  %2471 = vst.msk [vmem:[#allocation6 + $0x30] sm:$0xff] %vm471_vm3, %v2435_v34  ;;  %v2436_v3 = vadd.f32 %v9345_v58, %v2164_v57  ;;  %v2829_v45 = vadd.f32 %v9378_v27, %v2557_v59  ;;  %v2305_v50 = vpop.f32.mrb[79].mxu0  ;;  %v2555_v2 = vld [vmem:[#allocation6] sm:$0xff]  ;;  %v2175_v58 = vld [vmem:[#allocation6 + $0x90] sm:$0xff] }
 0x1c3   : > { %v2703_v4 = vpop.f32.mrb[79].mxu1  ;;  %2469 = vst.msk [vmem:[#allocation6 + $0x20] sm:$0xff] %vm471_vm3, %v2433_v62  ;;  %v2434_v5 = vadd.f32 %v2305_v50, %v2162_v52  ;;  %v2827_v6 = vadd.f32 %v2684_v31, %v2555_v2  ;;  %v2558_v56 = vld [vmem:[#allocation6 + $0x18] sm:$0xff] }
 0x1c4   : > { %2472 = vst.msk [vmem:[#allocation6 + $0x38] sm:$0xff] %vm471_vm3, %v2436_v3  ;;  %2865 = vst.msk [vmem:[#allocation6 + $0x10] sm:$0xff] %vm471_vm3, %v2829_v45  ;;  %v2830_v7 = vadd.f32 %v9379_v63, %v2558_v56  ;;  %v2556_v11 = vld [vmem:[#allocation6 + $0x8] sm:$0xff]  ;;  %v2173_v45 = vld [vmem:[#allocation6 + $0x80] sm:$0xff] }
 0x1c5   : > { %2470 = vst.msk [vmem:[#allocation6 + $0x28] sm:$0xff] %vm471_vm3, %v2434_v5  ;;  %2863 = vst.msk [vmem:[#allocation6] sm:$0xff] %vm471_vm3, %v2827_v6  ;;  %v2828_v8 = vadd.f32 %v2687_v43, %v2556_v11 }
 0x1c6   : > { %2866 = vst.msk [vmem:[#allocation6 + $0x18] sm:$0xff] %vm471_vm3, %v2830_v7 }
 0x1c7   : > { %2864 = vst.msk [vmem:[#allocation6 + $0x8] sm:$0xff] %vm471_vm3, %v2828_v8  ;;  %v9348_v10 = vpop.f32.mrb[80].mxu0  ;;  %v2174_v8 = vld [vmem:[#allocation6 + $0x88] sm:$0xff] }
 0x1c8   : > { %v9386_v61 = vpop.f32.mrb[80].mxu1  ;;  %v2439_v12 = vadd.f32 %v9348_v10, %v2167_v36  ;;  %v2318_v14 = vpop.f32.mrb[81].mxu0 }
 0x1c9   : > { %v2716_v16 = vpop.f32.mrb[81].mxu1  ;;  %v2437_v17 = vadd.f32 %v2318_v14, %v2165_v1  ;;  %v9349_v18 = vpop.f32.mrb[82].mxu0  ;;  %v2561_v21 = vld [vmem:[#allocation6 + $0x30] sm:$0xff] }
 0x1ca   : > { %v9387_v19 = vpop.f32.mrb[82].mxu1  ;;  %2475 = vst.msk [vmem:[#allocation6 + $0x50] sm:$0xff] %vm471_vm3, %v2439_v12  ;;  %v2440_v20 = vadd.f32 %v9349_v18, %v2168_v47  ;;  %v2833_v13 = vadd.f32 %v9382_v53, %v2561_v21  ;;  %v2321_v24 = vpop.f32.mrb[83].mxu0  ;;  %v2559_v27 = vld [vmem:[#allocation6 + $0x20] sm:$0xff]  ;;  %v2179_v18 = vld [vmem:[#allocation6 + $0xb0] sm:$0xff] }
 0x1cb   : > { %v2719_v28 = vpop.f32.mrb[83].mxu1  ;;  %2473 = vst.msk [vmem:[#allocation6 + $0x40] sm:$0xff] %vm471_vm3, %v2437_v17  ;;  %v2438_v29 = vadd.f32 %v2321_v24, %v2166_v22  ;;  %v2831_v30 = vadd.f32 %v2700_v55, %v2559_v27  ;;  %v2562_v31 = vld [vmem:[#allocation6 + $0x38] sm:$0xff] }
 0x1cc   : > { %2476 = vst.msk [vmem:[#allocation6 + $0x58] sm:$0xff] %vm471_vm3, %v2440_v20  ;;  %2869 = vst.msk [vmem:[#allocation6 + $0x30] sm:$0xff] %vm471_vm3, %v2833_v13  ;;  %v2834_v32 = vadd.f32 %v9383_v60, %v2562_v31  ;;  %v2560_v33 = vld [vmem:[#allocation6 + $0x28] sm:$0xff]  ;;  %v2177_v13 = vld [vmem:[#allocation6 + $0xa0] sm:$0xff] }
 0x1cd   : > { %2474 = vst.msk [vmem:[#allocation6 + $0x48] sm:$0xff] %vm471_vm3, %v2438_v29  ;;  %2867 = vst.msk [vmem:[#allocation6 + $0x20] sm:$0xff] %vm471_vm3, %v2831_v30  ;;  %v2832_v35 = vadd.f32 %v2703_v4, %v2560_v33  ;;  %v2176_v4 = vld [vmem:[#allocation6 + $0x98] sm:$0xff] }
 0x1ce   : > { %2870 = vst.msk [vmem:[#allocation6 + $0x38] sm:$0xff] %vm471_vm3, %v2834_v32 }
 0x1cf   : > { %2868 = vst.msk [vmem:[#allocation6 + $0x28] sm:$0xff] %vm471_vm3, %v2832_v35  ;;  %v9352_v63 = vpop.f32.mrb[84].mxu0  ;;  %v2178_v35 = vld [vmem:[#allocation6 + $0xa8] sm:$0xff] }
 0x1d0   : > { %v9390_v38 = vpop.f32.mrb[84].mxu1  ;;  %v2443_v39 = vadd.f32 %v9352_v63, %v2171_v37  ;;  %v2334_v41 = vpop.f32.mrb[85].mxu0 }
 0x1d1   : > { %v2732_v42 = vpop.f32.mrb[85].mxu1  ;;  %v2441_v43 = vadd.f32 %v2334_v41, %v2169_v40  ;;  %v9353_v44 = vpop.f32.mrb[86].mxu0  ;;  %v2565_v15 = vld [vmem:[#allocation6 + $0x50] sm:$0xff] }
 0x1d2   : > { %v9391_v46 = vpop.f32.mrb[86].mxu1  ;;  %2479 = vst.msk [vmem:[#allocation6 + $0x70] sm:$0xff] %vm471_vm3, %v2443_v39  ;;  %v2444_v51 = vadd.f32 %v9353_v44, %v2172_v23  ;;  %v2837_v9 = vadd.f32 %v9386_v61, %v2565_v15  ;;  %v2337_v48 = vpop.f32.mrb[87].mxu0  ;;  %v2563_v25 = vld [vmem:[#allocation6 + $0x40] sm:$0xff]  ;;  %v2183_v44 = vld [vmem:[#allocation6 + $0xd0] sm:$0xff] }
 0x1d3   : > { %v2735_v53 = vpop.f32.mrb[87].mxu1  ;;  %2477 = vst.msk [vmem:[#allocation6 + $0x60] sm:$0xff] %vm471_vm3, %v2441_v43  ;;  %v2442_v34 = vadd.f32 %v2337_v48, %v2170_v49  ;;  %v2835_v54 = vadd.f32 %v2716_v16, %v2563_v25  ;;  %v2566_v26 = vld [vmem:[#allocation6 + $0x58] sm:$0xff] }
 0x1d4   : > { %2480 = vst.msk [vmem:[#allocation6 + $0x78] sm:$0xff] %vm471_vm3, %v2444_v51  ;;  %2873 = vst.msk [vmem:[#allocation6 + $0x50] sm:$0xff] %vm471_vm3, %v2837_v9  ;;  %v2838_v55 = vadd.f32 %v9387_v19, %v2566_v26  ;;  %v2564_v62 = vld [vmem:[#allocation6 + $0x48] sm:$0xff]  ;;  %v2181_v9 = vld [vmem:[#allocation6 + $0xc0] sm:$0xff] }
 0x1d5   : > { %2478 = vst.msk [vmem:[#allocation6 + $0x68] sm:$0xff] %vm471_vm3, %v2442_v34  ;;  %2871 = vst.msk [vmem:[#allocation6 + $0x40] sm:$0xff] %vm471_vm3, %v2835_v54  ;;  %v2836_v57 = vadd.f32 %v2719_v28, %v2564_v62  ;;  %v2180_v28 = vld [vmem:[#allocation6 + $0xb8] sm:$0xff] }
 0x1d6   : > { %2874 = vst.msk [vmem:[#allocation6 + $0x58] sm:$0xff] %vm471_vm3, %v2838_v55  ;;  %v9930_v55 = vld [vmem:[%s12005_s3 + $0x10] sm:$0xff]  }
 0x1d7   : > { %2872 = vst.msk [vmem:[#allocation6 + $0x48] sm:$0xff] %vm471_vm3, %v2836_v57  ;;  %v9356_v59 = vpop.f32.mrb[88].mxu0  ;;  %9571 = vmatpush3.bf16.msra.mxu0 %v9930_v55 }
 0x1d8   : > { %v9394_v60 = vpop.f32.mrb[88].mxu1  ;;  %v2447_v3 = vadd.f32 %v9356_v59, %v2175_v58  ;;  %v2350_v52 = vpop.f32.mrb[89].mxu0  ;;  %v2182_v58 = vld [vmem:[#allocation6 + $0xc8] sm:$0xff]  ;;  %9614 = vmatprep.subr.bf16.mxu0 %v10271_v0 }
 0x1d9   : > { %v2748_v50 = vpop.f32.mrb[89].mxu1  ;;  %v2445_v2 = vadd.f32 %v2350_v52, %v2173_v45  ;;  %v9357_v5 = vpop.f32.mrb[90].mxu0  ;;  %v2569_v6 = vld [vmem:[#allocation6 + $0x70] sm:$0xff] }
 0x1da   : > { %v9395_v56 = vpop.f32.mrb[90].mxu1  ;;  %2483 = vst.msk [vmem:[#allocation6 + $0x90] sm:$0xff] %vm471_vm3, %v2447_v3  ;;  %v2448_v7 = vadd.f32 %v9357_v5, %v2176_v4  ;;  %v2841_v11 = vadd.f32 %v9390_v38, %v2569_v6  ;;  %v2353_v36 = vpop.f32.mrb[91].mxu0  ;;  %v2567_v10 = vld [vmem:[#allocation6 + $0x60] sm:$0xff]  ;;  %v2187_v6 = vld [vmem:[#allocation6 + $0xf0] sm:$0xff] }
 0x1db   : > { %v2751_v61 = vpop.f32.mrb[91].mxu1  ;;  %2481 = vst.msk [vmem:[#allocation6 + $0x80] sm:$0xff] %vm471_vm3, %v2445_v2  ;;  %v2446_v12 = vadd.f32 %v2353_v36, %v2174_v8  ;;  %v2839_v1 = vadd.f32 %v2732_v42, %v2567_v10  ;;  %v2570_v14 = vld [vmem:[#allocation6 + $0x78] sm:$0xff]  ;;  %v2185_v8 = vld [vmem:[#allocation6 + $0xe0] sm:$0xff] }
 0x1dc   : > { %2484 = vst.msk [vmem:[#allocation6 + $0x98] sm:$0xff] %vm471_vm3, %v2448_v7  ;;  %2877 = vst.msk [vmem:[#allocation6 + $0x70] sm:$0xff] %vm471_vm3, %v2841_v11  ;;  %v2842_v16 = vadd.f32 %v9391_v46, %v2570_v14  ;;  %v2568_v17 = vld [vmem:[#allocation6 + $0x68] sm:$0xff] }
 0x1dd   : > { %2482 = vst.msk [vmem:[#allocation6 + $0x88] sm:$0xff] %vm471_vm3, %v2446_v12  ;;  %2875 = vst.msk [vmem:[#allocation6 + $0x60] sm:$0xff] %vm471_vm3, %v2839_v1  ;;  %v2840_v47 = vadd.f32 %v2735_v53, %v2568_v17  ;;  %v2184_v53 = vld [vmem:[#allocation6 + $0xd8] sm:$0xff] }
 0x1de   : > { %2878 = vst.msk [vmem:[#allocation6 + $0x78] sm:$0xff] %vm471_vm3, %v2842_v16  ;;  %v2188_v12 = vld [vmem:[#allocation6 + $0xf8] sm:$0xff] }
 0x1df   : > { %2876 = vst.msk [vmem:[#allocation6 + $0x68] sm:$0xff] %vm471_vm3, %v2840_v47  ;;  %v9360_v21 = vpop.f32.mrb[92].mxu0 }
 0x1e0   : > { %v9398_v19 = vpop.f32.mrb[92].mxu1  ;;  %v2451_v20 = vadd.f32 %v9360_v21, %v2179_v18  ;;  %v2366_v22 = vpop.f32.mrb[93].mxu0  ;;  %v2186_v18 = vld [vmem:[#allocation6 + $0xe8] sm:$0xff] }
 0x1e1   : > { %v2764_v24 = vpop.f32.mrb[93].mxu1  ;;  %v2449_v27 = vadd.f32 %v2366_v22, %v2177_v13  ;;  %v9361_v29 = vpop.f32.mrb[94].mxu0  ;;  %v2573_v30 = vld [vmem:[#allocation6 + $0x90] sm:$0xff] }
 0x1e2   : > { %v9399_v31 = vpop.f32.mrb[94].mxu1  ;;  %2487 = vst.msk [vmem:[#allocation6 + $0xb0] sm:$0xff] %vm471_vm3, %v2451_v20  ;;  %v2452_v32 = vadd.f32 %v9361_v29, %v2180_v28  ;;  %v2845_v33 = vadd.f32 %v9394_v60, %v2573_v30  ;;  %v2369_v37 = vpop.f32.mrb[95].mxu0  ;;  %v2571_v63 = vld [vmem:[#allocation6 + $0x80] sm:$0xff]  ;;  %v2191_v30 = vld [vmem:[#allocation6 + $0x110] sm:$0xff] }
 0x1e3   : > { %v2767_v38 = vpop.f32.mrb[95].mxu1  ;;  %2485 = vst.msk [vmem:[#allocation6 + $0xa0] sm:$0xff] %vm471_vm3, %v2449_v27  ;;  %v2450_v39 = vadd.f32 %v2369_v37, %v2178_v35  ;;  %v2843_v40 = vadd.f32 %v2748_v50, %v2571_v63  ;;  %v2574_v41 = vld [vmem:[#allocation6 + $0x98] sm:$0xff]  ;;  %v2189_v35 = vld [vmem:[#allocation6 + $0x100] sm:$0xff] }
 0x1e4   : > { %2488 = vst.msk [vmem:[#allocation6 + $0xb8] sm:$0xff] %vm471_vm3, %v2452_v32  ;;  %2881 = vst.msk [vmem:[#allocation6 + $0x90] sm:$0xff] %vm471_vm3, %v2845_v33  ;;  %v2846_v42 = vadd.f32 %v9395_v56, %v2574_v41  ;;  %v2572_v43 = vld [vmem:[#allocation6 + $0x88] sm:$0xff] }
 0x1e5   : > { %2486 = vst.msk [vmem:[#allocation6 + $0xa8] sm:$0xff] %vm471_vm3, %v2450_v39  ;;  %2879 = vst.msk [vmem:[#allocation6 + $0x80] sm:$0xff] %vm471_vm3, %v2843_v40  ;;  %v2844_v23 = vadd.f32 %v2751_v61, %v2572_v43  ;;  %v2192_v39 = vld [vmem:[#allocation6 + $0x118] sm:$0xff] }
 0x1e6   : > { %2882 = vst.msk [vmem:[#allocation6 + $0x98] sm:$0xff] %vm471_vm3, %v2846_v42 }
 0x1e7   : > { %2880 = vst.msk [vmem:[#allocation6 + $0x88] sm:$0xff] %vm471_vm3, %v2844_v23  ;;  %v9364_v15 = vpop.f32.mrb[96].mxu0 }
 0x1e8   : > { %v9402_v46 = vpop.f32.mrb[96].mxu1  ;;  %v2455_v51 = vadd.f32 %v9364_v15, %v2183_v44  ;;  %v2382_v49 = vpop.f32.mrb[97].mxu0  ;;  %v2190_v44 = vld [vmem:[#allocation6 + $0x108] sm:$0xff] }
 0x1e9   : > { %v2780_v48 = vpop.f32.mrb[97].mxu1  ;;  %v2453_v25 = vadd.f32 %v2382_v49, %v2181_v9  ;;  %v9365_v34 = vpop.f32.mrb[98].mxu0  ;;  %v2577_v54 = vld [vmem:[#allocation6 + $0xb0] sm:$0xff] }
 0x1ea   : > { %v9403_v26 = vpop.f32.mrb[98].mxu1  ;;  %2491 = vst.msk [vmem:[#allocation6 + $0xd0] sm:$0xff] %vm471_vm3, %v2455_v51  ;;  %v2456_v62 = vadd.f32 %v9365_v34, %v2184_v53  ;;  %v2849_v57 = vadd.f32 %v9398_v19, %v2577_v54  ;;  %v2385_v59 = vpop.f32.mrb[99].mxu0  ;;  %v2575_v60 = vld [vmem:[#allocation6 + $0xa0] sm:$0xff]  ;;  %v2955_v54 = vld [vmem:[#allocation6 + $0x10] sm:$0xff] }
 0x1eb   : > { %v2783_v3 = vpop.f32.mrb[99].mxu1  ;;  %2489 = vst.msk [vmem:[#allocation6 + $0xc0] sm:$0xff] %vm471_vm3, %v2453_v25  ;;  %v2454_v45 = vadd.f32 %v2385_v59, %v2182_v58  ;;  %v2847_v52 = vadd.f32 %v2764_v24, %v2575_v60  ;;  %v2578_v50 = vld [vmem:[#allocation6 + $0xb8] sm:$0xff] }
 0x1ec   : > { %2492 = vst.msk [vmem:[#allocation6 + $0xd8] sm:$0xff] %vm471_vm3, %v2456_v62  ;;  %2885 = vst.msk [vmem:[#allocation6 + $0xb0] sm:$0xff] %vm471_vm3, %v2849_v57  ;;  %v2850_v2 = vadd.f32 %v9399_v31, %v2578_v50  ;;  %v2576_v4 = vld [vmem:[#allocation6 + $0xa8] sm:$0xff]  ;;  %v2953_v57 = vld [vmem:[#allocation6] sm:$0xff] }
 0x1ed   : > { %2490 = vst.msk [vmem:[#allocation6 + $0xc8] sm:$0xff] %vm471_vm3, %v2454_v45  ;;  %2883 = vst.msk [vmem:[#allocation6 + $0xa0] sm:$0xff] %vm471_vm3, %v2847_v52  ;;  %v2848_v5 = vadd.f32 %v2767_v38, %v2576_v4  ;;  %v2956_v45 = vld [vmem:[#allocation6 + $0x18] sm:$0xff] }
 0x1ee   : > { %2886 = vst.msk [vmem:[#allocation6 + $0xb8] sm:$0xff] %vm471_vm3, %v2850_v2 }
 0x1ef   : > { %2884 = vst.msk [vmem:[#allocation6 + $0xa8] sm:$0xff] %vm471_vm3, %v2848_v5  ;;  %v9368_v56 = vpop.f32.mrb[100].mxu0 }
 0x1f0   : > { %v9406_v7 = vpop.f32.mrb[100].mxu1  ;;  %v2459_v11 = vadd.f32 %v9368_v56, %v2187_v6  ;;  %v2398_v36 = vpop.f32.mrb[101].mxu0  ;;  %v2954_v6 = vld [vmem:[#allocation6 + $0x8] sm:$0xff] }
 0x1f1   : > { %v2796_v10 = vpop.f32.mrb[101].mxu1  ;;  %v2457_v61 = vadd.f32 %v2398_v36, %v2185_v8  ;;  %v9369_v1 = vpop.f32.mrb[102].mxu0  ;;  %v2581_v14 = vld [vmem:[#allocation6 + $0xd0] sm:$0xff] }
 0x1f2   : > { %v9407_v16 = vpop.f32.mrb[102].mxu1  ;;  %2495 = vst.msk [vmem:[#allocation6 + $0xf0] sm:$0xff] %vm471_vm3, %v2459_v11  ;;  %v2460_v17 = vadd.f32 %v9369_v1, %v2188_v12  ;;  %v2853_v47 = vadd.f32 %v9402_v46, %v2581_v14  ;;  %v2401_v21 = vpop.f32.mrb[103].mxu0  ;;  %v2579_v19 = vld [vmem:[#allocation6 + $0xc0] sm:$0xff]  ;;  %v2959_v1 = vld [vmem:[#allocation6 + $0x30] sm:$0xff] }
 0x1f3   : > { %v2799_v20 = vpop.f32.mrb[103].mxu1  ;;  %2493 = vst.msk [vmem:[#allocation6 + $0xe0] sm:$0xff] %vm471_vm3, %v2457_v61  ;;  %v2458_v13 = vadd.f32 %v2401_v21, %v2186_v18  ;;  %v2851_v22 = vadd.f32 %v2780_v48, %v2579_v19  ;;  %v2582_v24 = vld [vmem:[#allocation6 + $0xd8] sm:$0xff] }
 0x1f4   : > { %2496 = vst.msk [vmem:[#allocation6 + $0xf8] sm:$0xff] %vm471_vm3, %v2460_v17  ;;  %2889 = vst.msk [vmem:[#allocation6 + $0xd0] sm:$0xff] %vm471_vm3, %v2853_v47  ;;  %v2854_v27 = vadd.f32 %v9403_v26, %v2582_v24  ;;  %v2580_v28 = vld [vmem:[#allocation6 + $0xc8] sm:$0xff]  ;;  %v2957_v47 = vld [vmem:[#allocation6 + $0x20] sm:$0xff] }
 0x1f5   : > { %2494 = vst.msk [vmem:[#allocation6 + $0xe8] sm:$0xff] %vm471_vm3, %v2458_v13  ;;  %2887 = vst.msk [vmem:[#allocation6 + $0xc0] sm:$0xff] %vm471_vm3, %v2851_v22  ;;  %v2852_v29 = vadd.f32 %v2783_v3, %v2580_v28 }
 0x1f6   : > { %2890 = vst.msk [vmem:[#allocation6 + $0xd8] sm:$0xff] %vm471_vm3, %v2854_v27 }
 0x1f7   : > { %2888 = vst.msk [vmem:[#allocation6 + $0xc8] sm:$0xff] %vm471_vm3, %v2852_v29  ;;  %v9372_v31 = vpop.f32.mrb[104].mxu0  ;;  %v2958_v29 = vld [vmem:[#allocation6 + $0x28] sm:$0xff] }
 0x1f8   : > { %v9410_v32 = vpop.f32.mrb[104].mxu1  ;;  %v2463_v33 = vadd.f32 %v9372_v31, %v2191_v30  ;;  %v2414_v37 = vpop.f32.mrb[105].mxu0 }
 0x1f9   : > { %v2812_v63 = vpop.f32.mrb[105].mxu1  ;;  %v2461_v38 = vadd.f32 %v2414_v37, %v2189_v35  ;;  %v9373_v40 = vpop.f32.mrb[106].mxu0  ;;  %v2585_v41 = vld [vmem:[#allocation6 + $0xf0] sm:$0xff] }
 0x1fa   : > { %v9411_v42 = vpop.f32.mrb[106].mxu1  ;;  %2499 = vst.msk [vmem:[#allocation6 + $0x110] sm:$0xff] %vm471_vm3, %v2463_v33  ;;  %v2464_v43 = vadd.f32 %v9373_v40, %v2192_v39  ;;  %v2857_v23 = vadd.f32 %v9406_v7, %v2585_v41  ;;  %v2417_v15 = vpop.f32.mrb[107].mxu0  ;;  %v2583_v46 = vld [vmem:[#allocation6 + $0xe0] sm:$0xff]  ;;  %v2963_v40 = vld [vmem:[#allocation6 + $0x50] sm:$0xff] }
 0x1fb   : > { %v2815_v51 = vpop.f32.mrb[107].mxu1  ;;  %2497 = vst.msk [vmem:[#allocation6 + $0x100] sm:$0xff] %vm471_vm3, %v2461_v38  ;;  %v2462_v9 = vadd.f32 %v2417_v15, %v2190_v44  ;;  %v2855_v49 = vadd.f32 %v2796_v10, %v2583_v46  ;;  %v2586_v48 = vld [vmem:[#allocation6 + $0xf8] sm:$0xff] }
 0x1fc   : > { %2500 = vst.msk [vmem:[#allocation6 + $0x118] sm:$0xff] %vm471_vm3, %v2464_v43  ;;  %2893 = vst.msk [vmem:[#allocation6 + $0xf0] sm:$0xff] %vm471_vm3, %v2857_v23  ;;  %v2858_v25 = vadd.f32 %v9407_v16, %v2586_v48  ;;  %v2584_v53 = vld [vmem:[#allocation6 + $0xe8] sm:$0xff]  ;;  %v2961_v23 = vld [vmem:[#allocation6 + $0x40] sm:$0xff] }
 0x1fd   : > { %2498 = vst.msk [vmem:[#allocation6 + $0x108] sm:$0xff] %vm471_vm3, %v2462_v9  ;;  %2891 = vst.msk [vmem:[#allocation6 + $0xe0] sm:$0xff] %vm471_vm3, %v2855_v49  ;;  %v2856_v34 = vadd.f32 %v2799_v20, %v2584_v53  ;;  %v2960_v20 = vld [vmem:[#allocation6 + $0x38] sm:$0xff] }
 0x1fe   : > { %2894 = vst.msk [vmem:[#allocation6 + $0xf8] sm:$0xff] %vm471_vm3, %v2858_v25 }
 0x1ff   : > { %2892 = vst.msk [vmem:[#allocation6 + $0xe8] sm:$0xff] %vm471_vm3, %v2856_v34  ;;  %v9416_v26 = vpop.f32.mrb[108].mxu0  ;;  %v2962_v34 = vld [vmem:[#allocation6 + $0x48] sm:$0xff] }
 0x200   : > { %v9454_v55 = vpop.f32.mrb[108].mxu1  ;;  %v3227_v62 = vadd.f32 %v9416_v26, %v2955_v54  ;;  %v3082_v58 = vpop.f32.mrb[109].mxu0 }
 0x201   : > { %v3480_v59 = vpop.f32.mrb[109].mxu1  ;;  %v3225_v60 = vadd.f32 %v3082_v58, %v2953_v57  ;;  %v2589_v3 = vld [vmem:[#allocation6 + $0x110] sm:$0xff]  ;;  %v9417_v52 = vpop.f32.mrb[110].mxu0 }
 0x202   : > { %v9455_v50 = vpop.f32.mrb[110].mxu1  ;;  %3263 = vst.msk [vmem:[#allocation6 + $0x10] sm:$0xff] %vm471_vm3, %v3227_v62  ;;  %v2861_v2 = vadd.f32 %v9410_v32, %v2589_v3  ;;  %v3228_v4 = vadd.f32 %v9417_v52, %v2956_v45  ;;  %v2587_v5 = vld [vmem:[#allocation6 + $0x100] sm:$0xff]  ;;  %v3085_v56 = vpop.f32.mrb[111].mxu0  ;;  %v2967_v45 = vld [vmem:[#allocation6 + $0x70] sm:$0xff] }
 0x203   : > { %v3483_v7 = vpop.f32.mrb[111].mxu1  ;;  %3261 = vst.msk [vmem:[#allocation6] sm:$0xff] %vm471_vm3, %v3225_v60  ;;  %v2859_v11 = vadd.f32 %v2812_v63, %v2587_v5  ;;  %v3226_v8 = vadd.f32 %v3085_v56, %v2954_v6  ;;  %v2590_v36 = vld [vmem:[#allocation6 + $0x118] sm:$0xff] }
 0x204   : > { %2897 = vst.msk [vmem:[#allocation6 + $0x110] sm:$0xff] %vm471_vm3, %v2861_v2  ;;  %3264 = vst.msk [vmem:[#allocation6 + $0x18] sm:$0xff] %vm471_vm3, %v3228_v4  ;;  %v2862_v10 = vadd.f32 %v9411_v42, %v2590_v36  ;;  %v2588_v61 = vld [vmem:[#allocation6 + $0x108] sm:$0xff]  ;;  %v2965_v4 = vld [vmem:[#allocation6 + $0x60] sm:$0xff] }
 0x205   : > { %2895 = vst.msk [vmem:[#allocation6 + $0x100] sm:$0xff] %vm471_vm3, %v2859_v11  ;;  %3262 = vst.msk [vmem:[#allocation6 + $0x8] sm:$0xff] %vm471_vm3, %v3226_v8  ;;  %v2860_v12 = vadd.f32 %v2815_v51, %v2588_v61  ;;  %v2964_v51 = vld [vmem:[#allocation6 + $0x58] sm:$0xff] }
 0x206   : > { %2898 = vst.msk [vmem:[#allocation6 + $0x118] sm:$0xff] %vm471_vm3, %v2862_v10 }
 0x207   : > { %2896 = vst.msk [vmem:[#allocation6 + $0x108] sm:$0xff] %vm471_vm3, %v2860_v12  ;;  %v9420_v14 = vpop.f32.mrb[112].mxu0  ;;  %v2966_v12 = vld [vmem:[#allocation6 + $0x68] sm:$0xff] }
 0x208   : > { %v9458_v16 = vpop.f32.mrb[112].mxu1  ;;  %v3231_v17 = vadd.f32 %v9420_v14, %v2959_v1  ;;  %v3098_v18 = vpop.f32.mrb[113].mxu0 }
 0x209   : > { %v3496_v21 = vpop.f32.mrb[113].mxu1  ;;  %v3229_v19 = vadd.f32 %v3098_v18, %v2957_v47  ;;  %v9421_v13 = vpop.f32.mrb[114].mxu0  ;;  %v3353_v22 = vld [vmem:[#allocation6 + $0x10] sm:$0xff] }
 0x20a   : > { %v9459_v24 = vpop.f32.mrb[114].mxu1  ;;  %3267 = vst.msk [vmem:[#allocation6 + $0x30] sm:$0xff] %vm471_vm3, %v3231_v17  ;;  %v3232_v27 = vadd.f32 %v9421_v13, %v2960_v20  ;;  %v3625_v28 = vadd.f32 %v9454_v55, %v3353_v22  ;;  %v3101_v30 = vpop.f32.mrb[115].mxu0  ;;  %v3351_v31 = vld [vmem:[#allocation6] sm:$0xff]  ;;  %v2971_v13 = vld [vmem:[#allocation6 + $0x90] sm:$0xff] }
 0x20b   : > { %v3499_v32 = vpop.f32.mrb[115].mxu1  ;;  %3265 = vst.msk [vmem:[#allocation6 + $0x20] sm:$0xff] %vm471_vm3, %v3229_v19  ;;  %v3230_v33 = vadd.f32 %v3101_v30, %v2958_v29  ;;  %v3623_v35 = vadd.f32 %v3480_v59, %v3351_v31  ;;  %v3354_v37 = vld [vmem:[#allocation6 + $0x18] sm:$0xff] }
 0x20c   : > { %3268 = vst.msk [vmem:[#allocation6 + $0x38] sm:$0xff] %vm471_vm3, %v3232_v27  ;;  %3661 = vst.msk [vmem:[#allocation6 + $0x10] sm:$0xff] %vm471_vm3, %v3625_v28  ;;  %v3626_v63 = vadd.f32 %v9455_v50, %v3354_v37  ;;  %v3352_v38 = vld [vmem:[#allocation6 + $0x8] sm:$0xff]  ;;  %v2969_v28 = vld [vmem:[#allocation6 + $0x80] sm:$0xff] }
 0x20d   : > { %3266 = vst.msk [vmem:[#allocation6 + $0x28] sm:$0xff] %vm471_vm3, %v3230_v33  ;;  %3659 = vst.msk [vmem:[#allocation6] sm:$0xff] %vm471_vm3, %v3623_v35  ;;  %v3624_v39 = vadd.f32 %v3483_v7, %v3352_v38  ;;  %v2968_v7 = vld [vmem:[#allocation6 + $0x78] sm:$0xff] }
 0x20e   : > { %3662 = vst.msk [vmem:[#allocation6 + $0x18] sm:$0xff] %vm471_vm3, %v3626_v63 }
 0x20f   : > { %3660 = vst.msk [vmem:[#allocation6 + $0x8] sm:$0xff] %vm471_vm3, %v3624_v39  ;;  %v9424_v41 = vpop.f32.mrb[116].mxu0  ;;  %v2970_v39 = vld [vmem:[#allocation6 + $0x88] sm:$0xff] }
 0x210   : > { %v9462_v42 = vpop.f32.mrb[116].mxu1  ;;  %v3235_v43 = vadd.f32 %v9424_v41, %v2963_v40  ;;  %v3114_v44 = vpop.f32.mrb[117].mxu0 }
 0x211   : > { %v3512_v15 = vpop.f32.mrb[117].mxu1  ;;  %v3233_v46 = vadd.f32 %v3114_v44, %v2961_v23  ;;  %v9425_v9 = vpop.f32.mrb[118].mxu0  ;;  %v3357_v49 = vld [vmem:[#allocation6 + $0x30] sm:$0xff] }
 0x212   : > { %v9463_v48 = vpop.f32.mrb[118].mxu1  ;;  %3271 = vst.msk [vmem:[#allocation6 + $0x50] sm:$0xff] %vm471_vm3, %v3235_v43  ;;  %v3236_v25 = vadd.f32 %v9425_v9, %v2964_v51  ;;  %v3629_v53 = vadd.f32 %v9458_v16, %v3357_v49  ;;  %v3117_v54 = vpop.f32.mrb[119].mxu0  ;;  %v3355_v26 = vld [vmem:[#allocation6 + $0x20] sm:$0xff]  ;;  %v2975_v9 = vld [vmem:[#allocation6 + $0xb0] sm:$0xff] }
 0x213   : > { %v3515_v55 = vpop.f32.mrb[119].mxu1  ;;  %3269 = vst.msk [vmem:[#allocation6 + $0x40] sm:$0xff] %vm471_vm3, %v3233_v46  ;;  %v3234_v62 = vadd.f32 %v3117_v54, %v2962_v34  ;;  %v3627_v57 = vadd.f32 %v3496_v21, %v3355_v26  ;;  %v3358_v58 = vld [vmem:[#allocation6 + $0x38] sm:$0xff] }
 0x214   : > { %3272 = vst.msk [vmem:[#allocation6 + $0x58] sm:$0xff] %vm471_vm3, %v3236_v25  ;;  %3665 = vst.msk [vmem:[#allocation6 + $0x30] sm:$0xff] %vm471_vm3, %v3629_v53  ;;  %v3630_v59 = vadd.f32 %v9459_v24, %v3358_v58  ;;  %v3356_v60 = vld [vmem:[#allocation6 + $0x28] sm:$0xff]  ;;  %v2973_v53 = vld [vmem:[#allocation6 + $0xa0] sm:$0xff] }
 0x215   : > { %3270 = vst.msk [vmem:[#allocation6 + $0x48] sm:$0xff] %vm471_vm3, %v3234_v62  ;;  %3663 = vst.msk [vmem:[#allocation6 + $0x20] sm:$0xff] %vm471_vm3, %v3627_v57  ;;  %v3628_v3 = vadd.f32 %v3499_v32, %v3356_v60  ;;  %v2972_v32 = vld [vmem:[#allocation6 + $0x98] sm:$0xff] }
 0x216   : > { %3666 = vst.msk [vmem:[#allocation6 + $0x38] sm:$0xff] %vm471_vm3, %v3630_v59 }
 0x217   : > { %3664 = vst.msk [vmem:[#allocation6 + $0x28] sm:$0xff] %vm471_vm3, %v3628_v3  ;;  %v9428_v52 = vpop.f32.mrb[120].mxu0  ;;  %v2974_v3 = vld [vmem:[#allocation6 + $0xa8] sm:$0xff] }
 0x218   : > { %v9466_v50 = vpop.f32.mrb[120].mxu1  ;;  %v3239_v2 = vadd.f32 %v9428_v52, %v2967_v45  ;;  %v3130_v5 = vpop.f32.mrb[121].mxu0 }
 0x219   : > { %v3528_v6 = vpop.f32.mrb[121].mxu1  ;;  %v3237_v56 = vadd.f32 %v3130_v5, %v2965_v4  ;;  %v9429_v11 = vpop.f32.mrb[122].mxu0  ;;  %v3361_v8 = vld [vmem:[#allocation6 + $0x50] sm:$0xff] }
 0x21a   : > { %v9467_v36 = vpop.f32.mrb[122].mxu1  ;;  %3275 = vst.msk [vmem:[#allocation6 + $0x70] sm:$0xff] %vm471_vm3, %v3239_v2  ;;  %v3240_v10 = vadd.f32 %v9429_v11, %v2968_v7  ;;  %v3633_v61 = vadd.f32 %v9462_v42, %v3361_v8  ;;  %v3133_v1 = vpop.f32.mrb[123].mxu0  ;;  %v3359_v14 = vld [vmem:[#allocation6 + $0x40] sm:$0xff]  ;;  %v2979_v11 = vld [vmem:[#allocation6 + $0xd0] sm:$0xff] }
 0x21b   : > { %v3531_v16 = vpop.f32.mrb[123].mxu1  ;;  %3273 = vst.msk [vmem:[#allocation6 + $0x60] sm:$0xff] %vm471_vm3, %v3237_v56  ;;  %v3238_v17 = vadd.f32 %v3133_v1, %v2966_v12  ;;  %v3631_v47 = vadd.f32 %v3512_v15, %v3359_v14  ;;  %v3362_v18 = vld [vmem:[#allocation6 + $0x58] sm:$0xff] }
 0x21c   : > { %3276 = vst.msk [vmem:[#allocation6 + $0x78] sm:$0xff] %vm471_vm3, %v3240_v10  ;;  %3669 = vst.msk [vmem:[#allocation6 + $0x50] sm:$0xff] %vm471_vm3, %v3633_v61  ;;  %v3634_v21 = vadd.f32 %v9463_v48, %v3362_v18  ;;  %v3360_v19 = vld [vmem:[#allocation6 + $0x48] sm:$0xff]  ;;  %v2977_v61 = vld [vmem:[#allocation6 + $0xc0] sm:$0xff] }
 0x21d   : > { %3274 = vst.msk [vmem:[#allocation6 + $0x68] sm:$0xff] %vm471_vm3, %v3238_v17  ;;  %3667 = vst.msk [vmem:[#allocation6 + $0x40] sm:$0xff] %vm471_vm3, %v3631_v47  ;;  %v3632_v20 = vadd.f32 %v3515_v55, %v3360_v19  ;;  %v2976_v55 = vld [vmem:[#allocation6 + $0xb8] sm:$0xff] }
 0x21e   : > { %3670 = vst.msk [vmem:[#allocation6 + $0x58] sm:$0xff] %vm471_vm3, %v3634_v21 }
 0x21f   : > { %3668 = vst.msk [vmem:[#allocation6 + $0x48] sm:$0xff] %vm471_vm3, %v3632_v20  ;;  %v9432_v22 = vpop.f32.mrb[124].mxu0  ;;  %v2978_v20 = vld [vmem:[#allocation6 + $0xc8] sm:$0xff] }
 0x220   : > { %v9470_v24 = vpop.f32.mrb[124].mxu1  ;;  %v3243_v27 = vadd.f32 %v9432_v22, %v2971_v13  ;;  %v3146_v29 = vpop.f32.mrb[125].mxu0 }
 0x221   : > { %v3544_v30 = vpop.f32.mrb[125].mxu1  ;;  %v3241_v31 = vadd.f32 %v3146_v29, %v2969_v28  ;;  %v9433_v33 = vpop.f32.mrb[126].mxu0  ;;  %v3365_v35 = vld [vmem:[#allocation6 + $0x70] sm:$0xff] }
 0x222   : > { %v9471_v37 = vpop.f32.mrb[126].mxu1  ;;  %3279 = vst.msk [vmem:[#allocation6 + $0x90] sm:$0xff] %vm471_vm3, %v3243_v27  ;;  %v3244_v63 = vadd.f32 %v9433_v33, %v2972_v32  ;;  %v3637_v38 = vadd.f32 %v9466_v50, %v3365_v35  ;;  %v3149_v40 = vpop.f32.mrb[127].mxu0  ;;  %v3363_v41 = vld [vmem:[#allocation6 + $0x60] sm:$0xff]  ;;  %v2983_v33 = vld [vmem:[#allocation6 + $0xf0] sm:$0xff] }
 0x223   : > { %v3547_v42 = vpop.f32.mrb[127].mxu1  ;;  %3277 = vst.msk [vmem:[#allocation6 + $0x80] sm:$0xff] %vm471_vm3, %v3241_v31  ;;  %v3242_v43 = vadd.f32 %v3149_v40, %v2970_v39  ;;  %v3635_v23 = vadd.f32 %v3528_v6, %v3363_v41  ;;  %v3366_v44 = vld [vmem:[#allocation6 + $0x78] sm:$0xff] }
 0x224   : > { %3280 = vst.msk [vmem:[#allocation6 + $0x98] sm:$0xff] %vm471_vm3, %v3244_v63  ;;  %3673 = vst.msk [vmem:[#allocation6 + $0x70] sm:$0xff] %vm471_vm3, %v3637_v38  ;;  %v3638_v15 = vadd.f32 %v9467_v36, %v3366_v44  ;;  %v3364_v46 = vld [vmem:[#allocation6 + $0x68] sm:$0xff]  ;;  %v2981_v38 = vld [vmem:[#allocation6 + $0xe0] sm:$0xff] }
 0x225   : > { %3278 = vst.msk [vmem:[#allocation6 + $0x88] sm:$0xff] %vm471_vm3, %v3242_v43  ;;  %3671 = vst.msk [vmem:[#allocation6 + $0x60] sm:$0xff] %vm471_vm3, %v3635_v23  ;;  %v3636_v51 = vadd.f32 %v3531_v16, %v3364_v46  ;;  %v2980_v16 = vld [vmem:[#allocation6 + $0xd8] sm:$0xff] }
 0x226   : > { %3674 = vst.msk [vmem:[#allocation6 + $0x78] sm:$0xff] %vm471_vm3, %v3638_v15 }
 0x227   : > { %3672 = vst.msk [vmem:[#allocation6 + $0x68] sm:$0xff] %vm471_vm3, %v3636_v51  ;;  %v9436_v49 = vpop.f32.mrb[128].mxu0  ;;  %v2982_v51 = vld [vmem:[#allocation6 + $0xe8] sm:$0xff] }
 0x228   : > { %v9474_v48 = vpop.f32.mrb[128].mxu1  ;;  %v3247_v25 = vadd.f32 %v9436_v49, %v2975_v9  ;;  %v3162_v34 = vpop.f32.mrb[129].mxu0 }
 0x229   : > { %v3560_v54 = vpop.f32.mrb[129].mxu1  ;;  %v3245_v26 = vadd.f32 %v3162_v34, %v2973_v53  ;;  %v9437_v62 = vpop.f32.mrb[130].mxu0  ;;  %v3369_v57 = vld [vmem:[#allocation6 + $0x90] sm:$0xff] }
 0x22a   : > { %v9475_v58 = vpop.f32.mrb[130].mxu1  ;;  %3283 = vst.msk [vmem:[#allocation6 + $0xb0] sm:$0xff] %vm471_vm3, %v3247_v25  ;;  %v3248_v59 = vadd.f32 %v9437_v62, %v2976_v55  ;;  %v3641_v60 = vadd.f32 %v9470_v24, %v3369_v57  ;;  %v3165_v45 = vpop.f32.mrb[131].mxu0  ;;  %v3367_v52 = vld [vmem:[#allocation6 + $0x80] sm:$0xff]  ;;  %v2987_v62 = vld [vmem:[#allocation6 + $0x110] sm:$0xff] }
 0x22b   : > { %v3563_v50 = vpop.f32.mrb[131].mxu1  ;;  %3281 = vst.msk [vmem:[#allocation6 + $0xa0] sm:$0xff] %vm471_vm3, %v3245_v26  ;;  %v3246_v2 = vadd.f32 %v3165_v45, %v2974_v3  ;;  %v3639_v4 = vadd.f32 %v3544_v30, %v3367_v52  ;;  %v3370_v5 = vld [vmem:[#allocation6 + $0x98] sm:$0xff] }
 0x22c   : > { %3284 = vst.msk [vmem:[#allocation6 + $0xb8] sm:$0xff] %vm471_vm3, %v3248_v59  ;;  %3677 = vst.msk [vmem:[#allocation6 + $0x90] sm:$0xff] %vm471_vm3, %v3641_v60  ;;  %v3642_v6 = vadd.f32 %v9471_v37, %v3370_v5  ;;  %v3368_v56 = vld [vmem:[#allocation6 + $0x88] sm:$0xff]  ;;  %v2985_v60 = vld [vmem:[#allocation6 + $0x100] sm:$0xff] }
 0x22d   : > { %3282 = vst.msk [vmem:[#allocation6 + $0xa8] sm:$0xff] %vm471_vm3, %v3246_v2  ;;  %3675 = vst.msk [vmem:[#allocation6 + $0x80] sm:$0xff] %vm471_vm3, %v3639_v4  ;;  %v3640_v7 = vadd.f32 %v3547_v42, %v3368_v56  ;;  %v2984_v42 = vld [vmem:[#allocation6 + $0xf8] sm:$0xff] }
 0x22e   : > { %3678 = vst.msk [vmem:[#allocation6 + $0x98] sm:$0xff] %vm471_vm3, %v3642_v6 }
 0x22f   : > { %3676 = vst.msk [vmem:[#allocation6 + $0x88] sm:$0xff] %vm471_vm3, %v3640_v7  ;;  %v9440_v8 = vpop.f32.mrb[132].mxu0  ;;  %v2986_v7 = vld [vmem:[#allocation6 + $0x108] sm:$0xff] }
 0x230   : > { %v9478_v36 = vpop.f32.mrb[132].mxu1  ;;  %v3251_v10 = vadd.f32 %v9440_v8, %v2979_v11  ;;  %v3178_v12 = vpop.f32.mrb[133].mxu0 }
 0x231   : > { %v3576_v1 = vpop.f32.mrb[133].mxu1  ;;  %v3249_v14 = vadd.f32 %v3178_v12, %v2977_v61  ;;  %v9441_v17 = vpop.f32.mrb[134].mxu0  ;;  %v3373_v47 = vld [vmem:[#allocation6 + $0xb0] sm:$0xff] }
 0x232   : > { %v9479_v18 = vpop.f32.mrb[134].mxu1  ;;  %3287 = vst.msk [vmem:[#allocation6 + $0xd0] sm:$0xff] %vm471_vm3, %v3251_v10  ;;  %v3252_v21 = vadd.f32 %v9441_v17, %v2980_v16  ;;  %v3645_v19 = vadd.f32 %v9474_v48, %v3373_v47  ;;  %v3181_v13 = vpop.f32.mrb[135].mxu0  ;;  %v3371_v22 = vld [vmem:[#allocation6 + $0xa0] sm:$0xff]  ;;  %v3751_v17 = vld [vmem:[#allocation6 + $0x10] sm:$0xff] }
 0x233   : > { %v3579_v24 = vpop.f32.mrb[135].mxu1  ;;  %3285 = vst.msk [vmem:[#allocation6 + $0xc0] sm:$0xff] %vm471_vm3, %v3249_v14  ;;  %v3250_v27 = vadd.f32 %v3181_v13, %v2978_v20  ;;  %v3643_v28 = vadd.f32 %v3560_v54, %v3371_v22  ;;  %v3374_v29 = vld [vmem:[#allocation6 + $0xb8] sm:$0xff] }
 0x234   : > { %3288 = vst.msk [vmem:[#allocation6 + $0xd8] sm:$0xff] %vm471_vm3, %v3252_v21  ;;  %3681 = vst.msk [vmem:[#allocation6 + $0xb0] sm:$0xff] %vm471_vm3, %v3645_v19  ;;  %v3646_v30 = vadd.f32 %v9475_v58, %v3374_v29  ;;  %v3372_v31 = vld [vmem:[#allocation6 + $0xa8] sm:$0xff]  ;;  %v3749_v21 = vld [vmem:[#allocation6] sm:$0xff] }
 0x235   : > { %3286 = vst.msk [vmem:[#allocation6 + $0xc8] sm:$0xff] %vm471_vm3, %v3250_v27  ;;  %3679 = vst.msk [vmem:[#allocation6 + $0xa0] sm:$0xff] %vm471_vm3, %v3643_v28  ;;  %v3644_v32 = vadd.f32 %v3563_v50, %v3372_v31  ;;  %v2988_v50 = vld [vmem:[#allocation6 + $0x118] sm:$0xff] }
 0x236   : > { %3682 = vst.msk [vmem:[#allocation6 + $0xb8] sm:$0xff] %vm471_vm3, %v3646_v30  ;;  %v3752_v22 = vld [vmem:[#allocation6 + $0x18] sm:$0xff]  ;;  %v3750_v30 = vld [vmem:[#allocation6 + $0x8] sm:$0xff] }
 0x237   : > { %3680 = vst.msk [vmem:[#allocation6 + $0xa8] sm:$0xff] %vm471_vm3, %v3644_v32  ;;  %v9444_v35 = vpop.f32.mrb[136].mxu0 }
 0x238   : > { %v9482_v37 = vpop.f32.mrb[136].mxu1  ;;  %v3255_v63 = vadd.f32 %v9444_v35, %v2983_v33  ;;  %v3194_v39 = vpop.f32.mrb[137].mxu0 }
 0x239   : > { %v3592_v40 = vpop.f32.mrb[137].mxu1  ;;  %v3253_v41 = vadd.f32 %v3194_v39, %v2981_v38  ;;  %v9445_v43 = vpop.f32.mrb[138].mxu0  ;;  %v3377_v23 = vld [vmem:[#allocation6 + $0xd0] sm:$0xff] }
 0x23a   : > { %v9483_v44 = vpop.f32.mrb[138].mxu1  ;;  %3291 = vst.msk [vmem:[#allocation6 + $0xf0] sm:$0xff] %vm471_vm3, %v3255_v63  ;;  %v3256_v15 = vadd.f32 %v9445_v43, %v2984_v42  ;;  %v3649_v46 = vadd.f32 %v9478_v36, %v3377_v23  ;;  %v3197_v9 = vpop.f32.mrb[139].mxu0  ;;  %v3375_v49 = vld [vmem:[#allocation6 + $0xc0] sm:$0xff]  ;;  %v3755_v39 = vld [vmem:[#allocation6 + $0x30] sm:$0xff] }
 0x23b   : > { %v3595_v48 = vpop.f32.mrb[139].mxu1  ;;  %3289 = vst.msk [vmem:[#allocation6 + $0xe0] sm:$0xff] %vm471_vm3, %v3253_v41  ;;  %v3254_v25 = vadd.f32 %v3197_v9, %v2982_v51  ;;  %v3647_v53 = vadd.f32 %v3576_v1, %v3375_v49  ;;  %v3378_v34 = vld [vmem:[#allocation6 + $0xd8] sm:$0xff]  ;;  %v3753_v42 = vld [vmem:[#allocation6 + $0x20] sm:$0xff]  ;;  %v3754_v51 = vld [vmem:[#allocation6 + $0x28] sm:$0xff] }
 0x23c   : > { %3292 = vst.msk [vmem:[#allocation6 + $0xf8] sm:$0xff] %vm471_vm3, %v3256_v15  ;;  %3685 = vst.msk [vmem:[#allocation6 + $0xd0] sm:$0xff] %vm471_vm3, %v3649_v46  ;;  %v3650_v54 = vadd.f32 %v9479_v18, %v3378_v34  ;;  %v3376_v26 = vld [vmem:[#allocation6 + $0xc8] sm:$0xff] }
 0x23d   : > { %3290 = vst.msk [vmem:[#allocation6 + $0xe8] sm:$0xff] %vm471_vm3, %v3254_v25  ;;  %3683 = vst.msk [vmem:[#allocation6 + $0xc0] sm:$0xff] %vm471_vm3, %v3647_v53  ;;  %v3648_v55 = vadd.f32 %v3579_v24, %v3376_v26  ;;  %v3757_v26 = vld [vmem:[#allocation6 + $0x40] sm:$0xff] }
 0x23e   : > { %3686 = vst.msk [vmem:[#allocation6 + $0xd8] sm:$0xff] %vm471_vm3, %v3650_v54 }
 0x23f   : > { %3684 = vst.msk [vmem:[#allocation6 + $0xc8] sm:$0xff] %vm471_vm3, %v3648_v55  ;;  %v9448_v57 = vpop.f32.mrb[140].mxu0 }
 0x240   : > { %v9486_v58 = vpop.f32.mrb[140].mxu1  ;;  %v3259_v59 = vadd.f32 %v9448_v57, %v2987_v62  ;;  %v3210_v3 = vpop.f32.mrb[141].mxu0  ;;  %v3760_v57 = vld [vmem:[#allocation6 + $0x58] sm:$0xff] }
 0x241   : > { %v3608_v45 = vpop.f32.mrb[141].mxu1  ;;  %v3257_v52 = vadd.f32 %v3210_v3, %v2985_v60  ;;  %v9449_v2 = vpop.f32.mrb[142].mxu0  ;;  %v3381_v4 = vld [vmem:[#allocation6 + $0xf0] sm:$0xff] }
 0x242   : > { %v9487_v5 = vpop.f32.mrb[142].mxu1  ;;  %3295 = vst.msk [vmem:[#allocation6 + $0x110] sm:$0xff] %vm471_vm3, %v3259_v59  ;;  %v3260_v6 = vadd.f32 %v9449_v2, %v2988_v50  ;;  %v3653_v56 = vadd.f32 %v9482_v37, %v3381_v4  ;;  %v3213_v11 = vpop.f32.mrb[143].mxu0  ;;  %v3379_v8 = vld [vmem:[#allocation6 + $0xe0] sm:$0xff] }
 0x243   : > { %v3611_v36 = vpop.f32.mrb[143].mxu1  ;;  %3293 = vst.msk [vmem:[#allocation6 + $0x100] sm:$0xff] %vm471_vm3, %v3257_v52  ;;  %v3258_v10 = vadd.f32 %v3213_v11, %v2986_v7  ;;  %v3651_v61 = vadd.f32 %v3592_v40, %v3379_v8  ;;  %v3382_v12 = vld [vmem:[#allocation6 + $0xf8] sm:$0xff]  ;;  %v3763_v7 = vld [vmem:[#allocation6 + $0x70] sm:$0xff] }
 0x244   : > { %3296 = vst.msk [vmem:[#allocation6 + $0x118] sm:$0xff] %vm471_vm3, %v3260_v6  ;;  %3689 = vst.msk [vmem:[#allocation6 + $0xf0] sm:$0xff] %vm471_vm3, %v3653_v56  ;;  %v3654_v1 = vadd.f32 %v9483_v44, %v3382_v12  ;;  %v3380_v14 = vld [vmem:[#allocation6 + $0xe8] sm:$0xff]  ;;  %v3756_v44 = vld [vmem:[#allocation6 + $0x38] sm:$0xff] }
 0x245   : > { %3294 = vst.msk [vmem:[#allocation6 + $0x108] sm:$0xff] %vm471_vm3, %v3258_v10  ;;  %3687 = vst.msk [vmem:[#allocation6 + $0xe0] sm:$0xff] %vm471_vm3, %v3651_v61  ;;  %v3652_v16 = vadd.f32 %v3595_v48, %v3380_v14  ;;  %v3759_v48 = vld [vmem:[#allocation6 + $0x50] sm:$0xff]  ;;  %v3761_v61 = vld [vmem:[#allocation6 + $0x60] sm:$0xff] }
 0x246   : > { %3690 = vst.msk [vmem:[#allocation6 + $0xf8] sm:$0xff] %vm471_vm3, %v3654_v1 }
 0x247   : > { %3688 = vst.msk [vmem:[#allocation6 + $0xe8] sm:$0xff] %vm471_vm3, %v3652_v16  ;;  %v9492_v47 = vpop.f32.mrb[144].mxu0  ;;  %v3764_v16 = vld [vmem:[#allocation6 + $0x78] sm:$0xff] }
 0x248   : > { %v4023_v18 = vadd.f32 %v9492_v47, %v3751_v17  ;;  %v3878_v19 = vpop.f32.mrb[145].mxu0 }
 0x249   : > { %v4021_v20 = vadd.f32 %v3878_v19, %v3749_v21  ;;  %v3385_v13 = vld [vmem:[#allocation6 + $0x110] sm:$0xff]  ;;  %v9493_v24 = vpop.f32.mrb[146].mxu0  ;;  %v3762_v19 = vld [vmem:[#allocation6 + $0x68] sm:$0xff] }
 0x24a   : > { %4059 = vst.msk [vmem:[#allocation6 + $0x10] sm:$0xff] %vm471_vm3, %v4023_v18  ;;  %v3657_v27 = vadd.f32 %v9486_v58, %v3385_v13  ;;  %v4024_v28 = vadd.f32 %v9493_v24, %v3752_v22  ;;  %v3383_v29 = vld [vmem:[#allocation6 + $0x100] sm:$0xff]  ;;  %v3881_v31 = vpop.f32.mrb[147].mxu0 }
 0x24b   : > { %4057 = vst.msk [vmem:[#allocation6] sm:$0xff] %vm471_vm3, %v4021_v20  ;;  %v3655_v32 = vadd.f32 %v3608_v45, %v3383_v29  ;;  %v4022_v33 = vadd.f32 %v3881_v31, %v3750_v30  ;;  %v3386_v35 = vld [vmem:[#allocation6 + $0x118] sm:$0xff]  ;;  %v3758_v45 = vld [vmem:[#allocation6 + $0x48] sm:$0xff]  ;;  %v3767_v29 = vld [vmem:[#allocation6 + $0x90] sm:$0xff] }
 0x24c   : > { %3693 = vst.msk [vmem:[#allocation6 + $0x110] sm:$0xff] %vm471_vm3, %v3657_v27  ;;  %4060 = vst.msk [vmem:[#allocation6 + $0x18] sm:$0xff] %vm471_vm3, %v4024_v28  ;;  %v3658_v37 = vadd.f32 %v9487_v5, %v3386_v35  ;;  %v3384_v63 = vld [vmem:[#allocation6 + $0x108] sm:$0xff]  ;;  %v11273_v5 = vld [vmem:[%s12004_s2] ss:$0 sm:$0xff] }
 0x24d   : > { %3691 = vst.msk [vmem:[#allocation6 + $0x100] sm:$0xff] %vm471_vm3, %v3655_v32  ;;  %4058 = vst.msk [vmem:[#allocation6 + $0x8] sm:$0xff] %vm471_vm3, %v4022_v33  ;;  %v3656_v38 = vadd.f32 %v3611_v36, %v3384_v63  ;;  %v3765_v32 = vld [vmem:[#allocation6 + $0x80] sm:$0xff]  ;;  %v4237_v35 = vld [vmem:[#allocation3] sm:$0xff] }
 0x24e   : > { %3694 = vst.msk [vmem:[#allocation6 + $0x118] sm:$0xff] %vm471_vm3, %v3658_v37  ;;  %v4520_v37 = vld [vmem:[#allocation3 + $0x2] sm:$0xff] }
 0x24f   : > { %3692 = vst.msk [vmem:[#allocation6 + $0x108] sm:$0xff] %vm471_vm3, %v3656_v38  ;;  %v9496_v40 = vpop.f32.mrb[148].mxu0 }
 0x250   : > { %v4027_v41 = vadd.f32 %v9496_v40, %v3755_v39  ;;  %v3894_v43 = vpop.f32.mrb[149].mxu0  ;;  %v3768_v40 = vld [vmem:[#allocation6 + $0x98] sm:$0xff] }
 0x251   : > { %v4025_v23 = vadd.f32 %v3894_v43, %v3753_v42  ;;  %v9497_v15 = vpop.f32.mrb[150].mxu0  ;;  %v3766_v42 = vld [vmem:[#allocation6 + $0x88] sm:$0xff] }
 0x252   : > { %4063 = vst.msk [vmem:[#allocation6 + $0x30] sm:$0xff] %vm471_vm3, %v4027_v41  ;;  %v4028_v46 = vadd.f32 %v9497_v15, %v3756_v44  ;;  %v3897_v9 = vpop.f32.mrb[151].mxu0 }
 0x253   : > { %4061 = vst.msk [vmem:[#allocation6 + $0x20] sm:$0xff] %vm471_vm3, %v4025_v23  ;;  %v4026_v49 = vadd.f32 %v3897_v9, %v3754_v51 }
 0x254   : > { %4064 = vst.msk [vmem:[#allocation6 + $0x38] sm:$0xff] %vm471_vm3, %v4028_v46  ;;  %v4109_v53 = vld [vmem:[#allocation6] ss:$2 sm:$0xff]  ;;  %v4111_v34 = vld [vmem:[#allocation6 + $0x1] ss:$2 sm:$0xff] }
 0x255   : > { %4062 = vst.msk [vmem:[#allocation6 + $0x28] sm:$0xff] %vm471_vm3, %v4026_v49  ;;  %v4116_v50 = vmax.f32 %v4109_v53, %v4111_v34 }
 0x257   : > { %v9500_v25 = vpop.f32.mrb[152].mxu0 }
 0x258   : > { %v4031_v54 = vadd.f32 %v9500_v25, %v3759_v48  ;;  %v3910_v55 = vpop.f32.mrb[153].mxu0  ;;  %v9931_v48 = vld [vmem:[%s12005_s3 + $0x8] sm:$0xff]   ;;  %v9933_v25 = vld [vmem:[%s12005_s3 + $0x20] sm:$0xff]  }
 0x259   : > { %v4029_v62 = vadd.f32 %v3910_v55, %v3757_v26  ;;  %v9501_v58 = vpop.f32.mrb[154].mxu0 }
 0x25a   : > { %v4113_v59 = vld [vmem:[#allocation6 + $0x12] ss:$2 sm:$0xff]  ;;  %v4115_v60 = vld [vmem:[#allocation6 + $0x13] ss:$2 sm:$0xff]  ;;  %4067 = vst.msk [vmem:[#allocation6 + $0x50] sm:$0xff] %vm471_vm3, %v4031_v54  ;;  %v4032_v3 = vadd.f32 %v9501_v58, %v3760_v57  ;;  %v3913_v52 = vpop.f32.mrb[155].mxu0 }
 0x25b   : > { %v4117_v2 = vmax.f32 %v4113_v59, %v4115_v60  ;;  %4065 = vst.msk [vmem:[#allocation6 + $0x40] sm:$0xff] %vm471_vm3, %v4029_v62  ;;  %v4030_v4 = vadd.f32 %v3913_v52, %v3758_v45  ;;  %v3771_v62 = vld [vmem:[#allocation6 + $0xb0] sm:$0xff]  ;;  %v3769_v59 = vld [vmem:[#allocation6 + $0xa0] sm:$0xff]  ;;  %v3772_v52 = vld [vmem:[#allocation6 + $0xb8] sm:$0xff] }
 0x25c   : > { %4068 = vst.msk [vmem:[#allocation6 + $0x58] sm:$0xff] %vm471_vm3, %v4032_v3  ;;  %v4129_v8 = vld [vmem:[#allocation6 + $0x24] ss:$2 sm:$0xff]  ;;  %v4131_v36 = vld [vmem:[#allocation6 + $0x25] ss:$2 sm:$0xff] }
 0x25d   : > { %v4118_v6 = vmax.f32 %v4116_v50, %v4117_v2  ;;  %4066 = vst.msk [vmem:[#allocation6 + $0x48] sm:$0xff] %vm471_vm3, %v4030_v4  ;;  %v4136_v13 = vmax.f32 %v4129_v8, %v4131_v36  ;;  %v3770_v2 = vld [vmem:[#allocation6 + $0xa8] sm:$0xff] }
 0x25f   : > { %v4125_v56 = vadd.f32 %v11273_v5, %v4118_v6  ;;  %v9504_v11 = vpop.f32.mrb[156].mxu0 }
 0x260   : > { %v4035_v10 = vadd.f32 %v9504_v11, %v3763_v7  ;;  %v3926_v12 = vpop.f32.mrb[157].mxu0 }
 0x261   : > { %v4126_v1 = vmax.f32 %v4125_v56, 0.0  ;;  %v4033_v14 = vadd.f32 %v3926_v12, %v3761_v61  ;;  %v9505_v17 = vpop.f32.mrb[158].mxu0 }
 0x262   : > { %v4133_v47 = vld [vmem:[#allocation6 + $0x36] ss:$2 sm:$0xff]  ;;  %v4135_v18 = vld [vmem:[#allocation6 + $0x37] ss:$2 sm:$0xff]  ;;  %4071 = vst.msk [vmem:[#allocation6 + $0x70] sm:$0xff] %vm471_vm3, %v4035_v10  ;;  %v4036_v21 = vadd.f32 %v9505_v17, %v3764_v16  ;;  %v3929_v20 = vpop.f32.mrb[159].mxu0 }
 0x263   : > { %4127 = vst.msk [vmem:[#allocation3 + $0xb] sm:$0xff] %vm471_vm3, %v4126_v1  ;;  %v4137_v22 = vmax.f32 %v4133_v47, %v4135_v18  ;;  %4069 = vst.msk [vmem:[#allocation6 + $0x60] sm:$0xff] %vm471_vm3, %v4033_v14  ;;  %v4034_v24 = vadd.f32 %v3929_v20, %v3762_v19  ;;  %v3775_v17 = vld [vmem:[#allocation6 + $0xd0] sm:$0xff] }
 0x264   : > { %4072 = vst.msk [vmem:[#allocation6 + $0x78] sm:$0xff] %vm471_vm3, %v4036_v21  ;;  %v4143_v38 = vld [vmem:[#allocation6 + $0x48] ss:$2 sm:$0xff]  ;;  %v4145_v43 = vld [vmem:[#allocation6 + $0x49] ss:$2 sm:$0xff]  ;;  %v3773_v21 = vld [vmem:[#allocation6 + $0xc0] sm:$0xff] }
 0x265   : > { %v4138_v27 = vmax.f32 %v4136_v13, %v4137_v22  ;;  %4070 = vst.msk [vmem:[#allocation6 + $0x68] sm:$0xff] %vm471_vm3, %v4034_v24  ;;  %v4150_v54 = vmax.f32 %v4143_v38, %v4145_v43  ;;  %v3776_v22 = vld [vmem:[#allocation6 + $0xd8] sm:$0xff] }
 0x267   : > { %v4139_v28 = vadd.f32 %v11273_v5, %v4138_v27  ;;  %v9508_v30 = vpop.f32.mrb[160].mxu0 }
 0x268   : > { %v4039_v31 = vadd.f32 %v9508_v30, %v3767_v29  ;;  %v3942_v33 = vpop.f32.mrb[161].mxu0  ;;  %v3774_v30 = vld [vmem:[#allocation6 + $0xc8] sm:$0xff] }
 0x269   : > { %v4140_v63 = vmax.f32 %v4139_v28, 0.0  ;;  %v4037_v39 = vadd.f32 %v3942_v33, %v3765_v32  ;;  %v9509_v41 = vpop.f32.mrb[162].mxu0 }
 0x26a   : > { %4075 = vst.msk [vmem:[#allocation6 + $0x90] sm:$0xff] %vm471_vm3, %v4039_v31  ;;  %v4040_v23 = vadd.f32 %v9509_v41, %v3768_v40  ;;  %v3945_v44 = vpop.f32.mrb[163].mxu0  ;;  %v4238_v15 = vld [vmem:[#allocation3 + $0x8] sm:$0xff] }
 0x26b   : > { %v11285_v46 = vld [vmem:[#allocation3 + $0xa] sm:$0xff]  ;;  %4141 = vst.msk [vmem:[#allocation3 + $0x15] sm:$0xff] %vm471_vm3, %v4140_v63  ;;  %4073 = vst.msk [vmem:[#allocation6 + $0x80] sm:$0xff] %vm471_vm3, %v4037_v39  ;;  %v4038_v51 = vadd.f32 %v3945_v44, %v3766_v42  ;;  %v4247_v9 = vpack.c.bf16 %v4238_v15, %v4237_v35 }
 0x26c   : > { %v4530_v49 = vpack.c.bf16 %v11285_v46, %v4520_v37  ;;  %v4147_v53 = vld [vmem:[#allocation6 + $0x5a] ss:$2 sm:$0xff]  ;;  %v4149_v34 = vld [vmem:[#allocation6 + $0x5b] ss:$2 sm:$0xff]  ;;  %4076 = vst.msk [vmem:[#allocation6 + $0x98] sm:$0xff] %vm471_vm3, %v4040_v23  ;;  %v3779_v44 = vld [vmem:[#allocation6 + $0xf0] sm:$0xff] }
 0x26d   : > { %v4151_v26 = vmax.f32 %v4147_v53, %v4149_v34  ;;  %4074 = vst.msk [vmem:[#allocation6 + $0x88] sm:$0xff] %vm471_vm3, %v4038_v51  ;;  %9529 = vmatmul.mubr.msk.bf16.vlgmr.msra.gmra.mrb[144].mxu1 %vm471_vm3, %v4247_v9  ;;  %v4157_v4 = vld [vmem:[#allocation6 + $0x6c] ss:$2 sm:$0xff]  ;;  %v4159_v6 = vld [vmem:[#allocation6 + $0x6d] ss:$2 sm:$0xff]  ;;  %v3777_v9 = vld [vmem:[#allocation6 + $0xe0] sm:$0xff] }
 0x26e   : > { %9573 = vmatmul.mubr.msk.bf16.vlgmr.msra.gmra.mrb[180].mxu0 %vm471_vm3, %v4530_v49  ;;  %9532 = vmatprep.mubr.msk.bf16.mxu1 %vm10273_vm4, %v10271_v0  ;;  %v4164_v1 = vmax.f32 %v4157_v4, %v4159_v6  ;;  %v3780_v53 = vld [vmem:[#allocation6 + $0xf8] sm:$0xff] }
 0x26f   : > { %9576 = vmatprep.mubr.msk.bf16.mxu0 %vm10273_vm4, %v10271_v0  ;;  %v4152_v55 = vmax.f32 %v4150_v54, %v4151_v26  ;;  %v9512_v57 = vpop.f32.mrb[164].mxu0  ;;  %9549 = vmatpush3.bf16.msra.mxu1 %v9931_v48 }
 0x270   : > { %9615 = vmatpush3.bf16.msra.mxu0 %v9933_v25  ;;  %v4043_v58 = vadd.f32 %v9512_v57, %v3771_v62  ;;  %v3958_v60 = vpop.f32.mrb[165].mxu0  ;;  %9592 = vmatprep.subr.bf16.mxu1 %v10271_v0  ;;  %v3778_v62 = vld [vmem:[#allocation6 + $0xe8] sm:$0xff] }
 0x271   : > { %9658 = vmatprep.subr.bf16.mxu0 %v10271_v0  ;;  %v4153_v3 = vadd.f32 %v11273_v5, %v4152_v55  ;;  %v4041_v45 = vadd.f32 %v3958_v60, %v3769_v59  ;;  %v9513_v50 = vpop.f32.mrb[166].mxu0 }
 0x272   : > { %4079 = vst.msk [vmem:[#allocation6 + $0xb0] sm:$0xff] %vm471_vm3, %v4043_v58  ;;  %v4044_v56 = vadd.f32 %v9513_v50, %v3772_v52  ;;  %v3961_v7 = vpop.f32.mrb[167].mxu0  ;;  %v11308_v11 = vld [vmem:[#allocation3 + $0x12] sm:$0xff] }
 0x273   : > { %v4154_v8 = vmax.f32 %v4153_v3, 0.0  ;;  %4077 = vst.msk [vmem:[#allocation6 + $0xa0] sm:$0xff] %vm471_vm3, %v4041_v45  ;;  %v4042_v36 = vadd.f32 %v3961_v7, %v3770_v2  ;;  %v4672_v10 = vpack.c.bf16 %v11308_v11, %v11285_v46  ;;  %v4171_v27 = vld [vmem:[#allocation6 + $0x90] ss:$2 sm:$0xff]  ;;  %v4173_v28 = vld [vmem:[#allocation6 + $0x91] ss:$2 sm:$0xff] }
 0x274   : > { %v4161_v61 = vld [vmem:[#allocation6 + $0x7e] ss:$2 sm:$0xff]  ;;  %v4163_v12 = vld [vmem:[#allocation6 + $0x7f] ss:$2 sm:$0xff]  ;;  %4080 = vst.msk [vmem:[#allocation6 + $0xb8] sm:$0xff] %vm471_vm3, %v4044_v56  ;;  %v4178_v39 = vmax.f32 %v4171_v27, %v4173_v28 }
 0x275   : > { %4155 = vst.msk [vmem:[#allocation3 + $0x1f] sm:$0xff] %vm471_vm3, %v4154_v8  ;;  %v4165_v14 = vmax.f32 %v4161_v61, %v4163_v12  ;;  %4078 = vst.msk [vmem:[#allocation6 + $0xa8] sm:$0xff] %vm471_vm3, %v4042_v36  ;;  %v4239_v35 = vld [vmem:[#allocation3 + $0x10] sm:$0xff]  ;;  %v3783_v61 = vld [vmem:[#allocation6 + $0x110] sm:$0xff] }
 0x276   : > { %v9937_v46 = vld [vmem:[%s12005_s3 + $0x40] sm:$0xff]  }
 0x277   : > { %v4166_v16 = vmax.f32 %v4164_v1, %v4165_v14  ;;  %v9516_v47 = vpop.f32.mrb[168].mxu0  ;;  %v3781_v14 = vld [vmem:[#allocation6 + $0x100] sm:$0xff] }
 0x278   : > { %v4047_v18 = vadd.f32 %v9516_v47, %v3775_v17  ;;  %v3974_v19 = vpop.f32.mrb[169].mxu0 }
 0x279   : > { %v4167_v20 = vadd.f32 %v11273_v5, %v4166_v16  ;;  %v4045_v13 = vadd.f32 %v3974_v19, %v3773_v21  ;;  %v9517_v24 = vpop.f32.mrb[170].mxu0 }
 0x27a   : > { %4083 = vst.msk [vmem:[#allocation6 + $0xd0] sm:$0xff] %vm471_vm3, %v4047_v18  ;;  %v4048_v29 = vadd.f32 %v9517_v24, %v3776_v22  ;;  %v3977_v31 = vpop.f32.mrb[171].mxu0  ;;  %v3784_v18 = vld [vmem:[#allocation6 + $0x118] sm:$0xff]  ;;  %v3782_v22 = vld [vmem:[#allocation6 + $0x108] sm:$0xff] }
 0x27b   : > { %v4168_v32 = vmax.f32 %v4167_v20, 0.0  ;;  %4081 = vst.msk [vmem:[#allocation6 + $0xc0] sm:$0xff] %vm471_vm3, %v4045_v13  ;;  %v4046_v33 = vadd.f32 %v3977_v31, %v3774_v30 }
 0x27c   : > { %v4175_v37 = vld [vmem:[#allocation6 + $0xa2] ss:$2 sm:$0xff]  ;;  %v4177_v63 = vld [vmem:[#allocation6 + $0xa3] ss:$2 sm:$0xff]  ;;  %4084 = vst.msk [vmem:[#allocation6 + $0xd8] sm:$0xff] %vm471_vm3, %v4048_v29 }
 0x27d   : > { %v4240_v38 = vld [vmem:[#allocation3 + $0x18] sm:$0xff]  ;;  %4169 = vst.msk [vmem:[#allocation3 + $0x29] sm:$0xff] %vm471_vm3, %v4168_v32  ;;  %v4179_v40 = vmax.f32 %v4175_v37, %v4177_v63  ;;  %4082 = vst.msk [vmem:[#allocation6 + $0xc8] sm:$0xff] %vm471_vm3, %v4046_v33  ;;  %v4241_v60 = vld [vmem:[#allocation3 + $0x20] sm:$0xff] }
 0x27e   : > { %v4248_v41 = vpack.c.bf16 %v4240_v38, %v4239_v35  ;;  %v11322_v42 = vld [vmem:[#allocation3 + $0x1a] sm:$0xff] }
 0x27f   : > { %v4531_v43 = vpack.c.bf16 %v11322_v42, %v11308_v11  ;;  %v4180_v23 = vmax.f32 %v4178_v39, %v4179_v40  ;;  %v9520_v15 = vpop.f32.mrb[172].mxu0 }
 0x280   : > { %9533 = vmatmul.mubr.msk.bf16.gmra.mrb[148].mxu1 %vm471_vm3, %v4248_v41  ;;  %v4051_v51 = vadd.f32 %v9520_v15, %v3779_v44  ;;  %v3990_v49 = vpop.f32.mrb[173].mxu0 }
 0x281   : > { %9577 = vmatmul.mubr.msk.bf16.gmra.mrb[184].mxu0 %vm471_vm3, %v4531_v43  ;;  %9536 = vmatprep.mubr.msk.bf16.mxu1 %vm10273_vm4, %v10271_v0  ;;  %v4181_v48 = vadd.f32 %v11273_v5, %v4180_v23  ;;  %v4049_v25 = vadd.f32 %v3990_v49, %v3777_v9  ;;  %v9521_v34 = vpop.f32.mrb[174].mxu0 }
 0x282   : > { %9580 = vmatprep.mubr.msk.bf16.mxu0 %vm10273_vm4, %v10271_v0  ;;  %v4185_v54 = vld [vmem:[#allocation6 + $0xb4] ss:$2 sm:$0xff]  ;;  %v4187_v26 = vld [vmem:[#allocation6 + $0xb5] ss:$2 sm:$0xff]  ;;  %4087 = vst.msk [vmem:[#allocation6 + $0xf0] sm:$0xff] %vm471_vm3, %v4051_v51  ;;  %v4052_v55 = vadd.f32 %v9521_v34, %v3780_v53  ;;  %v3993_v57 = vpop.f32.mrb[175].mxu0 }
 0x283   : > { %v4182_v58 = vmax.f32 %v4181_v48, 0.0  ;;  %4085 = vst.msk [vmem:[#allocation6 + $0xe0] sm:$0xff] %vm471_vm3, %v4049_v25  ;;  %v4050_v59 = vadd.f32 %v3993_v57, %v3778_v62  ;;  %v4192_v50 = vmax.f32 %v4185_v54, %v4187_v26 }
 0x284   : > { %v4189_v3 = vld [vmem:[#allocation6 + $0xc6] ss:$2 sm:$0xff]  ;;  %v4191_v45 = vld [vmem:[#allocation6 + $0xc7] ss:$2 sm:$0xff]  ;;  %4088 = vst.msk [vmem:[#allocation6 + $0xf8] sm:$0xff] %vm471_vm3, %v4052_v55 }
 0x285   : > { %v4242_v52 = vld [vmem:[#allocation3 + $0x28] sm:$0xff]  ;;  %4183 = vst.msk [vmem:[#allocation3 + $0x33] sm:$0xff] %vm471_vm3, %v4182_v58  ;;  %v4193_v2 = vmax.f32 %v4189_v3, %v4191_v45  ;;  %4086 = vst.msk [vmem:[#allocation6 + $0xe8] sm:$0xff] %vm471_vm3, %v4050_v59 }
 0x286   : > { %v4249_v4 = vpack.c.bf16 %v4242_v52, %v4241_v60  ;;  %v11338_v6 = vld [vmem:[#allocation3 + $0x22] sm:$0xff]  ;;  %v11340_v56 = vld [vmem:[#allocation3 + $0x2a] sm:$0xff]  ;;  %v4381_v52 = vld [vmem:[#allocation3 + $0x19] sm:$0xff] }
 0x287   : > { %v4532_v7 = vpack.c.bf16 %v11340_v56, %v11338_v6  ;;  %v4673_v8 = vpack.c.bf16 %v11338_v6, %v11322_v42  ;;  %v4194_v36 = vmax.f32 %v4192_v50, %v4193_v2  ;;  %v9524_v12 = vpop.f32.mrb[176].mxu0  ;;  %v4378_v58 = vld [vmem:[#allocation3 + $0x1] sm:$0xff]  ;;  %v4379_v59 = vld [vmem:[#allocation3 + $0x9] sm:$0xff]  ;;  %v4805_v50 = vld [vmem:[#allocation3 + $0x13] sm:$0xff] }
 0x288   : > { %9537 = vmatmul.mubr.msk.bf16.gmra.mrb[152].mxu1 %vm471_vm3, %v4249_v4  ;;  %v4055_v1 = vadd.f32 %v9524_v12, %v3783_v61  ;;  %v4006_v16 = vpop.f32.mrb[177].mxu0  ;;  %v4388_v3 = vpack.c.bf16 %v4379_v59, %v4378_v58  ;;  %v4380_v2 = vld [vmem:[#allocation3 + $0x11] sm:$0xff]  ;;  %v9935_v61 = vld [vmem:[%s12005_s3 + $0x30] sm:$0xff]  }
 0x289   : > { %9581 = vmatmul.mubr.msk.bf16.gmra.mrb[188].mxu0 %vm471_vm3, %v4532_v7  ;;  %9540 = vmatprep.mubr.msk.bf16.mxu1 %vm10273_vm4, %v10271_v0  ;;  %v4195_v17 = vadd.f32 %v11273_v5, %v4194_v36  ;;  %v4053_v47 = vadd.f32 %v4006_v16, %v3781_v14  ;;  %v9525_v21 = vpop.f32.mrb[178].mxu0  ;;  %v4804_v4 = vld [vmem:[#allocation3 + $0xb] sm:$0xff]  ;;  %v4389_v7 = vpack.c.bf16 %v4381_v52, %v4380_v2  ;;  %v4382_v14 = vld [vmem:[#allocation3 + $0x21] sm:$0xff] }
 0x28a   : > { %9584 = vmatprep.mubr.msk.bf16.mxu0 %vm10273_vm4, %v10271_v0  ;;  %v4199_v19 = vld [vmem:[#allocation6 + $0xd8] ss:$2 sm:$0xff]  ;;  %v4201_v20 = vld [vmem:[#allocation6 + $0xd9] ss:$2 sm:$0xff]  ;;  %4091 = vst.msk [vmem:[#allocation6 + $0x110] sm:$0xff] %vm471_vm3, %v4055_v1  ;;  %v4056_v13 = vadd.f32 %v9525_v21, %v3784_v18  ;;  %v4009_v24 = vpop.f32.mrb[179].mxu0  ;;  %v4814_v36 = vpack.c.bf16 %v4805_v50, %v4804_v4 }
 0x28b   : > { %v4196_v27 = vmax.f32 %v4195_v17, 0.0  ;;  %4089 = vst.msk [vmem:[#allocation6 + $0x100] sm:$0xff] %vm471_vm3, %v4053_v47  ;;  %v4054_v28 = vadd.f32 %v4009_v24, %v3782_v22  ;;  %v4206_v31 = vmax.f32 %v4199_v19, %v4201_v20  ;;  %v4383_v12 = vld [vmem:[#allocation3 + $0x29] sm:$0xff]  ;;  %v4806_v16 = vld [vmem:[#allocation3 + $0x1b] sm:$0xff] }
 0x28c   : > { %v4203_v29 = vld [vmem:[#allocation6 + $0xea] ss:$2 sm:$0xff]  ;;  %v4205_v30 = vld [vmem:[#allocation6 + $0xeb] ss:$2 sm:$0xff]  ;;  %4092 = vst.msk [vmem:[#allocation6 + $0x118] sm:$0xff] %vm471_vm3, %v4056_v13  ;;  %v11358_v33 = vld [vmem:[#allocation3 + $0x32] sm:$0xff]  ;;  %v4390_v17 = vpack.c.bf16 %v4383_v12, %v4382_v14 }
 0x28d   : > { %4197 = vst.msk [vmem:[#allocation3 + $0x3d] sm:$0xff] %vm471_vm3, %v4196_v27  ;;  %v4207_v32 = vmax.f32 %v4203_v29, %v4205_v30  ;;  %4090 = vst.msk [vmem:[#allocation6 + $0x108] sm:$0xff] %vm471_vm3, %v4054_v28  ;;  %v4674_v35 = vpack.c.bf16 %v11358_v33, %v11340_v56  ;;  %v4243_v39 = vld [vmem:[#allocation3 + $0x30] sm:$0xff]  ;;  %v4807_v1 = vld [vmem:[#allocation3 + $0x23] sm:$0xff] }
 0x28e   : > { %v4815_v47 = vpack.c.bf16 %v4807_v1, %v4806_v16  ;;  %v4809_v21 = vld [vmem:[#allocation3 + $0x33] sm:$0xff]  ;;  %v4808_v20 = vld [vmem:[#allocation3 + $0x2b] sm:$0xff]  ;;  %v5231_v4 = vld [vmem:[#allocation3 + $0x1d] sm:$0xff] }
 0x28f   : > { %v4208_v37 = vmax.f32 %v4206_v31, %v4207_v32  ;;  %v4384_v19 = vld [vmem:[#allocation3 + $0x31] sm:$0xff]  ;;  %v4816_v22 = vpack.c.bf16 %v4809_v21, %v4808_v20  ;;  %v5232_v16 = vld [vmem:[#allocation3 + $0x25] sm:$0xff] }
 0x290   : > { %v5091_v11 = vld [vmem:[#allocation3 + $0x2c] sm:$0xff]  ;;  %v5092_v6 = vld [vmem:[#allocation3 + $0x34] sm:$0xff] }
 0x291   : > { %v4209_v63 = vadd.f32 %v11273_v5, %v4208_v37  ;;  %v5233_v14 = vld [vmem:[#allocation3 + $0x2d] sm:$0xff] }
 0x293   : > { %v4210_v38 = vmax.f32 %v4209_v63, 0.0  ;;  %v9934_v63 = vld [vmem:[%s12005_s3 + $0x28] sm:$0xff]  }
 0x294   : > { %v4213_v40 = vld [vmem:[#allocation6 + $0xfc] ss:$2 sm:$0xff]  ;;  %v4215_v41 = vld [vmem:[#allocation6 + $0xfd] ss:$2 sm:$0xff] }
 0x295   : > { %v4217_v43 = vld [vmem:[#allocation6 + $0x10e] ss:$2 sm:$0xff]  ;;  %4211 = vst.msk [vmem:[#allocation3 + $0x47] sm:$0xff] %vm471_vm3, %v4210_v38  ;;  %v4219_v23 = vld [vmem:[#allocation6 + $0x10f] ss:$2 sm:$0xff]  ;;  %v4220_v44 = vmax.f32 %v4213_v40, %v4215_v41  ;;  %v4244_v15 = vld [vmem:[#allocation3 + $0x38] sm:$0xff] }
 0x296   : > { %v11364_v51 = vld [vmem:[#allocation3 + $0x3a] sm:$0xff]  ;;  %v4221_v9 = vmax.f32 %v4217_v43, %v4219_v23  ;;  %v4250_v49 = vpack.c.bf16 %v4244_v15, %v4243_v39 }
 0x297   : > { %v4533_v48 = vpack.c.bf16 %v11364_v51, %v11358_v33  ;;  %v4385_v18 = vld [vmem:[#allocation3 + $0x39] sm:$0xff] }
 0x298   : > { %v4222_v25 = vmax.f32 %v4220_v44, %v4221_v9  ;;  %9541 = vmatmul.mubr.msk.bf16.gmra.mrb[156].mxu1 %vm471_vm3, %v4250_v49  ;;  %v4391_v13 = vpack.c.bf16 %v4385_v18, %v4384_v19  ;;  %v4810_v29 = vld [vmem:[#allocation3 + $0x3b] sm:$0xff]  ;;  %v4946_v9 = vld [vmem:[#allocation3 + $0xc] sm:$0xff] }
 0x299   : > { %9585 = vmatmul.mubr.msk.bf16.gmra.mrb[192].mxu0 %vm471_vm3, %v4533_v48  ;;  %9544 = vmatprep.mubr.msk.bf16.mxu1 %vm10273_vm4, %v10271_v0  ;;  %v5089_v39 = vld [vmem:[#allocation3 + $0x1c] sm:$0xff]  ;;  %v5088_v40 = vld [vmem:[#allocation3 + $0x14] sm:$0xff] }
 0x29a   : > { %9588 = vmatprep.mubr.msk.bf16.mxu0 %vm10273_vm4, %v10271_v0  ;;  %v4223_v53 = vadd.f32 %v11273_v5, %v4222_v25  ;;  %v9932_v5 = vld [vmem:[%s12005_s3 + $0x18] sm:$0xff]   ;;  %v5098_v41 = vpack.c.bf16 %v5089_v39, %v5088_v40  ;;  %v5093_v42 = vld [vmem:[#allocation3 + $0x3c] sm:$0xff]  ;;  %v4956_v48 = vpack.c.bf16 %v5088_v40, %v4946_v9 }
 0x29b   : > { %v9936_v49 = vld [vmem:[%s12005_s3 + $0x38] sm:$0xff]  }
 0x29c   : > { %v4224_v34 = vmax.f32 %v4223_v53, 0.0  ;;  %v4245_v54 = vld [vmem:[#allocation3 + $0x40] sm:$0xff]  ;;  %v4246_v26 = vld [vmem:[#allocation3 + $0x48] sm:$0xff]  ;;  %v5376_v59 = vld [vmem:[#allocation3 + $0x36] sm:$0xff] }
 0x29d   : > { %v11375_v55 = vld [vmem:[#allocation3 + $0x42] sm:$0xff]  ;;  %v4251_v62 = vpack.c.bf16 %v4246_v26, %v4245_v54  ;;  %v5234_v18 = vld [vmem:[#allocation3 + $0x35] sm:$0xff] }
 0x29e   : > { %v4675_v57 = vpack.c.bf16 %v11375_v55, %v11364_v51  ;;  %4225 = vst.msk [vmem:[#allocation3 + $0x51] sm:$0xff] %vm471_vm3, %v4224_v34  ;;  %v4386_v24 = vld [vmem:[#allocation3 + $0x41] sm:$0xff]  ;;  %v4387_v27 = vld [vmem:[#allocation3 + $0x49] sm:$0xff]  ;;  %v5372_v34 = vld [vmem:[#allocation3 + $0x16] sm:$0xff] }
 0x29f   : > { %v4811_v28 = vld [vmem:[#allocation3 + $0x43] sm:$0xff]  ;;  %v4392_v30 = vpack.c.bf16 %v4387_v27, %v4386_v24 }
 0x2a0   : > { %9545 = vmatmul.mubr.msk.bf16.gmra.mrb[160].mxu1 %vm471_vm3, %v4251_v62  ;;  %v4817_v31 = vpack.c.bf16 %v4811_v28, %v4810_v29  ;;  %v5097_v51 = vld [vmem:[#allocation3 + $0x5c] sm:$0xff]  ;;  %v5374_v62 = vld [vmem:[#allocation3 + $0x26] sm:$0xff] }
 0x2a1   : > { %9550 = vmatprep.mubr.msk.bf16.mxu1 %vm10273_vm4, %v10271_v0  ;;  %v5373_v53 = vld [vmem:[#allocation3 + $0x1e] sm:$0xff]  ;;  %v5378_v52 = vld [vmem:[#allocation3 + $0x46] sm:$0xff] }
 0x2a2   : > { %v5382_v26 = vpack.c.bf16 %v5373_v53, %v5372_v34  ;;  %v5236_v20 = vld [vmem:[#allocation3 + $0x45] sm:$0xff]  ;;  %v5239_v24 = vld [vmem:[#allocation3 + $0x5d] sm:$0xff] }
 0x2a3   : > { %v4252_v28 = vld [vmem:[#allocation7] sm:$0xff] }
 0x2a5   : > { %v11383_v60 = vld [vmem:[#allocation3 + $0x4a] sm:$0xff]  ;;  %v4813_v37 = vld [vmem:[#allocation3 + $0x53] sm:$0xff] }
 0x2a6   : > { %v4534_v45 = vpack.c.bf16 %v11383_v60, %v11375_v55  ;;  %v4812_v32 = vld [vmem:[#allocation3 + $0x4b] sm:$0xff]  ;;  %v5096_v15 = vld [vmem:[#allocation3 + $0x54] sm:$0xff] }
 0x2a7   : > { %v4818_v38 = vpack.c.bf16 %v4813_v37, %v4812_v32  ;;  %v4671_v56 = vld [vmem:[#allocation3 + $0x52] sm:$0xff]  ;;  %v5102_v25 = vpack.c.bf16 %v5097_v51, %v5096_v15 }
 0x2a8   : > { %9551 = vmatmul.mubr.msk.bf16.vlgmr.msra.gmra.mrb[164].mxu1 %vm471_vm3, %v4388_v3  ;;  %9589 = vmatmul.mubr.msk.bf16.gmra.mrb[196].mxu0 %vm471_vm3, %v4534_v45  ;;  %v5095_v33 = vld [vmem:[#allocation3 + $0x4c] sm:$0xff]  ;;  %v4676_v23 = vpack.c.bf16 %v4671_v56, %v11383_v60  ;;  %v5377_v60 = vld [vmem:[#allocation3 + $0x3e] sm:$0xff] }
 0x2a9   : > { %9593 = vmatpush3.bf16.msra.mxu1 %v9932_v5  ;;  %9554 = vmatprep.mubr.msk.bf16.mxu1 %vm10273_vm4, %v10271_v0  ;;  %v5375_v55 = vld [vmem:[#allocation3 + $0x2e] sm:$0xff]  ;;  %v5384_v3 = vpack.c.bf16 %v5377_v60, %v5376_v59  ;;  %v4960_v50 = vpack.c.bf16 %v5096_v15, %v5095_v33  ;;  %v4256_v51 = vld [vmem:[#allocation7 + $0x20] sm:$0xff] }
 0x2aa   : > { %9616 = vmatprep.mubr.msk.bf16.mxu0 %vm10273_vm4, %v10271_v0  ;;  %9636 = vmatprep.subr.bf16.mxu1 %v10271_v0  ;;  %v5383_v58 = vpack.c.bf16 %v5375_v55, %v5374_v62  ;;  %v5379_v45 = vld [vmem:[#allocation3 + $0x4e] sm:$0xff] }
 0x2ab   : > { %v5385_v2 = vpack.c.bf16 %v5379_v45, %v5378_v52  ;;  %v5237_v19 = vld [vmem:[#allocation3 + $0x4d] sm:$0xff] }
 0x2b0   : > { %9555 = vmatmul.mubr.msk.bf16.gmra.mrb[168].mxu1 %vm471_vm3, %v4389_v7  ;;  %9617 = vmatmul.mubr.msk.bf16.vlgmr.msra.gmra.mrb[200].mxu0 %vm471_vm3, %v4814_v36  ;;  %v5380_v7 = vld [vmem:[#allocation3 + $0x56] sm:$0xff]  ;;  %v5381_v36 = vld [vmem:[#allocation3 + $0x5e] sm:$0xff] }
 0x2b1   : > { %9558 = vmatprep.mubr.msk.bf16.mxu1 %vm10273_vm4, %v10271_v0  ;;  %9620 = vmatprep.mubr.msk.bf16.mxu0 %vm10273_vm4, %v10271_v0  ;;  %v5386_v1 = vpack.c.bf16 %v5381_v36, %v5380_v7 }
 0x2b2   : > { %9659 = vmatpush3.bf16.msra.mxu0 %v9935_v61  ;;  %v5230_v61 = vld [vmem:[#allocation3 + $0x15] sm:$0xff] }
 0x2b3   : > { %9702 = vmatprep.subr.bf16.mxu0 %v10271_v0  ;;  %v5240_v12 = vpack.c.bf16 %v5231_v4, %v5230_v61  ;;  %v4260_v61 = vld [vmem:[#allocation7 + $0x40] sm:$0xff] }
 0x2b8   : > { %9559 = vmatmul.mubr.msk.bf16.gmra.mrb[172].mxu1 %vm471_vm3, %v4390_v17  ;;  %9621 = vmatmul.mubr.msk.bf16.gmra.mrb[204].mxu0 %vm471_vm3, %v4815_v47  ;;  %v5241_v17 = vpack.c.bf16 %v5233_v14, %v5232_v16  ;;  %v5235_v47 = vld [vmem:[#allocation3 + $0x3d] sm:$0xff] }
 0x2b9   : > { %9562 = vmatprep.mubr.msk.bf16.mxu1 %vm10273_vm4, %v10271_v0  ;;  %9624 = vmatprep.mubr.msk.bf16.mxu0 %vm10273_vm4, %v10271_v0  ;;  %v5242_v21 = vpack.c.bf16 %v5235_v47, %v5234_v18 }
 0x2c0   : > { %9563 = vmatmul.mubr.msk.bf16.gmra.mrb[176].mxu1 %vm471_vm3, %v4391_v13  ;;  %9625 = vmatmul.mubr.msk.bf16.gmra.mrb[208].mxu0 %vm471_vm3, %v4816_v22  ;;  %v5243_v13 = vpack.c.bf16 %v5237_v19, %v5236_v20  ;;  %v5238_v22 = vld [vmem:[#allocation3 + $0x55] sm:$0xff] }
 0x2c1   : > { %9566 = vmatprep.mubr.msk.bf16.mxu1 %vm10273_vm4, %v10271_v0  ;;  %9628 = vmatprep.mubr.msk.bf16.mxu0 %vm10273_vm4, %v10271_v0  ;;  %v5244_v27 = vpack.c.bf16 %v5239_v24, %v5238_v22 }
 0x2c8   : > { %9567 = vmatmul.mubr.msk.bf16.gmra.mrb[180].mxu1 %vm471_vm3, %v4392_v30  ;;  %9629 = vmatmul.mubr.msk.bf16.gmra.mrb[212].mxu0 %vm471_vm3, %v4817_v31  ;;  %v4253_v31 = vld [vmem:[#allocation7 + $0x8] sm:$0xff] }
 0x2c9   : > { %9594 = vmatprep.mubr.msk.bf16.mxu1 %vm10273_vm4, %v10271_v0  ;;  %9632 = vmatprep.mubr.msk.bf16.mxu0 %vm10273_vm4, %v10271_v0 }
 0x2d0   : > { %9595 = vmatmul.mubr.msk.bf16.vlgmr.msra.gmra.mrb[184].mxu1 %vm471_vm3, %v4672_v10  ;;  %9633 = vmatmul.mubr.msk.bf16.gmra.mrb[216].mxu0 %vm471_vm3, %v4818_v38  ;;  %v5090_v10 = vld [vmem:[#allocation3 + $0x24] sm:$0xff] }
 0x2d1   : > { %9637 = vmatpush3.bf16.msra.mxu1 %v9934_v63  ;;  %9598 = vmatprep.mubr.msk.bf16.mxu1 %vm10273_vm4, %v10271_v0  ;;  %v5099_v43 = vpack.c.bf16 %v5091_v11, %v5090_v10  ;;  %v4957_v54 = vpack.c.bf16 %v5090_v10, %v5089_v39 }
 0x2d2   : > { %9660 = vmatprep.mubr.msk.bf16.mxu0 %vm10273_vm4, %v10271_v0  ;;  %9680 = vmatprep.subr.bf16.mxu1 %v10271_v0 }
 0x2d8   : > { %9599 = vmatmul.mubr.msk.bf16.gmra.mrb[188].mxu1 %vm471_vm3, %v4673_v8  ;;  %9661 = vmatmul.mubr.msk.bf16.vlgmr.msra.gmra.mrb[220].mxu0 %vm471_vm3, %v5098_v41  ;;  %v5100_v8 = vpack.c.bf16 %v5093_v42, %v5092_v6 }
 0x2d9   : > { %9602 = vmatprep.mubr.msk.bf16.mxu1 %vm10273_vm4, %v10271_v0  ;;  %9664 = vmatprep.mubr.msk.bf16.mxu0 %vm10273_vm4, %v10271_v0 }
 0x2da   : > { %9703 = vmatpush3.bf16.msra.mxu0 %v9937_v46 }
 0x2e0   : > { %9603 = vmatmul.mubr.msk.bf16.gmra.mrb[192].mxu1 %vm471_vm3, %v4674_v35  ;;  %9665 = vmatmul.mubr.msk.bf16.gmra.mrb[224].mxu0 %vm471_vm3, %v5099_v43  ;;  %v5094_v35 = vld [vmem:[#allocation3 + $0x44] sm:$0xff]  ;;  %v4255_v43 = vld [vmem:[#allocation7 + $0x18] sm:$0xff] }
 0x2e1   : > { %9606 = vmatprep.mubr.msk.bf16.mxu1 %vm10273_vm4, %v10271_v0  ;;  %9668 = vmatprep.mubr.msk.bf16.mxu0 %vm10273_vm4, %v10271_v0  ;;  %v5101_v44 = vpack.c.bf16 %v5095_v33, %v5094_v35  ;;  %v4959_v5 = vpack.c.bf16 %v5094_v35, %v5093_v42 }
 0x2e8   : > { %9607 = vmatmul.mubr.msk.bf16.gmra.mrb[196].mxu1 %vm471_vm3, %v4675_v57  ;;  %9669 = vmatmul.mubr.msk.bf16.gmra.mrb[228].mxu0 %vm471_vm3, %v5100_v8  ;;  %v4958_v57 = vpack.c.bf16 %v5092_v6, %v5091_v11  ;;  %v4254_v11 = vld [vmem:[#allocation7 + $0x10] sm:$0xff] }
 0x2e9   : > { %9610 = vmatprep.mubr.msk.bf16.mxu1 %vm10273_vm4, %v10271_v0  ;;  %9672 = vmatprep.mubr.msk.bf16.mxu0 %vm10273_vm4, %v10271_v0 }
 0x2f0   : > { %9611 = vmatmul.mubr.msk.bf16.gmra.mrb[200].mxu1 %vm471_vm3, %v4676_v23  ;;  %9673 = vmatmul.mubr.msk.bf16.gmra.mrb[232].mxu0 %vm471_vm3, %v5101_v44 }
 0x2f1   : > { %9638 = vmatprep.mubr.msk.bf16.mxu1 %vm10273_vm4, %v10271_v0  ;;  %9676 = vmatprep.mubr.msk.bf16.mxu0 %vm10273_vm4, %v10271_v0 }
 0x2f8   : > { %9639 = vmatmul.mubr.msk.bf16.vlgmr.msra.gmra.mrb[204].mxu1 %vm471_vm3, %v4956_v48  ;;  %9677 = vmatmul.mubr.msk.bf16.gmra.mrb[236].mxu0 %vm471_vm3, %v5102_v25 }
 0x2f9   : > { %9681 = vmatpush3.bf16.msra.mxu1 %v9936_v49  ;;  %9642 = vmatprep.mubr.msk.bf16.mxu1 %vm10273_vm4, %v10271_v0  ;;  %v4257_v49 = vld [vmem:[#allocation7 + $0x28] sm:$0xff] }
 0x2fa   : > { %9704 = vmatprep.mubr.msk.bf16.mxu0 %vm10273_vm4, %v10271_v0 }
 0x300   : > { %9643 = vmatmul.mubr.msk.bf16.gmra.mrb[208].mxu1 %vm471_vm3, %v4957_v54  ;;  %9705 = vmatmul.mubr.msk.bf16.vlgmr.msra.gmra.mrb[240].mxu0 %vm471_vm3, %v5382_v26 }
 0x301   : > { %9646 = vmatprep.mubr.msk.bf16.mxu1 %vm10273_vm4, %v10271_v0  ;;  %9708 = vmatprep.mubr.msk.bf16.mxu0 %vm10273_vm4, %v10271_v0 }
 0x308   : > { %9647 = vmatmul.mubr.msk.bf16.gmra.mrb[212].mxu1 %vm471_vm3, %v4958_v57  ;;  %9709 = vmatmul.mubr.msk.bf16.gmra.mrb[244].mxu0 %vm471_vm3, %v5383_v58  ;;  %v4258_v58 = vld [vmem:[#allocation7 + $0x30] sm:$0xff] }
 0x309   : > { %9650 = vmatprep.mubr.msk.bf16.mxu1 %vm10273_vm4, %v10271_v0  ;;  %9712 = vmatprep.mubr.msk.bf16.mxu0 %vm10273_vm4, %v10271_v0 }
 0x310   : > { %9651 = vmatmul.mubr.msk.bf16.gmra.mrb[216].mxu1 %vm471_vm3, %v4959_v5  ;;  %9713 = vmatmul.mubr.msk.bf16.gmra.mrb[248].mxu0 %vm471_vm3, %v5384_v3  ;;  %v4259_v5 = vld [vmem:[#allocation7 + $0x38] sm:$0xff] }
 0x311   : > { %9654 = vmatprep.mubr.msk.bf16.mxu1 %vm10273_vm4, %v10271_v0  ;;  %9716 = vmatprep.mubr.msk.bf16.mxu0 %vm10273_vm4, %v10271_v0 }
 0x318   : > { %9655 = vmatmul.mubr.msk.bf16.gmra.mrb[220].mxu1 %vm471_vm3, %v4960_v50  ;;  %9717 = vmatmul.mubr.msk.bf16.gmra.mrb[252].mxu0 %vm471_vm3, %v5385_v2 }
 0x319   : > { %9682 = vmatprep.mubr.msk.bf16.mxu1 %vm10273_vm4, %v10271_v0  ;;  %9720 = vmatprep.mubr.msk.bf16.mxu0 %vm10273_vm4, %v10271_v0 }
 0x320   : > { %9683 = vmatmul.mubr.msk.bf16.vlgmr.msra.gmra.mrb[224].mxu1 %vm471_vm3, %v5240_v12  ;;  %9721 = vmatmul.mubr.msk.bf16.gmra.mrb[0].mxu0 %vm471_vm3, %v5386_v1  ;;  %v4261_v1 = vld [vmem:[#allocation7 + $0x48] sm:$0xff] }
 0x321   : > { %9686 = vmatprep.mubr.msk.bf16.mxu1 %vm10273_vm4, %v10271_v0 }
 0x328   : > { %9687 = vmatmul.mubr.msk.bf16.gmra.mrb[228].mxu1 %vm471_vm3, %v5241_v17 }
 0x329   : > { %9690 = vmatprep.mubr.msk.bf16.mxu1 %vm10273_vm4, %v10271_v0 }
 0x330   : > { %9691 = vmatmul.mubr.msk.bf16.gmra.mrb[232].mxu1 %vm471_vm3, %v5242_v21 }
 0x331   : > { %9694 = vmatprep.mubr.msk.bf16.mxu1 %vm10273_vm4, %v10271_v0 }
 0x338   : > { %9695 = vmatmul.mubr.msk.bf16.gmra.mrb[236].mxu1 %vm471_vm3, %v5243_v13 }
 0x339   : > { %9698 = vmatprep.mubr.msk.bf16.mxu1 %vm10273_vm4, %v10271_v0 }
 0x340   : > { %9699 = vmatmul.mubr.msk.bf16.gmra.mrb[240].mxu1 %vm471_vm3, %v5244_v27  ;;  %v4319_v29 = vpop.f32.mrb[144].mxu1 }
 0x341   : > { %v11552_v30 = vpop.f32.mrb[180].mxu0  ;;  %v4358_v32 = vadd.f32 %v4319_v29, %v4252_v28  ;;  %v9530_v37 = vpop.f32.mrb[145].mxu1 }
 0x342   : > { %v9574_v63 = vpop.f32.mrb[181].mxu0  ;;  %v4322_v38 = vpop.f32.mrb[146].mxu1 }
 0x343   : > { %v11554_v39 = vpop.f32.mrb[182].mxu0  ;;  %4368 = vst.msk [vmem:[#allocation7] sm:$0xff] %vm4226_vm5, %v4358_v32  ;;  %v4359_v40 = vadd.f32 %v4322_v38, %v4253_v31  ;;  %v9531_v41 = vpop.f32.mrb[147].mxu1 }
 0x344   : > { %v9575_v46 = vpop.f32.mrb[183].mxu0 }
 0x345   : > { %4369 = vst.msk [vmem:[#allocation7 + $0x8] sm:$0xff] %vm4226_vm5, %v4359_v40 }
 0x34a   : > { %v4393_v21 = vld [vmem:[#allocation7] sm:$0xff] }
 0x34c   : > { %v4394_v27 = vld [vmem:[#allocation7 + $0x8] sm:$0xff] }
 0x353   : > { %v4327_v10 = vpop.f32.mrb[148].mxu1 }
 0x354   : > { %v4360_v42 = vadd.f32 %v4327_v10, %v4254_v11  ;;  %v11558_v6 = vpop.f32.mrb[184].mxu0  ;;  %v9534_v8 = vpop.f32.mrb[149].mxu1 }
 0x355   : > { %v9578_v56 = vpop.f32.mrb[185].mxu0  ;;  %v4330_v33 = vpop.f32.mrb[150].mxu1 }
 0x356   : > { %4370 = vst.msk [vmem:[#allocation7 + $0x10] sm:$0xff] %vm4226_vm5, %v4360_v42  ;;  %v4361_v35 = vadd.f32 %v4330_v33, %v4255_v43  ;;  %v11561_v23 = vpop.f32.mrb[186].mxu0  ;;  %v9535_v44 = vpop.f32.mrb[151].mxu1 }
 0x357   : > { %v9579_v15 = vpop.f32.mrb[187].mxu0 }
 0x358   : > { %4371 = vst.msk [vmem:[#allocation7 + $0x18] sm:$0xff] %vm4226_vm5, %v4361_v35 }
 0x35b   : > { %v4335_v9 = vpop.f32.mrb[152].mxu1 }
 0x35c   : > { %v4362_v48 = vadd.f32 %v4335_v9, %v4256_v51  ;;  %v11564_v25 = vpop.f32.mrb[188].mxu0  ;;  %v9538_v53 = vpop.f32.mrb[153].mxu1 }
 0x35d   : > { %v9582_v34 = vpop.f32.mrb[189].mxu0  ;;  %v4338_v54 = vpop.f32.mrb[154].mxu1  ;;  %v4395_v63 = vld [vmem:[#allocation7 + $0x10] sm:$0xff] }
 0x35e   : > { %4372 = vst.msk [vmem:[#allocation7 + $0x20] sm:$0xff] %vm4226_vm5, %v4362_v48  ;;  %v4363_v26 = vadd.f32 %v4338_v54, %v4257_v49  ;;  %v11567_v55 = vpop.f32.mrb[190].mxu0  ;;  %v9539_v62 = vpop.f32.mrb[155].mxu1 }
 0x35f   : > { %v9583_v57 = vpop.f32.mrb[191].mxu0  ;;  %v4396_v10 = vld [vmem:[#allocation7 + $0x18] sm:$0xff] }
 0x360   : > { %4373 = vst.msk [vmem:[#allocation7 + $0x28] sm:$0xff] %vm4226_vm5, %v4363_v26 }
 0x365   : > { %v4397_v9 = vld [vmem:[#allocation7 + $0x20] sm:$0xff] }
 0x367   : > { %v4398_v26 = vld [vmem:[#allocation7 + $0x28] sm:$0xff] }
 0x36b   : > { %v4343_v59 = vpop.f32.mrb[156].mxu1 }
 0x36c   : > { %v11570_v60 = vpop.f32.mrb[192].mxu0  ;;  %v4364_v3 = vadd.f32 %v4343_v59, %v4258_v58  ;;  %v9542_v45 = vpop.f32.mrb[157].mxu1 }
 0x36d   : > { %v9586_v52 = vpop.f32.mrb[193].mxu0  ;;  %v4346_v50 = vpop.f32.mrb[158].mxu1 }
 0x36e   : > { %v11572_v2 = vpop.f32.mrb[194].mxu0  ;;  %4374 = vst.msk [vmem:[#allocation7 + $0x30] sm:$0xff] %vm4226_vm5, %v4364_v3  ;;  %v4365_v4 = vadd.f32 %v4346_v50, %v4259_v5  ;;  %v9543_v7 = vpop.f32.mrb[159].mxu1 }
 0x36f   : > { %v9587_v36 = vpop.f32.mrb[195].mxu0 }
 0x370   : > { %4375 = vst.msk [vmem:[#allocation7 + $0x38] sm:$0xff] %vm4226_vm5, %v4365_v4 }
 0x373   : > { %v4351_v12 = vpop.f32.mrb[160].mxu1 }
 0x374   : > { %v4366_v14 = vadd.f32 %v4351_v12, %v4260_v61  ;;  %v9546_v16 = vpop.f32.mrb[161].mxu1 }
 0x375   : > { %v4354_v17 = vpop.f32.mrb[162].mxu1  ;;  %v4399_v52 = vld [vmem:[#allocation7 + $0x30] sm:$0xff] }
 0x376   : > { %4376 = vst.msk [vmem:[#allocation7 + $0x40] sm:$0xff] %vm4226_vm5, %v4366_v14  ;;  %v4367_v47 = vadd.f32 %v4354_v17, %v4261_v1  ;;  %v9547_v18 = vpop.f32.mrb[163].mxu1 }
 0x377   : > { %v4400_v12 = vld [vmem:[#allocation7 + $0x38] sm:$0xff] }
 0x378   : > { %4377 = vst.msk [vmem:[#allocation7 + $0x48] sm:$0xff] %vm4226_vm5, %v4367_v47 }
 0x37b   : > { %v4461_v19 = vpop.f32.mrb[164].mxu1  ;;  %v11578_v20 = vpop.f32.mrb[196].mxu0 }
 0x37c   : > { %v4500_v13 = vadd.f32 %v4461_v19, %v4393_v21  ;;  %v9552_v22 = vpop.f32.mrb[165].mxu1  ;;  %v9590_v24 = vpop.f32.mrb[197].mxu0 }
 0x37d   : > { %v4464_v28 = vpop.f32.mrb[166].mxu1  ;;  %v11580_v29 = vpop.f32.mrb[198].mxu0  ;;  %v4401_v19 = vld [vmem:[#allocation7 + $0x40] sm:$0xff] }
 0x37e   : > { %4510 = vst.msk [vmem:[#allocation7] sm:$0xff] %vm4226_vm5, %v4500_v13  ;;  %v4501_v31 = vadd.f32 %v4464_v28, %v4394_v27  ;;  %v9553_v32 = vpop.f32.mrb[167].mxu1  ;;  %v9591_v37 = vpop.f32.mrb[199].mxu0 }
 0x380   : > { %4511 = vst.msk [vmem:[#allocation7 + $0x8] sm:$0xff] %vm4226_vm5, %v4501_v31  ;;  %v4402_v31 = vld [vmem:[#allocation7 + $0x48] sm:$0xff] }
 0x383   : > { %v4469_v38 = vpop.f32.mrb[168].mxu1  ;;  %v11584_v40 = vpop.f32.mrb[200].mxu0 }
 0x384   : > { %v4502_v41 = vadd.f32 %v4469_v38, %v4395_v63  ;;  %v9556_v46 = vpop.f32.mrb[169].mxu1  ;;  %v9618_v11 = vpop.f32.mrb[201].mxu0 }
 0x385   : > { %v4472_v43 = vpop.f32.mrb[170].mxu1  ;;  %v11586_v42 = vpop.f32.mrb[202].mxu0  ;;  %v4535_v8 = vld [vmem:[#allocation7] sm:$0xff] }
 0x386   : > { %4512 = vst.msk [vmem:[#allocation7 + $0x10] sm:$0xff] %vm4226_vm5, %v4502_v41  ;;  %v4503_v56 = vadd.f32 %v4472_v43, %v4396_v10  ;;  %v9557_v33 = vpop.f32.mrb[171].mxu1  ;;  %v9619_v35 = vpop.f32.mrb[203].mxu0  ;;  %v4642_v44 = vadd.f32 %v11552_v30, %v4535_v8  ;;  %v9938_v46 = vld [vmem:[%s12007_s5] sm:$0xff]  }
 0x387   : > { %v4536_v15 = vld [vmem:[#allocation7 + $0x8] sm:$0xff]  ;;  %9724 = vmatprep.subr.bf16.mxu1 %v9938_v46 }
 0x388   : > { %4513 = vst.msk [vmem:[#allocation7 + $0x18] sm:$0xff] %vm4226_vm5, %v4503_v56  ;;  %4652 = vst.msk [vmem:[#allocation7] sm:$0xff] %vm4226_vm5, %v4642_v44  ;;  %v4643_v51 = vadd.f32 %v11554_v39, %v4536_v15  ;;  %9725 = vmatpush3.bf16.msra.mxu1 %v9938_v46 }
 0x38a   : > { %4653 = vst.msk [vmem:[#allocation7 + $0x8] sm:$0xff] %vm4226_vm5, %v4643_v51 }
 0x38b   : > { %v4477_v49 = vpop.f32.mrb[172].mxu1  ;;  %v11594_v48 = vpop.f32.mrb[204].mxu0 }
 0x38c   : > { %v4504_v53 = vadd.f32 %v4477_v49, %v4397_v9  ;;  %v9560_v34 = vpop.f32.mrb[173].mxu1  ;;  %v9622_v54 = vpop.f32.mrb[205].mxu0 }
 0x38d   : > { %v4480_v62 = vpop.f32.mrb[174].mxu1  ;;  %v11596_v57 = vpop.f32.mrb[206].mxu0  ;;  %v4537_v30 = vld [vmem:[#allocation7 + $0x10] sm:$0xff] }
 0x38e   : > { %4514 = vst.msk [vmem:[#allocation7 + $0x20] sm:$0xff] %vm4226_vm5, %v4504_v53  ;;  %v4505_v58 = vadd.f32 %v4480_v62, %v4398_v26  ;;  %v9561_v59 = vpop.f32.mrb[175].mxu1  ;;  %v9623_v5 = vpop.f32.mrb[207].mxu0  ;;  %v4644_v39 = vadd.f32 %v11558_v6, %v4537_v30 }
 0x38f   : > { %v4538_v3 = vld [vmem:[#allocation7 + $0x18] sm:$0xff]  ;;  %v4677_v43 = vld [vmem:[#allocation7] sm:$0xff] }
 0x390   : > { %4515 = vst.msk [vmem:[#allocation7 + $0x28] sm:$0xff] %vm4226_vm5, %v4505_v58  ;;  %4654 = vst.msk [vmem:[#allocation7 + $0x10] sm:$0xff] %vm4226_vm5, %v4644_v39  ;;  %v4645_v45 = vadd.f32 %v11561_v23, %v4538_v3 }
 0x391   : > { %v4678_v44 = vld [vmem:[#allocation7 + $0x8] sm:$0xff] }
 0x392   : > { %4655 = vst.msk [vmem:[#allocation7 + $0x18] sm:$0xff] %vm4226_vm5, %v4645_v45 }
 0x393   : > { %v4485_v50 = vpop.f32.mrb[176].mxu1  ;;  %v11604_v4 = vpop.f32.mrb[208].mxu0 }
 0x394   : > { %v4506_v7 = vadd.f32 %v4485_v50, %v4399_v52  ;;  %v9564_v36 = vpop.f32.mrb[177].mxu1  ;;  %v9626_v61 = vpop.f32.mrb[209].mxu0 }
 0x395   : > { %v4488_v1 = vpop.f32.mrb[178].mxu1  ;;  %v11606_v14 = vpop.f32.mrb[210].mxu0  ;;  %v4539_v6 = vld [vmem:[#allocation7 + $0x20] sm:$0xff] }
 0x396   : > { %4516 = vst.msk [vmem:[#allocation7 + $0x30] sm:$0xff] %vm4226_vm5, %v4506_v7  ;;  %v4507_v16 = vadd.f32 %v4488_v1, %v4400_v12  ;;  %v9565_v17 = vpop.f32.mrb[179].mxu1  ;;  %v9627_v47 = vpop.f32.mrb[211].mxu0  ;;  %v4646_v23 = vadd.f32 %v11564_v25, %v4539_v6  ;;  %v9939_v1 = vld [vmem:[%s12007_s5 + $0x8] sm:$0xff]  }
 0x397   : > { %v4540_v18 = vld [vmem:[#allocation7 + $0x28] sm:$0xff]  ;;  %v4679_v62 = vld [vmem:[#allocation7 + $0x10] sm:$0xff]  ;;  %9726 = vmatprep.subr.bf16.mxu1 %v9939_v1 }
 0x398   : > { %4517 = vst.msk [vmem:[#allocation7 + $0x38] sm:$0xff] %vm4226_vm5, %v4507_v16  ;;  %4656 = vst.msk [vmem:[#allocation7 + $0x20] sm:$0xff] %vm4226_vm5, %v4646_v23  ;;  %v4647_v21 = vadd.f32 %v11567_v55, %v4540_v18  ;;  %9727 = vmatpush3.bf16.msra.mxu1 %v9939_v1 }
 0x399   : > { %v4680_v3 = vld [vmem:[#allocation7 + $0x18] sm:$0xff] }
 0x39a   : > { %4657 = vst.msk [vmem:[#allocation7 + $0x28] sm:$0xff] %vm4226_vm5, %v4647_v21 }
 0x39b   : > { %v4493_v13 = vpop.f32.mrb[180].mxu1  ;;  %v11614_v22 = vpop.f32.mrb[212].mxu0 }
 0x39c   : > { %v4508_v24 = vadd.f32 %v4493_v13, %v4401_v19  ;;  %v9568_v27 = vpop.f32.mrb[181].mxu1  ;;  %v9630_v28 = vpop.f32.mrb[213].mxu0 }
 0x39d   : > { %v4496_v32 = vpop.f32.mrb[182].mxu1  ;;  %v11616_v37 = vpop.f32.mrb[214].mxu0  ;;  %v4541_v25 = vld [vmem:[#allocation7 + $0x30] sm:$0xff] }
 0x39e   : > { %4518 = vst.msk [vmem:[#allocation7 + $0x40] sm:$0xff] %vm4226_vm5, %v4508_v24  ;;  %v4509_v63 = vadd.f32 %v4496_v32, %v4402_v31  ;;  %v9569_v38 = vpop.f32.mrb[183].mxu1  ;;  %v9631_v41 = vpop.f32.mrb[215].mxu0  ;;  %v4648_v55 = vadd.f32 %v11570_v60, %v4541_v25  ;;  %v11660_v24 = vld [vmem:[%s12007_s5 + $0x10] sm:$0xff]  }
 0x39f   : > { %v4542_v11 = vld [vmem:[#allocation7 + $0x38] sm:$0xff]  ;;  %v4681_v6 = vld [vmem:[#allocation7 + $0x20] sm:$0xff]  ;;  %9732 = vmatprep.subr.bf16.mxu1 %v11660_v24 }
 0x3a0   : > { %4519 = vst.msk [vmem:[#allocation7 + $0x48] sm:$0xff] %vm4226_vm5, %v4509_v63  ;;  %4658 = vst.msk [vmem:[#allocation7 + $0x30] sm:$0xff] %vm4226_vm5, %v4648_v55  ;;  %v4649_v10 = vadd.f32 %v11572_v2, %v4542_v11  ;;  %v9943_v63 = vld [vmem:[%s12007_s5 + $0x48] sm:$0xff]  }
 0x3a2   : > { %4659 = vst.msk [vmem:[#allocation7 + $0x38] sm:$0xff] %vm4226_vm5, %v4649_v10 }
 0x3a3   : > { %v4745_v8 = vpop.f32.mrb[184].mxu1  ;;  %v11627_v56 = vpop.f32.mrb[216].mxu0 }
 0x3a4   : > { %v4784_v60 = vadd.f32 %v4745_v8, %v4677_v43  ;;  %v9596_v33 = vpop.f32.mrb[185].mxu1  ;;  %v9634_v35 = vpop.f32.mrb[217].mxu0 }
 0x3a5   : > { %v4748_v15 = vpop.f32.mrb[186].mxu1  ;;  %v11629_v51 = vpop.f32.mrb[218].mxu0  ;;  %v4543_v9 = vld [vmem:[#allocation7 + $0x40] sm:$0xff] }
 0x3a6   : > { %4794 = vst.msk [vmem:[#allocation7] sm:$0xff] %vm4226_vm5, %v4784_v60  ;;  %v4785_v49 = vadd.f32 %v4748_v15, %v4678_v44  ;;  %v9597_v2 = vpop.f32.mrb[187].mxu1  ;;  %v9635_v53 = vpop.f32.mrb[219].mxu0  ;;  %v4650_v34 = vadd.f32 %v11578_v20, %v4543_v9 }
 0x3a7   : > { %v4544_v54 = vld [vmem:[#allocation7 + $0x48] sm:$0xff]  ;;  %v4683_v41 = vld [vmem:[#allocation7 + $0x30] sm:$0xff] }
 0x3a8   : > { %4795 = vst.msk [vmem:[#allocation7 + $0x8] sm:$0xff] %vm4226_vm5, %v4785_v49  ;;  %4660 = vst.msk [vmem:[#allocation7 + $0x40] sm:$0xff] %vm4226_vm5, %v4650_v34  ;;  %v4651_v26 = vadd.f32 %v11580_v29, %v4544_v54 }
 0x3a9   : > { %v4684_v43 = vld [vmem:[#allocation7 + $0x38] sm:$0xff] }
 0x3aa   : > { %4661 = vst.msk [vmem:[#allocation7 + $0x48] sm:$0xff] %vm4226_vm5, %v4651_v26 }
 0x3ab   : > { %v4753_v30 = vpop.f32.mrb[188].mxu1  ;;  %v11637_v58 = vpop.f32.mrb[220].mxu0 }
 0x3ac   : > { %v4786_v59 = vadd.f32 %v4753_v30, %v4679_v62  ;;  %v9600_v5 = vpop.f32.mrb[189].mxu1  ;;  %v9662_v39 = vpop.f32.mrb[221].mxu0 }
 0x3ad   : > { %v4756_v45 = vpop.f32.mrb[190].mxu1  ;;  %v11639_v52 = vpop.f32.mrb[222].mxu0  ;;  %v4819_v20 = vld [vmem:[#allocation7] sm:$0xff] }
 0x3ae   : > { %4796 = vst.msk [vmem:[#allocation7 + $0x10] sm:$0xff] %vm4226_vm5, %v4786_v59  ;;  %v4787_v50 = vadd.f32 %v4756_v45, %v4680_v3  ;;  %v9601_v7 = vpop.f32.mrb[191].mxu1  ;;  %v9663_v36 = vpop.f32.mrb[223].mxu0  ;;  %v4926_v29 = vadd.f32 %v11584_v40, %v4819_v20  ;;  %v9940_v40 = vld [vmem:[%s12007_s5 + $0x40] sm:$0xff]  }
 0x3af   : > { %v4820_v61 = vld [vmem:[#allocation7 + $0x8] sm:$0xff]  ;;  %9756 = vmatprep.subr.bf16.mxu0 %v9940_v40  ;;  %v4685_v53 = vld [vmem:[#allocation7 + $0x40] sm:$0xff] }
 0x3b0   : > { %4797 = vst.msk [vmem:[#allocation7 + $0x18] sm:$0xff] %vm4226_vm5, %v4787_v50  ;;  %4936 = vst.msk [vmem:[#allocation7] sm:$0xff] %vm4226_vm5, %v4926_v29  ;;  %v4927_v12 = vadd.f32 %v11586_v42, %v4820_v61  ;;  %v4682_v42 = vld [vmem:[#allocation7 + $0x28] sm:$0xff]  ;;  %9757 = vmatpush3.bf16.msra.mxu0 %v9940_v40 }
 0x3b1   : > { %9758 = vmatprep.subr.bf16.mxu0 %v9943_v63  ;;  %v4686_v59 = vld [vmem:[#allocation7 + $0x48] sm:$0xff] }
 0x3b2   : > { %4937 = vst.msk [vmem:[#allocation7 + $0x8] sm:$0xff] %vm4226_vm5, %v4927_v12 }
 0x3b3   : > { %v4761_v16 = vpop.f32.mrb[192].mxu1  ;;  %v11650_v17 = vpop.f32.mrb[224].mxu0 }
 0x3b4   : > { %v4788_v47 = vadd.f32 %v4761_v16, %v4681_v6  ;;  %v9604_v23 = vpop.f32.mrb[193].mxu1  ;;  %v9666_v18 = vpop.f32.mrb[225].mxu0  ;;  %9759 = vmatpush3.bf16.msra.mxu0 %v9943_v63 }
 0x3b5   : > { %v4764_v21 = vpop.f32.mrb[194].mxu1  ;;  %v11655_v19 = vpop.f32.mrb[226].mxu0  ;;  %v4821_v13 = vld [vmem:[#allocation7 + $0x10] sm:$0xff] }
 0x3b6   : > { %4798 = vst.msk [vmem:[#allocation7 + $0x20] sm:$0xff] %vm4226_vm5, %v4788_v47  ;;  %v4789_v27 = vadd.f32 %v4764_v21, %v4682_v42  ;;  %v9605_v28 = vpop.f32.mrb[195].mxu1  ;;  %v9667_v31 = vpop.f32.mrb[227].mxu0  ;;  %v4928_v32 = vadd.f32 %v11594_v48, %v4821_v13 }
 0x3b7   : > { %v4822_v25 = vld [vmem:[#allocation7 + $0x18] sm:$0xff]  ;;  %v4961_v36 = vld [vmem:[#allocation7] sm:$0xff] }
 0x3b8   : > { %4799 = vst.msk [vmem:[#allocation7 + $0x28] sm:$0xff] %vm4226_vm5, %v4789_v27  ;;  %4938 = vst.msk [vmem:[#allocation7 + $0x10] sm:$0xff] %vm4226_vm5, %v4928_v32  ;;  %v4929_v38 = vadd.f32 %v11596_v57, %v4822_v25  ;;  %v11679_v57 = vld [vmem:[%s12007_s5 + $0x60] sm:$0xff]  }
 0x3b9   : > { %9772 = vmatprep.subr.bf16.mxu0 %v11679_v57  ;;  %v4962_v16 = vld [vmem:[#allocation7 + $0x8] sm:$0xff] }
 0x3ba   : > { %4939 = vst.msk [vmem:[#allocation7 + $0x18] sm:$0xff] %vm4226_vm5, %v4929_v38 }
 0x3bb   : > { %v4769_v48 = vpop.f32.mrb[196].mxu1  ;;  %v11672_v55 = vpop.f32.mrb[228].mxu0 }
 0x3bc   : > { %v4790_v46 = vadd.f32 %v4769_v48, %v4683_v41  ;;  %v9608_v11 = vpop.f32.mrb[197].mxu1  ;;  %v9670_v10 = vpop.f32.mrb[229].mxu0 }
 0x3bd   : > { %v4772_v8 = vpop.f32.mrb[198].mxu1  ;;  %v11674_v60 = vpop.f32.mrb[230].mxu0  ;;  %v4823_v33 = vld [vmem:[#allocation7 + $0x20] sm:$0xff] }
 0x3be   : > { %4800 = vst.msk [vmem:[#allocation7 + $0x30] sm:$0xff] %vm4226_vm5, %v4790_v46  ;;  %v4791_v35 = vadd.f32 %v4772_v8, %v4684_v43  ;;  %v9609_v44 = vpop.f32.mrb[199].mxu1  ;;  %v9671_v15 = vpop.f32.mrb[231].mxu0  ;;  %v4930_v9 = vadd.f32 %v11604_v4, %v4823_v33 }
 0x3bf   : > { %v4824_v49 = vld [vmem:[#allocation7 + $0x28] sm:$0xff]  ;;  %v4963_v27 = vld [vmem:[#allocation7 + $0x10] sm:$0xff] }
 0x3c0   : > { %4801 = vst.msk [vmem:[#allocation7 + $0x38] sm:$0xff] %vm4226_vm5, %v4791_v35  ;;  %4940 = vst.msk [vmem:[#allocation7 + $0x20] sm:$0xff] %vm4226_vm5, %v4930_v9  ;;  %v4931_v2 = vadd.f32 %v11606_v14, %v4824_v49 }
 0x3c1   : > { %v4964_v38 = vld [vmem:[#allocation7 + $0x18] sm:$0xff] }
 0x3c2   : > { %4941 = vst.msk [vmem:[#allocation7 + $0x28] sm:$0xff] %vm4226_vm5, %v4931_v2 }
 0x3c3   : > { %v4777_v34 = vpop.f32.mrb[200].mxu1  ;;  %v11688_v54 = vpop.f32.mrb[232].mxu0 }
 0x3c4   : > { %v4792_v26 = vadd.f32 %v4777_v34, %v4685_v53  ;;  %v9612_v62 = vpop.f32.mrb[201].mxu1  ;;  %v9674_v30 = vpop.f32.mrb[233].mxu0 }
 0x3c5   : > { %v4780_v4 = vpop.f32.mrb[202].mxu1  ;;  %v11690_v5 = vpop.f32.mrb[234].mxu0  ;;  %v4825_v39 = vld [vmem:[#allocation7 + $0x30] sm:$0xff] }
 0x3c6   : > { %4802 = vst.msk [vmem:[#allocation7 + $0x40] sm:$0xff] %vm4226_vm5, %v4792_v26  ;;  %v4793_v3 = vadd.f32 %v4780_v4, %v4686_v59  ;;  %v9613_v45 = vpop.f32.mrb[203].mxu1  ;;  %v9675_v20 = vpop.f32.mrb[235].mxu0  ;;  %v4932_v14 = vadd.f32 %v11614_v22, %v4825_v39 }
 0x3c7   : > { %v4826_v50 = vld [vmem:[#allocation7 + $0x38] sm:$0xff]  ;;  %v4965_v33 = vld [vmem:[#allocation7 + $0x20] sm:$0xff] }
 0x3c8   : > { %4803 = vst.msk [vmem:[#allocation7 + $0x48] sm:$0xff] %vm4226_vm5, %v4793_v3  ;;  %4942 = vst.msk [vmem:[#allocation7 + $0x30] sm:$0xff] %vm4226_vm5, %v4932_v14  ;;  %v4933_v7 = vadd.f32 %v11616_v37, %v4826_v50 }
 0x3c9   : > { %v4966_v2 = vld [vmem:[#allocation7 + $0x28] sm:$0xff] }
 0x3ca   : > { %4943 = vst.msk [vmem:[#allocation7 + $0x38] sm:$0xff] %vm4226_vm5, %v4933_v7 }
 0x3cb   : > { %v5029_v29 = vpop.f32.mrb[204].mxu1  ;;  %v11698_v61 = vpop.f32.mrb[236].mxu0 }
 0x3cc   : > { %v5068_v12 = vadd.f32 %v5029_v29, %v4961_v36  ;;  %v9640_v1 = vpop.f32.mrb[205].mxu1  ;;  %v9678_v6 = vpop.f32.mrb[237].mxu0 }
 0x3cd   : > { %v5032_v40 = vpop.f32.mrb[206].mxu1  ;;  %v11700_v47 = vpop.f32.mrb[238].mxu0  ;;  %v4827_v22 = vld [vmem:[#allocation7 + $0x40] sm:$0xff] }
 0x3ce   : > { %5078 = vst.msk [vmem:[#allocation7] sm:$0xff] %vm4226_vm5, %v5068_v12  ;;  %v5069_v23 = vadd.f32 %v5032_v40, %v4962_v16  ;;  %v9641_v18 = vpop.f32.mrb[207].mxu1  ;;  %v9679_v42 = vpop.f32.mrb[239].mxu0  ;;  %v4934_v37 = vadd.f32 %v11627_v56, %v4827_v22 }
 0x3cf   : > { %v4828_v21 = vld [vmem:[#allocation7 + $0x48] sm:$0xff]  ;;  %v4967_v4 = vld [vmem:[#allocation7 + $0x30] sm:$0xff] }
 0x3d0   : > { %5079 = vst.msk [vmem:[#allocation7 + $0x8] sm:$0xff] %vm4226_vm5, %v5069_v23  ;;  %4944 = vst.msk [vmem:[#allocation7 + $0x40] sm:$0xff] %vm4226_vm5, %v4934_v37  ;;  %v4935_v13 = vadd.f32 %v11629_v51, %v4828_v21 }
 0x3d1   : > { %v4968_v50 = vld [vmem:[#allocation7 + $0x38] sm:$0xff] }
 0x3d2   : > { %4945 = vst.msk [vmem:[#allocation7 + $0x48] sm:$0xff] %vm4226_vm5, %v4935_v13 }
 0x3d3   : > { %v5037_v28 = vpop.f32.mrb[208].mxu1  ;;  %v11708_v31 = vpop.f32.mrb[240].mxu0 }
 0x3d4   : > { %v5070_v32 = vadd.f32 %v5037_v28, %v4963_v27  ;;  %v9644_v25 = vpop.f32.mrb[209].mxu1  ;;  %v9706_v63 = vpop.f32.mrb[241].mxu0 }
 0x3d5   : > { %v5040_v41 = vpop.f32.mrb[210].mxu1  ;;  %v11710_v48 = vpop.f32.mrb[242].mxu0  ;;  %v5103_v56 = vld [vmem:[#allocation7] sm:$0xff] }
 0x3d6   : > { %5080 = vst.msk [vmem:[#allocation7 + $0x10] sm:$0xff] %vm4226_vm5, %v5070_v32  ;;  %v5071_v46 = vadd.f32 %v5040_v41, %v4964_v38  ;;  %v9645_v11 = vpop.f32.mrb[211].mxu1  ;;  %v9707_v10 = vpop.f32.mrb[243].mxu0  ;;  %v5210_v51 = vadd.f32 %v11637_v58, %v5103_v56 }
 0x3d7   : > { %v5104_v43 = vld [vmem:[#allocation7 + $0x8] sm:$0xff]  ;;  %v4969_v22 = vld [vmem:[#allocation7 + $0x40] sm:$0xff] }
 0x3d8   : > { %5081 = vst.msk [vmem:[#allocation7 + $0x18] sm:$0xff] %vm4226_vm5, %v5071_v46  ;;  %5220 = vst.msk [vmem:[#allocation7] sm:$0xff] %vm4226_vm5, %v5210_v51  ;;  %v5211_v8 = vadd.f32 %v11639_v52, %v5104_v43 }
 0x3d9   : > { %v4970_v13 = vld [vmem:[#allocation7 + $0x48] sm:$0xff] }
 0x3da   : > { %5221 = vst.msk [vmem:[#allocation7 + $0x8] sm:$0xff] %vm4226_vm5, %v5211_v8 }
 0x3db   : > { %v5045_v35 = vpop.f32.mrb[212].mxu1  ;;  %v11718_v44 = vpop.f32.mrb[244].mxu0 }
 0x3dc   : > { %v5072_v15 = vadd.f32 %v5045_v35, %v4965_v33  ;;  %v9648_v9 = vpop.f32.mrb[213].mxu1  ;;  %v9710_v49 = vpop.f32.mrb[245].mxu0 }
 0x3dd   : > { %v5048_v53 = vpop.f32.mrb[214].mxu1  ;;  %v11720_v34 = vpop.f32.mrb[246].mxu0  ;;  %v5105_v58 = vld [vmem:[#allocation7 + $0x10] sm:$0xff] }
 0x3de   : > { %5082 = vst.msk [vmem:[#allocation7 + $0x20] sm:$0xff] %vm4226_vm5, %v5072_v15  ;;  %v5073_v26 = vadd.f32 %v5048_v53, %v4966_v2  ;;  %v9649_v62 = vpop.f32.mrb[215].mxu1  ;;  %v9711_v52 = vpop.f32.mrb[247].mxu0  ;;  %v5212_v30 = vadd.f32 %v11650_v17, %v5105_v58 }
 0x3df   : > { %v5106_v59 = vld [vmem:[#allocation7 + $0x18] sm:$0xff]  ;;  %v5245_v56 = vld [vmem:[#allocation7] sm:$0xff] }
 0x3e0   : > { %5083 = vst.msk [vmem:[#allocation7 + $0x28] sm:$0xff] %vm4226_vm5, %v5073_v26  ;;  %5222 = vst.msk [vmem:[#allocation7 + $0x10] sm:$0xff] %vm4226_vm5, %v5212_v30  ;;  %v5213_v17 = vadd.f32 %v11655_v19, %v5106_v59 }
 0x3e1   : > { %v5246_v8 = vld [vmem:[#allocation7 + $0x8] sm:$0xff] }
 0x3e2   : > { %5223 = vst.msk [vmem:[#allocation7 + $0x18] sm:$0xff] %vm4226_vm5, %v5213_v17 }
 0x3e3   : > { %v5053_v39 = vpop.f32.mrb[216].mxu1  ;;  %v11738_v3 = vpop.f32.mrb[248].mxu0 }
 0x3e4   : > { %v5074_v45 = vadd.f32 %v5053_v39, %v4967_v4  ;;  %v9652_v20 = vpop.f32.mrb[217].mxu1  ;;  %v9714_v14 = vpop.f32.mrb[249].mxu0 }
 0x3e5   : > { %v5056_v7 = vpop.f32.mrb[218].mxu1  ;;  %v11740_v36 = vpop.f32.mrb[250].mxu0  ;;  %v5107_v29 = vld [vmem:[#allocation7 + $0x20] sm:$0xff] }
 0x3e6   : > { %5084 = vst.msk [vmem:[#allocation7 + $0x30] sm:$0xff] %vm4226_vm5, %v5074_v45  ;;  %v5075_v12 = vadd.f32 %v5056_v7, %v4968_v50  ;;  %v9653_v1 = vpop.f32.mrb[219].mxu1  ;;  %v9715_v6 = vpop.f32.mrb[251].mxu0  ;;  %v5214_v19 = vadd.f32 %v11672_v55, %v5107_v29 }
 0x3e7   : > { %v5108_v16 = vld [vmem:[#allocation7 + $0x28] sm:$0xff]  ;;  %v5247_v58 = vld [vmem:[#allocation7 + $0x10] sm:$0xff] }
 0x3e8   : > { %5085 = vst.msk [vmem:[#allocation7 + $0x38] sm:$0xff] %vm4226_vm5, %v5075_v12  ;;  %5224 = vst.msk [vmem:[#allocation7 + $0x20] sm:$0xff] %vm4226_vm5, %v5214_v19  ;;  %v5215_v40 = vadd.f32 %v11674_v60, %v5108_v16 }
 0x3e9   : > { %v5248_v59 = vld [vmem:[#allocation7 + $0x18] sm:$0xff] }
 0x3ea   : > { %5225 = vst.msk [vmem:[#allocation7 + $0x28] sm:$0xff] %vm4226_vm5, %v5215_v40 }
 0x3eb   : > { %v5061_v23 = vpop.f32.mrb[220].mxu1  ;;  %v11748_v18 = vpop.f32.mrb[252].mxu0 }
 0x3ec   : > { %v5076_v42 = vadd.f32 %v5061_v23, %v4969_v22  ;;  %v9656_v37 = vpop.f32.mrb[221].mxu1  ;;  %v9718_v21 = vpop.f32.mrb[253].mxu0 }
 0x3ed   : > { %v5064_v27 = vpop.f32.mrb[222].mxu1  ;;  %v11750_v28 = vpop.f32.mrb[254].mxu0  ;;  %v5109_v55 = vld [vmem:[#allocation7 + $0x30] sm:$0xff] }
 0x3ee   : > { %5086 = vst.msk [vmem:[#allocation7 + $0x40] sm:$0xff] %vm4226_vm5, %v5076_v42  ;;  %v5077_v32 = vadd.f32 %v5064_v27, %v4970_v13  ;;  %v9657_v25 = vpop.f32.mrb[223].mxu1  ;;  %v9719_v63 = vpop.f32.mrb[255].mxu0  ;;  %v5216_v60 = vadd.f32 %v11688_v54, %v5109_v55 }
 0x3ef   : > { %v5110_v38 = vld [vmem:[#allocation7 + $0x38] sm:$0xff]  ;;  %v5249_v20 = vld [vmem:[#allocation7 + $0x20] sm:$0xff] }
 0x3f0   : > { %5087 = vst.msk [vmem:[#allocation7 + $0x48] sm:$0xff] %vm4226_vm5, %v5077_v32  ;;  %5226 = vst.msk [vmem:[#allocation7 + $0x30] sm:$0xff] %vm4226_vm5, %v5216_v60  ;;  %v5217_v41 = vadd.f32 %v11690_v5, %v5110_v38 }
 0x3f1   : > { %v5250_v12 = vld [vmem:[#allocation7 + $0x28] sm:$0xff] }
 0x3f2   : > { %5227 = vst.msk [vmem:[#allocation7 + $0x38] sm:$0xff] %vm4226_vm5, %v5217_v41 }
 0x3f3   : > { %v5313_v46 = vpop.f32.mrb[224].mxu1  ;;  %v11758_v11 = vpop.f32.mrb[0].mxu0 }
 0x3f4   : > { %v5352_v10 = vadd.f32 %v5313_v46, %v5245_v56  ;;  %v9684_v51 = vpop.f32.mrb[225].mxu1  ;;  %v9722_v43 = vpop.f32.mrb[1].mxu0  ;;  %v8684_v56 = vld [vmem:[%s12006_s4] ss:$0 sm:$0xff] }
 0x3f5   : > { %v5316_v33 = vpop.f32.mrb[226].mxu1  ;;  %v11760_v35 = vpop.f32.mrb[2].mxu0  ;;  %v5111_v54 = vld [vmem:[#allocation7 + $0x40] sm:$0xff] }
 0x3f6   : > { %5362 = vst.msk [vmem:[#allocation7] sm:$0xff] %vm4226_vm5, %v5352_v10  ;;  %v5353_v15 = vadd.f32 %v5316_v33, %v5246_v8  ;;  %v9685_v9 = vpop.f32.mrb[227].mxu1  ;;  %v9723_v49 = vpop.f32.mrb[3].mxu0  ;;  %v5218_v5 = vadd.f32 %v11698_v61, %v5111_v54 }
 0x3f7   : > { %v5112_v2 = vld [vmem:[#allocation7 + $0x48] sm:$0xff]  ;;  %v5251_v40 = vld [vmem:[#allocation7 + $0x30] sm:$0xff] }
 0x3f8   : > { %5363 = vst.msk [vmem:[#allocation7 + $0x8] sm:$0xff] %vm4226_vm5, %v5353_v15  ;;  %5228 = vst.msk [vmem:[#allocation7 + $0x40] sm:$0xff] %vm4226_vm5, %v5218_v5  ;;  %v5219_v53 = vadd.f32 %v11700_v47, %v5112_v2 }
 0x3f9   : > { %v5252_v13 = vld [vmem:[#allocation7 + $0x38] sm:$0xff] }
 0x3fa   : > { %5229 = vst.msk [vmem:[#allocation7 + $0x48] sm:$0xff] %vm4226_vm5, %v5219_v53 }
 0x3fb   : > { %v5321_v26 = vpop.f32.mrb[228].mxu1 }
 0x3fc   : > { %v5354_v62 = vadd.f32 %v5321_v26, %v5247_v58  ;;  %v9688_v52 = vpop.f32.mrb[229].mxu1 }
 0x3fd   : > { %v5387_v30 = vld [vmem:[#allocation7] sm:$0xff]  ;;  %v5324_v17 = vpop.f32.mrb[230].mxu1 }
 0x3fe   : > { %v5494_v4 = vadd.f32 %v11708_v31, %v5387_v30  ;;  %5364 = vst.msk [vmem:[#allocation7 + $0x10] sm:$0xff] %vm4226_vm5, %v5354_v62  ;;  %v5355_v61 = vadd.f32 %v5324_v17, %v5248_v59  ;;  %v9689_v39 = vpop.f32.mrb[231].mxu1 }
 0x3ff   : > { %v5388_v45 = vld [vmem:[#allocation7 + $0x8] sm:$0xff]  ;;  %v5253_v10 = vld [vmem:[#allocation7 + $0x40] sm:$0xff] }
 0x400   : > { %5504 = vst.msk [vmem:[#allocation7] sm:$0xff] %vm4226_vm5, %v5494_v4  ;;  %v5495_v47 = vadd.f32 %v11710_v48, %v5388_v45  ;;  %5365 = vst.msk [vmem:[#allocation7 + $0x18] sm:$0xff] %vm4226_vm5, %v5355_v61 }
 0x401   : > { %v5254_v49 = vld [vmem:[#allocation7 + $0x48] sm:$0xff] }
 0x402   : > { %5505 = vst.msk [vmem:[#allocation7 + $0x8] sm:$0xff] %vm4226_vm5, %v5495_v47 }
 0x403   : > { %v5329_v14 = vpop.f32.mrb[232].mxu1 }
 0x404   : > { %v5356_v50 = vadd.f32 %v5329_v14, %v5249_v20  ;;  %v9692_v7 = vpop.f32.mrb[233].mxu1 }
 0x405   : > { %v5389_v29 = vld [vmem:[#allocation7 + $0x10] sm:$0xff]  ;;  %v5332_v31 = vpop.f32.mrb[234].mxu1 }
 0x406   : > { %v5496_v1 = vadd.f32 %v11718_v44, %v5389_v29  ;;  %5366 = vst.msk [vmem:[#allocation7 + $0x20] sm:$0xff] %vm4226_vm5, %v5356_v50  ;;  %v5357_v6 = vadd.f32 %v5332_v31, %v5250_v12  ;;  %v9693_v19 = vpop.f32.mrb[235].mxu1 }
 0x407   : > { %v5390_v48 = vld [vmem:[#allocation7 + $0x18] sm:$0xff]  ;;  %v5522_v23 = vld [vmem:[#allocation7] ss:$2 sm:$0xf] }
 0x408   : > { %5506 = vst.msk [vmem:[#allocation7 + $0x10] sm:$0xff] %vm4226_vm5, %v5496_v1  ;;  %5367 = vst.msk [vmem:[#allocation7 + $0x28] sm:$0xff] %vm4226_vm5, %v5357_v6  ;;  %v5497_v16 = vadd.f32 %v11720_v34, %v5390_v48  ;;  %v5524_v21 = vld [vmem:[#allocation7 + $0x1] ss:$2 sm:$0xf] }
 0x409   : > { %v5529_v34 = vmax.f32 %v5522_v23, %v5524_v21 }
 0x40a   : > { %5507 = vst.msk [vmem:[#allocation7 + $0x18] sm:$0xff] %vm4226_vm5, %v5497_v16 }
 0x40b   : > { %v5337_v22 = vpop.f32.mrb[236].mxu1 }
 0x40c   : > { %v5358_v42 = vadd.f32 %v5337_v22, %v5251_v40  ;;  %v9696_v37 = vpop.f32.mrb[237].mxu1 }
 0x40d   : > { %v5391_v44 = vld [vmem:[#allocation7 + $0x20] sm:$0xff]  ;;  %v5340_v27 = vpop.f32.mrb[238].mxu1 }
 0x40e   : > { %v5498_v55 = vadd.f32 %v11738_v3, %v5391_v44  ;;  %5368 = vst.msk [vmem:[#allocation7 + $0x30] sm:$0xff] %vm4226_vm5, %v5358_v42  ;;  %v5359_v32 = vadd.f32 %v5340_v27, %v5252_v13  ;;  %v9697_v25 = vpop.f32.mrb[239].mxu1 }
 0x40f   : > { %v5526_v63 = vld [vmem:[#allocation7 + $0xa] ss:$2 sm:$0xf]  ;;  %v5528_v60 = vld [vmem:[#allocation7 + $0xb] ss:$2 sm:$0xf] }
 0x410   : > { %v5530_v38 = vmax.f32 %v5526_v63, %v5528_v60  ;;  %5508 = vst.msk [vmem:[#allocation7 + $0x20] sm:$0xff] %vm4226_vm5, %v5498_v55  ;;  %v5392_v41 = vld [vmem:[#allocation7 + $0x28] sm:$0xff]  ;;  %5369 = vst.msk [vmem:[#allocation7 + $0x38] sm:$0xff] %vm4226_vm5, %v5359_v32 }
 0x411   : > { %v5499_v46 = vadd.f32 %v11740_v36, %v5392_v41  ;;  %v5543_v8 = vld [vmem:[#allocation7 + $0x14] ss:$2 sm:$0xf]  ;;  %v5545_v15 = vld [vmem:[#allocation7 + $0x15] ss:$2 sm:$0xf] }
 0x412   : > { %v5531_v3 = vmax.f32 %v5529_v34, %v5530_v38  ;;  %v5550_v52 = vmax.f32 %v5543_v8, %v5545_v15  ;;  %v9942_v34 = vld [vmem:[%s12007_s5 + $0x18] sm:$0xff]   ;;  %v9944_v41 = vld [vmem:[%s12007_s5 + $0x20] sm:$0xff]  }
 0x413   : > { %5509 = vst.msk [vmem:[#allocation7 + $0x28] sm:$0xff] %vm4226_vm5, %v5499_v46  ;;  %v5345_v51 = vpop.f32.mrb[240].mxu1 }
 0x414   : > { %v5538_v43 = vadd.f32 %v8684_v56, %v5531_v3  ;;  %v5360_v33 = vadd.f32 %v5345_v51, %v5253_v10  ;;  %v9700_v54 = vpop.f32.mrb[241].mxu1 }
 0x415   : > { %v5393_v9 = vld [vmem:[#allocation7 + $0x30] sm:$0xff]  ;;  %v5348_v5 = vpop.f32.mrb[242].mxu1 }
 0x416   : > { %v5539_v2 = vmax.f32 %v5538_v43, 0.0  ;;  %v5500_v53 = vadd.f32 %v11748_v18, %v5393_v9  ;;  %5370 = vst.msk [vmem:[#allocation7 + $0x40] sm:$0xff] %vm4226_vm5, %v5360_v33  ;;  %v5361_v36 = vadd.f32 %v5348_v5, %v5254_v49  ;;  %v9701_v58 = vpop.f32.mrb[243].mxu1  ;;  %v9947_v9 = vld [vmem:[%s12007_s5 + $0x68] sm:$0xff]   ;;  %v9948_v49 = vld [vmem:[%s12007_s5 + $0x30] sm:$0xff]  }
 0x417   : > { %v5547_v26 = vld [vmem:[#allocation7 + $0x1e] ss:$2 sm:$0xf]  ;;  %v5549_v62 = vld [vmem:[#allocation7 + $0x1f] ss:$2 sm:$0xf] }
 0x418   : > { %v5551_v30 = vmax.f32 %v5547_v26, %v5549_v62  ;;  %5510 = vst.msk [vmem:[#allocation7 + $0x30] sm:$0xff] %vm4226_vm5, %v5500_v53  ;;  %v5394_v59 = vld [vmem:[#allocation7 + $0x38] sm:$0xff]  ;;  %5371 = vst.msk [vmem:[#allocation7 + $0x48] sm:$0xff] %vm4226_vm5, %v5361_v36 }
 0x419   : > { %5541 = vst.msk [vmem:[#allocation4 + $0x7] sm:$0xf] %vm5540_vm7, %v5539_v2  ;;  %v5501_v17 = vadd.f32 %v11750_v28, %v5394_v59  ;;  %v9954_v2 = vld [vmem:[%s12007_s5 + $0x80] sm:$0xff]  }
 0x41a   : > { %v5552_v4 = vmax.f32 %v5550_v52, %v5551_v30  ;;  %v5557_v20 = vld [vmem:[#allocation7 + $0x28] ss:$2 sm:$0xf]  ;;  %v5559_v14 = vld [vmem:[#allocation7 + $0x29] ss:$2 sm:$0xf] }
 0x41b   : > { %5511 = vst.msk [vmem:[#allocation7 + $0x38] sm:$0xff] %vm4226_vm5, %v5501_v17  ;;  %v5564_v28 = vmax.f32 %v5557_v20, %v5559_v14  ;;  %v9949_v52 = vld [vmem:[%s12007_s5 + $0x38] sm:$0xff]   ;;  %v9955_v17 = vld [vmem:[%s12007_s5 + $0x88] sm:$0xff]   ;;  %v9952_v20 = vld [vmem:[%s12007_s5 + $0x70] sm:$0xff]  }
 0x41c   : > { %v5553_v18 = vadd.f32 %v8684_v56, %v5552_v4  ;;  %v9950_v4 = vld [vmem:[%s12007_s5 + $0x50] sm:$0xff]  }
 0x41d   : > { %v5395_v61 = vld [vmem:[#allocation7 + $0x40] sm:$0xff] }
 0x41e   : > { %v5554_v39 = vmax.f32 %v5553_v18, 0.0  ;;  %v5502_v45 = vadd.f32 %v11758_v11, %v5395_v61  ;;  %v6269_v18 = vld [vmem:[#allocation4 + $0x1e] sm:$0xff] }
 0x41f   : > { %v5396_v47 = vld [vmem:[#allocation7 + $0x48] sm:$0xff] }
 0x420   : > { %5512 = vst.msk [vmem:[#allocation7 + $0x40] sm:$0xff] %vm4226_vm5, %v5502_v45  ;;  %v5503_v50 = vadd.f32 %v11760_v35, %v5396_v47  ;;  %v5588_v11 = vld [vmem:[#allocation4] sm:$0xff]  ;;  %v6271_v45 = vpack.c.bf16 %v6269_v18, %v6269_v18 }
 0x421   : > { %5555 = vst.msk [vmem:[#allocation4 + $0xd] sm:$0xf] %vm5540_vm7, %v5554_v39  ;;  %v5672_v60 = vld [vmem:[#allocation4 + $0x1] sm:$0xff] }
 0x422   : > { %v5561_v7 = vld [vmem:[#allocation7 + $0x32] ss:$2 sm:$0xf]  ;;  %v5563_v29 = vld [vmem:[#allocation7 + $0x33] ss:$2 sm:$0xf] }
 0x423   : > { %5513 = vst.msk [vmem:[#allocation7 + $0x48] sm:$0xff] %vm4226_vm5, %v5503_v50  ;;  %v5565_v12 = vmax.f32 %v5561_v7, %v5563_v29  ;;  %v5757_v33 = vld [vmem:[#allocation4 + $0x2] sm:$0xff] }
 0x424   : > { %v9951_v39 = vld [vmem:[%s12007_s5 + $0x58] sm:$0xff]  }
 0x425   : > { %v5566_v31 = vmax.f32 %v5564_v28, %v5565_v12  ;;  %v9953_v28 = vld [vmem:[%s12007_s5 + $0x78] sm:$0xff]  }
 0x427   : > { %v5567_v1 = vadd.f32 %v8684_v56, %v5566_v31  ;;  %v5571_v6 = vld [vmem:[#allocation7 + $0x3c] ss:$2 sm:$0xf]  ;;  %v5573_v19 = vld [vmem:[#allocation7 + $0x3d] ss:$2 sm:$0xf] }
 0x428   : > { %v11801_v48 = vld [vmem:[#allocation4 + $0x8] sm:$0xff]  ;;  %v5578_v23 = vmax.f32 %v5571_v6, %v5573_v19  ;;  %v6184_v31 = vld [vmem:[#allocation4 + $0x1d] sm:$0xff] }
 0x429   : > { %v5568_v16 = vmax.f32 %v5567_v1, 0.0  ;;  %v5591_v22 = vpack.c.bf16 %v11801_v48, %v5588_v11  ;;  %v5673_v13 = vld [vmem:[#allocation4 + $0x9] sm:$0xff]  ;;  %v6186_v1 = vpack.c.bf16 %v6184_v31, %v6184_v31  ;;  %v9958_v6 = vld [vmem:[#allocation10 + $0x4] ss:$16 sps:$4 sm:$0xff]  }
 0x42a   : > { %v5575_v40 = vld [vmem:[#allocation7 + $0x46] ss:$2 sm:$0xf]  ;;  %v5577_v35 = vld [vmem:[#allocation7 + $0x47] ss:$2 sm:$0xf]  ;;  %v5675_v38 = vpack.c.bf16 %v5673_v13, %v5672_v60 }
 0x42b   : > { %v5579_v42 = vmax.f32 %v5575_v40, %v5577_v35  ;;  %9728 = vmatprep.mubr.msk.bf16.mxu1 %vm4226_vm5, %v5591_v22  ;;  %5569 = vst.msk [vmem:[#allocation4 + $0x13] sm:$0xf] %vm5540_vm7, %v5568_v16  ;;  %v5927_v55 = vld [vmem:[#allocation4 + $0x7] sm:$0xff]  ;;  %v9956_v11 = vld [vmem:[#allocation10] ss:$16 sps:$4 sm:$0xff]  }
 0x42c   : > { %v5758_v46 = vld [vmem:[#allocation4 + $0xa] sm:$0xff]  ;;  %v9964_v16 = vld [vmem:[#allocation10 + $0x24] ss:$16 sps:$4 sm:$0xff]  }
 0x42d   : > { %v5580_v37 = vmax.f32 %v5578_v23, %v5579_v42  ;;  %v5760_v15 = vpack.c.bf16 %v5758_v46, %v5757_v33  ;;  %v5842_v62 = vld [vmem:[#allocation4 + $0x6] sm:$0xff]  ;;  %v9962_v22 = vld [vmem:[#allocation10 + $0x20] ss:$16 sps:$4 sm:$0xff]  }
 0x42e   : > { %v9961_v19 = vld [vmem:[#allocation10 + $0xc] ss:$16 sps:$4 sm:$0xff]   ;;  %v9965_v35 = vld [vmem:[#allocation10 + $0x28] ss:$16 sps:$4 sm:$0xff]   ;;  %v9968_v23 = vld [vmem:[#allocation10 + $0x40] ss:$16 sps:$4 sm:$0xff]  }
 0x42f   : > { %v5581_v21 = vadd.f32 %v8684_v56, %v5580_v37  ;;  %v9967_v40 = vld [vmem:[#allocation10 + $0x2c] ss:$16 sps:$4 sm:$0xff]   ;;  %v9970_v42 = vld [vmem:[#allocation10 + $0x44] ss:$16 sps:$4 sm:$0xff]   ;;  %v9971_v37 = vld [vmem:[#allocation10 + $0x48] ss:$16 sps:$4 sm:$0xff]  }
 0x430   : > { %v9979_v13 = vld [vmem:[#allocation10 + $0x6c] ss:$16 sps:$4 sm:$0xff]  }
 0x431   : > { %v5582_v44 = vmax.f32 %v5581_v21, 0.0  ;;  %v9973_v21 = vld [vmem:[#allocation10 + $0x4c] ss:$16 sps:$4 sm:$0xff]  }
 0x432   : > { %v11806_v27 = vld [vmem:[#allocation4 + $0x10] sm:$0xff]  ;;  %v5595_v60 = vld [vmem:[#allocation8 + $0x10] sm:$0xff] }
 0x433   : > { %v5928_v32 = vld [vmem:[#allocation4 + $0xf] sm:$0xff]  ;;  %5583 = vst.msk [vmem:[#allocation4 + $0x19] sm:$0xf] %vm5540_vm7, %v5582_v44  ;;  %v5592_v25 = vpack.c.bf16 %v11806_v27, %v11806_v27  ;;  %v6015_v47 = vpack.c.bf16 %v11806_v27, %v11801_v48  ;;  %v9959_v48 = vld [vmem:[#allocation10 + $0x8] ss:$16 sps:$4 sm:$0xff]  }
 0x434   : > { %v5930_v63 = vpack.c.bf16 %v5928_v32, %v5927_v55  ;;  %v5674_v56 = vld [vmem:[#allocation4 + $0x11] sm:$0xff] }
 0x435   : > { %9729 = vmatmul.mubr.msk.bf16.vlgmr.msra.gmra.mrb[244].mxu1 %vm4226_vm5, %v5592_v25  ;;  %v6097_v10 = vld [vmem:[#allocation4 + $0xc] sm:$0xff]  ;;  %v5676_v43 = vpack.c.bf16 %v5674_v56, %v5674_v56  ;;  %v9976_v44 = vld [vmem:[#allocation10 + $0x64] ss:$16 sps:$4 sm:$0xff]   ;;  %v9977_v55 = vld [vmem:[#allocation10 + $0x68] ss:$16 sps:$4 sm:$0xff]   ;;  %v10274_v25 = vmov 0  }
 0x436   : > { %9760 = vmatprep.mubr.msk.bf16.mxu0 %vm4226_vm5, %v5930_v63  ;;  %9733 = vmatpush3.bf16.msra.mxu1 %v11660_v24  ;;  %v9946_v24 = vld [vmem:[%s12007_s5 + $0x28] sm:$0xff]   ;;  %v9985_v63 = vld [vmem:[#allocation10 + $0x8c] ss:$16 sps:$4 sm:$0xff]   ;;  %v5594_v56 = vld [vmem:[#allocation8 + $0x8] sm:$0xff] }
 0x437   : > { %9736 = vmatprep.mubr.msk.bf16.mxu1 %vm4226_vm5, %v5675_v38  ;;  %9734 = vmatprep.subr.bf16.mxu1 %v9942_v34  ;;  %v5843_v36 = vld [vmem:[#allocation4 + $0xe] sm:$0xff] }
 0x438   : > { %v5845_v30 = vpack.c.bf16 %v5843_v36, %v5842_v62  ;;  %v6182_v29 = vld [vmem:[#allocation4 + $0xd] sm:$0xff] }
 0x439   : > { %v9974_v27 = vld [vmem:[#allocation10 + $0x60] ss:$16 sps:$4 sm:$0xff]   ;;  %v9982_v32 = vld [vmem:[#allocation10 + $0x84] ss:$16 sps:$4 sm:$0xff]  }
 0x43a   : > { %9735 = vmatpush3.bf16.msra.mxu1 %v9942_v34  ;;  %v5929_v3 = vld [vmem:[#allocation4 + $0x17] sm:$0xff] }
 0x43b   : > { %v6098_v51 = vld [vmem:[#allocation4 + $0x14] sm:$0xff]  ;;  %9740 = vmatprep.subr.bf16.mxu1 %v9944_v41  ;;  %v5931_v8 = vpack.c.bf16 %v5929_v3, %v5929_v3  ;;  %v6099_v53 = vld [vmem:[#allocation4 + $0x1c] sm:$0xff] }
 0x43c   : > { %v6100_v54 = vpack.c.bf16 %v6098_v51, %v6097_v10  ;;  %v5759_v5 = vld [vmem:[#allocation4 + $0x12] sm:$0xff] }
 0x43d   : > { %9737 = vmatmul.mubr.msk.bf16.vlgmr.msra.gmra.mrb[248].mxu1 %vm4226_vm5, %v5676_v43  ;;  %9761 = vmatmul.mubr.msk.bf16.vlgmr.msra.gmra.mrb[4].mxu0 %vm4226_vm5, %v5931_v8  ;;  %v6268_v58 = vld [vmem:[#allocation4 + $0x16] sm:$0xff]  ;;  %v5761_v26 = vpack.c.bf16 %v5759_v5, %v5759_v5 }
 0x43e   : > { %9741 = vmatpush3.bf16.msra.mxu1 %v9944_v41  ;;  %9744 = vmatprep.mubr.msk.bf16.mxu1 %vm4226_vm5, %v5760_v15  ;;  %v6270_v59 = vpack.c.bf16 %v6268_v58, %v5843_v36  ;;  %v5846_v61 = vpack.c.bf16 %v6268_v58, %v6268_v58  ;;  %v6014_v14 = vld [vmem:[#allocation4 + $0x18] sm:$0xff] }
 0x43f   : > { %9773 = vmatpush3.bf16.msra.mxu0 %v11679_v57  ;;  %9776 = vmatprep.mubr.msk.bf16.mxu0 %vm4226_vm5, %v6100_v54  ;;  %v6101_v57 = vpack.c.bf16 %v6099_v53, %v6099_v53  ;;  %v6183_v50 = vld [vmem:[#allocation4 + $0x15] sm:$0xff]  ;;  %v6016_v7 = vpack.c.bf16 %v6014_v14, %v6014_v14 }
 0x440   : > { %9742 = vmatprep.subr.bf16.mxu1 %v9946_v24  ;;  %9774 = vmatprep.subr.bf16.mxu0 %v9947_v9  ;;  %v6185_v12 = vpack.c.bf16 %v6183_v50, %v6182_v29  ;;  %v5593_v34 = vld [vmem:[#allocation8] sm:$0xff] }
 0x442   : > { %9743 = vmatpush3.bf16.msra.mxu1 %v9946_v24 }
 0x443   : > { %9775 = vmatpush3.bf16.msra.mxu0 %v9947_v9  ;;  %9748 = vmatprep.subr.bf16.mxu1 %v9948_v49 }
 0x444   : > { %9788 = vmatprep.subr.bf16.mxu0 %v9954_v2 }
 0x445   : > { %9745 = vmatmul.mubr.msk.bf16.vlgmr.msra.gmra.mrb[252].mxu1 %vm4226_vm5, %v5761_v26 }
 0x446   : > { %9777 = vmatmul.mubr.msk.bf16.vlgmr.msra.gmra.mrb[8].mxu0 %vm4226_vm5, %v6101_v57  ;;  %9749 = vmatpush3.bf16.msra.mxu1 %v9948_v49 }
 0x447   : > { %9752 = vmatprep.mubr.msk.bf16.mxu1 %vm4226_vm5, %v5845_v30  ;;  %9792 = vmatprep.mubr.msk.bf16.mxu0 %vm4226_vm5, %v6270_v59 }
 0x448   : > { %9750 = vmatprep.subr.bf16.mxu1 %v9949_v52  ;;  %9789 = vmatpush3.bf16.msra.mxu0 %v9954_v2 }
 0x449   : > { %9790 = vmatprep.subr.bf16.mxu0 %v9955_v17 }
 0x44a   : > { %9751 = vmatpush3.bf16.msra.mxu1 %v9949_v52 }
 0x44b   : > { %9764 = vmatprep.subr.bf16.mxu1 %v9950_v4 }
 0x44c   : > { %9791 = vmatpush3.bf16.msra.mxu0 %v9955_v17 }
 0x44d   : > { %9753 = vmatmul.mubr.msk.bf16.vlgmr.msra.gmra.mrb[0].mxu1 %vm4226_vm5, %v5846_v61  ;;  %6541 = vmatprep.subr.bf16.mxu0 %v9961_v19 }
 0x44e   : > { %9765 = vmatpush3.bf16.msra.mxu1 %v9950_v4  ;;  %9768 = vmatprep.mubr.msk.bf16.mxu1 %vm4226_vm5, %v6015_v47 }
 0x44f   : > { %9766 = vmatprep.subr.bf16.mxu1 %v9951_v39  ;;  %9793 = vmatmul.mubr.msk.bf16.vlgmr.msra.gmra.mrb[12].mxu0 %vm4226_vm5, %v6271_v45 }
 0x450   : > { %6542 = vmatpush1.bf16.msra.mxu0 %v9959_v48  ;;  %6573 = vmatprep.mubr.bf16.mxu0 %v10274_v25 }
 0x451   : > { %6543 = vmatprep.subr.bf16.mxu0 %v9967_v40 }
 0x452   : > { %9767 = vmatpush3.bf16.msra.mxu1 %v9951_v39 }
 0x453   : > { %9780 = vmatprep.subr.bf16.mxu1 %v9952_v20 }
 0x454   : > { %6544 = vmatpush1.bf16.msra.mxu0 %v9965_v35 }
 0x455   : > { %9769 = vmatmul.mubr.msk.bf16.vlgmr.msra.gmra.mrb[4].mxu1 %vm4226_vm5, %v6016_v7  ;;  %6545 = vmatprep.subr.bf16.mxu0 %v9973_v21 }
 0x456   : > { %9784 = vmatprep.mubr.msk.bf16.mxu1 %vm4226_vm5, %v6185_v12  ;;  %9781 = vmatpush3.bf16.msra.mxu1 %v9952_v20 }
 0x457   : > { %9782 = vmatprep.subr.bf16.mxu1 %v9953_v28 }
 0x458   : > { %6546 = vmatpush1.bf16.msra.mxu0 %v9971_v37 }
 0x459   : > { %6547 = vmatprep.subr.bf16.mxu0 %v9979_v13 }
 0x45a   : > { %9783 = vmatpush3.bf16.msra.mxu1 %v9953_v28 }
 0x45b   : > { %6500 = vmatprep.subr.bf16.mxu1 %v9958_v6 }
 0x45c   : > { %6548 = vmatpush1.bf16.msra.mxu0 %v9977_v55 }
 0x45d   : > { %9785 = vmatmul.mubr.msk.bf16.vlgmr.msra.gmra.mrb[8].mxu1 %vm4226_vm5, %v6186_v1  ;;  %6737 = vmatprep.subr.bf16.mxu0 %v9985_v63 }
 0x45e   : > { %6501 = vmatpush1.bf16.msra.mxu1 %v9956_v11  ;;  %6532 = vmatprep.mubr.bf16.mxu1 %v10274_v25 }
 0x45f   : > { %6502 = vmatprep.subr.bf16.mxu1 %v9964_v16 }
 0x462   : > { %6503 = vmatpush1.bf16.msra.mxu1 %v9962_v22 }
 0x463   : > { %6504 = vmatprep.subr.bf16.mxu1 %v9970_v42 }
 0x466   : > { %6505 = vmatpush1.bf16.msra.mxu1 %v9968_v23 }
 0x467   : > { %6506 = vmatprep.subr.bf16.mxu1 %v9976_v44 }
 0x46a   : > { %6507 = vmatpush1.bf16.msra.mxu1 %v9974_v27 }
 0x46b   : > { %6696 = vmatprep.subr.bf16.mxu1 %v9982_v32 }
 0x508   : > { %v9730_v38 = vpop.f32.mrb[244].mxu1 }
 0x509   : > { %v5668_v41 = vadd.f32 %v9730_v38, %v5595_v60  ;;  %v5652_v0 = vpop.f32.mrb[245].mxu1 }
 0x50a   : > { %v5666_v46 = vadd.f32 %v5652_v0, %v5593_v34  ;;  %v9731_v3 = vpop.f32.mrb[246].mxu1 }
 0x50b   : > { %5671 = vst.msk [vmem:[#allocation8 + $0x10] sm:$0xff] %vm5584_vm6, %v5668_v41  ;;  %v5655_v10 = vpop.f32.mrb[247].mxu1 }
 0x50c   : > { %5669 = vst.msk [vmem:[#allocation8] sm:$0xff] %vm5584_vm6, %v5666_v46  ;;  %v5667_v51 = vadd.f32 %v5655_v10, %v5594_v56 }
 0x50e   : > { %5670 = vst.msk [vmem:[#allocation8 + $0x8] sm:$0xff] %vm5584_vm6, %v5667_v51 }
 0x510   : > { %v9738_v43 = vpop.f32.mrb[248].mxu1  ;;  %v9762_v8 = vpop.f32.mrb[4].mxu0 }
 0x511   : > { %v5737_v33 = vpop.f32.mrb[249].mxu1  ;;  %v5992_v54 = vpop.f32.mrb[5].mxu0 }
 0x512   : > { %v5679_v15 = vld [vmem:[#allocation8 + $0x10] sm:$0xff]  ;;  %v9739_v24 = vpop.f32.mrb[250].mxu1  ;;  %v9763_v9 = vpop.f32.mrb[6].mxu0 }
 0x513   : > { %v5753_v49 = vadd.f32 %v9738_v43, %v5679_v15  ;;  %v5677_v5 = vld [vmem:[#allocation8] sm:$0xff]  ;;  %v5740_v2 = vpop.f32.mrb[251].mxu1  ;;  %v5995_v53 = vpop.f32.mrb[7].mxu0 }
 0x514   : > { %v5751_v36 = vadd.f32 %v5737_v33, %v5677_v5 }
 0x515   : > { %5756 = vst.msk [vmem:[#allocation8 + $0x10] sm:$0xff] %vm5584_vm6, %v5753_v49  ;;  %v5678_v58 = vld [vmem:[#allocation8 + $0x8] sm:$0xff] }
 0x516   : > { %5754 = vst.msk [vmem:[#allocation8] sm:$0xff] %vm5584_vm6, %v5751_v36  ;;  %v5752_v26 = vadd.f32 %v5740_v2, %v5678_v58 }
 0x518   : > { %5755 = vst.msk [vmem:[#allocation8 + $0x8] sm:$0xff] %vm5584_vm6, %v5752_v26  ;;  %v9746_v57 = vpop.f32.mrb[252].mxu1 }
 0x519   : > { %v9778_v62 = vpop.f32.mrb[8].mxu0  ;;  %v5822_v52 = vpop.f32.mrb[253].mxu1 }
 0x51a   : > { %v6162_v30 = vpop.f32.mrb[9].mxu0  ;;  %v9747_v59 = vpop.f32.mrb[254].mxu1 }
 0x51b   : > { %v9779_v17 = vpop.f32.mrb[10].mxu0  ;;  %v5825_v4 = vpop.f32.mrb[255].mxu1 }
 0x51c   : > { %v5764_v18 = vld [vmem:[#allocation8 + $0x10] sm:$0xff]  ;;  %v6165_v61 = vpop.f32.mrb[11].mxu0 }
 0x51d   : > { %v5838_v39 = vadd.f32 %v9746_v57, %v5764_v18  ;;  %v5762_v45 = vld [vmem:[#allocation8] sm:$0xff] }
 0x51e   : > { %v5836_v47 = vadd.f32 %v5822_v52, %v5762_v45 }
 0x51f   : > { %5841 = vst.msk [vmem:[#allocation8 + $0x10] sm:$0xff] %vm5584_vm6, %v5838_v39  ;;  %v5763_v20 = vld [vmem:[#allocation8 + $0x8] sm:$0xff] }
 0x520   : > { %5839 = vst.msk [vmem:[#allocation8] sm:$0xff] %vm5584_vm6, %v5836_v47  ;;  %v5837_v14 = vadd.f32 %v5825_v4, %v5763_v20  ;;  %v9754_v50 = vpop.f32.mrb[0].mxu1 }
 0x521   : > { %v5907_v7 = vpop.f32.mrb[1].mxu1 }
 0x522   : > { %5840 = vst.msk [vmem:[#allocation8 + $0x8] sm:$0xff] %vm5584_vm6, %v5837_v14  ;;  %v9755_v29 = vpop.f32.mrb[2].mxu1  ;;  %v9794_v28 = vpop.f32.mrb[12].mxu0 }
 0x523   : > { %v5910_v12 = vpop.f32.mrb[3].mxu1  ;;  %v6332_v31 = vpop.f32.mrb[13].mxu0 }
 0x524   : > { %v9795_v1 = vpop.f32.mrb[14].mxu0 }
 0x525   : > { %v6335_v6 = vpop.f32.mrb[15].mxu0 }
 0x526   : > { %v5849_v19 = vld [vmem:[#allocation8 + $0x10] sm:$0xff] }
 0x527   : > { %v5923_v11 = vadd.f32 %v9754_v50, %v5849_v19  ;;  %v5847_v48 = vld [vmem:[#allocation8] sm:$0xff]  ;;  %v8753_v50 = vld [vmem:[%s12008_s6] ss:$0 sm:$0xff]  ;;  %v9980_v19 = vld [vmem:[#allocation10 + $0x80] ss:$16 sps:$4 sm:$0xff]  }
 0x528   : > { %v5921_v16 = vadd.f32 %v5907_v7, %v5847_v48  ;;  %v9770_v40 = vpop.f32.mrb[4].mxu1 }
 0x529   : > { %5926 = vst.msk [vmem:[#allocation8 + $0x10] sm:$0xff] %vm5584_vm6, %v5923_v11  ;;  %v5848_v22 = vld [vmem:[#allocation8 + $0x8] sm:$0xff]  ;;  %v6077_v35 = vpop.f32.mrb[5].mxu1  ;;  %v9983_v11 = vld [vmem:[#allocation10 + $0x88] ss:$16 sps:$4 sm:$0xff]  }
 0x52a   : > { %5924 = vst.msk [vmem:[#allocation8] sm:$0xff] %vm5584_vm6, %v5921_v16  ;;  %v5922_v23 = vadd.f32 %v5910_v12, %v5848_v22  ;;  %v9771_v42 = vpop.f32.mrb[6].mxu1  ;;  %v9991_v22 = vld [vmem:[#allocation10 + $0xac] ss:$16 sps:$4 sm:$0xff]  }
 0x52b   : > { %v6080_v37 = vpop.f32.mrb[7].mxu1  ;;  %v9994_v42 = vld [vmem:[#allocation10 + $0xc4] ss:$16 sps:$4 sm:$0xff]  }
 0x52c   : > { %5925 = vst.msk [vmem:[#allocation8 + $0x8] sm:$0xff] %vm5584_vm6, %v5922_v23  ;;  %v9989_v23 = vld [vmem:[#allocation10 + $0xa8] ss:$16 sps:$4 sm:$0xff]  }
 0x530   : > { %v5934_v21 = vld [vmem:[#allocation8 + $0x10] sm:$0xff]  ;;  %v9786_v44 = vpop.f32.mrb[8].mxu1 }
 0x531   : > { %v6008_v13 = vadd.f32 %v9762_v8, %v5934_v21  ;;  %v5932_v27 = vld [vmem:[#allocation8] sm:$0xff]  ;;  %v6247_v55 = vpop.f32.mrb[9].mxu1  ;;  %v9992_v21 = vld [vmem:[#allocation10 + $0xc0] ss:$16 sps:$4 sm:$0xff]  }
 0x532   : > { %v6006_v32 = vadd.f32 %v5992_v54, %v5932_v27  ;;  %v9787_v63 = vpop.f32.mrb[10].mxu1  ;;  %v10003_v27 = vld [vmem:[#allocation10 + $0xec] ss:$16 sps:$4 sm:$0xff]  }
 0x533   : > { %6011 = vst.msk [vmem:[#allocation8 + $0x10] sm:$0xff] %vm5584_vm6, %v6008_v13  ;;  %v5933_v60 = vld [vmem:[#allocation8 + $0x8] sm:$0xff]  ;;  %v6250_v34 = vpop.f32.mrb[11].mxu1 }
 0x534   : > { %6009 = vst.msk [vmem:[#allocation8] sm:$0xff] %vm5584_vm6, %v6006_v32  ;;  %v6007_v38 = vadd.f32 %v5995_v53, %v5933_v60  ;;  %v10000_v13 = vld [vmem:[#allocation10 + $0xe4] ss:$16 sps:$4 sm:$0xff]   ;;  %v10001_v32 = vld [vmem:[#allocation10 + $0xe8] ss:$16 sps:$4 sm:$0xff]  }
 0x535   : > { %v10006_v63 = vld [vmem:[#allocation10 + $0x104] ss:$16 sps:$4 sm:$0xff]   ;;  %v10009_v60 = vld [vmem:[#allocation10 + $0x10c] ss:$16 sps:$4 sm:$0xff]  }
 0x536   : > { %6010 = vst.msk [vmem:[#allocation8 + $0x8] sm:$0xff] %vm5584_vm6, %v6007_v38  ;;  %v10004_v38 = vld [vmem:[#allocation10 + $0x100] ss:$16 sps:$4 sm:$0xff]  }
 0x53a   : > { %v6019_v41 = vld [vmem:[#allocation8 + $0x10] sm:$0xff] }
 0x53b   : > { %v6093_v0 = vadd.f32 %v9770_v40, %v6019_v41  ;;  %v6017_v56 = vld [vmem:[#allocation8] sm:$0xff]  ;;  %v9988_v40 = vld [vmem:[#allocation10 + $0xa4] ss:$16 sps:$4 sm:$0xff]  }
 0x53c   : > { %v6091_v46 = vadd.f32 %v6077_v35, %v6017_v56  ;;  %v9986_v35 = vld [vmem:[#allocation10 + $0xa0] ss:$16 sps:$4 sm:$0xff]   ;;  %v10007_v41 = vld [vmem:[#allocation10 + $0x108] ss:$16 sps:$4 sm:$0xff]   ;;  %v10012_v56 = vld [vmem:[#allocation10 + $0x124] ss:$16 sps:$4 sm:$0xff]  }
 0x53d   : > { %6096 = vst.msk [vmem:[#allocation8 + $0x10] sm:$0xff] %vm5584_vm6, %v6093_v0  ;;  %v6018_v3 = vld [vmem:[#allocation8 + $0x8] sm:$0xff] }
 0x53e   : > { %6094 = vst.msk [vmem:[#allocation8] sm:$0xff] %vm5584_vm6, %v6091_v46  ;;  %v6092_v10 = vadd.f32 %v6080_v37, %v6018_v3  ;;  %v9997_v37 = vld [vmem:[#allocation10 + $0xcc] ss:$16 sps:$4 sm:$0xff]   ;;  %v10010_v3 = vld [vmem:[#allocation10 + $0x120] ss:$16 sps:$4 sm:$0xff]  }
 0x53f   : > { %v10015_v46 = vld [vmem:[#allocation10 + $0x12c] ss:$16 sps:$4 sm:$0xff]  }
 0x540   : > { %6095 = vst.msk [vmem:[#allocation8 + $0x8] sm:$0xff] %vm5584_vm6, %v6092_v10  ;;  %v10013_v10 = vld [vmem:[#allocation10 + $0x128] ss:$16 sps:$4 sm:$0xff]  }
 0x544   : > { %v6104_v51 = vld [vmem:[#allocation8 + $0x10] sm:$0xff] }
 0x545   : > { %v6178_v43 = vadd.f32 %v9778_v62, %v6104_v51  ;;  %v6102_v8 = vld [vmem:[#allocation8] sm:$0xff]  ;;  %v10018_v51 = vld [vmem:[#allocation10 + $0x144] ss:$16 sps:$4 sm:$0xff]  }
 0x546   : > { %v6176_v33 = vadd.f32 %v6162_v30, %v6102_v8  ;;  %v10016_v8 = vld [vmem:[#allocation10 + $0x140] ss:$16 sps:$4 sm:$0xff]  }
 0x547   : > { %6181 = vst.msk [vmem:[#allocation8 + $0x10] sm:$0xff] %vm5584_vm6, %v6178_v43  ;;  %v6103_v54 = vld [vmem:[#allocation8 + $0x8] sm:$0xff]  ;;  %v10021_v43 = vld [vmem:[#allocation10 + $0x14c] ss:$16 sps:$4 sm:$0xff]  }
 0x548   : > { %6179 = vst.msk [vmem:[#allocation8] sm:$0xff] %vm5584_vm6, %v6176_v33  ;;  %v6177_v15 = vadd.f32 %v6165_v61, %v6103_v54  ;;  %v10019_v33 = vld [vmem:[#allocation10 + $0x148] ss:$16 sps:$4 sm:$0xff]   ;;  %v10024_v54 = vld [vmem:[#allocation10 + $0x164] ss:$16 sps:$4 sm:$0xff]  }
 0x54a   : > { %6180 = vst.msk [vmem:[#allocation8 + $0x8] sm:$0xff] %vm5584_vm6, %v6177_v15  ;;  %v10027_v15 = vld [vmem:[#allocation10 + $0x16c] ss:$16 sps:$4 sm:$0xff]  }
 0x54e   : > { %v6189_v24 = vld [vmem:[#allocation8 + $0x10] sm:$0xff] }
 0x54f   : > { %v6263_v9 = vadd.f32 %v9786_v44, %v6189_v24  ;;  %v6187_v49 = vld [vmem:[#allocation8] sm:$0xff]  ;;  %v10022_v24 = vld [vmem:[#allocation10 + $0x160] ss:$16 sps:$4 sm:$0xff]  }
 0x550   : > { %v6261_v5 = vadd.f32 %v6247_v55, %v6187_v49  ;;  %v9995_v44 = vld [vmem:[#allocation10 + $0xc8] ss:$16 sps:$4 sm:$0xff]   ;;  %v9998_v55 = vld [vmem:[#allocation10 + $0xe0] ss:$16 sps:$4 sm:$0xff]   ;;  %v10030_v49 = vld [vmem:[#allocation10 + $0x184] ss:$16 sps:$4 sm:$0xff]  }
 0x551   : > { %6266 = vst.msk [vmem:[#allocation8 + $0x10] sm:$0xff] %vm5584_vm6, %v6263_v9  ;;  %v6188_v2 = vld [vmem:[#allocation8 + $0x8] sm:$0xff]  ;;  %v10025_v9 = vld [vmem:[#allocation10 + $0x168] ss:$16 sps:$4 sm:$0xff]  }
 0x552   : > { %6264 = vst.msk [vmem:[#allocation8] sm:$0xff] %vm5584_vm6, %v6261_v5  ;;  %v6262_v53 = vadd.f32 %v6250_v34, %v6188_v2  ;;  %v10033_v5 = vld [vmem:[#allocation10 + $0x18c] ss:$16 sps:$4 sm:$0xff]  }
 0x554   : > { %6265 = vst.msk [vmem:[#allocation8 + $0x8] sm:$0xff] %vm5584_vm6, %v6262_v53  ;;  %v10028_v53 = vld [vmem:[#allocation10 + $0x180] ss:$16 sps:$4 sm:$0xff]  }
 0x558   : > { %v6274_v36 = vld [vmem:[#allocation8 + $0x10] sm:$0xff] }
 0x559   : > { %v6348_v58 = vadd.f32 %v9794_v28, %v6274_v36  ;;  %v6272_v26 = vld [vmem:[#allocation8] sm:$0xff] }
 0x55a   : > { %v6346_v57 = vadd.f32 %v6332_v31, %v6272_v26  ;;  %v10031_v36 = vld [vmem:[#allocation10 + $0x188] ss:$16 sps:$4 sm:$0xff]   ;;  %v10036_v26 = vld [vmem:[#allocation10 + $0x1a4] ss:$16 sps:$4 sm:$0xff]  }
 0x55b   : > { %6351 = vst.msk [vmem:[#allocation8 + $0x10] sm:$0xff] %vm5584_vm6, %v6348_v58  ;;  %v6273_v62 = vld [vmem:[#allocation8 + $0x8] sm:$0xff] }
 0x55c   : > { %6349 = vst.msk [vmem:[#allocation8] sm:$0xff] %vm5584_vm6, %v6346_v57  ;;  %v6347_v52 = vadd.f32 %v6335_v6, %v6273_v62  ;;  %v10039_v57 = vld [vmem:[#allocation10 + $0x1ac] ss:$16 sps:$4 sm:$0xff]   ;;  %v10034_v62 = vld [vmem:[#allocation10 + $0x1a0] ss:$16 sps:$4 sm:$0xff]  }
 0x55e   : > { %6350 = vst.msk [vmem:[#allocation8 + $0x8] sm:$0xff] %vm5584_vm6, %v6347_v52  ;;  %v10037_v52 = vld [vmem:[#allocation10 + $0x1a8] ss:$16 sps:$4 sm:$0xff]  }
 0x562   : > { %v6382_v17 = vld [vmem:[#allocation8 + $0x12] ss:$2 sm:$0x3]  ;;  %v6384_v4 = vld [vmem:[#allocation8 + $0x13] ss:$2 sm:$0x3] }
 0x563   : > { %v6357_v30 = vld [vmem:[#allocation8] ss:$2 sm:$0x3]  ;;  %v6359_v59 = vld [vmem:[#allocation8 + $0x1] ss:$2 sm:$0x3]  ;;  %v6386_v14 = vmax.f32 %v6382_v17, %v6384_v4 }
 0x564   : > { %v6364_v39 = vmax.f32 %v6357_v30, %v6359_v59  ;;  %v10042_v30 = vld [vmem:[#allocation10 + $0x1c4] ss:$16 sps:$4 sm:$0xff]   ;;  %v10045_v59 = vld [vmem:[#allocation10 + $0x1cc] ss:$16 sps:$4 sm:$0xff]   ;;  %v10040_v17 = vld [vmem:[#allocation10 + $0x1c0] ss:$16 sps:$4 sm:$0xff]  }
 0x565   : > { %v6361_v18 = vld [vmem:[#allocation8 + $0x6] ss:$2 sm:$0x3]  ;;  %v6363_v61 = vld [vmem:[#allocation8 + $0x7] ss:$2 sm:$0x3] }
 0x566   : > { %v6365_v45 = vmax.f32 %v6361_v18, %v6363_v61  ;;  %v6378_v47 = vld [vmem:[#allocation8 + $0xc] ss:$2 sm:$0x3]  ;;  %v6380_v20 = vld [vmem:[#allocation8 + $0xd] ss:$2 sm:$0x3] }
 0x567   : > { %v6385_v7 = vmax.f32 %v6378_v47, %v6380_v20  ;;  %v10043_v4 = vld [vmem:[#allocation10 + $0x1c8] ss:$16 sps:$4 sm:$0xff]   ;;  %v10048_v18 = vld [vmem:[#allocation10 + $0x1e4] ss:$16 sps:$4 sm:$0xff]   ;;  %v10051_v61 = vld [vmem:[#allocation10 + $0x1ec] ss:$16 sps:$4 sm:$0xff]  }
 0x568   : > { %v6366_v29 = vmax.f32 %v6364_v39, %v6365_v45  ;;  %v10046_v39 = vld [vmem:[#allocation10 + $0x1e0] ss:$16 sps:$4 sm:$0xff]   ;;  %v10049_v45 = vld [vmem:[#allocation10 + $0x1e8] ss:$16 sps:$4 sm:$0xff]   ;;  %v10054_v47 = vld [vmem:[#allocation10 + $0x204] ss:$16 sps:$4 sm:$0xff]  }
 0x569   : > { %v6387_v28 = vmax.f32 %v6385_v7, %v6386_v14  ;;  %v10057_v20 = vld [vmem:[#allocation10 + $0x20c] ss:$16 sps:$4 sm:$0xff]   ;;  %v10055_v7 = vld [vmem:[#allocation10 + $0x208] ss:$16 sps:$4 sm:$0xff]  }
 0x56a   : > { %v6373_v12 = vadd.f32 %v8753_v50, %v6366_v29 }
 0x56b   : > { %v6388_v31 = vadd.f32 %v8753_v50, %v6387_v28  ;;  %v10052_v50 = vld [vmem:[#allocation10 + $0x200] ss:$16 sps:$4 sm:$0xff]   ;;  %v10060_v28 = vld [vmem:[#allocation10 + $0x224] ss:$16 sps:$4 sm:$0xff]  }
 0x56c   : > { %v6374_v1 = vmax.f32 %v6373_v12, 0.0  ;;  %v10063_v12 = vld [vmem:[#allocation10 + $0x22c] ss:$16 sps:$4 sm:$0xff]  }
 0x56d   : > { %v6389_v6 = vmax.f32 %v6388_v31, 0.0  ;;  %v10058_v31 = vld [vmem:[#allocation10 + $0x220] ss:$16 sps:$4 sm:$0xff]  }
 0x56e   : > { %6376 = vst.msk [vmem:[#allocation5 + $0x5] sm:$0x3] %vm6375_vm9, %v6374_v1  ;;  %v10061_v1 = vld [vmem:[#allocation10 + $0x228] ss:$16 sps:$4 sm:$0xff]  }
 0x56f   : > { %6390 = vst.msk [vmem:[#allocation5 + $0x9] sm:$0x3] %vm6375_vm9, %v6389_v6  ;;  %v10066_v6 = vld [vmem:[#allocation10 + $0x244] ss:$16 sps:$4 sm:$0xff]  }
 0x575   : > { %v6395_v48 = vld [vmem:[#allocation5] sm:$0xff] }
 0x576   : > { %v6396_v16 = vpack.c.bf16 %v6395_v48, %v6395_v48  ;;  %v6590_v34 = vld [vmem:[#allocation5 + $0x1] sm:$0xff] }
 0x577   : > { %v6591_v0 = vpack.c.bf16 %v6590_v34, %v6590_v34  ;;  %v6786_v2 = vld [vmem:[#allocation5 + $0x2] sm:$0xff]  ;;  %v10093_v34 = vld [vmem:[#allocation10 + $0x2cc] ss:$16 sps:$4 sm:$0xff]  }
 0x578   : > { %8770 = vmatmul.mubr.msk.bf16.vlgmr.msra.gmra.mrb[12].mxu1 %vm5584_vm6, %v6396_v16  ;;  %8771 = vmatmul.mubr.msk.bf16.vlgmr.msra.gmra.mrb[16].mxu0 %vm5584_vm6, %v6396_v16  ;;  %v6787_v58 = vpack.c.bf16 %v6786_v2, %v6786_v2  ;;  %v6982_v14 = vld [vmem:[#allocation5 + $0x4] sm:$0xff]  ;;  %v10117_v2 = vld [vmem:[#allocation10 + $0x34c] ss:$16 sps:$4 sm:$0xff]  }
 0x579   : > { %6697 = vmatpush1.bf16.msra.mxu1 %v9980_v19  ;;  %6738 = vmatpush1.bf16.msra.mxu0 %v9983_v11  ;;  %v6983_v29 = vpack.c.bf16 %v6982_v14, %v6982_v14  ;;  %v10069_v19 = vld [vmem:[#allocation10 + $0x24c] ss:$16 sps:$4 sm:$0xff]   ;;  %v10064_v11 = vld [vmem:[#allocation10 + $0x240] ss:$16 sps:$4 sm:$0xff]   ;;  %v10067_v48 = vld [vmem:[#allocation10 + $0x248] ss:$16 sps:$4 sm:$0xff]  }
 0x57a   : > { %6698 = vmatprep.subr.bf16.mxu1 %v9988_v40  ;;  %6739 = vmatprep.subr.bf16.mxu0 %v9991_v22  ;;  %v10072_v16 = vld [vmem:[#allocation10 + $0x264] ss:$16 sps:$4 sm:$0xff]   ;;  %v10075_v40 = vld [vmem:[#allocation10 + $0x26c] ss:$16 sps:$4 sm:$0xff]   ;;  %v10070_v22 = vld [vmem:[#allocation10 + $0x260] ss:$16 sps:$4 sm:$0xff]  }
 0x57b   : > { %6728 = vmatprep.mubr.bf16.mxu1 %v10274_v25  ;;  %6769 = vmatprep.mubr.bf16.mxu0 %v10274_v25  ;;  %v10141_v14 = vld [vmem:[#allocation10 + $0x3cc] ss:$16 sps:$4 sm:$0xff]  }
 0x57d   : > { %6699 = vmatpush1.bf16.msra.mxu1 %v9986_v35  ;;  %6740 = vmatpush1.bf16.msra.mxu0 %v9989_v23  ;;  %v10073_v35 = vld [vmem:[#allocation10 + $0x268] ss:$16 sps:$4 sm:$0xff]   ;;  %v10078_v23 = vld [vmem:[#allocation10 + $0x284] ss:$16 sps:$4 sm:$0xff]  }
 0x57e   : > { %6700 = vmatprep.subr.bf16.mxu1 %v9994_v42  ;;  %6741 = vmatprep.subr.bf16.mxu0 %v9997_v37  ;;  %v10081_v42 = vld [vmem:[#allocation10 + $0x28c] ss:$16 sps:$4 sm:$0xff]  }
 0x57f   : > { %v7178_v37 = vld [vmem:[#allocation5 + $0x5] sm:$0xff] }
 0x581   : > { %6701 = vmatpush1.bf16.msra.mxu1 %v9992_v21  ;;  %6742 = vmatpush1.bf16.msra.mxu0 %v9995_v44  ;;  %v10076_v21 = vld [vmem:[#allocation10 + $0x280] ss:$16 sps:$4 sm:$0xff]   ;;  %v10079_v44 = vld [vmem:[#allocation10 + $0x288] ss:$16 sps:$4 sm:$0xff]  }
 0x582   : > { %6702 = vmatprep.subr.bf16.mxu1 %v10000_v13  ;;  %6743 = vmatprep.subr.bf16.mxu0 %v10003_v27  ;;  %v7179_v13 = vpack.c.bf16 %v7178_v37, %v7178_v37  ;;  %v10084_v27 = vld [vmem:[#allocation10 + $0x2a4] ss:$16 sps:$4 sm:$0xff]   ;;  %v10165_v37 = vld [vmem:[#allocation10 + $0x44c] ss:$16 sps:$4 sm:$0xff]  }
 0x585   : > { %6703 = vmatpush1.bf16.msra.mxu1 %v9998_v55  ;;  %6744 = vmatpush1.bf16.msra.mxu0 %v10001_v32  ;;  %v10087_v55 = vld [vmem:[#allocation10 + $0x2ac] ss:$16 sps:$4 sm:$0xff]   ;;  %v10082_v32 = vld [vmem:[#allocation10 + $0x2a0] ss:$16 sps:$4 sm:$0xff]  }
 0x586   : > { %6892 = vmatprep.subr.bf16.mxu1 %v10006_v63  ;;  %6933 = vmatprep.subr.bf16.mxu0 %v10009_v60  ;;  %v10085_v63 = vld [vmem:[#allocation10 + $0x2a8] ss:$16 sps:$4 sm:$0xff]   ;;  %v10090_v60 = vld [vmem:[#allocation10 + $0x2c4] ss:$16 sps:$4 sm:$0xff]  }
 0x588   : > { %8788 = vmatmul.mubr.msk.bf16.vlgmr.msra.gmra.mrb[12].mxu1 %vm5584_vm6, %v6591_v0  ;;  %8789 = vmatmul.mubr.msk.bf16.vlgmr.msra.gmra.mrb[16].mxu0 %vm5584_vm6, %v6591_v0  ;;  %v10096_v0 = vld [vmem:[#allocation10 + $0x2e4] ss:$16 sps:$4 sm:$0xff]  }
 0x589   : > { %6893 = vmatpush1.bf16.msra.mxu1 %v10004_v38  ;;  %6934 = vmatpush1.bf16.msra.mxu0 %v10007_v41  ;;  %v10088_v38 = vld [vmem:[#allocation10 + $0x2c0] ss:$16 sps:$4 sm:$0xff]   ;;  %v10091_v41 = vld [vmem:[#allocation10 + $0x2c8] ss:$16 sps:$4 sm:$0xff]  }
 0x58a   : > { %6894 = vmatprep.subr.bf16.mxu1 %v10012_v56  ;;  %6935 = vmatprep.subr.bf16.mxu0 %v10015_v46  ;;  %v10099_v56 = vld [vmem:[#allocation10 + $0x2ec] ss:$16 sps:$4 sm:$0xff]   ;;  %v10094_v46 = vld [vmem:[#allocation10 + $0x2e0] ss:$16 sps:$4 sm:$0xff]  }
 0x58b   : > { %6924 = vmatprep.mubr.bf16.mxu1 %v10274_v25  ;;  %6965 = vmatprep.mubr.bf16.mxu0 %v10274_v25 }
 0x58d   : > { %6895 = vmatpush1.bf16.msra.mxu1 %v10010_v3  ;;  %6936 = vmatpush1.bf16.msra.mxu0 %v10013_v10  ;;  %v10097_v3 = vld [vmem:[#allocation10 + $0x2e8] ss:$16 sps:$4 sm:$0xff]   ;;  %v10102_v10 = vld [vmem:[#allocation10 + $0x304] ss:$16 sps:$4 sm:$0xff]  }
 0x58e   : > { %6896 = vmatprep.subr.bf16.mxu1 %v10018_v51  ;;  %6937 = vmatprep.subr.bf16.mxu0 %v10021_v43  ;;  %v10105_v51 = vld [vmem:[#allocation10 + $0x30c] ss:$16 sps:$4 sm:$0xff]  }
 0x58f   : > { %v7374_v43 = vld [vmem:[#allocation5 + $0x6] sm:$0xff] }
 0x591   : > { %6897 = vmatpush1.bf16.msra.mxu1 %v10016_v8  ;;  %6938 = vmatpush1.bf16.msra.mxu0 %v10019_v33  ;;  %v10100_v8 = vld [vmem:[#allocation10 + $0x300] ss:$16 sps:$4 sm:$0xff]   ;;  %v10103_v33 = vld [vmem:[#allocation10 + $0x308] ss:$16 sps:$4 sm:$0xff]  }
 0x592   : > { %6898 = vmatprep.subr.bf16.mxu1 %v10024_v54  ;;  %6939 = vmatprep.subr.bf16.mxu0 %v10027_v15  ;;  %v7375_v54 = vpack.c.bf16 %v7374_v43, %v7374_v43  ;;  %v10108_v15 = vld [vmem:[#allocation10 + $0x324] ss:$16 sps:$4 sm:$0xff]  }
 0x595   : > { %6899 = vmatpush1.bf16.msra.mxu1 %v10022_v24  ;;  %6940 = vmatpush1.bf16.msra.mxu0 %v10025_v9  ;;  %v10111_v24 = vld [vmem:[#allocation10 + $0x32c] ss:$16 sps:$4 sm:$0xff]   ;;  %v10106_v9 = vld [vmem:[#allocation10 + $0x320] ss:$16 sps:$4 sm:$0xff]  }
 0x596   : > { %7088 = vmatprep.subr.bf16.mxu1 %v10030_v49  ;;  %7129 = vmatprep.subr.bf16.mxu0 %v10033_v5  ;;  %v10109_v49 = vld [vmem:[#allocation10 + $0x328] ss:$16 sps:$4 sm:$0xff]   ;;  %v10114_v5 = vld [vmem:[#allocation10 + $0x344] ss:$16 sps:$4 sm:$0xff]  }
 0x598   : > { %8806 = vmatmul.mubr.msk.bf16.vlgmr.msra.gmra.mrb[12].mxu1 %vm5584_vm6, %v6787_v58  ;;  %8807 = vmatmul.mubr.msk.bf16.vlgmr.msra.gmra.mrb[16].mxu0 %vm5584_vm6, %v6787_v58  ;;  %v10120_v58 = vld [vmem:[#allocation10 + $0x364] ss:$16 sps:$4 sm:$0xff]  }
 0x599   : > { %7089 = vmatpush1.bf16.msra.mxu1 %v10028_v53  ;;  %7130 = vmatpush1.bf16.msra.mxu0 %v10031_v36  ;;  %v10112_v53 = vld [vmem:[#allocation10 + $0x340] ss:$16 sps:$4 sm:$0xff]   ;;  %v10115_v36 = vld [vmem:[#allocation10 + $0x348] ss:$16 sps:$4 sm:$0xff]  }
 0x59a   : > { %7090 = vmatprep.subr.bf16.mxu1 %v10036_v26  ;;  %7131 = vmatprep.subr.bf16.mxu0 %v10039_v57  ;;  %v10123_v26 = vld [vmem:[#allocation10 + $0x36c] ss:$16 sps:$4 sm:$0xff]   ;;  %v10118_v57 = vld [vmem:[#allocation10 + $0x360] ss:$16 sps:$4 sm:$0xff]  }
 0x59b   : > { %7120 = vmatprep.mubr.bf16.mxu1 %v10274_v25  ;;  %7161 = vmatprep.mubr.bf16.mxu0 %v10274_v25 }
 0x59d   : > { %7091 = vmatpush1.bf16.msra.mxu1 %v10034_v62  ;;  %7132 = vmatpush1.bf16.msra.mxu0 %v10037_v52  ;;  %v10121_v62 = vld [vmem:[#allocation10 + $0x368] ss:$16 sps:$4 sm:$0xff]   ;;  %v10126_v52 = vld [vmem:[#allocation10 + $0x384] ss:$16 sps:$4 sm:$0xff]  }
 0x59e   : > { %7092 = vmatprep.subr.bf16.mxu1 %v10042_v30  ;;  %7133 = vmatprep.subr.bf16.mxu0 %v10045_v59  ;;  %v10129_v30 = vld [vmem:[#allocation10 + $0x38c] ss:$16 sps:$4 sm:$0xff]  }
 0x59f   : > { %v7570_v59 = vld [vmem:[#allocation5 + $0x8] sm:$0xff] }
 0x5a1   : > { %7093 = vmatpush1.bf16.msra.mxu1 %v10040_v17  ;;  %7134 = vmatpush1.bf16.msra.mxu0 %v10043_v4  ;;  %v10124_v17 = vld [vmem:[#allocation10 + $0x380] ss:$16 sps:$4 sm:$0xff]   ;;  %v10127_v4 = vld [vmem:[#allocation10 + $0x388] ss:$16 sps:$4 sm:$0xff]  }
 0x5a2   : > { %7094 = vmatprep.subr.bf16.mxu1 %v10048_v18  ;;  %7135 = vmatprep.subr.bf16.mxu0 %v10051_v61  ;;  %v7571_v18 = vpack.c.bf16 %v7570_v59, %v7570_v59  ;;  %v10132_v61 = vld [vmem:[#allocation10 + $0x3a4] ss:$16 sps:$4 sm:$0xff]  }
 0x5a5   : > { %7095 = vmatpush1.bf16.msra.mxu1 %v10046_v39  ;;  %7136 = vmatpush1.bf16.msra.mxu0 %v10049_v45  ;;  %v10135_v39 = vld [vmem:[#allocation10 + $0x3ac] ss:$16 sps:$4 sm:$0xff]   ;;  %v10130_v45 = vld [vmem:[#allocation10 + $0x3a0] ss:$16 sps:$4 sm:$0xff]  }
 0x5a6   : > { %7284 = vmatprep.subr.bf16.mxu1 %v10054_v47  ;;  %7325 = vmatprep.subr.bf16.mxu0 %v10057_v20  ;;  %v10133_v47 = vld [vmem:[#allocation10 + $0x3a8] ss:$16 sps:$4 sm:$0xff]   ;;  %v10138_v20 = vld [vmem:[#allocation10 + $0x3c4] ss:$16 sps:$4 sm:$0xff]  }
 0x5a8   : > { %8824 = vmatmul.mubr.msk.bf16.vlgmr.msra.gmra.mrb[12].mxu1 %vm5584_vm6, %v6983_v29  ;;  %8825 = vmatmul.mubr.msk.bf16.vlgmr.msra.gmra.mrb[16].mxu0 %vm5584_vm6, %v6983_v29  ;;  %v10144_v29 = vld [vmem:[#allocation10 + $0x3e4] ss:$16 sps:$4 sm:$0xff]  }
 0x5a9   : > { %7285 = vmatpush1.bf16.msra.mxu1 %v10052_v50  ;;  %7326 = vmatpush1.bf16.msra.mxu0 %v10055_v7  ;;  %v10136_v50 = vld [vmem:[#allocation10 + $0x3c0] ss:$16 sps:$4 sm:$0xff]   ;;  %v10139_v7 = vld [vmem:[#allocation10 + $0x3c8] ss:$16 sps:$4 sm:$0xff]  }
 0x5aa   : > { %7286 = vmatprep.subr.bf16.mxu1 %v10060_v28  ;;  %7327 = vmatprep.subr.bf16.mxu0 %v10063_v12  ;;  %v10147_v28 = vld [vmem:[#allocation10 + $0x3ec] ss:$16 sps:$4 sm:$0xff]   ;;  %v10142_v12 = vld [vmem:[#allocation10 + $0x3e0] ss:$16 sps:$4 sm:$0xff]  }
 0x5ab   : > { %7316 = vmatprep.mubr.bf16.mxu1 %v10274_v25  ;;  %7357 = vmatprep.mubr.bf16.mxu0 %v10274_v25 }
 0x5ad   : > { %7287 = vmatpush1.bf16.msra.mxu1 %v10058_v31  ;;  %7328 = vmatpush1.bf16.msra.mxu0 %v10061_v1  ;;  %v10145_v31 = vld [vmem:[#allocation10 + $0x3e8] ss:$16 sps:$4 sm:$0xff]   ;;  %v10150_v1 = vld [vmem:[#allocation10 + $0x404] ss:$16 sps:$4 sm:$0xff]  }
 0x5ae   : > { %7288 = vmatprep.subr.bf16.mxu1 %v10066_v6  ;;  %7329 = vmatprep.subr.bf16.mxu0 %v10069_v19  ;;  %v10153_v6 = vld [vmem:[#allocation10 + $0x40c] ss:$16 sps:$4 sm:$0xff]  }
 0x5af   : > { %v7766_v19 = vld [vmem:[#allocation5 + $0x9] sm:$0xff] }
 0x5b1   : > { %7289 = vmatpush1.bf16.msra.mxu1 %v10064_v11  ;;  %7330 = vmatpush1.bf16.msra.mxu0 %v10067_v48  ;;  %v10148_v11 = vld [vmem:[#allocation10 + $0x400] ss:$16 sps:$4 sm:$0xff]   ;;  %v10151_v48 = vld [vmem:[#allocation10 + $0x408] ss:$16 sps:$4 sm:$0xff]  }
 0x5b2   : > { %7290 = vmatprep.subr.bf16.mxu1 %v10072_v16  ;;  %7331 = vmatprep.subr.bf16.mxu0 %v10075_v40  ;;  %v7767_v16 = vpack.c.bf16 %v7766_v19, %v7766_v19  ;;  %v10156_v40 = vld [vmem:[#allocation10 + $0x424] ss:$16 sps:$4 sm:$0xff]  }
 0x5b5   : > { %7291 = vmatpush1.bf16.msra.mxu1 %v10070_v22  ;;  %7332 = vmatpush1.bf16.msra.mxu0 %v10073_v35  ;;  %v10159_v22 = vld [vmem:[#allocation10 + $0x42c] ss:$16 sps:$4 sm:$0xff]   ;;  %v10154_v35 = vld [vmem:[#allocation10 + $0x420] ss:$16 sps:$4 sm:$0xff]  }
 0x5b6   : > { %7480 = vmatprep.subr.bf16.mxu1 %v10078_v23  ;;  %7521 = vmatprep.subr.bf16.mxu0 %v10081_v42  ;;  %v10157_v23 = vld [vmem:[#allocation10 + $0x428] ss:$16 sps:$4 sm:$0xff]   ;;  %v10162_v42 = vld [vmem:[#allocation10 + $0x444] ss:$16 sps:$4 sm:$0xff]  }
 0x5b8   : > { %8842 = vmatmul.mubr.msk.bf16.vlgmr.msra.gmra.mrb[12].mxu1 %vm5584_vm6, %v7179_v13  ;;  %8843 = vmatmul.mubr.msk.bf16.vlgmr.msra.gmra.mrb[16].mxu0 %vm5584_vm6, %v7179_v13  ;;  %v10168_v13 = vld [vmem:[#allocation10 + $0x464] ss:$16 sps:$4 sm:$0xff]  }
 0x5b9   : > { %7481 = vmatpush1.bf16.msra.mxu1 %v10076_v21  ;;  %7522 = vmatpush1.bf16.msra.mxu0 %v10079_v44  ;;  %v10160_v21 = vld [vmem:[#allocation10 + $0x440] ss:$16 sps:$4 sm:$0xff]   ;;  %v10163_v44 = vld [vmem:[#allocation10 + $0x448] ss:$16 sps:$4 sm:$0xff]  }
 0x5ba   : > { %7482 = vmatprep.subr.bf16.mxu1 %v10084_v27  ;;  %7523 = vmatprep.subr.bf16.mxu0 %v10087_v55  ;;  %v10171_v27 = vld [vmem:[#allocation10 + $0x46c] ss:$16 sps:$4 sm:$0xff]   ;;  %v10166_v55 = vld [vmem:[#allocation10 + $0x460] ss:$16 sps:$4 sm:$0xff]  }
 0x5bb   : > { %7512 = vmatprep.mubr.bf16.mxu1 %v10274_v25  ;;  %7553 = vmatprep.mubr.bf16.mxu0 %v10274_v25 }
 0x5bd   : > { %7483 = vmatpush1.bf16.msra.mxu1 %v10082_v32  ;;  %7524 = vmatpush1.bf16.msra.mxu0 %v10085_v63  ;;  %v10169_v32 = vld [vmem:[#allocation10 + $0x468] ss:$16 sps:$4 sm:$0xff]  }
 0x5be   : > { %7484 = vmatprep.subr.bf16.mxu1 %v10090_v60  ;;  %7525 = vmatprep.subr.bf16.mxu0 %v10093_v34  ;;  %v7962_v63 = vld [vmem:[#allocation5 + $0xa] sm:$0xff] }
 0x5bf   : > { %v7963_v60 = vpack.c.bf16 %v7962_v63, %v7962_v63 }
 0x5c1   : > { %7485 = vmatpush1.bf16.msra.mxu1 %v10088_v38  ;;  %7526 = vmatpush1.bf16.msra.mxu0 %v10091_v41 }
 0x5c2   : > { %7486 = vmatprep.subr.bf16.mxu1 %v10096_v0  ;;  %7527 = vmatprep.subr.bf16.mxu0 %v10099_v56 }
 0x5c5   : > { %7487 = vmatpush1.bf16.msra.mxu1 %v10094_v46  ;;  %7528 = vmatpush1.bf16.msra.mxu0 %v10097_v3 }
 0x5c6   : > { %7676 = vmatprep.subr.bf16.mxu1 %v10102_v10  ;;  %7717 = vmatprep.subr.bf16.mxu0 %v10105_v51 }
 0x5c8   : > { %8860 = vmatmul.mubr.msk.bf16.vlgmr.msra.gmra.mrb[12].mxu1 %vm5584_vm6, %v7375_v54  ;;  %8861 = vmatmul.mubr.msk.bf16.vlgmr.msra.gmra.mrb[16].mxu0 %vm5584_vm6, %v7375_v54 }
 0x5c9   : > { %7677 = vmatpush1.bf16.msra.mxu1 %v10100_v8  ;;  %7718 = vmatpush1.bf16.msra.mxu0 %v10103_v33  ;;  %v8158_v33 = vld [vmem:[%s12010_s8] sm:$0xf] }
 0x5ca   : > { %7678 = vmatprep.subr.bf16.mxu1 %v10108_v15  ;;  %7719 = vmatprep.subr.bf16.mxu0 %v10111_v24 }
 0x5cb   : > { %7708 = vmatprep.mubr.bf16.mxu1 %v10274_v25  ;;  %7749 = vmatprep.mubr.bf16.mxu0 %v10274_v25 }
 0x5cd   : > { %7679 = vmatpush1.bf16.msra.mxu1 %v10106_v9  ;;  %7720 = vmatpush1.bf16.msra.mxu0 %v10109_v49 }
 0x5ce   : > { %7680 = vmatprep.subr.bf16.mxu1 %v10114_v5  ;;  %7721 = vmatprep.subr.bf16.mxu0 %v10117_v2 }
 0x5d1   : > { %7681 = vmatpush1.bf16.msra.mxu1 %v10112_v53  ;;  %7722 = vmatpush1.bf16.msra.mxu0 %v10115_v36 }
 0x5d2   : > { %7682 = vmatprep.subr.bf16.mxu1 %v10120_v58  ;;  %7723 = vmatprep.subr.bf16.mxu0 %v10123_v26 }
 0x5d5   : > { %7683 = vmatpush1.bf16.msra.mxu1 %v10118_v57  ;;  %7724 = vmatpush1.bf16.msra.mxu0 %v10121_v62 }
 0x5d6   : > { %7872 = vmatprep.subr.bf16.mxu1 %v10126_v52  ;;  %7913 = vmatprep.subr.bf16.mxu0 %v10129_v30 }
 0x5d8   : > { %8878 = vmatmul.mubr.msk.bf16.vlgmr.msra.gmra.mrb[12].mxu1 %vm5584_vm6, %v7571_v18  ;;  %8879 = vmatmul.mubr.msk.bf16.vlgmr.msra.gmra.mrb[16].mxu0 %vm5584_vm6, %v7571_v18 }
 0x5d9   : > { %7873 = vmatpush1.bf16.msra.mxu1 %v10124_v17  ;;  %7914 = vmatpush1.bf16.msra.mxu0 %v10127_v4 }
 0x5da   : > { %7874 = vmatprep.subr.bf16.mxu1 %v10132_v61  ;;  %7915 = vmatprep.subr.bf16.mxu0 %v10135_v39 }
 0x5db   : > { %7904 = vmatprep.mubr.bf16.mxu1 %v10274_v25  ;;  %7945 = vmatprep.mubr.bf16.mxu0 %v10274_v25 }
 0x5dd   : > { %7875 = vmatpush1.bf16.msra.mxu1 %v10130_v45  ;;  %7916 = vmatpush1.bf16.msra.mxu0 %v10133_v47 }
 0x5de   : > { %7876 = vmatprep.subr.bf16.mxu1 %v10138_v20  ;;  %7917 = vmatprep.subr.bf16.mxu0 %v10141_v14 }
 0x5e1   : > { %7877 = vmatpush1.bf16.msra.mxu1 %v10136_v50  ;;  %7918 = vmatpush1.bf16.msra.mxu0 %v10139_v7 }
 0x5e2   : > { %7878 = vmatprep.subr.bf16.mxu1 %v10144_v29  ;;  %7919 = vmatprep.subr.bf16.mxu0 %v10147_v28 }
 0x5e5   : > { %7879 = vmatpush1.bf16.msra.mxu1 %v10142_v12  ;;  %7920 = vmatpush1.bf16.msra.mxu0 %v10145_v31 }
 0x5e6   : > { %8068 = vmatprep.subr.bf16.mxu1 %v10150_v1  ;;  %8109 = vmatprep.subr.bf16.mxu0 %v10153_v6 }
 0x5e8   : > { %8896 = vmatmul.mubr.msk.bf16.vlgmr.msra.gmra.mrb[12].mxu1 %vm5584_vm6, %v7767_v16  ;;  %8897 = vmatmul.mubr.msk.bf16.vlgmr.msra.gmra.mrb[16].mxu0 %vm5584_vm6, %v7767_v16 }
 0x5e9   : > { %8069 = vmatpush1.bf16.msra.mxu1 %v10148_v11  ;;  %8110 = vmatpush1.bf16.msra.mxu0 %v10151_v48 }
 0x5ea   : > { %8070 = vmatprep.subr.bf16.mxu1 %v10156_v40  ;;  %8111 = vmatprep.subr.bf16.mxu0 %v10159_v22 }
 0x5eb   : > { %8100 = vmatprep.mubr.bf16.mxu1 %v10274_v25  ;;  %8141 = vmatprep.mubr.bf16.mxu0 %v10274_v25  ;;  %v8164_v25 = vlaneseq }
 0x5ed   : > { %8071 = vmatpush1.bf16.msra.mxu1 %v10154_v35  ;;  %8112 = vmatpush1.bf16.msra.mxu0 %v10157_v23  ;;  %v11936_v34 = vshrl.u32 %v8164_v25, 7  ;;  %vm8315_vm10 = vcmp.lt.s32.totalorder %v8164_v25, 512 }
 0x5ee   : > { %8072 = vmatprep.subr.bf16.mxu1 %v10162_v42  ;;  %8113 = vmatprep.subr.bf16.mxu0 %v10165_v37 }
 0x5ef   : > { %v8166_v43 = vsub.s32 0, %v11936_v34  ;;  %v8174_v8 = vsub.s32 2, %v11936_v34  ;;  %v8170_v54 = vsub.s32 1, %v11936_v34  ;;  %v8178_v15 = vsub.s32 3, %v11936_v34 }
 0x5f1   : > { %8073 = vmatpush1.bf16.msra.mxu1 %v10160_v21  ;;  %8114 = vmatpush1.bf16.msra.mxu0 %v10163_v44  ;;  %v8167_v24 = vrot.slane %v8158_v33, %v8166_v43  ;;  %v8175_v9 = vrot.slane %v8158_v33, %v8174_v8  ;;  %v8171_v49 = vrot.slane %v8158_v33, %v8170_v54 }
 0x5f2   : > { %8074 = vmatprep.subr.bf16.mxu1 %v10168_v13  ;;  %8115 = vmatprep.subr.bf16.mxu0 %v10171_v27  ;;  %v8179_v5 = vrot.slane %v8158_v33, %v8178_v15 }
 0x5f5   : > { %8075 = vmatpush1.bf16.msra.mxu1 %v10166_v55  ;;  %8116 = vmatpush1.bf16.msra.mxu0 %v10169_v32 }
 0x5f8   : > { %8914 = vmatmul.mubr.msk.bf16.vlgmr.msra.gmra.mrb[12].mxu1 %vm5584_vm6, %v7963_v60  ;;  %8915 = vmatmul.mubr.msk.bf16.vlgmr.msra.gmra.mrb[16].mxu0 %vm5584_vm6, %v7963_v60 }
 0x6cb   : > { %v8102_v38 = vpop.f32.mrb[12].mxu1  ;;  %v8143_v41 = vpop.f32.mrb[16].mxu0 }
 0x6cc   : > { %v8104_v0 = vpop.f32.mrb[13].mxu1  ;;  %v8145_v56 = vpop.f32.mrb[17].mxu0  ;;  %8154 = vst [vmem:[#allocation9] sm:$0xff] %v8102_v38  ;;  %8156 = vst [vmem:[#allocation9 + $0x10] sm:$0xff] %v8143_v41 }
 0x6cd   : > { %v8106_v46 = vpop.f32.mrb[14].mxu1  ;;  %v8147_v3 = vpop.f32.mrb[18].mxu0  ;;  %8155 = vst [vmem:[#allocation9 + $0x8] sm:$0xff] %v8104_v0  ;;  %8157 = vst [vmem:[#allocation9 + $0x18] sm:$0xff] %v8145_v56 }
 0x6ce   : > { %v8107_v10 = vpop.f32.mrb[15].mxu1  ;;  %v8148_v51 = vpop.f32.mrb[19].mxu0 }
 0x6d3   : > { %v8159_v2 = vld [vmem:[#allocation9] sm:$0x3]  ;;  %v8161_v53 = vld [vmem:[#allocation9 + $0x10] sm:$0x3]  ;;  %v8224_v36 = vld [vmem:[#allocation9] sm:$0x30] }
 0x6d4   : > { %v8160_v58 = vld [vmem:[#allocation9 + $0x8] sm:$0x3]  ;;  %v8162_v26 = vld [vmem:[#allocation9 + $0x18] sm:$0x3]  ;;  %v8184_v57 = vadd.f32 %v8167_v24, %v8159_v2  ;;  %v8186_v62 = vadd.f32 %v8175_v9, %v8161_v53  ;;  %v8225_v52 = vld [vmem:[#allocation9 + $0x8] sm:$0x30]  ;;  %v8228_v30 = vadd.f32 %v8224_v36, %v8167_v24 }
 0x6d5   : > { %v8185_v59 = vadd.f32 %v8171_v49, %v8160_v58  ;;  %v8187_v17 = vadd.f32 %v8179_v5, %v8162_v26  ;;  %v8226_v4 = vld [vmem:[#allocation9 + $0x10] sm:$0x30]  ;;  %v8227_v18 = vld [vmem:[#allocation9 + $0x18] sm:$0x30]  ;;  %v8229_v61 = vadd.f32 %v8225_v52, %v8171_v49 }
 0x6d6   : > { %v8188_v39 = vmax.f32 %v8184_v57, 0.0  ;;  %v8190_v45 = vmax.f32 %v8186_v62, 0.0  ;;  %v8230_v47 = vadd.f32 %v8226_v4, %v8175_v9  ;;  %v8231_v20 = vadd.f32 %v8227_v18, %v8179_v5 }
 0x6d7   : > { %v8189_v14 = vmax.f32 %v8185_v59, 0.0  ;;  %v8191_v50 = vmax.f32 %v8187_v17, 0.0  ;;  %v8232_v7 = vmax.f32 %v8228_v30, 0.0  ;;  %v8233_v29 = vmax.f32 %v8229_v61, 0.0 }
 0x6d8   : > { %v8192_v28 = vsel %vm654_vm2, %v8188_v39, 0.0  ;;  %v8206_v12 = vsel %vm654_vm2, %v8190_v45, 0.0  ;;  %v8234_v31 = vmax.f32 %v8230_v47, 0.0  ;;  %v8235_v1 = vmax.f32 %v8231_v20, 0.0 }
 0x6d9   : > { %v8193_v6 = vrot.slane %v8192_v28, 4  ;;  %v8199_v19 = vsel %vm654_vm2, %v8189_v14, 0.0  ;;  %v8207_v11 = vrot.slane %v8206_v12, 4  ;;  %v8213_v48 = vsel %vm654_vm2, %v8191_v50, 0.0 }
 0x6da   : > { %v8200_v16 = vrot.slane %v8199_v19, 4  ;;  %v8214_v40 = vrot.slane %v8213_v48, 4  ;;  %v8240_v22 = vrot.slane %v8232_v7, 4  ;;  %v8241_v35 = vrot.slane %v8233_v29, 4 }
 0x6db   : > { %v8194_v23 = vadd.f32 %v8193_v6, %v8192_v28  ;;  %v8208_v42 = vadd.f32 %v8207_v11, %v8206_v12  ;;  %v8242_v37 = vrot.slane %v8234_v31, 4  ;;  %v8243_v21 = vrot.slane %v8235_v1, 4 }
 0x6dc   : > { %v8201_v44 = vadd.f32 %v8200_v16, %v8199_v19  ;;  %v8215_v13 = vadd.f32 %v8214_v40, %v8213_v48  ;;  %v8248_v27 = vsel %vm654_vm2, %v8240_v22, 0.0  ;;  %v8255_v55 = vsel %vm654_vm2, %v8241_v35, 0.0 }
 0x6dd   : > { %v8195_v32 = vrot.slane %v8194_v23, 2  ;;  %v8209_v63 = vrot.slane %v8208_v42, 2  ;;  %v8249_v60 = vrot.slane %v8248_v27, 4  ;;  %v8256_v38 = vrot.slane %v8255_v55, 4 }
 0x6de   : > { %v8202_v41 = vrot.slane %v8201_v44, 2  ;;  %v8216_v0 = vrot.slane %v8215_v13, 2  ;;  %v8262_v56 = vsel %vm654_vm2, %v8242_v37, 0.0  ;;  %v8269_v46 = vsel %vm654_vm2, %v8243_v21, 0.0 }
 0x6df   : > { %v8196_v3 = vadd.f32 %v8195_v32, %v8194_v23  ;;  %v8250_v10 = vadd.f32 %v8249_v60, %v8248_v27  ;;  %v8257_v51 = vadd.f32 %v8256_v38, %v8255_v55  ;;  %v8263_v8 = vrot.slane %v8262_v56, 4 }
 0x6e0   : > { %v8203_v43 = vadd.f32 %v8202_v41, %v8201_v44  ;;  %v8270_v33 = vrot.slane %v8269_v46, 4  ;;  %v8210_v24 = vadd.f32 %v8209_v63, %v8208_v42  ;;  %v8217_v9 = vadd.f32 %v8216_v0, %v8215_v13 }
 0x6e1   : > { %v8251_v54 = vrot.slane %v8250_v10, 2  ;;  %v8258_v15 = vrot.slane %v8257_v51, 2  ;;  %v8264_v49 = vadd.f32 %v8263_v8, %v8262_v56  ;;  %v8197_v2 = vrot.slane %v8196_v3, 1 }
 0x6e2   : > { %v8271_v5 = vadd.f32 %v8270_v33, %v8269_v46  ;;  %v8204_v53 = vrot.slane %v8203_v43, 1  ;;  %v10275_v62 = vmov 1966171168   ;;  %v8211_v17 = vrot.slane %v8210_v24, 1 }
 0x6e3   : > { %v8252_v36 = vadd.f32 %v8251_v54, %v8250_v10  ;;  %v8259_v58 = vadd.f32 %v8258_v15, %v8257_v51  ;;  %v8265_v26 = vrot.slane %v8264_v49, 2  ;;  %v8291_v52 = vunpack.c.l.s4 %v10275_v62 }
 0x6e4   : > { %v8272_v57 = vrot.slane %v8271_v5, 2  ;;  %v8218_v4 = vrot.slane %v8217_v9, 1  ;;  %v8198_v39 = vadd.f32 %v8197_v2, %v8196_v3  ;;  %v8205_v45 = vadd.f32 %v8204_v53, %v8203_v43 }
 0x6e5   : > { %v8253_v30 = vrot.slane %v8252_v36, 1  ;;  %v8260_v59 = vrot.slane %v8259_v58, 1  ;;  %v8266_v18 = vadd.f32 %v8265_v26, %v8264_v49  ;;  %v8292_v7 = vunpack.c.0.s8 %v8291_v52 }
 0x6e6   : > { %v8273_v61 = vadd.f32 %v8272_v57, %v8271_v5  ;;  %v8212_v12 = vadd.f32 %v8211_v17, %v8210_v24  ;;  %v8219_v31 = vadd.f32 %v8218_v4, %v8217_v9 }
 0x6e7   : > { %v8254_v47 = vadd.f32 %v8253_v30, %v8252_v36  ;;  %v8261_v20 = vadd.f32 %v8260_v59, %v8259_v58  ;;  %v8267_v14 = vrot.slane %v8266_v18, 1  ;;  %v8295_v40 = vsub.s32 %v8292_v7, %v11936_v34 }
 0x6e8   : > { %v8274_v50 = vrot.slane %v8273_v61, 1 }
 0x6e9   : > { %v8276_v29 = vadd.f32 %v8254_v47, %v8198_v39  ;;  %v8277_v28 = vadd.f32 %v8261_v20, %v8205_v45  ;;  %v8268_v1 = vadd.f32 %v8267_v14, %v8266_v18 }
 0x6ea   : > { %v8275_v6 = vadd.f32 %v8274_v50, %v8273_v61 }
 0x6eb   : > { %v8280_v19 = vmul.f32 0.25, %v8276_v29  ;;  %v8281_v11 = vmul.f32 0.25, %v8277_v28  ;;  %v8278_v48 = vadd.f32 %v8268_v1, %v8212_v12 }
 0x6ec   : > { %v8279_v16 = vadd.f32 %v8275_v6, %v8219_v31 }
 0x6ed   : > { %v8288_v22 = vcombine.low %v8280_v19, %v8281_v11  ;;  %v8282_v35 = vmul.f32 0.25, %v8278_v48 }
 0x6ee   : > { %v8283_v23 = vmul.f32 0.25, %v8279_v16 }
 0x6ef   : > { %v8296_v37 = vrot.slane %v8288_v22, %v8295_v40 }
 0x6f0   : > { %v8289_v42 = vcombine.low %v8282_v35, %v8283_v23 }
 0x6f2   : > { %v8303_v21 = vrot.slane %v8289_v42, %v8295_v40 }
 0x6f4   : > { %v8304_v44 = vcombine.low %v8296_v37, %v8303_v21 }
 0x6f6   : > { %v8311_v13 = vrot.slane %v8304_v44, %v8295_v40 }
 0x6f8   : > { %8317 = vst.msk [vmem:[%s340_s14] sm:$0xf] %vm8315_vm10, %v8311_v13 }
 0x6f9   : > { %10213 = shalt.err (!%p10210_p7)
}
 0x6fa   : > { %s10214_s23 = scalar_lea.hbm %s11960_s22, 64  ;;  %s10218_s14 = scalar_lea.hbm %s12011_s9, 128 }
 0x6fb   : > { %p10215_p8 = scmp.ne.s32.totalorder %s11960_s22, %s10214_s23  ;;  %p10219_p1 = scmp.lt.u32.totalorder %s11960_s22, %s12011_s9 }
 0x6fc   : > { %p10220_p0 = scmp.lt.u32.totalorder %s10218_s14, %s10214_s23  ;;  %p10222_p6 = scmp.lt.u32.totalorder %s10214_s23, %s11960_s22 }
 0x6fd   : > { %p10216_p11 = pnand %p10215_p8, %p12022_p9 }
 0x6fe   : > { %p10221_p5 = por %p10220_p0, %p10219_p1 }
 0x6ff   : > { %p10217_p13 = pneg %p10216_p11 }
 0x700   : > { %p10223_p10 = por %p10222_p6, %p10221_p5 }
 0x702   : > { %p10224_p12 = pnand %p10223_p10, %p10217_p13 }
 0x704   : > { %10227 = shalt.err (!%p10224_p12)
}
 0x705   : > { %9876 = dma.vmem_to_hbm [thread:$0]  (%p12022_p9), %s11962_s29, 64, %s11960_s22, %s8319_s25  }
 0x706 PF: > { %p9888_p2 = scmp.ge.s32.totalorder %s10266_s12, 2  ;;  %s8345_s26 = sand.u32 1, %s10254_s30  }
 0x707   : > { %p12023_p3 = scmp.ne.s32.totalorder %s12016_s20, 0  ;;  %s8346_s13 = scalar_lea.sflag [#allocation12], %s8345_s26 }
 0x709   : > { %p9883_p4 = pnand %p9888_p2, %p12023_p3 }
 0x70b   : > { %10249 = dma.done.wait (!%p9883_p4), %s8346_s13, 64  }
 0x70c   : > { %10251 = vsyncadd (!%p9883_p4), %s8346_s13, 4294967232  ;;  %p20_p7 = scmp.ge.s32.totalorder %s10352_s15, 4   ;;  %s12024_s30 = smov %s10258_s10 }
 0x70d   : > { %s12025_s10 = smov %s10262_s11  ;;  %s12026_s11 = smov %s10363_s18 }
 0x70e   : > { %s12027_s12 = smov %s10352_s15  ;;  %22 = sbr.rel (!%p20_p7) target bundleno = 4 (0x4), region = 196 }
 0x715   :  { %8351 = vsyncpa [#allocation11], 1 }
 0x716   :  { %8353 = vsyncpa [#allocation11 + $0x1], 1 }
 0x717   :  { %8354 = vsyncpa [#allocation12], 1 }
 0x718   :  { %8356 = vsyncpa [#allocation12 + $0x1], 1 }

</bundles_post_ra>
